<compile_context>
chip_gen: v6e
topology: v6e:2x2x1
jax: 0.10.0
libtpu: 0.0.40
codegen_flags: <defaults>
</compile_context>

<pallas_src>
import functools
import numpy as np
import jax
import jax.numpy as jnp
from jax import lax
from jax.experimental import pallas as pl
from jax.experimental.pallas import tpu as pltpu

H = 14          # real hidden size (from the PyTorch module)
HP = 32         # padded hidden size -> 4*HP = 128 lanes (one vreg lane group)
G = 4 * HP      # padded gate width (128)


# ----------------------------------------------------------------------------
# In-kernel building blocks (traced inline inside the single fused kernel)
# ----------------------------------------------------------------------------
def _lstm_cell(gates, c):
    """gates: (N, 128) padded pre-activations, gate blocks i,f,g,o of 32 lanes."""
    i_g = jax.nn.sigmoid(gates[:, 0 * HP:1 * HP])
    f_g = jax.nn.sigmoid(gates[:, 1 * HP:2 * HP])
    g_g = jnp.tanh(gates[:, 2 * HP:3 * HP])
    o_g = jax.nn.sigmoid(gates[:, 3 * HP:4 * HP])
    c_new = f_g * c + i_g * g_g
    h_new = o_g * jnp.tanh(c_new)
    return h_new, c_new


def _run_bi_layer(x_all, wih_cat, b_cat, whh_stack, out_ref, *, T, B):
    """Fused bidirectional LSTM layer, fully unrolled over T.

    x_all     : (T*B, Din)   time-major activations (value)
    wih_cat   : (Din, 2*G)   [W_ih_fwd | W_ih_bwd], gate-padded
    b_cat     : (1, 2*G)     combined (b_ih + b_hh) per direction, gate-padded
    whh_stack : (2*HP, G)    [[W_hh_fwd], [W_hh_bwd]] stacked along K
    out_ref   : (T*B, 2*HP)  scratch ref; cols 0:HP fwd h(t), HP:2HP bwd h(t)
    """
    # Hoisted input projection (+ bias) for BOTH directions, all timesteps.
    gx_all = jnp.dot(x_all, wih_cat, preferred_element_type=jnp.float32) + b_cat

    # Block-diagonal embedding mask so one matmul serves both directions:
    # rows 0:B carry h_fwd in cols 0:HP, rows B:2B carry h_bwd in cols HP:2HP.
    row = lax.broadcasted_iota(jnp.int32, (2 * B, 2 * HP), 0)
    col = lax.broadcasted_iota(jnp.int32, (2 * B, 2 * HP), 1)
    diag_mask = (row < B) == (col < HP)

    h = jnp.zeros((2 * B, 2 * HP), jnp.float32)   # block-diagonal hidden state
    c = jnp.zeros((2 * B, HP), jnp.float32)

    for t in range(T):
        # fwd direction consumes time t, bwd direction consumes time T-1-t.
        gx_f = gx_all[t * B:(t + 1) * B, 0:G]
        gx_b = gx_all[(T - 1 - t) * B:(T - t) * B, G:2 * G]
        gx = jnp.concatenate([gx_f, gx_b], axis=0)                    # (2B, 128)
        gates = gx + jnp.dot(h, whh_stack, preferred_element_type=jnp.float32)
        h_new, c = _lstm_cell(gates, c)                               # (2B, HP)
        h = jnp.where(diag_mask,
                      jnp.concatenate([h_new, h_new], axis=1), 0.0)   # re-embed
        out_ref[t * B:(t + 1) * B, 0:HP] = h_new[0:B]                 # fwd @ t
        out_ref[(T - 1 - t) * B:(T - t) * B, HP:2 * HP] = h_new[B:2 * B]  # bwd @ T-1-t


def _run_uni_layer(x_all, wih, b, whh, out_ref, *, T, B):
    """Single-direction LSTM layer (the `latent` layer), unrolled over T."""
    gx_all = jnp.dot(x_all, wih, preferred_element_type=jnp.float32) + b
    h = jnp.zeros((B, HP), jnp.float32)
    c = jnp.zeros((B, HP), jnp.float32)
    for t in range(T):
        gates = gx_all[t * B:(t + 1) * B, :] + jnp.dot(
            h, whh, preferred_element_type=jnp.float32)
        h, c = _lstm_cell(gates, c)
        out_ref[t * B:(t + 1) * B, :] = h


# ----------------------------------------------------------------------------
# The single fused kernel: whole AE forward pass, everything VMEM-resident
# ----------------------------------------------------------------------------
def _ae_fused_kernel(x_ref,
                     e1_wih, e1_b, e1_whh,
                     e2_wih, e2_b, e2_whh,
                     lat_wih, lat_b, lat_whh,
                     d1_wih, d1_b, d1_whh,
                     d2_wih, d2_b, d2_whh,
                     wout_ref, bout_ref,
                     out_ref,
                     act_a, act_b, act_lat,
                     *, T, B):
    # ---- encoder ----
    _run_bi_layer(x_ref[...], e1_wih[...], e1_b[...], e1_whh[...], act_a, T=T, B=B)
    _run_bi_layer(act_a[...], e2_wih[...], e2_b[...], e2_whh[...], act_b, T=T, B=B)
    _run_uni_layer(act_b[...], lat_wih[...], lat_b[...], lat_whh[...], act_lat, T=T, B=B)
    # ---- decoder (synthesized mirror; see TODO at top) ----
    _run_bi_layer(act_lat[...], d1_wih[...], d1_b[...], d1_whh[...], act_a, T=T, B=B)
    _run_bi_layer(act_a[...], d2_wih[...], d2_b[...], d2_whh[...], act_b, T=T, B=B)
    # ---- time-distributed output projection, fused as epilogue ----
    out_ref[...] = (jnp.dot(act_b[...], wout_ref[...],
                            preferred_element_type=jnp.float32)
                    + bout_ref[...])


# ----------------------------------------------------------------------------
# Wrapper
# ----------------------------------------------------------------------------
_VMEM = pl.BlockSpec(memory_space=pltpu.MemorySpace.VMEM)

_PARAM_ORDER = ("e1_wih", "e1_b", "e1_whh",
                "e2_wih", "e2_b", "e2_whh",
                "lat_wih", "lat_b", "lat_whh",
                "d1_wih", "d1_b", "d1_whh",
                "d2_wih", "d2_b", "d2_whh",
                "wout", "bout")


def ae_forward(params, x):
    """x: (batch, seq, n_input) -> (batch, seq, n_input). One pallas_call."""
    Bsz, T, F = x.shape
    n_out = params["wout"].shape[1]
    x_tm = jnp.transpose(x, (1, 0, 2)).reshape(T * Bsz, F)   # time-major rows t*B+b

    args = [x_tm] + [params[k] for k in _PARAM_ORDER]
    kernel = functools.partial(_ae_fused_kernel, T=T, B=Bsz)
    out = pl.pallas_call(
        kernel,
        out_shape=jax.ShapeDtypeStruct((T * Bsz, n_out), jnp.float32),
        in_specs=[_VMEM] * len(args),
        out_specs=_VMEM,
        scratch_shapes=[pltpu.VMEM((T * Bsz, 2 * HP), jnp.float32),   # act_a
                        pltpu.VMEM((T * Bsz, 2 * HP), jnp.float32),   # act_b
                        pltpu.VMEM((T * Bsz, HP), jnp.float32)],      # act_lat
    )(*args)
    return jnp.transpose(out.reshape(T, Bsz, n_out), (1, 0, 2))


# ----------------------------------------------------------------------------
# Parameter init (PyTorch-LSTM-style uniform) + padded/packed weight layout
# ----------------------------------------------------------------------------
def _init_lstm_dir(key, input_size, hidden):
    k = 1.0 / np.sqrt(hidden)
    k0, k1, k2, k3 = jax.random.split(key, 4)
    wih = jax.random.uniform(k0, (4 * hidden, input_size), jnp.float32, -k, k)
    whh = jax.random.uniform(k1, (4 * hidden, hidden), jnp.float32, -k, k)
    bih = jax.random.uniform(k2, (4 * hidden,), jnp.float32, -k, k)
    bhh = jax.random.uniform(k3, (4 * hidden,), jnp.float32, -k, k)
    # pre-transposed, combined bias; PyTorch gate order i, f, g, o
    return np.asarray(wih.T), np.asarray(whh.T), np.asarray((bih + bhh).reshape(1, -1))


def _init_linear(key, input_size, output_size):
    k = 1.0 / np.sqrt(input_size)
    k0, k1 = jax.random.split(key, 2)
    w = jax.random.uniform(k0, (output_size, input_size), jnp.float32, -k, k)
    b = jax.random.uniform(k1, (output_size,), jnp.float32, -k, k)
    return np.asarray(w.T), np.asarray(b.reshape(1, -1))


def _pad_gate_cols(w):
    """(K, 4H) -> (K, 4*HP): each real gate block starts at a 32-lane boundary."""
    K, four_h = w.shape
    h = four_h // 4
    out = np.zeros((K, G), np.float32)
    for g in range(4):
        out[:, g * HP:g * HP + h] = w[:, g * h:(g + 1) * h]
    return out


def _pad_in_rows(w, row_map, k_pad):
    """Scatter real input rows into the padded K layout; padded rows are zero."""
    out = np.zeros((k_pad, w.shape[1]), np.float32)
    out[np.asarray(row_map)] = w
    return out


def _pack_dir(wih, whh, b, row_map, k_pad):
    wih_p = _pad_gate_cols(wih)
    if row_map is not None:
        wih_p = _pad_in_rows(wih_p, row_map, k_pad)
    whh_p = _pad_in_rows(_pad_gate_cols(whh), list(range(H)), HP)
    b_p = _pad_gate_cols(b)
    return wih_p, whh_p, b_p


def _pack_bi(key, input_size, row_map, k_pad):
    kf, kb = jax.random.split(key)
    wf = _pack_dir(*_init_lstm_dir(kf, input_size, H), row_map, k_pad)
    wb = _pack_dir(*_init_lstm_dir(kb, input_size, H), row_map, k_pad)
    wih_cat = np.concatenate([wf[0], wb[0]], axis=1)    # (K_pad, 256)
    whh_stack = np.concatenate([wf[1], wb[1]], axis=0)  # (64, 128)
    b_cat = np.concatenate([wf[2], wb[2]], axis=1)      # (1, 256)
    return wih_cat, b_cat, whh_stack


def _pack_uni(key, input_size, row_map, k_pad):
    wih, whh, b = _pack_dir(*_init_lstm_dir(key, input_size, H), row_map, k_pad)
    return wih, b, whh


def init_ae_params(n_input, seed=0):
    key = jax.random.PRNGKey(seed)
    ks = jax.random.split(key, 6)
    bi_map = list(range(H)) + [HP + r for r in range(H)]   # prev bi-output rows
    lat_map = list(range(H))                               # latent-output rows
    p = {}
    # encoder
    p["e1_wih"], p["e1_b"], p["e1_whh"] = _pack_bi(ks[0], n_input, None, n_input)
    p["e2_wih"], p["e2_b"], p["e2_whh"] = _pack_bi(ks[1], 2 * H, bi_map, 2 * HP)
    p["lat_wih"], p["lat_b"], p["lat_whh"] = _pack_uni(ks[2], 2 * H, bi_map, 2 * HP)
    # decoder (TODO(synk): real decoder_model not in the source; mirrored here)
    p["d1_wih"], p["d1_b"], p["d1_whh"] = _pack_bi(ks[3], H, lat_map, HP)
    p["d2_wih"], p["d2_b"], p["d2_whh"] = _pack_bi(ks[4], 2 * H, bi_map, 2 * HP)
    w_out, b_out = _init_linear(ks[5], 2 * H, n_input)
    p["wout"] = _pad_in_rows(w_out, bi_map, 2 * HP)        # (64, n_input)
    p["bout"] = b_out                                      # (1, n_input)
    return {k: jnp.asarray(v) for k, v in p.items()}


# ----------------------------------------------------------------------------
if __name__ == "__main__":
    n_input = 14
    batch, seq = 2, 8

    params = init_ae_params(n_input, seed=0)
    x = jax.random.normal(jax.random.PRNGKey(0), (batch, seq, n_input), jnp.float32)

    fwd = jax.jit(ae_forward)
    y = fwd(params, x)
    jax.block_until_ready(y)

    assert y.shape == (batch, seq, n_input), y.shape
    assert bool(jnp.all(jnp.isfinite(y)))
    print("KERNEL_OK")
</pallas_src>

<mosaic_0001>
module attributes {stable_mosaic.version = 11 : i64} {
  func.func @_ae_fused_kernel(%arg0: memref<16x14xf32, #tpu.memory_space<vmem>>, %arg1: memref<14x256xf32, #tpu.memory_space<vmem>>, %arg2: memref<1x256xf32, #tpu.memory_space<vmem>>, %arg3: memref<64x128xf32, #tpu.memory_space<vmem>>, %arg4: memref<64x256xf32, #tpu.memory_space<vmem>>, %arg5: memref<1x256xf32, #tpu.memory_space<vmem>>, %arg6: memref<64x128xf32, #tpu.memory_space<vmem>>, %arg7: memref<64x128xf32, #tpu.memory_space<vmem>>, %arg8: memref<1x128xf32, #tpu.memory_space<vmem>>, %arg9: memref<32x128xf32, #tpu.memory_space<vmem>>, %arg10: memref<32x256xf32, #tpu.memory_space<vmem>>, %arg11: memref<1x256xf32, #tpu.memory_space<vmem>>, %arg12: memref<64x128xf32, #tpu.memory_space<vmem>>, %arg13: memref<64x256xf32, #tpu.memory_space<vmem>>, %arg14: memref<1x256xf32, #tpu.memory_space<vmem>>, %arg15: memref<64x128xf32, #tpu.memory_space<vmem>>, %arg16: memref<64x14xf32, #tpu.memory_space<vmem>>, %arg17: memref<1x14xf32, #tpu.memory_space<vmem>>, %arg18: memref<16x14xf32, #tpu.memory_space<vmem>>, %arg19: memref<16x64xf32, #tpu.memory_space<vmem>>, %arg20: memref<16x64xf32, #tpu.memory_space<vmem>>, %arg21: memref<16x32xf32, #tpu.memory_space<vmem>>) attributes {dimension_semantics = [], scalar_prefetch = 0 : i64, scratch_operands = 3 : i64, tpu.core_type = #tpu.core_type<tc>} {
    %c0 = arith.constant 0 : index
    %c0_0 = arith.constant 0 : index
    %0 = vector.load %arg0[%c0, %c0_0] : memref<16x14xf32, #tpu.memory_space<vmem>>, vector<16x14xf32>
    %c0_1 = arith.constant 0 : index
    %c0_2 = arith.constant 0 : index
    %1 = vector.load %arg1[%c0_1, %c0_2] : memref<14x256xf32, #tpu.memory_space<vmem>>, vector<14x256xf32>
    %c0_3 = arith.constant 0 : index
    %c0_4 = arith.constant 0 : index
    %2 = vector.load %arg2[%c0_3, %c0_4] : memref<1x256xf32, #tpu.memory_space<vmem>>, vector<1x256xf32>
    %c0_5 = arith.constant 0 : index
    %c0_6 = arith.constant 0 : index
    %3 = vector.load %arg3[%c0_5, %c0_6] : memref<64x128xf32, #tpu.memory_space<vmem>>, vector<64x128xf32>
    %cst = arith.constant dense<0.000000e+00> : vector<16x256xf32>
    %4 = tpu.matmul %0, %1, %cst {dimension_numbers = #tpu.dot_dimension_numbers<[1], [0], [0], [1], [0, 0, 1, 1], [], []>} : vector<16x14xf32>, vector<14x256xf32>, vector<16x256xf32> -> vector<16x256xf32>
    %5 = vector.broadcast %2 : vector<1x256xf32> to vector<16x256xf32>
    %6 = arith.addf %4, %5 : vector<16x256xf32>
    %7 = tpu.iota {dimensions = array<i32: 0>} : vector<4x64xi32>
    %8 = tpu.iota {dimensions = array<i32: 1>} : vector<4x64xi32>
    %c2_i32 = arith.constant 2 : i32
    %9 = vector.broadcast %c2_i32 : i32 to vector<4x64xi32>
    %10 = arith.cmpi slt, %7, %9 : vector<4x64xi32>
    %c32_i32 = arith.constant 32 : i32
    %11 = vector.broadcast %c32_i32 : i32 to vector<4x64xi32>
    %12 = arith.cmpi slt, %8, %11 : vector<4x64xi32>
    %13 = arith.xori %10, %12 : vector<4x64xi1>
    %cst_7 = arith.constant dense<true> : vector<4x64xi1>
    %14 = arith.xori %13, %cst_7 : vector<4x64xi1>
    %cst_8 = arith.constant 0.000000e+00 : f32
    %15 = vector.broadcast %cst_8 : f32 to vector<4x64xf32>
    %cst_9 = arith.constant 0.000000e+00 : f32
    %16 = vector.broadcast %cst_9 : f32 to vector<4x32xf32>
    %17 = vector.extract_strided_slice %6 {offsets = [0, 0], sizes = [2, 128], strides = [1, 1]} : vector<16x256xf32> to vector<2x128xf32>
    %18 = vector.extract_strided_slice %6 {offsets = [14, 128], sizes = [2, 128], strides = [1, 1]} : vector<16x256xf32> to vector<2x128xf32>
    %19 = tpu.concatenate %17, %18 in 0 : vector<2x128xf32>, vector<2x128xf32> -> vector<4x128xf32>
    %cst_10 = arith.constant dense<0.000000e+00> : vector<4x128xf32>
    %20 = tpu.matmul %15, %3, %cst_10 {dimension_numbers = #tpu.dot_dimension_numbers<[1], [0], [0], [1], [0, 0, 1, 1], [], []>} : vector<4x64xf32>, vector<64x128xf32>, vector<4x128xf32> -> vector<4x128xf32>
    %21 = arith.addf %19, %20 : vector<4x128xf32>
    %22 = vector.extract_strided_slice %21 {offsets = [0, 0], sizes = [4, 32], strides = [1, 1]} : vector<4x128xf32> to vector<4x32xf32>
    %23 = arith.negf %22 : vector<4x32xf32>
    %24 = math.exp %23 : vector<4x32xf32>
    %cst_11 = arith.constant 1.000000e+00 : f32
    %25 = vector.broadcast %cst_11 : f32 to vector<4x32xf32>
    %26 = arith.addf %25, %24 : vector<4x32xf32>
    %27 = arith.divf %25, %26 : vector<4x32xf32>
    %28 = vector.extract_strided_slice %21 {offsets = [0, 32], sizes = [4, 32], strides = [1, 1]} : vector<4x128xf32> to vector<4x32xf32>
    %29 = arith.negf %28 : vector<4x32xf32>
    %30 = math.exp %29 : vector<4x32xf32>
    %cst_12 = arith.constant 1.000000e+00 : f32
    %31 = vector.broadcast %cst_12 : f32 to vector<4x32xf32>
    %32 = arith.addf %31, %30 : vector<4x32xf32>
    %33 = arith.divf %31, %32 : vector<4x32xf32>
    %34 = vector.extract_strided_slice %21 {offsets = [0, 64], sizes = [4, 32], strides = [1, 1]} : vector<4x128xf32> to vector<4x32xf32>
    %35 = math.tanh %34 : vector<4x32xf32>
    %36 = vector.extract_strided_slice %21 {offsets = [0, 96], sizes = [4, 32], strides = [1, 1]} : vector<4x128xf32> to vector<4x32xf32>
    %37 = arith.negf %36 : vector<4x32xf32>
    %38 = math.exp %37 : vector<4x32xf32>
    %cst_13 = arith.constant 1.000000e+00 : f32
    %39 = vector.broadcast %cst_13 : f32 to vector<4x32xf32>
    %40 = arith.addf %39, %38 : vector<4x32xf32>
    %41 = arith.divf %39, %40 : vector<4x32xf32>
    %42 = arith.mulf %33, %16 : vector<4x32xf32>
    %43 = arith.mulf %27, %35 : vector<4x32xf32>
    %44 = arith.addf %42, %43 : vector<4x32xf32>
    %45 = math.tanh %44 : vector<4x32xf32>
    %46 = arith.mulf %41, %45 : vector<4x32xf32>
    %47 = tpu.concatenate %46, %46 in 1 : vector<4x32xf32>, vector<4x32xf32> -> vector<4x64xf32>
    %cst_14 = arith.constant 0.000000e+00 : f32
    %48 = vector.broadcast %cst_14 : f32 to vector<4x64xf32>
    %49 = arith.select %14, %47, %48 : vector<4x64xi1>, vector<4x64xf32>
    %50 = vector.extract_strided_slice %46 {offsets = [0, 0], sizes = [2, 32], strides = [1, 1]} : vector<4x32xf32> to vector<2x32xf32>
    %c0_15 = arith.constant 0 : index
    %c0_16 = arith.constant 0 : index
    %51 = vector.load %arg19[%c0_15, %c0_16] : memref<16x64xf32, #tpu.memory_space<vmem>>, vector<2x32xf32>
    tpu.vector_store %arg19[%c0_15, %c0_16], %50 {strides = array<i32>} : memref<16x64xf32, #tpu.memory_space<vmem>>, vector<2x32xf32>,
    %52 = vector.extract_strided_slice %46 {offsets = [2, 0], sizes = [2, 32], strides = [1, 1]} : vector<4x32xf32> to vector<2x32xf32>
    %c14 = arith.constant 14 : index
    %c32 = arith.constant 32 : index
    %53 = vector.load %arg19[%c14, %c32] : memref<16x64xf32, #tpu.memory_space<vmem>>, vector<2x32xf32>
    tpu.vector_store %arg19[%c14, %c32], %52 {strides = array<i32>} : memref<16x64xf32, #tpu.memory_space<vmem>>, vector<2x32xf32>,
    %54 = vector.extract_strided_slice %6 {offsets = [2, 0], sizes = [2, 128], strides = [1, 1]} : vector<16x256xf32> to vector<2x128xf32>
    %55 = vector.extract_strided_slice %6 {offsets = [12, 128], sizes = [2, 128], strides = [1, 1]} : vector<16x256xf32> to vector<2x128xf32>
    %56 = tpu.concatenate %54, %55 in 0 : vector<2x128xf32>, vector<2x128xf32> -> vector<4x128xf32>
    %cst_17 = arith.constant dense<0.000000e+00> : vector<4x128xf32>
    %57 = tpu.matmul %49, %3, %cst_17 {dimension_numbers = #tpu.dot_dimension_numbers<[1], [0], [0], [1], [0, 0, 1, 1], [], []>} : vector<4x64xf32>, vector<64x128xf32>, vector<4x128xf32> -> vector<4x128xf32>
    %58 = arith.addf %56, %57 : vector<4x128xf32>
    %59 = vector.extract_strided_slice %58 {offsets = [0, 0], sizes = [4, 32], strides = [1, 1]} : vector<4x128xf32> to vector<4x32xf32>
    %60 = arith.negf %59 : vector<4x32xf32>
    %61 = math.exp %60 : vector<4x32xf32>
    %cst_18 = arith.constant 1.000000e+00 : f32
    %62 = vector.broadcast %cst_18 : f32 to vector<4x32xf32>
    %63 = arith.addf %62, %61 : vector<4x32xf32>
    %64 = arith.divf %62, %63 : vector<4x32xf32>
    %65 = vector.extract_strided_slice %58 {offsets = [0, 32], sizes = [4, 32], strides = [1, 1]} : vector<4x128xf32> to vector<4x32xf32>
    %66 = arith.negf %65 : vector<4x32xf32>
    %67 = math.exp %66 : vector<4x32xf32>
    %cst_19 = arith.constant 1.000000e+00 : f32
    %68 = vector.broadcast %cst_19 : f32 to vector<4x32xf32>
    %69 = arith.addf %68, %67 : vector<4x32xf32>
    %70 = arith.divf %68, %69 : vector<4x32xf32>
    %71 = vector.extract_strided_slice %58 {offsets = [0, 64], sizes = [4, 32], strides = [1, 1]} : vector<4x128xf32> to vector<4x32xf32>
    %72 = math.tanh %71 : vector<4x32xf32>
    %73 = vector.extract_strided_slice %58 {offsets = [0, 96], sizes = [4, 32], strides = [1, 1]} : vector<4x128xf32> to vector<4x32xf32>
    %74 = arith.negf %73 : vector<4x32xf32>
    %75 = math.exp %74 : vector<4x32xf32>
    %cst_20 = arith.constant 1.000000e+00 : f32
    %76 = vector.broadcast %cst_20 : f32 to vector<4x32xf32>
    %77 = arith.addf %76, %75 : vector<4x32xf32>
    %78 = arith.divf %76, %77 : vector<4x32xf32>
    %79 = arith.mulf %70, %44 : vector<4x32xf32>
    %80 = arith.mulf %64, %72 : vector<4x32xf32>
    %81 = arith.addf %79, %80 : vector<4x32xf32>
    %82 = math.tanh %81 : vector<4x32xf32>
    %83 = arith.mulf %78, %82 : vector<4x32xf32>
    %84 = tpu.concatenate %83, %83 in 1 : vector<4x32xf32>, vector<4x32xf32> -> vector<4x64xf32>
    %cst_21 = arith.constant 0.000000e+00 : f32
    %85 = vector.broadcast %cst_21 : f32 to vector<4x64xf32>
    %86 = arith.select %14, %84, %85 : vector<4x64xi1>, vector<4x64xf32>
    %87 = vector.extract_strided_slice %83 {offsets = [0, 0], sizes = [2, 32], strides = [1, 1]} : vector<4x32xf32> to vector<2x32xf32>
    %c2 = arith.constant 2 : index
    %c0_22 = arith.constant 0 : index
    %88 = vector.load %arg19[%c2, %c0_22] : memref<16x64xf32, #tpu.memory_space<vmem>>, vector<2x32xf32>
    tpu.vector_store %arg19[%c2, %c0_22], %87 {strides = array<i32>} : memref<16x64xf32, #tpu.memory_space<vmem>>, vector<2x32xf32>,
    %89 = vector.extract_strided_slice %83 {offsets = [2, 0], sizes = [2, 32], strides = [1, 1]} : vector<4x32xf32> to vector<2x32xf32>
    %c12 = arith.constant 12 : index
    %c32_23 = arith.constant 32 : index
    %90 = vector.load %arg19[%c12, %c32_23] : memref<16x64xf32, #tpu.memory_space<vmem>>, vector<2x32xf32>
    tpu.vector_store %arg19[%c12, %c32_23], %89 {strides = array<i32>} : memref<16x64xf32, #tpu.memory_space<vmem>>, vector<2x32xf32>,
    %91 = vector.extract_strided_slice %6 {offsets = [4, 0], sizes = [2, 128], strides = [1, 1]} : vector<16x256xf32> to vector<2x128xf32>
    %92 = vector.extract_strided_slice %6 {offsets = [10, 128], sizes = [2, 128], strides = [1, 1]} : vector<16x256xf32> to vector<2x128xf32>
    %93 = tpu.concatenate %91, %92 in 0 : vector<2x128xf32>, vector<2x128xf32> -> vector<4x128xf32>
    %cst_24 = arith.constant dense<0.000000e+00> : vector<4x128xf32>
    %94 = tpu.matmul %86, %3, %cst_24 {dimension_numbers = #tpu.dot_dimension_numbers<[1], [0], [0], [1], [0, 0, 1, 1], [], []>} : vector<4x64xf32>, vector<64x128xf32>, vector<4x128xf32> -> vector<4x128xf32>
    %95 = arith.addf %93, %94 : vector<4x128xf32>
    %96 = vector.extract_strided_slice %95 {offsets = [0, 0], sizes = [4, 32], strides = [1, 1]} : vector<4x128xf32> to vector<4x32xf32>
    %97 = arith.negf %96 : vector<4x32xf32>
    %98 = math.exp %97 : vector<4x32xf32>
    %cst_25 = arith.constant 1.000000e+00 : f32
    %99 = vector.broadcast %cst_25 : f32 to vector<4x32xf32>
    %100 = arith.addf %99, %98 : vector<4x32xf32>
    %101 = arith.divf %99, %100 : vector<4x32xf32>
    %102 = vector.extract_strided_slice %95 {offsets = [0, 32], sizes = [4, 32], strides = [1, 1]} : vector<4x128xf32> to vector<4x32xf32>
    %103 = arith.negf %102 : vector<4x32xf32>
    %104 = math.exp %103 : vector<4x32xf32>
    %cst_26 = arith.constant 1.000000e+00 : f32
    %105 = vector.broadcast %cst_26 : f32 to vector<4x32xf32>
    %106 = arith.addf %105, %104 : vector<4x32xf32>
    %107 = arith.divf %105, %106 : vector<4x32xf32>
    %108 = vector.extract_strided_slice %95 {offsets = [0, 64], sizes = [4, 32], strides = [1, 1]} : vector<4x128xf32> to vector<4x32xf32>
    %109 = math.tanh %108 : vector<4x32xf32>
    %110 = vector.extract_strided_slice %95 {offsets = [0, 96], sizes = [4, 32], strides = [1, 1]} : vector<4x128xf32> to vector<4x32xf32>
    %111 = arith.negf %110 : vector<4x32xf32>
    %112 = math.exp %111 : vector<4x32xf32>
    %cst_27 = arith.constant 1.000000e+00 : f32
    %113 = vector.broadcast %cst_27 : f32 to vector<4x32xf32>
    %114 = arith.addf %113, %112 : vector<4x32xf32>
    %115 = arith.divf %113, %114 : vector<4x32xf32>
    %116 = arith.mulf %107, %81 : vector<4x32xf32>
    %117 = arith.mulf %101, %109 : vector<4x32xf32>
    %118 = arith.addf %116, %117 : vector<4x32xf32>
    %119 = math.tanh %118 : vector<4x32xf32>
    %120 = arith.mulf %115, %119 : vector<4x32xf32>
    %121 = tpu.concatenate %120, %120 in 1 : vector<4x32xf32>, vector<4x32xf32> -> vector<4x64xf32>
    %cst_28 = arith.constant 0.000000e+00 : f32
    %122 = vector.broadcast %cst_28 : f32 to vector<4x64xf32>
    %123 = arith.select %14, %121, %122 : vector<4x64xi1>, vector<4x64xf32>
    %124 = vector.extract_strided_slice %120 {offsets = [0, 0], sizes = [2, 32], strides = [1, 1]} : vector<4x32xf32> to vector<2x32xf32>
    %c4 = arith.constant 4 : index
    %c0_29 = arith.constant 0 : index
    %125 = vector.load %arg19[%c4, %c0_29] : memref<16x64xf32, #tpu.memory_space<vmem>>, vector<2x32xf32>
    tpu.vector_store %arg19[%c4, %c0_29], %124 {strides = array<i32>} : memref<16x64xf32, #tpu.memory_space<vmem>>, vector<2x32xf32>,
    %126 = vector.extract_strided_slice %120 {offsets = [2, 0], sizes = [2, 32], strides = [1, 1]} : vector<4x32xf32> to vector<2x32xf32>
    %c10 = arith.constant 10 : index
    %c32_30 = arith.constant 32 : index
    %127 = vector.load %arg19[%c10, %c32_30] : memref<16x64xf32, #tpu.memory_space<vmem>>, vector<2x32xf32>
    tpu.vector_store %arg19[%c10, %c32_30], %126 {strides = array<i32>} : memref<16x64xf32, #tpu.memory_space<vmem>>, vector<2x32xf32>,
    %128 = vector.extract_strided_slice %6 {offsets = [6, 0], sizes = [2, 128], strides = [1, 1]} : vector<16x256xf32> to vector<2x128xf32>
    %129 = vector.extract_strided_slice %6 {offsets = [8, 128], sizes = [2, 128], strides = [1, 1]} : vector<16x256xf32> to vector<2x128xf32>
    %130 = tpu.concatenate %128, %129 in 0 : vector<2x128xf32>, vector<2x128xf32> -> vector<4x128xf32>
    %cst_31 = arith.constant dense<0.000000e+00> : vector<4x128xf32>
    %131 = tpu.matmul %123, %3, %cst_31 {dimension_numbers = #tpu.dot_dimension_numbers<[1], [0], [0], [1], [0, 0, 1, 1], [], []>} : vector<4x64xf32>, vector<64x128xf32>, vector<4x128xf32> -> vector<4x128xf32>
    %132 = arith.addf %130, %131 : vector<4x128xf32>
    %133 = vector.extract_strided_slice %132 {offsets = [0, 0], sizes = [4, 32], strides = [1, 1]} : vector<4x128xf32> to vector<4x32xf32>
    %134 = arith.negf %133 : vector<4x32xf32>
    %135 = math.exp %134 : vector<4x32xf32>
    %cst_32 = arith.constant 1.000000e+00 : f32
    %136 = vector.broadcast %cst_32 : f32 to vector<4x32xf32>
    %137 = arith.addf %136, %135 : vector<4x32xf32>
    %138 = arith.divf %136, %137 : vector<4x32xf32>
    %139 = vector.extract_strided_slice %132 {offsets = [0, 32], sizes = [4, 32], strides = [1, 1]} : vector<4x128xf32> to vector<4x32xf32>
    %140 = arith.negf %139 : vector<4x32xf32>
    %141 = math.exp %140 : vector<4x32xf32>
    %cst_33 = arith.constant 1.000000e+00 : f32
    %142 = vector.broadcast %cst_33 : f32 to vector<4x32xf32>
    %143 = arith.addf %142, %141 : vector<4x32xf32>
    %144 = arith.divf %142, %143 : vector<4x32xf32>
    %145 = vector.extract_strided_slice %132 {offsets = [0, 64], sizes = [4, 32], strides = [1, 1]} : vector<4x128xf32> to vector<4x32xf32>
    %146 = math.tanh %145 : vector<4x32xf32>
    %147 = vector.extract_strided_slice %132 {offsets = [0, 96], sizes = [4, 32], strides = [1, 1]} : vector<4x128xf32> to vector<4x32xf32>
    %148 = arith.negf %147 : vector<4x32xf32>
    %149 = math.exp %148 : vector<4x32xf32>
    %cst_34 = arith.constant 1.000000e+00 : f32
    %150 = vector.broadcast %cst_34 : f32 to vector<4x32xf32>
    %151 = arith.addf %150, %149 : vector<4x32xf32>
    %152 = arith.divf %150, %151 : vector<4x32xf32>
    %153 = arith.mulf %144, %118 : vector<4x32xf32>
    %154 = arith.mulf %138, %146 : vector<4x32xf32>
    %155 = arith.addf %153, %154 : vector<4x32xf32>
    %156 = math.tanh %155 : vector<4x32xf32>
    %157 = arith.mulf %152, %156 : vector<4x32xf32>
    %158 = tpu.concatenate %157, %157 in 1 : vector<4x32xf32>, vector<4x32xf32> -> vector<4x64xf32>
    %cst_35 = arith.constant 0.000000e+00 : f32
    %159 = vector.broadcast %cst_35 : f32 to vector<4x64xf32>
    %160 = arith.select %14, %158, %159 : vector<4x64xi1>, vector<4x64xf32>
    %161 = vector.extract_strided_slice %157 {offsets = [0, 0], sizes = [2, 32], strides = [1, 1]} : vector<4x32xf32> to vector<2x32xf32>
    %c6 = arith.constant 6 : index
    %c0_36 = arith.constant 0 : index
    %162 = vector.load %arg19[%c6, %c0_36] : memref<16x64xf32, #tpu.memory_space<vmem>>, vector<2x32xf32>
    tpu.vector_store %arg19[%c6, %c0_36], %161 {strides = array<i32>} : memref<16x64xf32, #tpu.memory_space<vmem>>, vector<2x32xf32>,
    %163 = vector.extract_strided_slice %157 {offsets = [2, 0], sizes = [2, 32], strides = [1, 1]} : vector<4x32xf32> to vector<2x32xf32>
    %c8 = arith.constant 8 : index
    %c32_37 = arith.constant 32 : index
    %164 = vector.load %arg19[%c8, %c32_37] : memref<16x64xf32, #tpu.memory_space<vmem>>, vector<2x32xf32>
    tpu.vector_store %arg19[%c8, %c32_37], %163 {strides = array<i32>} : memref<16x64xf32, #tpu.memory_space<vmem>>, vector<2x32xf32>,
    %165 = vector.extract_strided_slice %6 {offsets = [8, 0], sizes = [2, 128], strides = [1, 1]} : vector<16x256xf32> to vector<2x128xf32>
    %166 = vector.extract_strided_slice %6 {offsets = [6, 128], sizes = [2, 128], strides = [1, 1]} : vector<16x256xf32> to vector<2x128xf32>
    %167 = tpu.concatenate %165, %166 in 0 : vector<2x128xf32>, vector<2x128xf32> -> vector<4x128xf32>
    %cst_38 = arith.constant dense<0.000000e+00> : vector<4x128xf32>
    %168 = tpu.matmul %160, %3, %cst_38 {dimension_numbers = #tpu.dot_dimension_numbers<[1], [0], [0], [1], [0, 0, 1, 1], [], []>} : vector<4x64xf32>, vector<64x128xf32>, vector<4x128xf32> -> vector<4x128xf32>
    %169 = arith.addf %167, %168 : vector<4x128xf32>
    %170 = vector.extract_strided_slice %169 {offsets = [0, 0], sizes = [4, 32], strides = [1, 1]} : vector<4x128xf32> to vector<4x32xf32>
    %171 = arith.negf %170 : vector<4x32xf32>
    %172 = math.exp %171 : vector<4x32xf32>
    %cst_39 = arith.constant 1.000000e+00 : f32
    %173 = vector.broadcast %cst_39 : f32 to vector<4x32xf32>
    %174 = arith.addf %173, %172 : vector<4x32xf32>
    %175 = arith.divf %173, %174 : vector<4x32xf32>
    %176 = vector.extract_strided_slice %169 {offsets = [0, 32], sizes = [4, 32], strides = [1, 1]} : vector<4x128xf32> to vector<4x32xf32>
    %177 = arith.negf %176 : vector<4x32xf32>
    %178 = math.exp %177 : vector<4x32xf32>
    %cst_40 = arith.constant 1.000000e+00 : f32
    %179 = vector.broadcast %cst_40 : f32 to vector<4x32xf32>
    %180 = arith.addf %179, %178 : vector<4x32xf32>
    %181 = arith.divf %179, %180 : vector<4x32xf32>
    %182 = vector.extract_strided_slice %169 {offsets = [0, 64], sizes = [4, 32], strides = [1, 1]} : vector<4x128xf32> to vector<4x32xf32>
    %183 = math.tanh %182 : vector<4x32xf32>
    %184 = vector.extract_strided_slice %169 {offsets = [0, 96], sizes = [4, 32], strides = [1, 1]} : vector<4x128xf32> to vector<4x32xf32>
    %185 = arith.negf %184 : vector<4x32xf32>
    %186 = math.exp %185 : vector<4x32xf32>
    %cst_41 = arith.constant 1.000000e+00 : f32
    %187 = vector.broadcast %cst_41 : f32 to vector<4x32xf32>
    %188 = arith.addf %187, %186 : vector<4x32xf32>
    %189 = arith.divf %187, %188 : vector<4x32xf32>
    %190 = arith.mulf %181, %155 : vector<4x32xf32>
    %191 = arith.mulf %175, %183 : vector<4x32xf32>
    %192 = arith.addf %190, %191 : vector<4x32xf32>
    %193 = math.tanh %192 : vector<4x32xf32>
    %194 = arith.mulf %189, %193 : vector<4x32xf32>
    %195 = tpu.concatenate %194, %194 in 1 : vector<4x32xf32>, vector<4x32xf32> -> vector<4x64xf32>
    %cst_42 = arith.constant 0.000000e+00 : f32
    %196 = vector.broadcast %cst_42 : f32 to vector<4x64xf32>
    %197 = arith.select %14, %195, %196 : vector<4x64xi1>, vector<4x64xf32>
    %198 = vector.extract_strided_slice %194 {offsets = [0, 0], sizes = [2, 32], strides = [1, 1]} : vector<4x32xf32> to vector<2x32xf32>
    %c8_43 = arith.constant 8 : index
    %c0_44 = arith.constant 0 : index
    %199 = vector.load %arg19[%c8_43, %c0_44] : memref<16x64xf32, #tpu.memory_space<vmem>>, vector<2x32xf32>
    tpu.vector_store %arg19[%c8_43, %c0_44], %198 {strides = array<i32>} : memref<16x64xf32, #tpu.memory_space<vmem>>, vector<2x32xf32>,
    %200 = vector.extract_strided_slice %194 {offsets = [2, 0], sizes = [2, 32], strides = [1, 1]} : vector<4x32xf32> to vector<2x32xf32>
    %c6_45 = arith.constant 6 : index
    %c32_46 = arith.constant 32 : index
    %201 = vector.load %arg19[%c6_45, %c32_46] : memref<16x64xf32, #tpu.memory_space<vmem>>, vector<2x32xf32>
    tpu.vector_store %arg19[%c6_45, %c32_46], %200 {strides = array<i32>} : memref<16x64xf32, #tpu.memory_space<vmem>>, vector<2x32xf32>,
    %202 = vector.extract_strided_slice %6 {offsets = [10, 0], sizes = [2, 128], strides = [1, 1]} : vector<16x256xf32> to vector<2x128xf32>
    %203 = vector.extract_strided_slice %6 {offsets = [4, 128], sizes = [2, 128], strides = [1, 1]} : vector<16x256xf32> to vector<2x128xf32>
    %204 = tpu.concatenate %202, %203 in 0 : vector<2x128xf32>, vector<2x128xf32> -> vector<4x128xf32>
    %cst_47 = arith.constant dense<0.000000e+00> : vector<4x128xf32>
    %205 = tpu.matmul %197, %3, %cst_47 {dimension_numbers = #tpu.dot_dimension_numbers<[1], [0], [0], [1], [0, 0, 1, 1], [], []>} : vector<4x64xf32>, vector<64x128xf32>, vector<4x128xf32> -> vector<4x128xf32>
    %206 = arith.addf %204, %205 : vector<4x128xf32>
    %207 = vector.extract_strided_slice %206 {offsets = [0, 0], sizes = [4, 32], strides = [1, 1]} : vector<4x128xf32> to vector<4x32xf32>
    %208 = arith.negf %207 : vector<4x32xf32>
    %209 = math.exp %208 : vector<4x32xf32>
    %cst_48 = arith.constant 1.000000e+00 : f32
    %210 = vector.broadcast %cst_48 : f32 to vector<4x32xf32>
    %211 = arith.addf %210, %209 : vector<4x32xf32>
    %212 = arith.divf %210, %211 : vector<4x32xf32>
    %213 = vector.extract_strided_slice %206 {offsets = [0, 32], sizes = [4, 32], strides = [1, 1]} : vector<4x128xf32> to vector<4x32xf32>
    %214 = arith.negf %213 : vector<4x32xf32>
    %215 = math.exp %214 : vector<4x32xf32>
    %cst_49 = arith.constant 1.000000e+00 : f32
    %216 = vector.broadcast %cst_49 : f32 to vector<4x32xf32>
    %217 = arith.addf %216, %215 : vector<4x32xf32>
    %218 = arith.divf %216, %217 : vector<4x32xf32>
    %219 = vector.extract_strided_slice %206 {offsets = [0, 64], sizes = [4, 32], strides = [1, 1]} : vector<4x128xf32> to vector<4x32xf32>
    %220 = math.tanh %219 : vector<4x32xf32>
    %221 = vector.extract_strided_slice %206 {offsets = [0, 96], sizes = [4, 32], strides = [1, 1]} : vector<4x128xf32> to vector<4x32xf32>
    %222 = arith.negf %221 : vector<4x32xf32>
    %223 = math.exp %222 : vector<4x32xf32>
    %cst_50 = arith.constant 1.000000e+00 : f32
    %224 = vector.broadcast %cst_50 : f32 to vector<4x32xf32>
    %225 = arith.addf %224, %223 : vector<4x32xf32>
    %226 = arith.divf %224, %225 : vector<4x32xf32>
    %227 = arith.mulf %218, %192 : vector<4x32xf32>
    %228 = arith.mulf %212, %220 : vector<4x32xf32>
    %229 = arith.addf %227, %228 : vector<4x32xf32>
    %230 = math.tanh %229 : vector<4x32xf32>
    %231 = arith.mulf %226, %230 : vector<4x32xf32>
    %232 = tpu.concatenate %231, %231 in 1 : vector<4x32xf32>, vector<4x32xf32> -> vector<4x64xf32>
    %cst_51 = arith.constant 0.000000e+00 : f32
    %233 = vector.broadcast %cst_51 : f32 to vector<4x64xf32>
    %234 = arith.select %14, %232, %233 : vector<4x64xi1>, vector<4x64xf32>
    %235 = vector.extract_strided_slice %231 {offsets = [0, 0], sizes = [2, 32], strides = [1, 1]} : vector<4x32xf32> to vector<2x32xf32>
    %c10_52 = arith.constant 10 : index
    %c0_53 = arith.constant 0 : index
    %236 = vector.load %arg19[%c10_52, %c0_53] : memref<16x64xf32, #tpu.memory_space<vmem>>, vector<2x32xf32>
    tpu.vector_store %arg19[%c10_52, %c0_53], %235 {strides = array<i32>} : memref<16x64xf32, #tpu.memory_space<vmem>>, vector<2x32xf32>,
    %237 = vector.extract_strided_slice %231 {offsets = [2, 0], sizes = [2, 32], strides = [1, 1]} : vector<4x32xf32> to vector<2x32xf32>
    %c4_54 = arith.constant 4 : index
    %c32_55 = arith.constant 32 : index
    %238 = vector.load %arg19[%c4_54, %c32_55] : memref<16x64xf32, #tpu.memory_space<vmem>>, vector<2x32xf32>
    tpu.vector_store %arg19[%c4_54, %c32_55], %237 {strides = array<i32>} : memref<16x64xf32, #tpu.memory_space<vmem>>, vector<2x32xf32>,
    %239 = vector.extract_strided_slice %6 {offsets = [12, 0], sizes = [2, 128], strides = [1, 1]} : vector<16x256xf32> to vector<2x128xf32>
    %240 = vector.extract_strided_slice %6 {offsets = [2, 128], sizes = [2, 128], strides = [1, 1]} : vector<16x256xf32> to vector<2x128xf32>
    %241 = tpu.concatenate %239, %240 in 0 : vector<2x128xf32>, vector<2x128xf32> -> vector<4x128xf32>
    %cst_56 = arith.constant dense<0.000000e+00> : vector<4x128xf32>
    %242 = tpu.matmul %234, %3, %cst_56 {dimension_numbers = #tpu.dot_dimension_numbers<[1], [0], [0], [1], [0, 0, 1, 1], [], []>} : vector<4x64xf32>, vector<64x128xf32>, vector<4x128xf32> -> vector<4x128xf32>
    %243 = arith.addf %241, %242 : vector<4x128xf32>
    %244 = vector.extract_strided_slice %243 {offsets = [0, 0], sizes = [4, 32], strides = [1, 1]} : vector<4x128xf32> to vector<4x32xf32>
    %245 = arith.negf %244 : vector<4x32xf32>
    %246 = math.exp %245 : vector<4x32xf32>
    %cst_57 = arith.constant 1.000000e+00 : f32
    %247 = vector.broadcast %cst_57 : f32 to vector<4x32xf32>
    %248 = arith.addf %247, %246 : vector<4x32xf32>
    %249 = arith.divf %247, %248 : vector<4x32xf32>
    %250 = vector.extract_strided_slice %243 {offsets = [0, 32], sizes = [4, 32], strides = [1, 1]} : vector<4x128xf32> to vector<4x32xf32>
    %251 = arith.negf %250 : vector<4x32xf32>
    %252 = math.exp %251 : vector<4x32xf32>
    %cst_58 = arith.constant 1.000000e+00 : f32
    %253 = vector.broadcast %cst_58 : f32 to vector<4x32xf32>
    %254 = arith.addf %253, %252 : vector<4x32xf32>
    %255 = arith.divf %253, %254 : vector<4x32xf32>
    %256 = vector.extract_strided_slice %243 {offsets = [0, 64], sizes = [4, 32], strides = [1, 1]} : vector<4x128xf32> to vector<4x32xf32>
    %257 = math.tanh %256 : vector<4x32xf32>
    %258 = vector.extract_strided_slice %243 {offsets = [0, 96], sizes = [4, 32], strides = [1, 1]} : vector<4x128xf32> to vector<4x32xf32>
    %259 = arith.negf %258 : vector<4x32xf32>
    %260 = math.exp %259 : vector<4x32xf32>
    %cst_59 = arith.constant 1.000000e+00 : f32
    %261 = vector.broadcast %cst_59 : f32 to vector<4x32xf32>
    %262 = arith.addf %261, %260 : vector<4x32xf32>
    %263 = arith.divf %261, %262 : vector<4x32xf32>
    %264 = arith.mulf %255, %229 : vector<4x32xf32>
    %265 = arith.mulf %249, %257 : vector<4x32xf32>
    %266 = arith.addf %264, %265 : vector<4x32xf32>
    %267 = math.tanh %266 : vector<4x32xf32>
    %268 = arith.mulf %263, %267 : vector<4x32xf32>
    %269 = tpu.concatenate %268, %268 in 1 : vector<4x32xf32>, vector<4x32xf32> -> vector<4x64xf32>
    %cst_60 = arith.constant 0.000000e+00 : f32
    %270 = vector.broadcast %cst_60 : f32 to vector<4x64xf32>
    %271 = arith.select %14, %269, %270 : vector<4x64xi1>, vector<4x64xf32>
    %272 = vector.extract_strided_slice %268 {offsets = [0, 0], sizes = [2, 32], strides = [1, 1]} : vector<4x32xf32> to vector<2x32xf32>
    %c12_61 = arith.constant 12 : index
    %c0_62 = arith.constant 0 : index
    %273 = vector.load %arg19[%c12_61, %c0_62] : memref<16x64xf32, #tpu.memory_space<vmem>>, vector<2x32xf32>
    tpu.vector_store %arg19[%c12_61, %c0_62], %272 {strides = array<i32>} : memref<16x64xf32, #tpu.memory_space<vmem>>, vector<2x32xf32>,
    %274 = vector.extract_strided_slice %268 {offsets = [2, 0], sizes = [2, 32], strides = [1, 1]} : vector<4x32xf32> to vector<2x32xf32>
    %c2_63 = arith.constant 2 : index
    %c32_64 = arith.constant 32 : index
    %275 = vector.load %arg19[%c2_63, %c32_64] : memref<16x64xf32, #tpu.memory_space<vmem>>, vector<2x32xf32>
    tpu.vector_store %arg19[%c2_63, %c32_64], %274 {strides = array<i32>} : memref<16x64xf32, #tpu.memory_space<vmem>>, vector<2x32xf32>,
    %276 = vector.extract_strided_slice %6 {offsets = [14, 0], sizes = [2, 128], strides = [1, 1]} : vector<16x256xf32> to vector<2x128xf32>
    %277 = vector.extract_strided_slice %6 {offsets = [0, 128], sizes = [2, 128], strides = [1, 1]} : vector<16x256xf32> to vector<2x128xf32>
    %278 = tpu.concatenate %276, %277 in 0 : vector<2x128xf32>, vector<2x128xf32> -> vector<4x128xf32>
    %cst_65 = arith.constant dense<0.000000e+00> : vector<4x128xf32>
    %279 = tpu.matmul %271, %3, %cst_65 {dimension_numbers = #tpu.dot_dimension_numbers<[1], [0], [0], [1], [0, 0, 1, 1], [], []>} : vector<4x64xf32>, vector<64x128xf32>, vector<4x128xf32> -> vector<4x128xf32>
    %280 = arith.addf %278, %279 : vector<4x128xf32>
    %281 = vector.extract_strided_slice %280 {offsets = [0, 0], sizes = [4, 32], strides = [1, 1]} : vector<4x128xf32> to vector<4x32xf32>
    %282 = arith.negf %281 : vector<4x32xf32>
    %283 = math.exp %282 : vector<4x32xf32>
    %cst_66 = arith.constant 1.000000e+00 : f32
    %284 = vector.broadcast %cst_66 : f32 to vector<4x32xf32>
    %285 = arith.addf %284, %283 : vector<4x32xf32>
    %286 = arith.divf %284, %285 : vector<4x32xf32>
    %287 = vector.extract_strided_slice %280 {offsets = [0, 32], sizes = [4, 32], strides = [1, 1]} : vector<4x128xf32> to vector<4x32xf32>
    %288 = arith.negf %287 : vector<4x32xf32>
    %289 = math.exp %288 : vector<4x32xf32>
    %cst_67 = arith.constant 1.000000e+00 : f32
    %290 = vector.broadcast %cst_67 : f32 to vector<4x32xf32>
    %291 = arith.addf %290, %289 : vector<4x32xf32>
    %292 = arith.divf %290, %291 : vector<4x32xf32>
    %293 = vector.extract_strided_slice %280 {offsets = [0, 64], sizes = [4, 32], strides = [1, 1]} : vector<4x128xf32> to vector<4x32xf32>
    %294 = math.tanh %293 : vector<4x32xf32>
    %295 = vector.extract_strided_slice %280 {offsets = [0, 96], sizes = [4, 32], strides = [1, 1]} : vector<4x128xf32> to vector<4x32xf32>
    %296 = arith.negf %295 : vector<4x32xf32>
    %297 = math.exp %296 : vector<4x32xf32>
    %cst_68 = arith.constant 1.000000e+00 : f32
    %298 = vector.broadcast %cst_68 : f32 to vector<4x32xf32>
    %299 = arith.addf %298, %297 : vector<4x32xf32>
    %300 = arith.divf %298, %299 : vector<4x32xf32>
    %301 = arith.mulf %292, %266 : vector<4x32xf32>
    %302 = arith.mulf %286, %294 : vector<4x32xf32>
    %303 = arith.addf %301, %302 : vector<4x32xf32>
    %304 = math.tanh %303 : vector<4x32xf32>
    %305 = arith.mulf %300, %304 : vector<4x32xf32>
    %306 = vector.extract_strided_slice %305 {offsets = [0, 0], sizes = [2, 32], strides = [1, 1]} : vector<4x32xf32> to vector<2x32xf32>
    %c14_69 = arith.constant 14 : index
    %c0_70 = arith.constant 0 : index
    %307 = vector.load %arg19[%c14_69, %c0_70] : memref<16x64xf32, #tpu.memory_space<vmem>>, vector<2x32xf32>
    tpu.vector_store %arg19[%c14_69, %c0_70], %306 {strides = array<i32>} : memref<16x64xf32, #tpu.memory_space<vmem>>, vector<2x32xf32>,
    %308 = vector.extract_strided_slice %305 {offsets = [2, 0], sizes = [2, 32], strides = [1, 1]} : vector<4x32xf32> to vector<2x32xf32>
    %c0_71 = arith.constant 0 : index
    %c32_72 = arith.constant 32 : index
    %309 = vector.load %arg19[%c0_71, %c32_72] : memref<16x64xf32, #tpu.memory_space<vmem>>, vector<2x32xf32>
    tpu.vector_store %arg19[%c0_71, %c32_72], %308 {strides = array<i32>} : memref<16x64xf32, #tpu.memory_space<vmem>>, vector<2x32xf32>,
    %c0_73 = arith.constant 0 : index
    %c0_74 = arith.constant 0 : index
    %310 = vector.load %arg19[%c0_73, %c0_74] : memref<16x64xf32, #tpu.memory_space<vmem>>, vector<16x64xf32>
    %c0_75 = arith.constant 0 : index
    %c0_76 = arith.constant 0 : index
    %311 = vector.load %arg4[%c0_75, %c0_76] : memref<64x256xf32, #tpu.memory_space<vmem>>, vector<64x256xf32>
    %c0_77 = arith.constant 0 : index
    %c0_78 = arith.constant 0 : index
    %312 = vector.load %arg5[%c0_77, %c0_78] : memref<1x256xf32, #tpu.memory_space<vmem>>, vector<1x256xf32>
    %c0_79 = arith.constant 0 : index
    %c0_80 = arith.constant 0 : index
    %313 = vector.load %arg6[%c0_79, %c0_80] : memref<64x128xf32, #tpu.memory_space<vmem>>, vector<64x128xf32>
    %cst_81 = arith.constant dense<0.000000e+00> : vector<16x256xf32>
    %314 = tpu.matmul %310, %311, %cst_81 {dimension_numbers = #tpu.dot_dimension_numbers<[1], [0], [0], [1], [0, 0, 1, 1], [], []>} : vector<16x64xf32>, vector<64x256xf32>, vector<16x256xf32> -> vector<16x256xf32>
    %315 = vector.broadcast %312 : vector<1x256xf32> to vector<16x256xf32>
    %316 = arith.addf %314, %315 : vector<16x256xf32>
    %317 = tpu.iota {dimensions = array<i32: 0>} : vector<4x64xi32>
    %318 = tpu.iota {dimensions = array<i32: 1>} : vector<4x64xi32>
    %c2_i32_82 = arith.constant 2 : i32
    %319 = vector.broadcast %c2_i32_82 : i32 to vector<4x64xi32>
    %320 = arith.cmpi slt, %317, %319 : vector<4x64xi32>
    %c32_i32_83 = arith.constant 32 : i32
    %321 = vector.broadcast %c32_i32_83 : i32 to vector<4x64xi32>
    %322 = arith.cmpi slt, %318, %321 : vector<4x64xi32>
    %323 = arith.xori %320, %322 : vector<4x64xi1>
    %cst_84 = arith.constant dense<true> : vector<4x64xi1>
    %324 = arith.xori %323, %cst_84 : vector<4x64xi1>
    %cst_85 = arith.constant 0.000000e+00 : f32
    %325 = vector.broadcast %cst_85 : f32 to vector<4x64xf32>
    %cst_86 = arith.constant 0.000000e+00 : f32
    %326 = vector.broadcast %cst_86 : f32 to vector<4x32xf32>
    %327 = vector.extract_strided_slice %316 {offsets = [0, 0], sizes = [2, 128], strides = [1, 1]} : vector<16x256xf32> to vector<2x128xf32>
    %328 = vector.extract_strided_slice %316 {offsets = [14, 128], sizes = [2, 128], strides = [1, 1]} : vector<16x256xf32> to vector<2x128xf32>
    %329 = tpu.concatenate %327, %328 in 0 : vector<2x128xf32>, vector<2x128xf32> -> vector<4x128xf32>
    %cst_87 = arith.constant dense<0.000000e+00> : vector<4x128xf32>
    %330 = tpu.matmul %325, %313, %cst_87 {dimension_numbers = #tpu.dot_dimension_numbers<[1], [0], [0], [1], [0, 0, 1, 1], [], []>} : vector<4x64xf32>, vector<64x128xf32>, vector<4x128xf32> -> vector<4x128xf32>
    %331 = arith.addf %329, %330 : vector<4x128xf32>
    %332 = vector.extract_strided_slice %331 {offsets = [0, 0], sizes = [4, 32], strides = [1, 1]} : vector<4x128xf32> to vector<4x32xf32>
    %333 = arith.negf %332 : vector<4x32xf32>
    %334 = math.exp %333 : vector<4x32xf32>
    %cst_88 = arith.constant 1.000000e+00 : f32
    %335 = vector.broadcast %cst_88 : f32 to vector<4x32xf32>
    %336 = arith.addf %335, %334 : vector<4x32xf32>
    %337 = arith.divf %335, %336 : vector<4x32xf32>
    %338 = vector.extract_strided_slice %331 {offsets = [0, 32], sizes = [4, 32], strides = [1, 1]} : vector<4x128xf32> to vector<4x32xf32>
    %339 = arith.negf %338 : vector<4x32xf32>
    %340 = math.exp %339 : vector<4x32xf32>
    %cst_89 = arith.constant 1.000000e+00 : f32
    %341 = vector.broadcast %cst_89 : f32 to vector<4x32xf32>
    %342 = arith.addf %341, %340 : vector<4x32xf32>
    %343 = arith.divf %341, %342 : vector<4x32xf32>
    %344 = vector.extract_strided_slice %331 {offsets = [0, 64], sizes = [4, 32], strides = [1, 1]} : vector<4x128xf32> to vector<4x32xf32>
    %345 = math.tanh %344 : vector<4x32xf32>
    %346 = vector.extract_strided_slice %331 {offsets = [0, 96], sizes = [4, 32], strides = [1, 1]} : vector<4x128xf32> to vector<4x32xf32>
    %347 = arith.negf %346 : vector<4x32xf32>
    %348 = math.exp %347 : vector<4x32xf32>
    %cst_90 = arith.constant 1.000000e+00 : f32
    %349 = vector.broadcast %cst_90 : f32 to vector<4x32xf32>
    %350 = arith.addf %349, %348 : vector<4x32xf32>
    %351 = arith.divf %349, %350 : vector<4x32xf32>
    %352 = arith.mulf %343, %326 : vector<4x32xf32>
    %353 = arith.mulf %337, %345 : vector<4x32xf32>
    %354 = arith.addf %352, %353 : vector<4x32xf32>
    %355 = math.tanh %354 : vector<4x32xf32>
    %356 = arith.mulf %351, %355 : vector<4x32xf32>
    %357 = tpu.concatenate %356, %356 in 1 : vector<4x32xf32>, vector<4x32xf32> -> vector<4x64xf32>
    %cst_91 = arith.constant 0.000000e+00 : f32
    %358 = vector.broadcast %cst_91 : f32 to vector<4x64xf32>
    %359 = arith.select %324, %357, %358 : vector<4x64xi1>, vector<4x64xf32>
    %360 = vector.extract_strided_slice %356 {offsets = [0, 0], sizes = [2, 32], strides = [1, 1]} : vector<4x32xf32> to vector<2x32xf32>
    %c0_92 = arith.constant 0 : index
    %c0_93 = arith.constant 0 : index
    %361 = vector.load %arg20[%c0_92, %c0_93] : memref<16x64xf32, #tpu.memory_space<vmem>>, vector<2x32xf32>
    tpu.vector_store %arg20[%c0_92, %c0_93], %360 {strides = array<i32>} : memref<16x64xf32, #tpu.memory_space<vmem>>, vector<2x32xf32>,
    %362 = vector.extract_strided_slice %356 {offsets = [2, 0], sizes = [2, 32], strides = [1, 1]} : vector<4x32xf32> to vector<2x32xf32>
    %c14_94 = arith.constant 14 : index
    %c32_95 = arith.constant 32 : index
    %363 = vector.load %arg20[%c14_94, %c32_95] : memref<16x64xf32, #tpu.memory_space<vmem>>, vector<2x32xf32>
    tpu.vector_store %arg20[%c14_94, %c32_95], %362 {strides = array<i32>} : memref<16x64xf32, #tpu.memory_space<vmem>>, vector<2x32xf32>,
    %364 = vector.extract_strided_slice %316 {offsets = [2, 0], sizes = [2, 128], strides = [1, 1]} : vector<16x256xf32> to vector<2x128xf32>
    %365 = vector.extract_strided_slice %316 {offsets = [12, 128], sizes = [2, 128], strides = [1, 1]} : vector<16x256xf32> to vector<2x128xf32>
    %366 = tpu.concatenate %364, %365 in 0 : vector<2x128xf32>, vector<2x128xf32> -> vector<4x128xf32>
    %cst_96 = arith.constant dense<0.000000e+00> : vector<4x128xf32>
    %367 = tpu.matmul %359, %313, %cst_96 {dimension_numbers = #tpu.dot_dimension_numbers<[1], [0], [0], [1], [0, 0, 1, 1], [], []>} : vector<4x64xf32>, vector<64x128xf32>, vector<4x128xf32> -> vector<4x128xf32>
    %368 = arith.addf %366, %367 : vector<4x128xf32>
    %369 = vector.extract_strided_slice %368 {offsets = [0, 0], sizes = [4, 32], strides = [1, 1]} : vector<4x128xf32> to vector<4x32xf32>
    %370 = arith.negf %369 : vector<4x32xf32>
    %371 = math.exp %370 : vector<4x32xf32>
    %cst_97 = arith.constant 1.000000e+00 : f32
    %372 = vector.broadcast %cst_97 : f32 to vector<4x32xf32>
    %373 = arith.addf %372, %371 : vector<4x32xf32>
    %374 = arith.divf %372, %373 : vector<4x32xf32>
    %375 = vector.extract_strided_slice %368 {offsets = [0, 32], sizes = [4, 32], strides = [1, 1]} : vector<4x128xf32> to vector<4x32xf32>
    %376 = arith.negf %375 : vector<4x32xf32>
    %377 = math.exp %376 : vector<4x32xf32>
    %cst_98 = arith.constant 1.000000e+00 : f32
    %378 = vector.broadcast %cst_98 : f32 to vector<4x32xf32>
    %379 = arith.addf %378, %377 : vector<4x32xf32>
    %380 = arith.divf %378, %379 : vector<4x32xf32>
    %381 = vector.extract_strided_slice %368 {offsets = [0, 64], sizes = [4, 32], strides = [1, 1]} : vector<4x128xf32> to vector<4x32xf32>
    %382 = math.tanh %381 : vector<4x32xf32>
    %383 = vector.extract_strided_slice %368 {offsets = [0, 96], sizes = [4, 32], strides = [1, 1]} : vector<4x128xf32> to vector<4x32xf32>
    %384 = arith.negf %383 : vector<4x32xf32>
    %385 = math.exp %384 : vector<4x32xf32>
    %cst_99 = arith.constant 1.000000e+00 : f32
    %386 = vector.broadcast %cst_99 : f32 to vector<4x32xf32>
    %387 = arith.addf %386, %385 : vector<4x32xf32>
    %388 = arith.divf %386, %387 : vector<4x32xf32>
    %389 = arith.mulf %380, %354 : vector<4x32xf32>
    %390 = arith.mulf %374, %382 : vector<4x32xf32>
    %391 = arith.addf %389, %390 : vector<4x32xf32>
    %392 = math.tanh %391 : vector<4x32xf32>
    %393 = arith.mulf %388, %392 : vector<4x32xf32>
    %394 = tpu.concatenate %393, %393 in 1 : vector<4x32xf32>, vector<4x32xf32> -> vector<4x64xf32>
    %cst_100 = arith.constant 0.000000e+00 : f32
    %395 = vector.broadcast %cst_100 : f32 to vector<4x64xf32>
    %396 = arith.select %324, %394, %395 : vector<4x64xi1>, vector<4x64xf32>
    %397 = vector.extract_strided_slice %393 {offsets = [0, 0], sizes = [2, 32], strides = [1, 1]} : vector<4x32xf32> to vector<2x32xf32>
    %c2_101 = arith.constant 2 : index
    %c0_102 = arith.constant 0 : index
    %398 = vector.load %arg20[%c2_101, %c0_102] : memref<16x64xf32, #tpu.memory_space<vmem>>, vector<2x32xf32>
    tpu.vector_store %arg20[%c2_101, %c0_102], %397 {strides = array<i32>} : memref<16x64xf32, #tpu.memory_space<vmem>>, vector<2x32xf32>,
    %399 = vector.extract_strided_slice %393 {offsets = [2, 0], sizes = [2, 32], strides = [1, 1]} : vector<4x32xf32> to vector<2x32xf32>
    %c12_103 = arith.constant 12 : index
    %c32_104 = arith.constant 32 : index
    %400 = vector.load %arg20[%c12_103, %c32_104] : memref<16x64xf32, #tpu.memory_space<vmem>>, vector<2x32xf32>
    tpu.vector_store %arg20[%c12_103, %c32_104], %399 {strides = array<i32>} : memref<16x64xf32, #tpu.memory_space<vmem>>, vector<2x32xf32>,
    %401 = vector.extract_strided_slice %316 {offsets = [4, 0], sizes = [2, 128], strides = [1, 1]} : vector<16x256xf32> to vector<2x128xf32>
    %402 = vector.extract_strided_slice %316 {offsets = [10, 128], sizes = [2, 128], strides = [1, 1]} : vector<16x256xf32> to vector<2x128xf32>
    %403 = tpu.concatenate %401, %402 in 0 : vector<2x128xf32>, vector<2x128xf32> -> vector<4x128xf32>
    %cst_105 = arith.constant dense<0.000000e+00> : vector<4x128xf32>
    %404 = tpu.matmul %396, %313, %cst_105 {dimension_numbers = #tpu.dot_dimension_numbers<[1], [0], [0], [1], [0, 0, 1, 1], [], []>} : vector<4x64xf32>, vector<64x128xf32>, vector<4x128xf32> -> vector<4x128xf32>
    %405 = arith.addf %403, %404 : vector<4x128xf32>
    %406 = vector.extract_strided_slice %405 {offsets = [0, 0], sizes = [4, 32], strides = [1, 1]} : vector<4x128xf32> to vector<4x32xf32>
    %407 = arith.negf %406 : vector<4x32xf32>
    %408 = math.exp %407 : vector<4x32xf32>
    %cst_106 = arith.constant 1.000000e+00 : f32
    %409 = vector.broadcast %cst_106 : f32 to vector<4x32xf32>
    %410 = arith.addf %409, %408 : vector<4x32xf32>
    %411 = arith.divf %409, %410 : vector<4x32xf32>
    %412 = vector.extract_strided_slice %405 {offsets = [0, 32], sizes = [4, 32], strides = [1, 1]} : vector<4x128xf32> to vector<4x32xf32>
    %413 = arith.negf %412 : vector<4x32xf32>
    %414 = math.exp %413 : vector<4x32xf32>
    %cst_107 = arith.constant 1.000000e+00 : f32
    %415 = vector.broadcast %cst_107 : f32 to vector<4x32xf32>
    %416 = arith.addf %415, %414 : vector<4x32xf32>
    %417 = arith.divf %415, %416 : vector<4x32xf32>
    %418 = vector.extract_strided_slice %405 {offsets = [0, 64], sizes = [4, 32], strides = [1, 1]} : vector<4x128xf32> to vector<4x32xf32>
    %419 = math.tanh %418 : vector<4x32xf32>
    %420 = vector.extract_strided_slice %405 {offsets = [0, 96], sizes = [4, 32], strides = [1, 1]} : vector<4x128xf32> to vector<4x32xf32>
    %421 = arith.negf %420 : vector<4x32xf32>
    %422 = math.exp %421 : vector<4x32xf32>
    %cst_108 = arith.constant 1.000000e+00 : f32
    %423 = vector.broadcast %cst_108 : f32 to vector<4x32xf32>
    %424 = arith.addf %423, %422 : vector<4x32xf32>
    %425 = arith.divf %423, %424 : vector<4x32xf32>
    %426 = arith.mulf %417, %391 : vector<4x32xf32>
    %427 = arith.mulf %411, %419 : vector<4x32xf32>
    %428 = arith.addf %426, %427 : vector<4x32xf32>
    %429 = math.tanh %428 : vector<4x32xf32>
    %430 = arith.mulf %425, %429 : vector<4x32xf32>
    %431 = tpu.concatenate %430, %430 in 1 : vector<4x32xf32>, vector<4x32xf32> -> vector<4x64xf32>
    %cst_109 = arith.constant 0.000000e+00 : f32
    %432 = vector.broadcast %cst_109 : f32 to vector<4x64xf32>
    %433 = arith.select %324, %431, %432 : vector<4x64xi1>, vector<4x64xf32>
    %434 = vector.extract_strided_slice %430 {offsets = [0, 0], sizes = [2, 32], strides = [1, 1]} : vector<4x32xf32> to vector<2x32xf32>
    %c4_110 = arith.constant 4 : index
    %c0_111 = arith.constant 0 : index
    %435 = vector.load %arg20[%c4_110, %c0_111] : memref<16x64xf32, #tpu.memory_space<vmem>>, vector<2x32xf32>
    tpu.vector_store %arg20[%c4_110, %c0_111], %434 {strides = array<i32>} : memref<16x64xf32, #tpu.memory_space<vmem>>, vector<2x32xf32>,
    %436 = vector.extract_strided_slice %430 {offsets = [2, 0], sizes = [2, 32], strides = [1, 1]} : vector<4x32xf32> to vector<2x32xf32>
    %c10_112 = arith.constant 10 : index
    %c32_113 = arith.constant 32 : index
    %437 = vector.load %arg20[%c10_112, %c32_113] : memref<16x64xf32, #tpu.memory_space<vmem>>, vector<2x32xf32>
    tpu.vector_store %arg20[%c10_112, %c32_113], %436 {strides = array<i32>} : memref<16x64xf32, #tpu.memory_space<vmem>>, vector<2x32xf32>,
    %438 = vector.extract_strided_slice %316 {offsets = [6, 0], sizes = [2, 128], strides = [1, 1]} : vector<16x256xf32> to vector<2x128xf32>
    %439 = vector.extract_strided_slice %316 {offsets = [8, 128], sizes = [2, 128], strides = [1, 1]} : vector<16x256xf32> to vector<2x128xf32>
    %440 = tpu.concatenate %438, %439 in 0 : vector<2x128xf32>, vector<2x128xf32> -> vector<4x128xf32>
    %cst_114 = arith.constant dense<0.000000e+00> : vector<4x128xf32>
    %441 = tpu.matmul %433, %313, %cst_114 {dimension_numbers = #tpu.dot_dimension_numbers<[1], [0], [0], [1], [0, 0, 1, 1], [], []>} : vector<4x64xf32>, vector<64x128xf32>, vector<4x128xf32> -> vector<4x128xf32>
    %442 = arith.addf %440, %441 : vector<4x128xf32>
    %443 = vector.extract_strided_slice %442 {offsets = [0, 0], sizes = [4, 32], strides = [1, 1]} : vector<4x128xf32> to vector<4x32xf32>
    %444 = arith.negf %443 : vector<4x32xf32>
    %445 = math.exp %444 : vector<4x32xf32>
    %cst_115 = arith.constant 1.000000e+00 : f32
    %446 = vector.broadcast %cst_115 : f32 to vector<4x32xf32>
    %447 = arith.addf %446, %445 : vector<4x32xf32>
    %448 = arith.divf %446, %447 : vector<4x32xf32>
    %449 = vector.extract_strided_slice %442 {offsets = [0, 32], sizes = [4, 32], strides = [1, 1]} : vector<4x128xf32> to vector<4x32xf32>
    %450 = arith.negf %449 : vector<4x32xf32>
    %451 = math.exp %450 : vector<4x32xf32>
    %cst_116 = arith.constant 1.000000e+00 : f32
    %452 = vector.broadcast %cst_116 : f32 to vector<4x32xf32>
    %453 = arith.addf %452, %451 : vector<4x32xf32>
    %454 = arith.divf %452, %453 : vector<4x32xf32>
    %455 = vector.extract_strided_slice %442 {offsets = [0, 64], sizes = [4, 32], strides = [1, 1]} : vector<4x128xf32> to vector<4x32xf32>
    %456 = math.tanh %455 : vector<4x32xf32>
    %457 = vector.extract_strided_slice %442 {offsets = [0, 96], sizes = [4, 32], strides = [1, 1]} : vector<4x128xf32> to vector<4x32xf32>
    %458 = arith.negf %457 : vector<4x32xf32>
    %459 = math.exp %458 : vector<4x32xf32>
    %cst_117 = arith.constant 1.000000e+00 : f32
    %460 = vector.broadcast %cst_117 : f32 to vector<4x32xf32>
    %461 = arith.addf %460, %459 : vector<4x32xf32>
    %462 = arith.divf %460, %461 : vector<4x32xf32>
    %463 = arith.mulf %454, %428 : vector<4x32xf32>
    %464 = arith.mulf %448, %456 : vector<4x32xf32>
    %465 = arith.addf %463, %464 : vector<4x32xf32>
    %466 = math.tanh %465 : vector<4x32xf32>
    %467 = arith.mulf %462, %466 : vector<4x32xf32>
    %468 = tpu.concatenate %467, %467 in 1 : vector<4x32xf32>, vector<4x32xf32> -> vector<4x64xf32>
    %cst_118 = arith.constant 0.000000e+00 : f32
    %469 = vector.broadcast %cst_118 : f32 to vector<4x64xf32>
    %470 = arith.select %324, %468, %469 : vector<4x64xi1>, vector<4x64xf32>
    %471 = vector.extract_strided_slice %467 {offsets = [0, 0], sizes = [2, 32], strides = [1, 1]} : vector<4x32xf32> to vector<2x32xf32>
    %c6_119 = arith.constant 6 : index
    %c0_120 = arith.constant 0 : index
    %472 = vector.load %arg20[%c6_119, %c0_120] : memref<16x64xf32, #tpu.memory_space<vmem>>, vector<2x32xf32>
    tpu.vector_store %arg20[%c6_119, %c0_120], %471 {strides = array<i32>} : memref<16x64xf32, #tpu.memory_space<vmem>>, vector<2x32xf32>,
    %473 = vector.extract_strided_slice %467 {offsets = [2, 0], sizes = [2, 32], strides = [1, 1]} : vector<4x32xf32> to vector<2x32xf32>
    %c8_121 = arith.constant 8 : index
    %c32_122 = arith.constant 32 : index
    %474 = vector.load %arg20[%c8_121, %c32_122] : memref<16x64xf32, #tpu.memory_space<vmem>>, vector<2x32xf32>
    tpu.vector_store %arg20[%c8_121, %c32_122], %473 {strides = array<i32>} : memref<16x64xf32, #tpu.memory_space<vmem>>, vector<2x32xf32>,
    %475 = vector.extract_strided_slice %316 {offsets = [8, 0], sizes = [2, 128], strides = [1, 1]} : vector<16x256xf32> to vector<2x128xf32>
    %476 = vector.extract_strided_slice %316 {offsets = [6, 128], sizes = [2, 128], strides = [1, 1]} : vector<16x256xf32> to vector<2x128xf32>
    %477 = tpu.concatenate %475, %476 in 0 : vector<2x128xf32>, vector<2x128xf32> -> vector<4x128xf32>
    %cst_123 = arith.constant dense<0.000000e+00> : vector<4x128xf32>
    %478 = tpu.matmul %470, %313, %cst_123 {dimension_numbers = #tpu.dot_dimension_numbers<[1], [0], [0], [1], [0, 0, 1, 1], [], []>} : vector<4x64xf32>, vector<64x128xf32>, vector<4x128xf32> -> vector<4x128xf32>
    %479 = arith.addf %477, %478 : vector<4x128xf32>
    %480 = vector.extract_strided_slice %479 {offsets = [0, 0], sizes = [4, 32], strides = [1, 1]} : vector<4x128xf32> to vector<4x32xf32>
    %481 = arith.negf %480 : vector<4x32xf32>
    %482 = math.exp %481 : vector<4x32xf32>
    %cst_124 = arith.constant 1.000000e+00 : f32
    %483 = vector.broadcast %cst_124 : f32 to vector<4x32xf32>
    %484 = arith.addf %483, %482 : vector<4x32xf32>
    %485 = arith.divf %483, %484 : vector<4x32xf32>
    %486 = vector.extract_strided_slice %479 {offsets = [0, 32], sizes = [4, 32], strides = [1, 1]} : vector<4x128xf32> to vector<4x32xf32>
    %487 = arith.negf %486 : vector<4x32xf32>
    %488 = math.exp %487 : vector<4x32xf32>
    %cst_125 = arith.constant 1.000000e+00 : f32
    %489 = vector.broadcast %cst_125 : f32 to vector<4x32xf32>
    %490 = arith.addf %489, %488 : vector<4x32xf32>
    %491 = arith.divf %489, %490 : vector<4x32xf32>
    %492 = vector.extract_strided_slice %479 {offsets = [0, 64], sizes = [4, 32], strides = [1, 1]} : vector<4x128xf32> to vector<4x32xf32>
    %493 = math.tanh %492 : vector<4x32xf32>
    %494 = vector.extract_strided_slice %479 {offsets = [0, 96], sizes = [4, 32], strides = [1, 1]} : vector<4x128xf32> to vector<4x32xf32>
    %495 = arith.negf %494 : vector<4x32xf32>
    %496 = math.exp %495 : vector<4x32xf32>
    %cst_126 = arith.constant 1.000000e+00 : f32
    %497 = vector.broadcast %cst_126 : f32 to vector<4x32xf32>
    %498 = arith.addf %497, %496 : vector<4x32xf32>
    %499 = arith.divf %497, %498 : vector<4x32xf32>
    %500 = arith.mulf %491, %465 : vector<4x32xf32>
    %501 = arith.mulf %485, %493 : vector<4x32xf32>
    %502 = arith.addf %500, %501 : vector<4x32xf32>
    %503 = math.tanh %502 : vector<4x32xf32>
    %504 = arith.mulf %499, %503 : vector<4x32xf32>
    %505 = tpu.concatenate %504, %504 in 1 : vector<4x32xf32>, vector<4x32xf32> -> vector<4x64xf32>
    %cst_127 = arith.constant 0.000000e+00 : f32
    %506 = vector.broadcast %cst_127 : f32 to vector<4x64xf32>
    %507 = arith.select %324, %505, %506 : vector<4x64xi1>, vector<4x64xf32>
    %508 = vector.extract_strided_slice %504 {offsets = [0, 0], sizes = [2, 32], strides = [1, 1]} : vector<4x32xf32> to vector<2x32xf32>
    %c8_128 = arith.constant 8 : index
    %c0_129 = arith.constant 0 : index
    %509 = vector.load %arg20[%c8_128, %c0_129] : memref<16x64xf32, #tpu.memory_space<vmem>>, vector<2x32xf32>
    tpu.vector_store %arg20[%c8_128, %c0_129], %508 {strides = array<i32>} : memref<16x64xf32, #tpu.memory_space<vmem>>, vector<2x32xf32>,
    %510 = vector.extract_strided_slice %504 {offsets = [2, 0], sizes = [2, 32], strides = [1, 1]} : vector<4x32xf32> to vector<2x32xf32>
    %c6_130 = arith.constant 6 : index
    %c32_131 = arith.constant 32 : index
    %511 = vector.load %arg20[%c6_130, %c32_131] : memref<16x64xf32, #tpu.memory_space<vmem>>, vector<2x32xf32>
    tpu.vector_store %arg20[%c6_130, %c32_131], %510 {strides = array<i32>} : memref<16x64xf32, #tpu.memory_space<vmem>>, vector<2x32xf32>,
    %512 = vector.extract_strided_slice %316 {offsets = [10, 0], sizes = [2, 128], strides = [1, 1]} : vector<16x256xf32> to vector<2x128xf32>
    %513 = vector.extract_strided_slice %316 {offsets = [4, 128], sizes = [2, 128], strides = [1, 1]} : vector<16x256xf32> to vector<2x128xf32>
    %514 = tpu.concatenate %512, %513 in 0 : vector<2x128xf32>, vector<2x128xf32> -> vector<4x128xf32>
    %cst_132 = arith.constant dense<0.000000e+00> : vector<4x128xf32>
    %515 = tpu.matmul %507, %313, %cst_132 {dimension_numbers = #tpu.dot_dimension_numbers<[1], [0], [0], [1], [0, 0, 1, 1], [], []>} : vector<4x64xf32>, vector<64x128xf32>, vector<4x128xf32> -> vector<4x128xf32>
    %516 = arith.addf %514, %515 : vector<4x128xf32>
    %517 = vector.extract_strided_slice %516 {offsets = [0, 0], sizes = [4, 32], strides = [1, 1]} : vector<4x128xf32> to vector<4x32xf32>
    %518 = arith.negf %517 : vector<4x32xf32>
    %519 = math.exp %518 : vector<4x32xf32>
    %cst_133 = arith.constant 1.000000e+00 : f32
    %520 = vector.broadcast %cst_133 : f32 to vector<4x32xf32>
    %521 = arith.addf %520, %519 : vector<4x32xf32>
    %522 = arith.divf %520, %521 : vector<4x32xf32>
    %523 = vector.extract_strided_slice %516 {offsets = [0, 32], sizes = [4, 32], strides = [1, 1]} : vector<4x128xf32> to vector<4x32xf32>
    %524 = arith.negf %523 : vector<4x32xf32>
    %525 = math.exp %524 : vector<4x32xf32>
    %cst_134 = arith.constant 1.000000e+00 : f32
    %526 = vector.broadcast %cst_134 : f32 to vector<4x32xf32>
    %527 = arith.addf %526, %525 : vector<4x32xf32>
    %528 = arith.divf %526, %527 : vector<4x32xf32>
    %529 = vector.extract_strided_slice %516 {offsets = [0, 64], sizes = [4, 32], strides = [1, 1]} : vector<4x128xf32> to vector<4x32xf32>
    %530 = math.tanh %529 : vector<4x32xf32>
    %531 = vector.extract_strided_slice %516 {offsets = [0, 96], sizes = [4, 32], strides = [1, 1]} : vector<4x128xf32> to vector<4x32xf32>
    %532 = arith.negf %531 : vector<4x32xf32>
    %533 = math.exp %532 : vector<4x32xf32>
    %cst_135 = arith.constant 1.000000e+00 : f32
    %534 = vector.broadcast %cst_135 : f32 to vector<4x32xf32>
    %535 = arith.addf %534, %533 : vector<4x32xf32>
    %536 = arith.divf %534, %535 : vector<4x32xf32>
    %537 = arith.mulf %528, %502 : vector<4x32xf32>
    %538 = arith.mulf %522, %530 : vector<4x32xf32>
    %539 = arith.addf %537, %538 : vector<4x32xf32>
    %540 = math.tanh %539 : vector<4x32xf32>
    %541 = arith.mulf %536, %540 : vector<4x32xf32>
    %542 = tpu.concatenate %541, %541 in 1 : vector<4x32xf32>, vector<4x32xf32> -> vector<4x64xf32>
    %cst_136 = arith.constant 0.000000e+00 : f32
    %543 = vector.broadcast %cst_136 : f32 to vector<4x64xf32>
    %544 = arith.select %324, %542, %543 : vector<4x64xi1>, vector<4x64xf32>
    %545 = vector.extract_strided_slice %541 {offsets = [0, 0], sizes = [2, 32], strides = [1, 1]} : vector<4x32xf32> to vector<2x32xf32>
    %c10_137 = arith.constant 10 : index
    %c0_138 = arith.constant 0 : index
    %546 = vector.load %arg20[%c10_137, %c0_138] : memref<16x64xf32, #tpu.memory_space<vmem>>, vector<2x32xf32>
    tpu.vector_store %arg20[%c10_137, %c0_138], %545 {strides = array<i32>} : memref<16x64xf32, #tpu.memory_space<vmem>>, vector<2x32xf32>,
    %547 = vector.extract_strided_slice %541 {offsets = [2, 0], sizes = [2, 32], strides = [1, 1]} : vector<4x32xf32> to vector<2x32xf32>
    %c4_139 = arith.constant 4 : index
    %c32_140 = arith.constant 32 : index
    %548 = vector.load %arg20[%c4_139, %c32_140] : memref<16x64xf32, #tpu.memory_space<vmem>>, vector<2x32xf32>
    tpu.vector_store %arg20[%c4_139, %c32_140], %547 {strides = array<i32>} : memref<16x64xf32, #tpu.memory_space<vmem>>, vector<2x32xf32>,
    %549 = vector.extract_strided_slice %316 {offsets = [12, 0], sizes = [2, 128], strides = [1, 1]} : vector<16x256xf32> to vector<2x128xf32>
    %550 = vector.extract_strided_slice %316 {offsets = [2, 128], sizes = [2, 128], strides = [1, 1]} : vector<16x256xf32> to vector<2x128xf32>
    %551 = tpu.concatenate %549, %550 in 0 : vector<2x128xf32>, vector<2x128xf32> -> vector<4x128xf32>
    %cst_141 = arith.constant dense<0.000000e+00> : vector<4x128xf32>
    %552 = tpu.matmul %544, %313, %cst_141 {dimension_numbers = #tpu.dot_dimension_numbers<[1], [0], [0], [1], [0, 0, 1, 1], [], []>} : vector<4x64xf32>, vector<64x128xf32>, vector<4x128xf32> -> vector<4x128xf32>
    %553 = arith.addf %551, %552 : vector<4x128xf32>
    %554 = vector.extract_strided_slice %553 {offsets = [0, 0], sizes = [4, 32], strides = [1, 1]} : vector<4x128xf32> to vector<4x32xf32>
    %555 = arith.negf %554 : vector<4x32xf32>
    %556 = math.exp %555 : vector<4x32xf32>
    %cst_142 = arith.constant 1.000000e+00 : f32
    %557 = vector.broadcast %cst_142 : f32 to vector<4x32xf32>
    %558 = arith.addf %557, %556 : vector<4x32xf32>
    %559 = arith.divf %557, %558 : vector<4x32xf32>
    %560 = vector.extract_strided_slice %553 {offsets = [0, 32], sizes = [4, 32], strides = [1, 1]} : vector<4x128xf32> to vector<4x32xf32>
    %561 = arith.negf %560 : vector<4x32xf32>
    %562 = math.exp %561 : vector<4x32xf32>
    %cst_143 = arith.constant 1.000000e+00 : f32
    %563 = vector.broadcast %cst_143 : f32 to vector<4x32xf32>
    %564 = arith.addf %563, %562 : vector<4x32xf32>
    %565 = arith.divf %563, %564 : vector<4x32xf32>
    %566 = vector.extract_strided_slice %553 {offsets = [0, 64], sizes = [4, 32], strides = [1, 1]} : vector<4x128xf32> to vector<4x32xf32>
    %567 = math.tanh %566 : vector<4x32xf32>
    %568 = vector.extract_strided_slice %553 {offsets = [0, 96], sizes = [4, 32], strides = [1, 1]} : vector<4x128xf32> to vector<4x32xf32>
    %569 = arith.negf %568 : vector<4x32xf32>
    %570 = math.exp %569 : vector<4x32xf32>
    %cst_144 = arith.constant 1.000000e+00 : f32
    %571 = vector.broadcast %cst_144 : f32 to vector<4x32xf32>
    %572 = arith.addf %571, %570 : vector<4x32xf32>
    %573 = arith.divf %571, %572 : vector<4x32xf32>
    %574 = arith.mulf %565, %539 : vector<4x32xf32>
    %575 = arith.mulf %559, %567 : vector<4x32xf32>
    %576 = arith.addf %574, %575 : vector<4x32xf32>
    %577 = math.tanh %576 : vector<4x32xf32>
    %578 = arith.mulf %573, %577 : vector<4x32xf32>
    %579 = tpu.concatenate %578, %578 in 1 : vector<4x32xf32>, vector<4x32xf32> -> vector<4x64xf32>
    %cst_145 = arith.constant 0.000000e+00 : f32
    %580 = vector.broadcast %cst_145 : f32 to vector<4x64xf32>
    %581 = arith.select %324, %579, %580 : vector<4x64xi1>, vector<4x64xf32>
    %582 = vector.extract_strided_slice %578 {offsets = [0, 0], sizes = [2, 32], strides = [1, 1]} : vector<4x32xf32> to vector<2x32xf32>
    %c12_146 = arith.constant 12 : index
    %c0_147 = arith.constant 0 : index
    %583 = vector.load %arg20[%c12_146, %c0_147] : memref<16x64xf32, #tpu.memory_space<vmem>>, vector<2x32xf32>
    tpu.vector_store %arg20[%c12_146, %c0_147], %582 {strides = array<i32>} : memref<16x64xf32, #tpu.memory_space<vmem>>, vector<2x32xf32>,
    %584 = vector.extract_strided_slice %578 {offsets = [2, 0], sizes = [2, 32], strides = [1, 1]} : vector<4x32xf32> to vector<2x32xf32>
    %c2_148 = arith.constant 2 : index
    %c32_149 = arith.constant 32 : index
    %585 = vector.load %arg20[%c2_148, %c32_149] : memref<16x64xf32, #tpu.memory_space<vmem>>, vector<2x32xf32>
    tpu.vector_store %arg20[%c2_148, %c32_149], %584 {strides = array<i32>} : memref<16x64xf32, #tpu.memory_space<vmem>>, vector<2x32xf32>,
    %586 = vector.extract_strided_slice %316 {offsets = [14, 0], sizes = [2, 128], strides = [1, 1]} : vector<16x256xf32> to vector<2x128xf32>
    %587 = vector.extract_strided_slice %316 {offsets = [0, 128], sizes = [2, 128], strides = [1, 1]} : vector<16x256xf32> to vector<2x128xf32>
    %588 = tpu.concatenate %586, %587 in 0 : vector<2x128xf32>, vector<2x128xf32> -> vector<4x128xf32>
    %cst_150 = arith.constant dense<0.000000e+00> : vector<4x128xf32>
    %589 = tpu.matmul %581, %313, %cst_150 {dimension_numbers = #tpu.dot_dimension_numbers<[1], [0], [0], [1], [0, 0, 1, 1], [], []>} : vector<4x64xf32>, vector<64x128xf32>, vector<4x128xf32> -> vector<4x128xf32>
    %590 = arith.addf %588, %589 : vector<4x128xf32>
    %591 = vector.extract_strided_slice %590 {offsets = [0, 0], sizes = [4, 32], strides = [1, 1]} : vector<4x128xf32> to vector<4x32xf32>
    %592 = arith.negf %591 : vector<4x32xf32>
    %593 = math.exp %592 : vector<4x32xf32>
    %cst_151 = arith.constant 1.000000e+00 : f32
    %594 = vector.broadcast %cst_151 : f32 to vector<4x32xf32>
    %595 = arith.addf %594, %593 : vector<4x32xf32>
    %596 = arith.divf %594, %595 : vector<4x32xf32>
    %597 = vector.extract_strided_slice %590 {offsets = [0, 32], sizes = [4, 32], strides = [1, 1]} : vector<4x128xf32> to vector<4x32xf32>
    %598 = arith.negf %597 : vector<4x32xf32>
    %599 = math.exp %598 : vector<4x32xf32>
    %cst_152 = arith.constant 1.000000e+00 : f32
    %600 = vector.broadcast %cst_152 : f32 to vector<4x32xf32>
    %601 = arith.addf %600, %599 : vector<4x32xf32>
    %602 = arith.divf %600, %601 : vector<4x32xf32>
    %603 = vector.extract_strided_slice %590 {offsets = [0, 64], sizes = [4, 32], strides = [1, 1]} : vector<4x128xf32> to vector<4x32xf32>
    %604 = math.tanh %603 : vector<4x32xf32>
    %605 = vector.extract_strided_slice %590 {offsets = [0, 96], sizes = [4, 32], strides = [1, 1]} : vector<4x128xf32> to vector<4x32xf32>
    %606 = arith.negf %605 : vector<4x32xf32>
    %607 = math.exp %606 : vector<4x32xf32>
    %cst_153 = arith.constant 1.000000e+00 : f32
    %608 = vector.broadcast %cst_153 : f32 to vector<4x32xf32>
    %609 = arith.addf %608, %607 : vector<4x32xf32>
    %610 = arith.divf %608, %609 : vector<4x32xf32>
    %611 = arith.mulf %602, %576 : vector<4x32xf32>
    %612 = arith.mulf %596, %604 : vector<4x32xf32>
    %613 = arith.addf %611, %612 : vector<4x32xf32>
    %614 = math.tanh %613 : vector<4x32xf32>
    %615 = arith.mulf %610, %614 : vector<4x32xf32>
    %616 = vector.extract_strided_slice %615 {offsets = [0, 0], sizes = [2, 32], strides = [1, 1]} : vector<4x32xf32> to vector<2x32xf32>
    %c14_154 = arith.constant 14 : index
    %c0_155 = arith.constant 0 : index
    %617 = vector.load %arg20[%c14_154, %c0_155] : memref<16x64xf32, #tpu.memory_space<vmem>>, vector<2x32xf32>
    tpu.vector_store %arg20[%c14_154, %c0_155], %616 {strides = array<i32>} : memref<16x64xf32, #tpu.memory_space<vmem>>, vector<2x32xf32>,
    %618 = vector.extract_strided_slice %615 {offsets = [2, 0], sizes = [2, 32], strides = [1, 1]} : vector<4x32xf32> to vector<2x32xf32>
    %c0_156 = arith.constant 0 : index
    %c32_157 = arith.constant 32 : index
    %619 = vector.load %arg20[%c0_156, %c32_157] : memref<16x64xf32, #tpu.memory_space<vmem>>, vector<2x32xf32>
    tpu.vector_store %arg20[%c0_156, %c32_157], %618 {strides = array<i32>} : memref<16x64xf32, #tpu.memory_space<vmem>>, vector<2x32xf32>,
    %c0_158 = arith.constant 0 : index
    %c0_159 = arith.constant 0 : index
    %620 = vector.load %arg20[%c0_158, %c0_159] : memref<16x64xf32, #tpu.memory_space<vmem>>, vector<16x64xf32>
    %c0_160 = arith.constant 0 : index
    %c0_161 = arith.constant 0 : index
    %621 = vector.load %arg7[%c0_160, %c0_161] : memref<64x128xf32, #tpu.memory_space<vmem>>, vector<64x128xf32>
    %c0_162 = arith.constant 0 : index
    %c0_163 = arith.constant 0 : index
    %622 = vector.load %arg8[%c0_162, %c0_163] : memref<1x128xf32, #tpu.memory_space<vmem>>, vector<1x128xf32>
    %c0_164 = arith.constant 0 : index
    %c0_165 = arith.constant 0 : index
    %623 = vector.load %arg9[%c0_164, %c0_165] : memref<32x128xf32, #tpu.memory_space<vmem>>, vector<32x128xf32>
    %cst_166 = arith.constant dense<0.000000e+00> : vector<16x128xf32>
    %624 = tpu.matmul %620, %621, %cst_166 {dimension_numbers = #tpu.dot_dimension_numbers<[1], [0], [0], [1], [0, 0, 1, 1], [], []>} : vector<16x64xf32>, vector<64x128xf32>, vector<16x128xf32> -> vector<16x128xf32>
    %625 = vector.broadcast %622 : vector<1x128xf32> to vector<16x128xf32>
    %626 = arith.addf %624, %625 : vector<16x128xf32>
    %cst_167 = arith.constant 0.000000e+00 : f32
    %627 = vector.broadcast %cst_167 : f32 to vector<2x32xf32>
    %cst_168 = arith.constant 0.000000e+00 : f32
    %628 = vector.broadcast %cst_168 : f32 to vector<2x32xf32>
    %629 = vector.extract_strided_slice %626 {offsets = [0, 0], sizes = [2, 128], strides = [1, 1]} : vector<16x128xf32> to vector<2x128xf32>
    %cst_169 = arith.constant dense<0.000000e+00> : vector<2x128xf32>
    %630 = tpu.matmul %627, %623, %cst_169 {dimension_numbers = #tpu.dot_dimension_numbers<[1], [0], [0], [1], [0, 0, 1, 1], [], []>} : vector<2x32xf32>, vector<32x128xf32>, vector<2x128xf32> -> vector<2x128xf32>
    %631 = arith.addf %629, %630 : vector<2x128xf32>
    %632 = vector.extract_strided_slice %631 {offsets = [0, 0], sizes = [2, 32], strides = [1, 1]} : vector<2x128xf32> to vector<2x32xf32>
    %633 = arith.negf %632 : vector<2x32xf32>
    %634 = math.exp %633 : vector<2x32xf32>
    %cst_170 = arith.constant 1.000000e+00 : f32
    %635 = vector.broadcast %cst_170 : f32 to vector<2x32xf32>
    %636 = arith.addf %635, %634 : vector<2x32xf32>
    %637 = arith.divf %635, %636 : vector<2x32xf32>
    %638 = vector.extract_strided_slice %631 {offsets = [0, 32], sizes = [2, 32], strides = [1, 1]} : vector<2x128xf32> to vector<2x32xf32>
    %639 = arith.negf %638 : vector<2x32xf32>
    %640 = math.exp %639 : vector<2x32xf32>
    %cst_171 = arith.constant 1.000000e+00 : f32
    %641 = vector.broadcast %cst_171 : f32 to vector<2x32xf32>
    %642 = arith.addf %641, %640 : vector<2x32xf32>
    %643 = arith.divf %641, %642 : vector<2x32xf32>
    %644 = vector.extract_strided_slice %631 {offsets = [0, 64], sizes = [2, 32], strides = [1, 1]} : vector<2x128xf32> to vector<2x32xf32>
    %645 = math.tanh %644 : vector<2x32xf32>
    %646 = vector.extract_strided_slice %631 {offsets = [0, 96], sizes = [2, 32], strides = [1, 1]} : vector<2x128xf32> to vector<2x32xf32>
    %647 = arith.negf %646 : vector<2x32xf32>
    %648 = math.exp %647 : vector<2x32xf32>
    %cst_172 = arith.constant 1.000000e+00 : f32
    %649 = vector.broadcast %cst_172 : f32 to vector<2x32xf32>
    %650 = arith.addf %649, %648 : vector<2x32xf32>
    %651 = arith.divf %649, %650 : vector<2x32xf32>
    %652 = arith.mulf %643, %628 : vector<2x32xf32>
    %653 = arith.mulf %637, %645 : vector<2x32xf32>
    %654 = arith.addf %652, %653 : vector<2x32xf32>
    %655 = math.tanh %654 : vector<2x32xf32>
    %656 = arith.mulf %651, %655 : vector<2x32xf32>
    %c0_173 = arith.constant 0 : index
    %c0_174 = arith.constant 0 : index
    %657 = vector.load %arg21[%c0_173, %c0_174] : memref<16x32xf32, #tpu.memory_space<vmem>>, vector<2x32xf32>
    tpu.vector_store %arg21[%c0_173, %c0_174], %656 {strides = array<i32>} : memref<16x32xf32, #tpu.memory_space<vmem>>, vector<2x32xf32>,
    %658 = vector.extract_strided_slice %626 {offsets = [2, 0], sizes = [2, 128], strides = [1, 1]} : vector<16x128xf32> to vector<2x128xf32>
    %cst_175 = arith.constant dense<0.000000e+00> : vector<2x128xf32>
    %659 = tpu.matmul %656, %623, %cst_175 {dimension_numbers = #tpu.dot_dimension_numbers<[1], [0], [0], [1], [0, 0, 1, 1], [], []>} : vector<2x32xf32>, vector<32x128xf32>, vector<2x128xf32> -> vector<2x128xf32>
    %660 = arith.addf %658, %659 : vector<2x128xf32>
    %661 = vector.extract_strided_slice %660 {offsets = [0, 0], sizes = [2, 32], strides = [1, 1]} : vector<2x128xf32> to vector<2x32xf32>
    %662 = arith.negf %661 : vector<2x32xf32>
    %663 = math.exp %662 : vector<2x32xf32>
    %cst_176 = arith.constant 1.000000e+00 : f32
    %664 = vector.broadcast %cst_176 : f32 to vector<2x32xf32>
    %665 = arith.addf %664, %663 : vector<2x32xf32>
    %666 = arith.divf %664, %665 : vector<2x32xf32>
    %667 = vector.extract_strided_slice %660 {offsets = [0, 32], sizes = [2, 32], strides = [1, 1]} : vector<2x128xf32> to vector<2x32xf32>
    %668 = arith.negf %667 : vector<2x32xf32>
    %669 = math.exp %668 : vector<2x32xf32>
    %cst_177 = arith.constant 1.000000e+00 : f32
    %670 = vector.broadcast %cst_177 : f32 to vector<2x32xf32>
    %671 = arith.addf %670, %669 : vector<2x32xf32>
    %672 = arith.divf %670, %671 : vector<2x32xf32>
    %673 = vector.extract_strided_slice %660 {offsets = [0, 64], sizes = [2, 32], strides = [1, 1]} : vector<2x128xf32> to vector<2x32xf32>
    %674 = math.tanh %673 : vector<2x32xf32>
    %675 = vector.extract_strided_slice %660 {offsets = [0, 96], sizes = [2, 32], strides = [1, 1]} : vector<2x128xf32> to vector<2x32xf32>
    %676 = arith.negf %675 : vector<2x32xf32>
    %677 = math.exp %676 : vector<2x32xf32>
    %cst_178 = arith.constant 1.000000e+00 : f32
    %678 = vector.broadcast %cst_178 : f32 to vector<2x32xf32>
    %679 = arith.addf %678, %677 : vector<2x32xf32>
    %680 = arith.divf %678, %679 : vector<2x32xf32>
    %681 = arith.mulf %672, %654 : vector<2x32xf32>
    %682 = arith.mulf %666, %674 : vector<2x32xf32>
    %683 = arith.addf %681, %682 : vector<2x32xf32>
    %684 = math.tanh %683 : vector<2x32xf32>
    %685 = arith.mulf %680, %684 : vector<2x32xf32>
    %c2_179 = arith.constant 2 : index
    %c0_180 = arith.constant 0 : index
    %686 = vector.load %arg21[%c2_179, %c0_180] : memref<16x32xf32, #tpu.memory_space<vmem>>, vector<2x32xf32>
    tpu.vector_store %arg21[%c2_179, %c0_180], %685 {strides = array<i32>} : memref<16x32xf32, #tpu.memory_space<vmem>>, vector<2x32xf32>,
    %687 = vector.extract_strided_slice %626 {offsets = [4, 0], sizes = [2, 128], strides = [1, 1]} : vector<16x128xf32> to vector<2x128xf32>
    %cst_181 = arith.constant dense<0.000000e+00> : vector<2x128xf32>
    %688 = tpu.matmul %685, %623, %cst_181 {dimension_numbers = #tpu.dot_dimension_numbers<[1], [0], [0], [1], [0, 0, 1, 1], [], []>} : vector<2x32xf32>, vector<32x128xf32>, vector<2x128xf32> -> vector<2x128xf32>
    %689 = arith.addf %687, %688 : vector<2x128xf32>
    %690 = vector.extract_strided_slice %689 {offsets = [0, 0], sizes = [2, 32], strides = [1, 1]} : vector<2x128xf32> to vector<2x32xf32>
    %691 = arith.negf %690 : vector<2x32xf32>
    %692 = math.exp %691 : vector<2x32xf32>
    %cst_182 = arith.constant 1.000000e+00 : f32
    %693 = vector.broadcast %cst_182 : f32 to vector<2x32xf32>
    %694 = arith.addf %693, %692 : vector<2x32xf32>
    %695 = arith.divf %693, %694 : vector<2x32xf32>
    %696 = vector.extract_strided_slice %689 {offsets = [0, 32], sizes = [2, 32], strides = [1, 1]} : vector<2x128xf32> to vector<2x32xf32>
    %697 = arith.negf %696 : vector<2x32xf32>
    %698 = math.exp %697 : vector<2x32xf32>
    %cst_183 = arith.constant 1.000000e+00 : f32
    %699 = vector.broadcast %cst_183 : f32 to vector<2x32xf32>
    %700 = arith.addf %699, %698 : vector<2x32xf32>
    %701 = arith.divf %699, %700 : vector<2x32xf32>
    %702 = vector.extract_strided_slice %689 {offsets = [0, 64], sizes = [2, 32], strides = [1, 1]} : vector<2x128xf32> to vector<2x32xf32>
    %703 = math.tanh %702 : vector<2x32xf32>
    %704 = vector.extract_strided_slice %689 {offsets = [0, 96], sizes = [2, 32], strides = [1, 1]} : vector<2x128xf32> to vector<2x32xf32>
    %705 = arith.negf %704 : vector<2x32xf32>
    %706 = math.exp %705 : vector<2x32xf32>
    %cst_184 = arith.constant 1.000000e+00 : f32
    %707 = vector.broadcast %cst_184 : f32 to vector<2x32xf32>
    %708 = arith.addf %707, %706 : vector<2x32xf32>
    %709 = arith.divf %707, %708 : vector<2x32xf32>
    %710 = arith.mulf %701, %683 : vector<2x32xf32>
    %711 = arith.mulf %695, %703 : vector<2x32xf32>
    %712 = arith.addf %710, %711 : vector<2x32xf32>
    %713 = math.tanh %712 : vector<2x32xf32>
    %714 = arith.mulf %709, %713 : vector<2x32xf32>
    %c4_185 = arith.constant 4 : index
    %c0_186 = arith.constant 0 : index
    %715 = vector.load %arg21[%c4_185, %c0_186] : memref<16x32xf32, #tpu.memory_space<vmem>>, vector<2x32xf32>
    tpu.vector_store %arg21[%c4_185, %c0_186], %714 {strides = array<i32>} : memref<16x32xf32, #tpu.memory_space<vmem>>, vector<2x32xf32>,
    %716 = vector.extract_strided_slice %626 {offsets = [6, 0], sizes = [2, 128], strides = [1, 1]} : vector<16x128xf32> to vector<2x128xf32>
    %cst_187 = arith.constant dense<0.000000e+00> : vector<2x128xf32>
    %717 = tpu.matmul %714, %623, %cst_187 {dimension_numbers = #tpu.dot_dimension_numbers<[1], [0], [0], [1], [0, 0, 1, 1], [], []>} : vector<2x32xf32>, vector<32x128xf32>, vector<2x128xf32> -> vector<2x128xf32>
    %718 = arith.addf %716, %717 : vector<2x128xf32>
    %719 = vector.extract_strided_slice %718 {offsets = [0, 0], sizes = [2, 32], strides = [1, 1]} : vector<2x128xf32> to vector<2x32xf32>
    %720 = arith.negf %719 : vector<2x32xf32>
    %721 = math.exp %720 : vector<2x32xf32>
    %cst_188 = arith.constant 1.000000e+00 : f32
    %722 = vector.broadcast %cst_188 : f32 to vector<2x32xf32>
    %723 = arith.addf %722, %721 : vector<2x32xf32>
    %724 = arith.divf %722, %723 : vector<2x32xf32>
    %725 = vector.extract_strided_slice %718 {offsets = [0, 32], sizes = [2, 32], strides = [1, 1]} : vector<2x128xf32> to vector<2x32xf32>
    %726 = arith.negf %725 : vector<2x32xf32>
    %727 = math.exp %726 : vector<2x32xf32>
    %cst_189 = arith.constant 1.000000e+00 : f32
    %728 = vector.broadcast %cst_189 : f32 to vector<2x32xf32>
    %729 = arith.addf %728, %727 : vector<2x32xf32>
    %730 = arith.divf %728, %729 : vector<2x32xf32>
    %731 = vector.extract_strided_slice %718 {offsets = [0, 64], sizes = [2, 32], strides = [1, 1]} : vector<2x128xf32> to vector<2x32xf32>
    %732 = math.tanh %731 : vector<2x32xf32>
    %733 = vector.extract_strided_slice %718 {offsets = [0, 96], sizes = [2, 32], strides = [1, 1]} : vector<2x128xf32> to vector<2x32xf32>
    %734 = arith.negf %733 : vector<2x32xf32>
    %735 = math.exp %734 : vector<2x32xf32>
    %cst_190 = arith.constant 1.000000e+00 : f32
    %736 = vector.broadcast %cst_190 : f32 to vector<2x32xf32>
    %737 = arith.addf %736, %735 : vector<2x32xf32>
    %738 = arith.divf %736, %737 : vector<2x32xf32>
    %739 = arith.mulf %730, %712 : vector<2x32xf32>
    %740 = arith.mulf %724, %732 : vector<2x32xf32>
    %741 = arith.addf %739, %740 : vector<2x32xf32>
    %742 = math.tanh %741 : vector<2x32xf32>
    %743 = arith.mulf %738, %742 : vector<2x32xf32>
    %c6_191 = arith.constant 6 : index
    %c0_192 = arith.constant 0 : index
    %744 = vector.load %arg21[%c6_191, %c0_192] : memref<16x32xf32, #tpu.memory_space<vmem>>, vector<2x32xf32>
    tpu.vector_store %arg21[%c6_191, %c0_192], %743 {strides = array<i32>} : memref<16x32xf32, #tpu.memory_space<vmem>>, vector<2x32xf32>,
    %745 = vector.extract_strided_slice %626 {offsets = [8, 0], sizes = [2, 128], strides = [1, 1]} : vector<16x128xf32> to vector<2x128xf32>
    %cst_193 = arith.constant dense<0.000000e+00> : vector<2x128xf32>
    %746 = tpu.matmul %743, %623, %cst_193 {dimension_numbers = #tpu.dot_dimension_numbers<[1], [0], [0], [1], [0, 0, 1, 1], [], []>} : vector<2x32xf32>, vector<32x128xf32>, vector<2x128xf32> -> vector<2x128xf32>
    %747 = arith.addf %745, %746 : vector<2x128xf32>
    %748 = vector.extract_strided_slice %747 {offsets = [0, 0], sizes = [2, 32], strides = [1, 1]} : vector<2x128xf32> to vector<2x32xf32>
    %749 = arith.negf %748 : vector<2x32xf32>
    %750 = math.exp %749 : vector<2x32xf32>
    %cst_194 = arith.constant 1.000000e+00 : f32
    %751 = vector.broadcast %cst_194 : f32 to vector<2x32xf32>
    %752 = arith.addf %751, %750 : vector<2x32xf32>
    %753 = arith.divf %751, %752 : vector<2x32xf32>
    %754 = vector.extract_strided_slice %747 {offsets = [0, 32], sizes = [2, 32], strides = [1, 1]} : vector<2x128xf32> to vector<2x32xf32>
    %755 = arith.negf %754 : vector<2x32xf32>
    %756 = math.exp %755 : vector<2x32xf32>
    %cst_195 = arith.constant 1.000000e+00 : f32
    %757 = vector.broadcast %cst_195 : f32 to vector<2x32xf32>
    %758 = arith.addf %757, %756 : vector<2x32xf32>
    %759 = arith.divf %757, %758 : vector<2x32xf32>
    %760 = vector.extract_strided_slice %747 {offsets = [0, 64], sizes = [2, 32], strides = [1, 1]} : vector<2x128xf32> to vector<2x32xf32>
    %761 = math.tanh %760 : vector<2x32xf32>
    %762 = vector.extract_strided_slice %747 {offsets = [0, 96], sizes = [2, 32], strides = [1, 1]} : vector<2x128xf32> to vector<2x32xf32>
    %763 = arith.negf %762 : vector<2x32xf32>
    %764 = math.exp %763 : vector<2x32xf32>
    %cst_196 = arith.constant 1.000000e+00 : f32
    %765 = vector.broadcast %cst_196 : f32 to vector<2x32xf32>
    %766 = arith.addf %765, %764 : vector<2x32xf32>
    %767 = arith.divf %765, %766 : vector<2x32xf32>
    %768 = arith.mulf %759, %741 : vector<2x32xf32>
    %769 = arith.mulf %753, %761 : vector<2x32xf32>
    %770 = arith.addf %768, %769 : vector<2x32xf32>
    %771 = math.tanh %770 : vector<2x32xf32>
    %772 = arith.mulf %767, %771 : vector<2x32xf32>
    %c8_197 = arith.constant 8 : index
    %c0_198 = arith.constant 0 : index
    %773 = vector.load %arg21[%c8_197, %c0_198] : memref<16x32xf32, #tpu.memory_space<vmem>>, vector<2x32xf32>
    tpu.vector_store %arg21[%c8_197, %c0_198], %772 {strides = array<i32>} : memref<16x32xf32, #tpu.memory_space<vmem>>, vector<2x32xf32>,
    %774 = vector.extract_strided_slice %626 {offsets = [10, 0], sizes = [2, 128], strides = [1, 1]} : vector<16x128xf32> to vector<2x128xf32>
    %cst_199 = arith.constant dense<0.000000e+00> : vector<2x128xf32>
    %775 = tpu.matmul %772, %623, %cst_199 {dimension_numbers = #tpu.dot_dimension_numbers<[1], [0], [0], [1], [0, 0, 1, 1], [], []>} : vector<2x32xf32>, vector<32x128xf32>, vector<2x128xf32> -> vector<2x128xf32>
    %776 = arith.addf %774, %775 : vector<2x128xf32>
    %777 = vector.extract_strided_slice %776 {offsets = [0, 0], sizes = [2, 32], strides = [1, 1]} : vector<2x128xf32> to vector<2x32xf32>
    %778 = arith.negf %777 : vector<2x32xf32>
    %779 = math.exp %778 : vector<2x32xf32>
    %cst_200 = arith.constant 1.000000e+00 : f32
    %780 = vector.broadcast %cst_200 : f32 to vector<2x32xf32>
    %781 = arith.addf %780, %779 : vector<2x32xf32>
    %782 = arith.divf %780, %781 : vector<2x32xf32>
    %783 = vector.extract_strided_slice %776 {offsets = [0, 32], sizes = [2, 32], strides = [1, 1]} : vector<2x128xf32> to vector<2x32xf32>
    %784 = arith.negf %783 : vector<2x32xf32>
    %785 = math.exp %784 : vector<2x32xf32>
    %cst_201 = arith.constant 1.000000e+00 : f32
    %786 = vector.broadcast %cst_201 : f32 to vector<2x32xf32>
    %787 = arith.addf %786, %785 : vector<2x32xf32>
    %788 = arith.divf %786, %787 : vector<2x32xf32>
    %789 = vector.extract_strided_slice %776 {offsets = [0, 64], sizes = [2, 32], strides = [1, 1]} : vector<2x128xf32> to vector<2x32xf32>
    %790 = math.tanh %789 : vector<2x32xf32>
    %791 = vector.extract_strided_slice %776 {offsets = [0, 96], sizes = [2, 32], strides = [1, 1]} : vector<2x128xf32> to vector<2x32xf32>
    %792 = arith.negf %791 : vector<2x32xf32>
    %793 = math.exp %792 : vector<2x32xf32>
    %cst_202 = arith.constant 1.000000e+00 : f32
    %794 = vector.broadcast %cst_202 : f32 to vector<2x32xf32>
    %795 = arith.addf %794, %793 : vector<2x32xf32>
    %796 = arith.divf %794, %795 : vector<2x32xf32>
    %797 = arith.mulf %788, %770 : vector<2x32xf32>
    %798 = arith.mulf %782, %790 : vector<2x32xf32>
    %799 = arith.addf %797, %798 : vector<2x32xf32>
    %800 = math.tanh %799 : vector<2x32xf32>
    %801 = arith.mulf %796, %800 : vector<2x32xf32>
    %c10_203 = arith.constant 10 : index
    %c0_204 = arith.constant 0 : index
    %802 = vector.load %arg21[%c10_203, %c0_204] : memref<16x32xf32, #tpu.memory_space<vmem>>, vector<2x32xf32>
    tpu.vector_store %arg21[%c10_203, %c0_204], %801 {strides = array<i32>} : memref<16x32xf32, #tpu.memory_space<vmem>>, vector<2x32xf32>,
    %803 = vector.extract_strided_slice %626 {offsets = [12, 0], sizes = [2, 128], strides = [1, 1]} : vector<16x128xf32> to vector<2x128xf32>
    %cst_205 = arith.constant dense<0.000000e+00> : vector<2x128xf32>
    %804 = tpu.matmul %801, %623, %cst_205 {dimension_numbers = #tpu.dot_dimension_numbers<[1], [0], [0], [1], [0, 0, 1, 1], [], []>} : vector<2x32xf32>, vector<32x128xf32>, vector<2x128xf32> -> vector<2x128xf32>
    %805 = arith.addf %803, %804 : vector<2x128xf32>
    %806 = vector.extract_strided_slice %805 {offsets = [0, 0], sizes = [2, 32], strides = [1, 1]} : vector<2x128xf32> to vector<2x32xf32>
    %807 = arith.negf %806 : vector<2x32xf32>
    %808 = math.exp %807 : vector<2x32xf32>
    %cst_206 = arith.constant 1.000000e+00 : f32
    %809 = vector.broadcast %cst_206 : f32 to vector<2x32xf32>
    %810 = arith.addf %809, %808 : vector<2x32xf32>
    %811 = arith.divf %809, %810 : vector<2x32xf32>
    %812 = vector.extract_strided_slice %805 {offsets = [0, 32], sizes = [2, 32], strides = [1, 1]} : vector<2x128xf32> to vector<2x32xf32>
    %813 = arith.negf %812 : vector<2x32xf32>
    %814 = math.exp %813 : vector<2x32xf32>
    %cst_207 = arith.constant 1.000000e+00 : f32
    %815 = vector.broadcast %cst_207 : f32 to vector<2x32xf32>
    %816 = arith.addf %815, %814 : vector<2x32xf32>
    %817 = arith.divf %815, %816 : vector<2x32xf32>
    %818 = vector.extract_strided_slice %805 {offsets = [0, 64], sizes = [2, 32], strides = [1, 1]} : vector<2x128xf32> to vector<2x32xf32>
    %819 = math.tanh %818 : vector<2x32xf32>
    %820 = vector.extract_strided_slice %805 {offsets = [0, 96], sizes = [2, 32], strides = [1, 1]} : vector<2x128xf32> to vector<2x32xf32>
    %821 = arith.negf %820 : vector<2x32xf32>
    %822 = math.exp %821 : vector<2x32xf32>
    %cst_208 = arith.constant 1.000000e+00 : f32
    %823 = vector.broadcast %cst_208 : f32 to vector<2x32xf32>
    %824 = arith.addf %823, %822 : vector<2x32xf32>
    %825 = arith.divf %823, %824 : vector<2x32xf32>
    %826 = arith.mulf %817, %799 : vector<2x32xf32>
    %827 = arith.mulf %811, %819 : vector<2x32xf32>
    %828 = arith.addf %826, %827 : vector<2x32xf32>
    %829 = math.tanh %828 : vector<2x32xf32>
    %830 = arith.mulf %825, %829 : vector<2x32xf32>
    %c12_209 = arith.constant 12 : index
    %c0_210 = arith.constant 0 : index
    %831 = vector.load %arg21[%c12_209, %c0_210] : memref<16x32xf32, #tpu.memory_space<vmem>>, vector<2x32xf32>
    tpu.vector_store %arg21[%c12_209, %c0_210], %830 {strides = array<i32>} : memref<16x32xf32, #tpu.memory_space<vmem>>, vector<2x32xf32>,
    %832 = vector.extract_strided_slice %626 {offsets = [14, 0], sizes = [2, 128], strides = [1, 1]} : vector<16x128xf32> to vector<2x128xf32>
    %cst_211 = arith.constant dense<0.000000e+00> : vector<2x128xf32>
    %833 = tpu.matmul %830, %623, %cst_211 {dimension_numbers = #tpu.dot_dimension_numbers<[1], [0], [0], [1], [0, 0, 1, 1], [], []>} : vector<2x32xf32>, vector<32x128xf32>, vector<2x128xf32> -> vector<2x128xf32>
    %834 = arith.addf %832, %833 : vector<2x128xf32>
    %835 = vector.extract_strided_slice %834 {offsets = [0, 0], sizes = [2, 32], strides = [1, 1]} : vector<2x128xf32> to vector<2x32xf32>
    %836 = arith.negf %835 : vector<2x32xf32>
    %837 = math.exp %836 : vector<2x32xf32>
    %cst_212 = arith.constant 1.000000e+00 : f32
    %838 = vector.broadcast %cst_212 : f32 to vector<2x32xf32>
    %839 = arith.addf %838, %837 : vector<2x32xf32>
    %840 = arith.divf %838, %839 : vector<2x32xf32>
    %841 = vector.extract_strided_slice %834 {offsets = [0, 32], sizes = [2, 32], strides = [1, 1]} : vector<2x128xf32> to vector<2x32xf32>
    %842 = arith.negf %841 : vector<2x32xf32>
    %843 = math.exp %842 : vector<2x32xf32>
    %cst_213 = arith.constant 1.000000e+00 : f32
    %844 = vector.broadcast %cst_213 : f32 to vector<2x32xf32>
    %845 = arith.addf %844, %843 : vector<2x32xf32>
    %846 = arith.divf %844, %845 : vector<2x32xf32>
    %847 = vector.extract_strided_slice %834 {offsets = [0, 64], sizes = [2, 32], strides = [1, 1]} : vector<2x128xf32> to vector<2x32xf32>
    %848 = math.tanh %847 : vector<2x32xf32>
    %849 = vector.extract_strided_slice %834 {offsets = [0, 96], sizes = [2, 32], strides = [1, 1]} : vector<2x128xf32> to vector<2x32xf32>
    %850 = arith.negf %849 : vector<2x32xf32>
    %851 = math.exp %850 : vector<2x32xf32>
    %cst_214 = arith.constant 1.000000e+00 : f32
    %852 = vector.broadcast %cst_214 : f32 to vector<2x32xf32>
    %853 = arith.addf %852, %851 : vector<2x32xf32>
    %854 = arith.divf %852, %853 : vector<2x32xf32>
    %855 = arith.mulf %846, %828 : vector<2x32xf32>
    %856 = arith.mulf %840, %848 : vector<2x32xf32>
    %857 = arith.addf %855, %856 : vector<2x32xf32>
    %858 = math.tanh %857 : vector<2x32xf32>
    %859 = arith.mulf %854, %858 : vector<2x32xf32>
    %c14_215 = arith.constant 14 : index
    %c0_216 = arith.constant 0 : index
    %860 = vector.load %arg21[%c14_215, %c0_216] : memref<16x32xf32, #tpu.memory_space<vmem>>, vector<2x32xf32>
    tpu.vector_store %arg21[%c14_215, %c0_216], %859 {strides = array<i32>} : memref<16x32xf32, #tpu.memory_space<vmem>>, vector<2x32xf32>,
    %c0_217 = arith.constant 0 : index
    %c0_218 = arith.constant 0 : index
    %861 = vector.load %arg21[%c0_217, %c0_218] : memref<16x32xf32, #tpu.memory_space<vmem>>, vector<16x32xf32>
    %c0_219 = arith.constant 0 : index
    %c0_220 = arith.constant 0 : index
    %862 = vector.load %arg10[%c0_219, %c0_220] : memref<32x256xf32, #tpu.memory_space<vmem>>, vector<32x256xf32>
    %c0_221 = arith.constant 0 : index
    %c0_222 = arith.constant 0 : index
    %863 = vector.load %arg11[%c0_221, %c0_222] : memref<1x256xf32, #tpu.memory_space<vmem>>, vector<1x256xf32>
    %c0_223 = arith.constant 0 : index
    %c0_224 = arith.constant 0 : index
    %864 = vector.load %arg12[%c0_223, %c0_224] : memref<64x128xf32, #tpu.memory_space<vmem>>, vector<64x128xf32>
    %cst_225 = arith.constant dense<0.000000e+00> : vector<16x256xf32>
    %865 = tpu.matmul %861, %862, %cst_225 {dimension_numbers = #tpu.dot_dimension_numbers<[1], [0], [0], [1], [0, 0, 1, 1], [], []>} : vector<16x32xf32>, vector<32x256xf32>, vector<16x256xf32> -> vector<16x256xf32>
    %866 = vector.broadcast %863 : vector<1x256xf32> to vector<16x256xf32>
    %867 = arith.addf %865, %866 : vector<16x256xf32>
    %868 = tpu.iota {dimensions = array<i32: 0>} : vector<4x64xi32>
    %869 = tpu.iota {dimensions = array<i32: 1>} : vector<4x64xi32>
    %c2_i32_226 = arith.constant 2 : i32
    %870 = vector.broadcast %c2_i32_226 : i32 to vector<4x64xi32>
    %871 = arith.cmpi slt, %868, %870 : vector<4x64xi32>
    %c32_i32_227 = arith.constant 32 : i32
    %872 = vector.broadcast %c32_i32_227 : i32 to vector<4x64xi32>
    %873 = arith.cmpi slt, %869, %872 : vector<4x64xi32>
    %874 = arith.xori %871, %873 : vector<4x64xi1>
    %cst_228 = arith.constant dense<true> : vector<4x64xi1>
    %875 = arith.xori %874, %cst_228 : vector<4x64xi1>
    %cst_229 = arith.constant 0.000000e+00 : f32
    %876 = vector.broadcast %cst_229 : f32 to vector<4x64xf32>
    %cst_230 = arith.constant 0.000000e+00 : f32
    %877 = vector.broadcast %cst_230 : f32 to vector<4x32xf32>
    %878 = vector.extract_strided_slice %867 {offsets = [0, 0], sizes = [2, 128], strides = [1, 1]} : vector<16x256xf32> to vector<2x128xf32>
    %879 = vector.extract_strided_slice %867 {offsets = [14, 128], sizes = [2, 128], strides = [1, 1]} : vector<16x256xf32> to vector<2x128xf32>
    %880 = tpu.concatenate %878, %879 in 0 : vector<2x128xf32>, vector<2x128xf32> -> vector<4x128xf32>
    %cst_231 = arith.constant dense<0.000000e+00> : vector<4x128xf32>
    %881 = tpu.matmul %876, %864, %cst_231 {dimension_numbers = #tpu.dot_dimension_numbers<[1], [0], [0], [1], [0, 0, 1, 1], [], []>} : vector<4x64xf32>, vector<64x128xf32>, vector<4x128xf32> -> vector<4x128xf32>
    %882 = arith.addf %880, %881 : vector<4x128xf32>
    %883 = vector.extract_strided_slice %882 {offsets = [0, 0], sizes = [4, 32], strides = [1, 1]} : vector<4x128xf32> to vector<4x32xf32>
    %884 = arith.negf %883 : vector<4x32xf32>
    %885 = math.exp %884 : vector<4x32xf32>
    %cst_232 = arith.constant 1.000000e+00 : f32
    %886 = vector.broadcast %cst_232 : f32 to vector<4x32xf32>
    %887 = arith.addf %886, %885 : vector<4x32xf32>
    %888 = arith.divf %886, %887 : vector<4x32xf32>
    %889 = vector.extract_strided_slice %882 {offsets = [0, 32], sizes = [4, 32], strides = [1, 1]} : vector<4x128xf32> to vector<4x32xf32>
    %890 = arith.negf %889 : vector<4x32xf32>
    %891 = math.exp %890 : vector<4x32xf32>
    %cst_233 = arith.constant 1.000000e+00 : f32
    %892 = vector.broadcast %cst_233 : f32 to vector<4x32xf32>
    %893 = arith.addf %892, %891 : vector<4x32xf32>
    %894 = arith.divf %892, %893 : vector<4x32xf32>
    %895 = vector.extract_strided_slice %882 {offsets = [0, 64], sizes = [4, 32], strides = [1, 1]} : vector<4x128xf32> to vector<4x32xf32>
    %896 = math.tanh %895 : vector<4x32xf32>
    %897 = vector.extract_strided_slice %882 {offsets = [0, 96], sizes = [4, 32], strides = [1, 1]} : vector<4x128xf32> to vector<4x32xf32>
    %898 = arith.negf %897 : vector<4x32xf32>
    %899 = math.exp %898 : vector<4x32xf32>
    %cst_234 = arith.constant 1.000000e+00 : f32
    %900 = vector.broadcast %cst_234 : f32 to vector<4x32xf32>
    %901 = arith.addf %900, %899 : vector<4x32xf32>
    %902 = arith.divf %900, %901 : vector<4x32xf32>
    %903 = arith.mulf %894, %877 : vector<4x32xf32>
    %904 = arith.mulf %888, %896 : vector<4x32xf32>
    %905 = arith.addf %903, %904 : vector<4x32xf32>
    %906 = math.tanh %905 : vector<4x32xf32>
    %907 = arith.mulf %902, %906 : vector<4x32xf32>
    %908 = tpu.concatenate %907, %907 in 1 : vector<4x32xf32>, vector<4x32xf32> -> vector<4x64xf32>
    %cst_235 = arith.constant 0.000000e+00 : f32
    %909 = vector.broadcast %cst_235 : f32 to vector<4x64xf32>
    %910 = arith.select %875, %908, %909 : vector<4x64xi1>, vector<4x64xf32>
    %911 = vector.extract_strided_slice %907 {offsets = [0, 0], sizes = [2, 32], strides = [1, 1]} : vector<4x32xf32> to vector<2x32xf32>
    %c0_236 = arith.constant 0 : index
    %c0_237 = arith.constant 0 : index
    %912 = vector.load %arg19[%c0_236, %c0_237] : memref<16x64xf32, #tpu.memory_space<vmem>>, vector<2x32xf32>
    tpu.vector_store %arg19[%c0_236, %c0_237], %911 {strides = array<i32>} : memref<16x64xf32, #tpu.memory_space<vmem>>, vector<2x32xf32>,
    %913 = vector.extract_strided_slice %907 {offsets = [2, 0], sizes = [2, 32], strides = [1, 1]} : vector<4x32xf32> to vector<2x32xf32>
    %c14_238 = arith.constant 14 : index
    %c32_239 = arith.constant 32 : index
    %914 = vector.load %arg19[%c14_238, %c32_239] : memref<16x64xf32, #tpu.memory_space<vmem>>, vector<2x32xf32>
    tpu.vector_store %arg19[%c14_238, %c32_239], %913 {strides = array<i32>} : memref<16x64xf32, #tpu.memory_space<vmem>>, vector<2x32xf32>,
    %915 = vector.extract_strided_slice %867 {offsets = [2, 0], sizes = [2, 128], strides = [1, 1]} : vector<16x256xf32> to vector<2x128xf32>
    %916 = vector.extract_strided_slice %867 {offsets = [12, 128], sizes = [2, 128], strides = [1, 1]} : vector<16x256xf32> to vector<2x128xf32>
    %917 = tpu.concatenate %915, %916 in 0 : vector<2x128xf32>, vector<2x128xf32> -> vector<4x128xf32>
    %cst_240 = arith.constant dense<0.000000e+00> : vector<4x128xf32>
    %918 = tpu.matmul %910, %864, %cst_240 {dimension_numbers = #tpu.dot_dimension_numbers<[1], [0], [0], [1], [0, 0, 1, 1], [], []>} : vector<4x64xf32>, vector<64x128xf32>, vector<4x128xf32> -> vector<4x128xf32>
    %919 = arith.addf %917, %918 : vector<4x128xf32>
    %920 = vector.extract_strided_slice %919 {offsets = [0, 0], sizes = [4, 32], strides = [1, 1]} : vector<4x128xf32> to vector<4x32xf32>
    %921 = arith.negf %920 : vector<4x32xf32>
    %922 = math.exp %921 : vector<4x32xf32>
    %cst_241 = arith.constant 1.000000e+00 : f32
    %923 = vector.broadcast %cst_241 : f32 to vector<4x32xf32>
    %924 = arith.addf %923, %922 : vector<4x32xf32>
    %925 = arith.divf %923, %924 : vector<4x32xf32>
    %926 = vector.extract_strided_slice %919 {offsets = [0, 32], sizes = [4, 32], strides = [1, 1]} : vector<4x128xf32> to vector<4x32xf32>
    %927 = arith.negf %926 : vector<4x32xf32>
    %928 = math.exp %927 : vector<4x32xf32>
    %cst_242 = arith.constant 1.000000e+00 : f32
    %929 = vector.broadcast %cst_242 : f32 to vector<4x32xf32>
    %930 = arith.addf %929, %928 : vector<4x32xf32>
    %931 = arith.divf %929, %930 : vector<4x32xf32>
    %932 = vector.extract_strided_slice %919 {offsets = [0, 64], sizes = [4, 32], strides = [1, 1]} : vector<4x128xf32> to vector<4x32xf32>
    %933 = math.tanh %932 : vector<4x32xf32>
    %934 = vector.extract_strided_slice %919 {offsets = [0, 96], sizes = [4, 32], strides = [1, 1]} : vector<4x128xf32> to vector<4x32xf32>
    %935 = arith.negf %934 : vector<4x32xf32>
    %936 = math.exp %935 : vector<4x32xf32>
    %cst_243 = arith.constant 1.000000e+00 : f32
    %937 = vector.broadcast %cst_243 : f32 to vector<4x32xf32>
    %938 = arith.addf %937, %936 : vector<4x32xf32>
    %939 = arith.divf %937, %938 : vector<4x32xf32>
    %940 = arith.mulf %931, %905 : vector<4x32xf32>
    %941 = arith.mulf %925, %933 : vector<4x32xf32>
    %942 = arith.addf %940, %941 : vector<4x32xf32>
    %943 = math.tanh %942 : vector<4x32xf32>
    %944 = arith.mulf %939, %943 : vector<4x32xf32>
    %945 = tpu.concatenate %944, %944 in 1 : vector<4x32xf32>, vector<4x32xf32> -> vector<4x64xf32>
    %cst_244 = arith.constant 0.000000e+00 : f32
    %946 = vector.broadcast %cst_244 : f32 to vector<4x64xf32>
    %947 = arith.select %875, %945, %946 : vector<4x64xi1>, vector<4x64xf32>
    %948 = vector.extract_strided_slice %944 {offsets = [0, 0], sizes = [2, 32], strides = [1, 1]} : vector<4x32xf32> to vector<2x32xf32>
    %c2_245 = arith.constant 2 : index
    %c0_246 = arith.constant 0 : index
    %949 = vector.load %arg19[%c2_245, %c0_246] : memref<16x64xf32, #tpu.memory_space<vmem>>, vector<2x32xf32>
    tpu.vector_store %arg19[%c2_245, %c0_246], %948 {strides = array<i32>} : memref<16x64xf32, #tpu.memory_space<vmem>>, vector<2x32xf32>,
    %950 = vector.extract_strided_slice %944 {offsets = [2, 0], sizes = [2, 32], strides = [1, 1]} : vector<4x32xf32> to vector<2x32xf32>
    %c12_247 = arith.constant 12 : index
    %c32_248 = arith.constant 32 : index
    %951 = vector.load %arg19[%c12_247, %c32_248] : memref<16x64xf32, #tpu.memory_space<vmem>>, vector<2x32xf32>
    tpu.vector_store %arg19[%c12_247, %c32_248], %950 {strides = array<i32>} : memref<16x64xf32, #tpu.memory_space<vmem>>, vector<2x32xf32>,
    %952 = vector.extract_strided_slice %867 {offsets = [4, 0], sizes = [2, 128], strides = [1, 1]} : vector<16x256xf32> to vector<2x128xf32>
    %953 = vector.extract_strided_slice %867 {offsets = [10, 128], sizes = [2, 128], strides = [1, 1]} : vector<16x256xf32> to vector<2x128xf32>
    %954 = tpu.concatenate %952, %953 in 0 : vector<2x128xf32>, vector<2x128xf32> -> vector<4x128xf32>
    %cst_249 = arith.constant dense<0.000000e+00> : vector<4x128xf32>
    %955 = tpu.matmul %947, %864, %cst_249 {dimension_numbers = #tpu.dot_dimension_numbers<[1], [0], [0], [1], [0, 0, 1, 1], [], []>} : vector<4x64xf32>, vector<64x128xf32>, vector<4x128xf32> -> vector<4x128xf32>
    %956 = arith.addf %954, %955 : vector<4x128xf32>
    %957 = vector.extract_strided_slice %956 {offsets = [0, 0], sizes = [4, 32], strides = [1, 1]} : vector<4x128xf32> to vector<4x32xf32>
    %958 = arith.negf %957 : vector<4x32xf32>
    %959 = math.exp %958 : vector<4x32xf32>
    %cst_250 = arith.constant 1.000000e+00 : f32
    %960 = vector.broadcast %cst_250 : f32 to vector<4x32xf32>
    %961 = arith.addf %960, %959 : vector<4x32xf32>
    %962 = arith.divf %960, %961 : vector<4x32xf32>
    %963 = vector.extract_strided_slice %956 {offsets = [0, 32], sizes = [4, 32], strides = [1, 1]} : vector<4x128xf32> to vector<4x32xf32>
    %964 = arith.negf %963 : vector<4x32xf32>
    %965 = math.exp %964 : vector<4x32xf32>
    %cst_251 = arith.constant 1.000000e+00 : f32
    %966 = vector.broadcast %cst_251 : f32 to vector<4x32xf32>
    %967 = arith.addf %966, %965 : vector<4x32xf32>
    %968 = arith.divf %966, %967 : vector<4x32xf32>
    %969 = vector.extract_strided_slice %956 {offsets = [0, 64], sizes = [4, 32], strides = [1, 1]} : vector<4x128xf32> to vector<4x32xf32>
    %970 = math.tanh %969 : vector<4x32xf32>
    %971 = vector.extract_strided_slice %956 {offsets = [0, 96], sizes = [4, 32], strides = [1, 1]} : vector<4x128xf32> to vector<4x32xf32>
    %972 = arith.negf %971 : vector<4x32xf32>
    %973 = math.exp %972 : vector<4x32xf32>
    %cst_252 = arith.constant 1.000000e+00 : f32
    %974 = vector.broadcast %cst_252 : f32 to vector<4x32xf32>
    %975 = arith.addf %974, %973 : vector<4x32xf32>
    %976 = arith.divf %974, %975 : vector<4x32xf32>
    %977 = arith.mulf %968, %942 : vector<4x32xf32>
    %978 = arith.mulf %962, %970 : vector<4x32xf32>
    %979 = arith.addf %977, %978 : vector<4x32xf32>
    %980 = math.tanh %979 : vector<4x32xf32>
    %981 = arith.mulf %976, %980 : vector<4x32xf32>
    %982 = tpu.concatenate %981, %981 in 1 : vector<4x32xf32>, vector<4x32xf32> -> vector<4x64xf32>
    %cst_253 = arith.constant 0.000000e+00 : f32
    %983 = vector.broadcast %cst_253 : f32 to vector<4x64xf32>
    %984 = arith.select %875, %982, %983 : vector<4x64xi1>, vector<4x64xf32>
    %985 = vector.extract_strided_slice %981 {offsets = [0, 0], sizes = [2, 32], strides = [1, 1]} : vector<4x32xf32> to vector<2x32xf32>
    %c4_254 = arith.constant 4 : index
    %c0_255 = arith.constant 0 : index
    %986 = vector.load %arg19[%c4_254, %c0_255] : memref<16x64xf32, #tpu.memory_space<vmem>>, vector<2x32xf32>
    tpu.vector_store %arg19[%c4_254, %c0_255], %985 {strides = array<i32>} : memref<16x64xf32, #tpu.memory_space<vmem>>, vector<2x32xf32>,
    %987 = vector.extract_strided_slice %981 {offsets = [2, 0], sizes = [2, 32], strides = [1, 1]} : vector<4x32xf32> to vector<2x32xf32>
    %c10_256 = arith.constant 10 : index
    %c32_257 = arith.constant 32 : index
    %988 = vector.load %arg19[%c10_256, %c32_257] : memref<16x64xf32, #tpu.memory_space<vmem>>, vector<2x32xf32>
    tpu.vector_store %arg19[%c10_256, %c32_257], %987 {strides = array<i32>} : memref<16x64xf32, #tpu.memory_space<vmem>>, vector<2x32xf32>,
    %989 = vector.extract_strided_slice %867 {offsets = [6, 0], sizes = [2, 128], strides = [1, 1]} : vector<16x256xf32> to vector<2x128xf32>
    %990 = vector.extract_strided_slice %867 {offsets = [8, 128], sizes = [2, 128], strides = [1, 1]} : vector<16x256xf32> to vector<2x128xf32>
    %991 = tpu.concatenate %989, %990 in 0 : vector<2x128xf32>, vector<2x128xf32> -> vector<4x128xf32>
    %cst_258 = arith.constant dense<0.000000e+00> : vector<4x128xf32>
    %992 = tpu.matmul %984, %864, %cst_258 {dimension_numbers = #tpu.dot_dimension_numbers<[1], [0], [0], [1], [0, 0, 1, 1], [], []>} : vector<4x64xf32>, vector<64x128xf32>, vector<4x128xf32> -> vector<4x128xf32>
    %993 = arith.addf %991, %992 : vector<4x128xf32>
    %994 = vector.extract_strided_slice %993 {offsets = [0, 0], sizes = [4, 32], strides = [1, 1]} : vector<4x128xf32> to vector<4x32xf32>
    %995 = arith.negf %994 : vector<4x32xf32>
    %996 = math.exp %995 : vector<4x32xf32>
    %cst_259 = arith.constant 1.000000e+00 : f32
    %997 = vector.broadcast %cst_259 : f32 to vector<4x32xf32>
    %998 = arith.addf %997, %996 : vector<4x32xf32>
    %999 = arith.divf %997, %998 : vector<4x32xf32>
    %1000 = vector.extract_strided_slice %993 {offsets = [0, 32], sizes = [4, 32], strides = [1, 1]} : vector<4x128xf32> to vector<4x32xf32>
    %1001 = arith.negf %1000 : vector<4x32xf32>
    %1002 = math.exp %1001 : vector<4x32xf32>
    %cst_260 = arith.constant 1.000000e+00 : f32
    %1003 = vector.broadcast %cst_260 : f32 to vector<4x32xf32>
    %1004 = arith.addf %1003, %1002 : vector<4x32xf32>
    %1005 = arith.divf %1003, %1004 : vector<4x32xf32>
    %1006 = vector.extract_strided_slice %993 {offsets = [0, 64], sizes = [4, 32], strides = [1, 1]} : vector<4x128xf32> to vector<4x32xf32>
    %1007 = math.tanh %1006 : vector<4x32xf32>
    %1008 = vector.extract_strided_slice %993 {offsets = [0, 96], sizes = [4, 32], strides = [1, 1]} : vector<4x128xf32> to vector<4x32xf32>
    %1009 = arith.negf %1008 : vector<4x32xf32>
    %1010 = math.exp %1009 : vector<4x32xf32>
    %cst_261 = arith.constant 1.000000e+00 : f32
    %1011 = vector.broadcast %cst_261 : f32 to vector<4x32xf32>
    %1012 = arith.addf %1011, %1010 : vector<4x32xf32>
    %1013 = arith.divf %1011, %1012 : vector<4x32xf32>
    %1014 = arith.mulf %1005, %979 : vector<4x32xf32>
    %1015 = arith.mulf %999, %1007 : vector<4x32xf32>
    %1016 = arith.addf %1014, %1015 : vector<4x32xf32>
    %1017 = math.tanh %1016 : vector<4x32xf32>
    %1018 = arith.mulf %1013, %1017 : vector<4x32xf32>
    %1019 = tpu.concatenate %1018, %1018 in 1 : vector<4x32xf32>, vector<4x32xf32> -> vector<4x64xf32>
    %cst_262 = arith.constant 0.000000e+00 : f32
    %1020 = vector.broadcast %cst_262 : f32 to vector<4x64xf32>
    %1021 = arith.select %875, %1019, %1020 : vector<4x64xi1>, vector<4x64xf32>
    %1022 = vector.extract_strided_slice %1018 {offsets = [0, 0], sizes = [2, 32], strides = [1, 1]} : vector<4x32xf32> to vector<2x32xf32>
    %c6_263 = arith.constant 6 : index
    %c0_264 = arith.constant 0 : index
    %1023 = vector.load %arg19[%c6_263, %c0_264] : memref<16x64xf32, #tpu.memory_space<vmem>>, vector<2x32xf32>
    tpu.vector_store %arg19[%c6_263, %c0_264], %1022 {strides = array<i32>} : memref<16x64xf32, #tpu.memory_space<vmem>>, vector<2x32xf32>,
    %1024 = vector.extract_strided_slice %1018 {offsets = [2, 0], sizes = [2, 32], strides = [1, 1]} : vector<4x32xf32> to vector<2x32xf32>
    %c8_265 = arith.constant 8 : index
    %c32_266 = arith.constant 32 : index
    %1025 = vector.load %arg19[%c8_265, %c32_266] : memref<16x64xf32, #tpu.memory_space<vmem>>, vector<2x32xf32>
    tpu.vector_store %arg19[%c8_265, %c32_266], %1024 {strides = array<i32>} : memref<16x64xf32, #tpu.memory_space<vmem>>, vector<2x32xf32>,
    %1026 = vector.extract_strided_slice %867 {offsets = [8, 0], sizes = [2, 128], strides = [1, 1]} : vector<16x256xf32> to vector<2x128xf32>
    %1027 = vector.extract_strided_slice %867 {offsets = [6, 128], sizes = [2, 128], strides = [1, 1]} : vector<16x256xf32> to vector<2x128xf32>
    %1028 = tpu.concatenate %1026, %1027 in 0 : vector<2x128xf32>, vector<2x128xf32> -> vector<4x128xf32>
    %cst_267 = arith.constant dense<0.000000e+00> : vector<4x128xf32>
    %1029 = tpu.matmul %1021, %864, %cst_267 {dimension_numbers = #tpu.dot_dimension_numbers<[1], [0], [0], [1], [0, 0, 1, 1], [], []>} : vector<4x64xf32>, vector<64x128xf32>, vector<4x128xf32> -> vector<4x128xf32>
    %1030 = arith.addf %1028, %1029 : vector<4x128xf32>
    %1031 = vector.extract_strided_slice %1030 {offsets = [0, 0], sizes = [4, 32], strides = [1, 1]} : vector<4x128xf32> to vector<4x32xf32>
    %1032 = arith.negf %1031 : vector<4x32xf32>
    %1033 = math.exp %1032 : vector<4x32xf32>
    %cst_268 = arith.constant 1.000000e+00 : f32
    %1034 = vector.broadcast %cst_268 : f32 to vector<4x32xf32>
    %1035 = arith.addf %1034, %1033 : vector<4x32xf32>
    %1036 = arith.divf %1034, %1035 : vector<4x32xf32>
    %1037 = vector.extract_strided_slice %1030 {offsets = [0, 32], sizes = [4, 32], strides = [1, 1]} : vector<4x128xf32> to vector<4x32xf32>
    %1038 = arith.negf %1037 : vector<4x32xf32>
    %1039 = math.exp %1038 : vector<4x32xf32>
    %cst_269 = arith.constant 1.000000e+00 : f32
    %1040 = vector.broadcast %cst_269 : f32 to vector<4x32xf32>
    %1041 = arith.addf %1040, %1039 : vector<4x32xf32>
    %1042 = arith.divf %1040, %1041 : vector<4x32xf32>
    %1043 = vector.extract_strided_slice %1030 {offsets = [0, 64], sizes = [4, 32], strides = [1, 1]} : vector<4x128xf32> to vector<4x32xf32>
    %1044 = math.tanh %1043 : vector<4x32xf32>
    %1045 = vector.extract_strided_slice %1030 {offsets = [0, 96], sizes = [4, 32], strides = [1, 1]} : vector<4x128xf32> to vector<4x32xf32>
    %1046 = arith.negf %1045 : vector<4x32xf32>
    %1047 = math.exp %1046 : vector<4x32xf32>
    %cst_270 = arith.constant 1.000000e+00 : f32
    %1048 = vector.broadcast %cst_270 : f32 to vector<4x32xf32>
    %1049 = arith.addf %1048, %1047 : vector<4x32xf32>
    %1050 = arith.divf %1048, %1049 : vector<4x32xf32>
    %1051 = arith.mulf %1042, %1016 : vector<4x32xf32>
    %1052 = arith.mulf %1036, %1044 : vector<4x32xf32>
    %1053 = arith.addf %1051, %1052 : vector<4x32xf32>
    %1054 = math.tanh %1053 : vector<4x32xf32>
    %1055 = arith.mulf %1050, %1054 : vector<4x32xf32>
    %1056 = tpu.concatenate %1055, %1055 in 1 : vector<4x32xf32>, vector<4x32xf32> -> vector<4x64xf32>
    %cst_271 = arith.constant 0.000000e+00 : f32
    %1057 = vector.broadcast %cst_271 : f32 to vector<4x64xf32>
    %1058 = arith.select %875, %1056, %1057 : vector<4x64xi1>, vector<4x64xf32>
    %1059 = vector.extract_strided_slice %1055 {offsets = [0, 0], sizes = [2, 32], strides = [1, 1]} : vector<4x32xf32> to vector<2x32xf32>
    %c8_272 = arith.constant 8 : index
    %c0_273 = arith.constant 0 : index
    %1060 = vector.load %arg19[%c8_272, %c0_273] : memref<16x64xf32, #tpu.memory_space<vmem>>, vector<2x32xf32>
    tpu.vector_store %arg19[%c8_272, %c0_273], %1059 {strides = array<i32>} : memref<16x64xf32, #tpu.memory_space<vmem>>, vector<2x32xf32>,
    %1061 = vector.extract_strided_slice %1055 {offsets = [2, 0], sizes = [2, 32], strides = [1, 1]} : vector<4x32xf32> to vector<2x32xf32>
    %c6_274 = arith.constant 6 : index
    %c32_275 = arith.constant 32 : index
    %1062 = vector.load %arg19[%c6_274, %c32_275] : memref<16x64xf32, #tpu.memory_space<vmem>>, vector<2x32xf32>
    tpu.vector_store %arg19[%c6_274, %c32_275], %1061 {strides = array<i32>} : memref<16x64xf32, #tpu.memory_space<vmem>>, vector<2x32xf32>,
    %1063 = vector.extract_strided_slice %867 {offsets = [10, 0], sizes = [2, 128], strides = [1, 1]} : vector<16x256xf32> to vector<2x128xf32>
    %1064 = vector.extract_strided_slice %867 {offsets = [4, 128], sizes = [2, 128], strides = [1, 1]} : vector<16x256xf32> to vector<2x128xf32>
    %1065 = tpu.concatenate %1063, %1064 in 0 : vector<2x128xf32>, vector<2x128xf32> -> vector<4x128xf32>
    %cst_276 = arith.constant dense<0.000000e+00> : vector<4x128xf32>
    %1066 = tpu.matmul %1058, %864, %cst_276 {dimension_numbers = #tpu.dot_dimension_numbers<[1], [0], [0], [1], [0, 0, 1, 1], [], []>} : vector<4x64xf32>, vector<64x128xf32>, vector<4x128xf32> -> vector<4x128xf32>
    %1067 = arith.addf %1065, %1066 : vector<4x128xf32>
    %1068 = vector.extract_strided_slice %1067 {offsets = [0, 0], sizes = [4, 32], strides = [1, 1]} : vector<4x128xf32> to vector<4x32xf32>
    %1069 = arith.negf %1068 : vector<4x32xf32>
    %1070 = math.exp %1069 : vector<4x32xf32>
    %cst_277 = arith.constant 1.000000e+00 : f32
    %1071 = vector.broadcast %cst_277 : f32 to vector<4x32xf32>
    %1072 = arith.addf %1071, %1070 : vector<4x32xf32>
    %1073 = arith.divf %1071, %1072 : vector<4x32xf32>
    %1074 = vector.extract_strided_slice %1067 {offsets = [0, 32], sizes = [4, 32], strides = [1, 1]} : vector<4x128xf32> to vector<4x32xf32>
    %1075 = arith.negf %1074 : vector<4x32xf32>
    %1076 = math.exp %1075 : vector<4x32xf32>
    %cst_278 = arith.constant 1.000000e+00 : f32
    %1077 = vector.broadcast %cst_278 : f32 to vector<4x32xf32>
    %1078 = arith.addf %1077, %1076 : vector<4x32xf32>
    %1079 = arith.divf %1077, %1078 : vector<4x32xf32>
    %1080 = vector.extract_strided_slice %1067 {offsets = [0, 64], sizes = [4, 32], strides = [1, 1]} : vector<4x128xf32> to vector<4x32xf32>
    %1081 = math.tanh %1080 : vector<4x32xf32>
    %1082 = vector.extract_strided_slice %1067 {offsets = [0, 96], sizes = [4, 32], strides = [1, 1]} : vector<4x128xf32> to vector<4x32xf32>
    %1083 = arith.negf %1082 : vector<4x32xf32>
    %1084 = math.exp %1083 : vector<4x32xf32>
    %cst_279 = arith.constant 1.000000e+00 : f32
    %1085 = vector.broadcast %cst_279 : f32 to vector<4x32xf32>
    %1086 = arith.addf %1085, %1084 : vector<4x32xf32>
    %1087 = arith.divf %1085, %1086 : vector<4x32xf32>
    %1088 = arith.mulf %1079, %1053 : vector<4x32xf32>
    %1089 = arith.mulf %1073, %1081 : vector<4x32xf32>
    %1090 = arith.addf %1088, %1089 : vector<4x32xf32>
    %1091 = math.tanh %1090 : vector<4x32xf32>
    %1092 = arith.mulf %1087, %1091 : vector<4x32xf32>
    %1093 = tpu.concatenate %1092, %1092 in 1 : vector<4x32xf32>, vector<4x32xf32> -> vector<4x64xf32>
    %cst_280 = arith.constant 0.000000e+00 : f32
    %1094 = vector.broadcast %cst_280 : f32 to vector<4x64xf32>
    %1095 = arith.select %875, %1093, %1094 : vector<4x64xi1>, vector<4x64xf32>
    %1096 = vector.extract_strided_slice %1092 {offsets = [0, 0], sizes = [2, 32], strides = [1, 1]} : vector<4x32xf32> to vector<2x32xf32>
    %c10_281 = arith.constant 10 : index
    %c0_282 = arith.constant 0 : index
    %1097 = vector.load %arg19[%c10_281, %c0_282] : memref<16x64xf32, #tpu.memory_space<vmem>>, vector<2x32xf32>
    tpu.vector_store %arg19[%c10_281, %c0_282], %1096 {strides = array<i32>} : memref<16x64xf32, #tpu.memory_space<vmem>>, vector<2x32xf32>,
    %1098 = vector.extract_strided_slice %1092 {offsets = [2, 0], sizes = [2, 32], strides = [1, 1]} : vector<4x32xf32> to vector<2x32xf32>
    %c4_283 = arith.constant 4 : index
    %c32_284 = arith.constant 32 : index
    %1099 = vector.load %arg19[%c4_283, %c32_284] : memref<16x64xf32, #tpu.memory_space<vmem>>, vector<2x32xf32>
    tpu.vector_store %arg19[%c4_283, %c32_284], %1098 {strides = array<i32>} : memref<16x64xf32, #tpu.memory_space<vmem>>, vector<2x32xf32>,
    %1100 = vector.extract_strided_slice %867 {offsets = [12, 0], sizes = [2, 128], strides = [1, 1]} : vector<16x256xf32> to vector<2x128xf32>
    %1101 = vector.extract_strided_slice %867 {offsets = [2, 128], sizes = [2, 128], strides = [1, 1]} : vector<16x256xf32> to vector<2x128xf32>
    %1102 = tpu.concatenate %1100, %1101 in 0 : vector<2x128xf32>, vector<2x128xf32> -> vector<4x128xf32>
    %cst_285 = arith.constant dense<0.000000e+00> : vector<4x128xf32>
    %1103 = tpu.matmul %1095, %864, %cst_285 {dimension_numbers = #tpu.dot_dimension_numbers<[1], [0], [0], [1], [0, 0, 1, 1], [], []>} : vector<4x64xf32>, vector<64x128xf32>, vector<4x128xf32> -> vector<4x128xf32>
    %1104 = arith.addf %1102, %1103 : vector<4x128xf32>
    %1105 = vector.extract_strided_slice %1104 {offsets = [0, 0], sizes = [4, 32], strides = [1, 1]} : vector<4x128xf32> to vector<4x32xf32>
    %1106 = arith.negf %1105 : vector<4x32xf32>
    %1107 = math.exp %1106 : vector<4x32xf32>
    %cst_286 = arith.constant 1.000000e+00 : f32
    %1108 = vector.broadcast %cst_286 : f32 to vector<4x32xf32>
    %1109 = arith.addf %1108, %1107 : vector<4x32xf32>
    %1110 = arith.divf %1108, %1109 : vector<4x32xf32>
    %1111 = vector.extract_strided_slice %1104 {offsets = [0, 32], sizes = [4, 32], strides = [1, 1]} : vector<4x128xf32> to vector<4x32xf32>
    %1112 = arith.negf %1111 : vector<4x32xf32>
    %1113 = math.exp %1112 : vector<4x32xf32>
    %cst_287 = arith.constant 1.000000e+00 : f32
    %1114 = vector.broadcast %cst_287 : f32 to vector<4x32xf32>
    %1115 = arith.addf %1114, %1113 : vector<4x32xf32>
    %1116 = arith.divf %1114, %1115 : vector<4x32xf32>
    %1117 = vector.extract_strided_slice %1104 {offsets = [0, 64], sizes = [4, 32], strides = [1, 1]} : vector<4x128xf32> to vector<4x32xf32>
    %1118 = math.tanh %1117 : vector<4x32xf32>
    %1119 = vector.extract_strided_slice %1104 {offsets = [0, 96], sizes = [4, 32], strides = [1, 1]} : vector<4x128xf32> to vector<4x32xf32>
    %1120 = arith.negf %1119 : vector<4x32xf32>
    %1121 = math.exp %1120 : vector<4x32xf32>
    %cst_288 = arith.constant 1.000000e+00 : f32
    %1122 = vector.broadcast %cst_288 : f32 to vector<4x32xf32>
    %1123 = arith.addf %1122, %1121 : vector<4x32xf32>
    %1124 = arith.divf %1122, %1123 : vector<4x32xf32>
    %1125 = arith.mulf %1116, %1090 : vector<4x32xf32>
    %1126 = arith.mulf %1110, %1118 : vector<4x32xf32>
    %1127 = arith.addf %1125, %1126 : vector<4x32xf32>
    %1128 = math.tanh %1127 : vector<4x32xf32>
    %1129 = arith.mulf %1124, %1128 : vector<4x32xf32>
    %1130 = tpu.concatenate %1129, %1129 in 1 : vector<4x32xf32>, vector<4x32xf32> -> vector<4x64xf32>
    %cst_289 = arith.constant 0.000000e+00 : f32
    %1131 = vector.broadcast %cst_289 : f32 to vector<4x64xf32>
    %1132 = arith.select %875, %1130, %1131 : vector<4x64xi1>, vector<4x64xf32>
    %1133 = vector.extract_strided_slice %1129 {offsets = [0, 0], sizes = [2, 32], strides = [1, 1]} : vector<4x32xf32> to vector<2x32xf32>
    %c12_290 = arith.constant 12 : index
    %c0_291 = arith.constant 0 : index
    %1134 = vector.load %arg19[%c12_290, %c0_291] : memref<16x64xf32, #tpu.memory_space<vmem>>, vector<2x32xf32>
    tpu.vector_store %arg19[%c12_290, %c0_291], %1133 {strides = array<i32>} : memref<16x64xf32, #tpu.memory_space<vmem>>, vector<2x32xf32>,
    %1135 = vector.extract_strided_slice %1129 {offsets = [2, 0], sizes = [2, 32], strides = [1, 1]} : vector<4x32xf32> to vector<2x32xf32>
    %c2_292 = arith.constant 2 : index
    %c32_293 = arith.constant 32 : index
    %1136 = vector.load %arg19[%c2_292, %c32_293] : memref<16x64xf32, #tpu.memory_space<vmem>>, vector<2x32xf32>
    tpu.vector_store %arg19[%c2_292, %c32_293], %1135 {strides = array<i32>} : memref<16x64xf32, #tpu.memory_space<vmem>>, vector<2x32xf32>,
    %1137 = vector.extract_strided_slice %867 {offsets = [14, 0], sizes = [2, 128], strides = [1, 1]} : vector<16x256xf32> to vector<2x128xf32>
    %1138 = vector.extract_strided_slice %867 {offsets = [0, 128], sizes = [2, 128], strides = [1, 1]} : vector<16x256xf32> to vector<2x128xf32>
    %1139 = tpu.concatenate %1137, %1138 in 0 : vector<2x128xf32>, vector<2x128xf32> -> vector<4x128xf32>
    %cst_294 = arith.constant dense<0.000000e+00> : vector<4x128xf32>
    %1140 = tpu.matmul %1132, %864, %cst_294 {dimension_numbers = #tpu.dot_dimension_numbers<[1], [0], [0], [1], [0, 0, 1, 1], [], []>} : vector<4x64xf32>, vector<64x128xf32>, vector<4x128xf32> -> vector<4x128xf32>
    %1141 = arith.addf %1139, %1140 : vector<4x128xf32>
    %1142 = vector.extract_strided_slice %1141 {offsets = [0, 0], sizes = [4, 32], strides = [1, 1]} : vector<4x128xf32> to vector<4x32xf32>
    %1143 = arith.negf %1142 : vector<4x32xf32>
    %1144 = math.exp %1143 : vector<4x32xf32>
    %cst_295 = arith.constant 1.000000e+00 : f32
    %1145 = vector.broadcast %cst_295 : f32 to vector<4x32xf32>
    %1146 = arith.addf %1145, %1144 : vector<4x32xf32>
    %1147 = arith.divf %1145, %1146 : vector<4x32xf32>
    %1148 = vector.extract_strided_slice %1141 {offsets = [0, 32], sizes = [4, 32], strides = [1, 1]} : vector<4x128xf32> to vector<4x32xf32>
    %1149 = arith.negf %1148 : vector<4x32xf32>
    %1150 = math.exp %1149 : vector<4x32xf32>
    %cst_296 = arith.constant 1.000000e+00 : f32
    %1151 = vector.broadcast %cst_296 : f32 to vector<4x32xf32>
    %1152 = arith.addf %1151, %1150 : vector<4x32xf32>
    %1153 = arith.divf %1151, %1152 : vector<4x32xf32>
    %1154 = vector.extract_strided_slice %1141 {offsets = [0, 64], sizes = [4, 32], strides = [1, 1]} : vector<4x128xf32> to vector<4x32xf32>
    %1155 = math.tanh %1154 : vector<4x32xf32>
    %1156 = vector.extract_strided_slice %1141 {offsets = [0, 96], sizes = [4, 32], strides = [1, 1]} : vector<4x128xf32> to vector<4x32xf32>
    %1157 = arith.negf %1156 : vector<4x32xf32>
    %1158 = math.exp %1157 : vector<4x32xf32>
    %cst_297 = arith.constant 1.000000e+00 : f32
    %1159 = vector.broadcast %cst_297 : f32 to vector<4x32xf32>
    %1160 = arith.addf %1159, %1158 : vector<4x32xf32>
    %1161 = arith.divf %1159, %1160 : vector<4x32xf32>
    %1162 = arith.mulf %1153, %1127 : vector<4x32xf32>
    %1163 = arith.mulf %1147, %1155 : vector<4x32xf32>
    %1164 = arith.addf %1162, %1163 : vector<4x32xf32>
    %1165 = math.tanh %1164 : vector<4x32xf32>
    %1166 = arith.mulf %1161, %1165 : vector<4x32xf32>
    %1167 = vector.extract_strided_slice %1166 {offsets = [0, 0], sizes = [2, 32], strides = [1, 1]} : vector<4x32xf32> to vector<2x32xf32>
    %c14_298 = arith.constant 14 : index
    %c0_299 = arith.constant 0 : index
    %1168 = vector.load %arg19[%c14_298, %c0_299] : memref<16x64xf32, #tpu.memory_space<vmem>>, vector<2x32xf32>
    tpu.vector_store %arg19[%c14_298, %c0_299], %1167 {strides = array<i32>} : memref<16x64xf32, #tpu.memory_space<vmem>>, vector<2x32xf32>,
    %1169 = vector.extract_strided_slice %1166 {offsets = [2, 0], sizes = [2, 32], strides = [1, 1]} : vector<4x32xf32> to vector<2x32xf32>
    %c0_300 = arith.constant 0 : index
    %c32_301 = arith.constant 32 : index
    %1170 = vector.load %arg19[%c0_300, %c32_301] : memref<16x64xf32, #tpu.memory_space<vmem>>, vector<2x32xf32>
    tpu.vector_store %arg19[%c0_300, %c32_301], %1169 {strides = array<i32>} : memref<16x64xf32, #tpu.memory_space<vmem>>, vector<2x32xf32>,
    %c0_302 = arith.constant 0 : index
    %c0_303 = arith.constant 0 : index
    %1171 = vector.load %arg19[%c0_302, %c0_303] : memref<16x64xf32, #tpu.memory_space<vmem>>, vector<16x64xf32>
    %c0_304 = arith.constant 0 : index
    %c0_305 = arith.constant 0 : index
    %1172 = vector.load %arg13[%c0_304, %c0_305] : memref<64x256xf32, #tpu.memory_space<vmem>>, vector<64x256xf32>
    %c0_306 = arith.constant 0 : index
    %c0_307 = arith.constant 0 : index
    %1173 = vector.load %arg14[%c0_306, %c0_307] : memref<1x256xf32, #tpu.memory_space<vmem>>, vector<1x256xf32>
    %c0_308 = arith.constant 0 : index
    %c0_309 = arith.constant 0 : index
    %1174 = vector.load %arg15[%c0_308, %c0_309] : memref<64x128xf32, #tpu.memory_space<vmem>>, vector<64x128xf32>
    %cst_310 = arith.constant dense<0.000000e+00> : vector<16x256xf32>
    %1175 = tpu.matmul %1171, %1172, %cst_310 {dimension_numbers = #tpu.dot_dimension_numbers<[1], [0], [0], [1], [0, 0, 1, 1], [], []>} : vector<16x64xf32>, vector<64x256xf32>, vector<16x256xf32> -> vector<16x256xf32>
    %1176 = vector.broadcast %1173 : vector<1x256xf32> to vector<16x256xf32>
    %1177 = arith.addf %1175, %1176 : vector<16x256xf32>
    %1178 = tpu.iota {dimensions = array<i32: 0>} : vector<4x64xi32>
    %1179 = tpu.iota {dimensions = array<i32: 1>} : vector<4x64xi32>
    %c2_i32_311 = arith.constant 2 : i32
    %1180 = vector.broadcast %c2_i32_311 : i32 to vector<4x64xi32>
    %1181 = arith.cmpi slt, %1178, %1180 : vector<4x64xi32>
    %c32_i32_312 = arith.constant 32 : i32
    %1182 = vector.broadcast %c32_i32_312 : i32 to vector<4x64xi32>
    %1183 = arith.cmpi slt, %1179, %1182 : vector<4x64xi32>
    %1184 = arith.xori %1181, %1183 : vector<4x64xi1>
    %cst_313 = arith.constant dense<true> : vector<4x64xi1>
    %1185 = arith.xori %1184, %cst_313 : vector<4x64xi1>
    %cst_314 = arith.constant 0.000000e+00 : f32
    %1186 = vector.broadcast %cst_314 : f32 to vector<4x64xf32>
    %cst_315 = arith.constant 0.000000e+00 : f32
    %1187 = vector.broadcast %cst_315 : f32 to vector<4x32xf32>
    %1188 = vector.extract_strided_slice %1177 {offsets = [0, 0], sizes = [2, 128], strides = [1, 1]} : vector<16x256xf32> to vector<2x128xf32>
    %1189 = vector.extract_strided_slice %1177 {offsets = [14, 128], sizes = [2, 128], strides = [1, 1]} : vector<16x256xf32> to vector<2x128xf32>
    %1190 = tpu.concatenate %1188, %1189 in 0 : vector<2x128xf32>, vector<2x128xf32> -> vector<4x128xf32>
    %cst_316 = arith.constant dense<0.000000e+00> : vector<4x128xf32>
    %1191 = tpu.matmul %1186, %1174, %cst_316 {dimension_numbers = #tpu.dot_dimension_numbers<[1], [0], [0], [1], [0, 0, 1, 1], [], []>} : vector<4x64xf32>, vector<64x128xf32>, vector<4x128xf32> -> vector<4x128xf32>
    %1192 = arith.addf %1190, %1191 : vector<4x128xf32>
    %1193 = vector.extract_strided_slice %1192 {offsets = [0, 0], sizes = [4, 32], strides = [1, 1]} : vector<4x128xf32> to vector<4x32xf32>
    %1194 = arith.negf %1193 : vector<4x32xf32>
    %1195 = math.exp %1194 : vector<4x32xf32>
    %cst_317 = arith.constant 1.000000e+00 : f32
    %1196 = vector.broadcast %cst_317 : f32 to vector<4x32xf32>
    %1197 = arith.addf %1196, %1195 : vector<4x32xf32>
    %1198 = arith.divf %1196, %1197 : vector<4x32xf32>
    %1199 = vector.extract_strided_slice %1192 {offsets = [0, 32], sizes = [4, 32], strides = [1, 1]} : vector<4x128xf32> to vector<4x32xf32>
    %1200 = arith.negf %1199 : vector<4x32xf32>
    %1201 = math.exp %1200 : vector<4x32xf32>
    %cst_318 = arith.constant 1.000000e+00 : f32
    %1202 = vector.broadcast %cst_318 : f32 to vector<4x32xf32>
    %1203 = arith.addf %1202, %1201 : vector<4x32xf32>
    %1204 = arith.divf %1202, %1203 : vector<4x32xf32>
    %1205 = vector.extract_strided_slice %1192 {offsets = [0, 64], sizes = [4, 32], strides = [1, 1]} : vector<4x128xf32> to vector<4x32xf32>
    %1206 = math.tanh %1205 : vector<4x32xf32>
    %1207 = vector.extract_strided_slice %1192 {offsets = [0, 96], sizes = [4, 32], strides = [1, 1]} : vector<4x128xf32> to vector<4x32xf32>
    %1208 = arith.negf %1207 : vector<4x32xf32>
    %1209 = math.exp %1208 : vector<4x32xf32>
    %cst_319 = arith.constant 1.000000e+00 : f32
    %1210 = vector.broadcast %cst_319 : f32 to vector<4x32xf32>
    %1211 = arith.addf %1210, %1209 : vector<4x32xf32>
    %1212 = arith.divf %1210, %1211 : vector<4x32xf32>
    %1213 = arith.mulf %1204, %1187 : vector<4x32xf32>
    %1214 = arith.mulf %1198, %1206 : vector<4x32xf32>
    %1215 = arith.addf %1213, %1214 : vector<4x32xf32>
    %1216 = math.tanh %1215 : vector<4x32xf32>
    %1217 = arith.mulf %1212, %1216 : vector<4x32xf32>
    %1218 = tpu.concatenate %1217, %1217 in 1 : vector<4x32xf32>, vector<4x32xf32> -> vector<4x64xf32>
    %cst_320 = arith.constant 0.000000e+00 : f32
    %1219 = vector.broadcast %cst_320 : f32 to vector<4x64xf32>
    %1220 = arith.select %1185, %1218, %1219 : vector<4x64xi1>, vector<4x64xf32>
    %1221 = vector.extract_strided_slice %1217 {offsets = [0, 0], sizes = [2, 32], strides = [1, 1]} : vector<4x32xf32> to vector<2x32xf32>
    %c0_321 = arith.constant 0 : index
    %c0_322 = arith.constant 0 : index
    %1222 = vector.load %arg20[%c0_321, %c0_322] : memref<16x64xf32, #tpu.memory_space<vmem>>, vector<2x32xf32>
    tpu.vector_store %arg20[%c0_321, %c0_322], %1221 {strides = array<i32>} : memref<16x64xf32, #tpu.memory_space<vmem>>, vector<2x32xf32>,
    %1223 = vector.extract_strided_slice %1217 {offsets = [2, 0], sizes = [2, 32], strides = [1, 1]} : vector<4x32xf32> to vector<2x32xf32>
    %c14_323 = arith.constant 14 : index
    %c32_324 = arith.constant 32 : index
    %1224 = vector.load %arg20[%c14_323, %c32_324] : memref<16x64xf32, #tpu.memory_space<vmem>>, vector<2x32xf32>
    tpu.vector_store %arg20[%c14_323, %c32_324], %1223 {strides = array<i32>} : memref<16x64xf32, #tpu.memory_space<vmem>>, vector<2x32xf32>,
    %1225 = vector.extract_strided_slice %1177 {offsets = [2, 0], sizes = [2, 128], strides = [1, 1]} : vector<16x256xf32> to vector<2x128xf32>
    %1226 = vector.extract_strided_slice %1177 {offsets = [12, 128], sizes = [2, 128], strides = [1, 1]} : vector<16x256xf32> to vector<2x128xf32>
    %1227 = tpu.concatenate %1225, %1226 in 0 : vector<2x128xf32>, vector<2x128xf32> -> vector<4x128xf32>
    %cst_325 = arith.constant dense<0.000000e+00> : vector<4x128xf32>
    %1228 = tpu.matmul %1220, %1174, %cst_325 {dimension_numbers = #tpu.dot_dimension_numbers<[1], [0], [0], [1], [0, 0, 1, 1], [], []>} : vector<4x64xf32>, vector<64x128xf32>, vector<4x128xf32> -> vector<4x128xf32>
    %1229 = arith.addf %1227, %1228 : vector<4x128xf32>
    %1230 = vector.extract_strided_slice %1229 {offsets = [0, 0], sizes = [4, 32], strides = [1, 1]} : vector<4x128xf32> to vector<4x32xf32>
    %1231 = arith.negf %1230 : vector<4x32xf32>
    %1232 = math.exp %1231 : vector<4x32xf32>
    %cst_326 = arith.constant 1.000000e+00 : f32
    %1233 = vector.broadcast %cst_326 : f32 to vector<4x32xf32>
    %1234 = arith.addf %1233, %1232 : vector<4x32xf32>
    %1235 = arith.divf %1233, %1234 : vector<4x32xf32>
    %1236 = vector.extract_strided_slice %1229 {offsets = [0, 32], sizes = [4, 32], strides = [1, 1]} : vector<4x128xf32> to vector<4x32xf32>
    %1237 = arith.negf %1236 : vector<4x32xf32>
    %1238 = math.exp %1237 : vector<4x32xf32>
    %cst_327 = arith.constant 1.000000e+00 : f32
    %1239 = vector.broadcast %cst_327 : f32 to vector<4x32xf32>
    %1240 = arith.addf %1239, %1238 : vector<4x32xf32>
    %1241 = arith.divf %1239, %1240 : vector<4x32xf32>
    %1242 = vector.extract_strided_slice %1229 {offsets = [0, 64], sizes = [4, 32], strides = [1, 1]} : vector<4x128xf32> to vector<4x32xf32>
    %1243 = math.tanh %1242 : vector<4x32xf32>
    %1244 = vector.extract_strided_slice %1229 {offsets = [0, 96], sizes = [4, 32], strides = [1, 1]} : vector<4x128xf32> to vector<4x32xf32>
    %1245 = arith.negf %1244 : vector<4x32xf32>
    %1246 = math.exp %1245 : vector<4x32xf32>
    %cst_328 = arith.constant 1.000000e+00 : f32
    %1247 = vector.broadcast %cst_328 : f32 to vector<4x32xf32>
    %1248 = arith.addf %1247, %1246 : vector<4x32xf32>
    %1249 = arith.divf %1247, %1248 : vector<4x32xf32>
    %1250 = arith.mulf %1241, %1215 : vector<4x32xf32>
    %1251 = arith.mulf %1235, %1243 : vector<4x32xf32>
    %1252 = arith.addf %1250, %1251 : vector<4x32xf32>
    %1253 = math.tanh %1252 : vector<4x32xf32>
    %1254 = arith.mulf %1249, %1253 : vector<4x32xf32>
    %1255 = tpu.concatenate %1254, %1254 in 1 : vector<4x32xf32>, vector<4x32xf32> -> vector<4x64xf32>
    %cst_329 = arith.constant 0.000000e+00 : f32
    %1256 = vector.broadcast %cst_329 : f32 to vector<4x64xf32>
    %1257 = arith.select %1185, %1255, %1256 : vector<4x64xi1>, vector<4x64xf32>
    %1258 = vector.extract_strided_slice %1254 {offsets = [0, 0], sizes = [2, 32], strides = [1, 1]} : vector<4x32xf32> to vector<2x32xf32>
    %c2_330 = arith.constant 2 : index
    %c0_331 = arith.constant 0 : index
    %1259 = vector.load %arg20[%c2_330, %c0_331] : memref<16x64xf32, #tpu.memory_space<vmem>>, vector<2x32xf32>
    tpu.vector_store %arg20[%c2_330, %c0_331], %1258 {strides = array<i32>} : memref<16x64xf32, #tpu.memory_space<vmem>>, vector<2x32xf32>,
    %1260 = vector.extract_strided_slice %1254 {offsets = [2, 0], sizes = [2, 32], strides = [1, 1]} : vector<4x32xf32> to vector<2x32xf32>
    %c12_332 = arith.constant 12 : index
    %c32_333 = arith.constant 32 : index
    %1261 = vector.load %arg20[%c12_332, %c32_333] : memref<16x64xf32, #tpu.memory_space<vmem>>, vector<2x32xf32>
    tpu.vector_store %arg20[%c12_332, %c32_333], %1260 {strides = array<i32>} : memref<16x64xf32, #tpu.memory_space<vmem>>, vector<2x32xf32>,
    %1262 = vector.extract_strided_slice %1177 {offsets = [4, 0], sizes = [2, 128], strides = [1, 1]} : vector<16x256xf32> to vector<2x128xf32>
    %1263 = vector.extract_strided_slice %1177 {offsets = [10, 128], sizes = [2, 128], strides = [1, 1]} : vector<16x256xf32> to vector<2x128xf32>
    %1264 = tpu.concatenate %1262, %1263 in 0 : vector<2x128xf32>, vector<2x128xf32> -> vector<4x128xf32>
    %cst_334 = arith.constant dense<0.000000e+00> : vector<4x128xf32>
    %1265 = tpu.matmul %1257, %1174, %cst_334 {dimension_numbers = #tpu.dot_dimension_numbers<[1], [0], [0], [1], [0, 0, 1, 1], [], []>} : vector<4x64xf32>, vector<64x128xf32>, vector<4x128xf32> -> vector<4x128xf32>
    %1266 = arith.addf %1264, %1265 : vector<4x128xf32>
    %1267 = vector.extract_strided_slice %1266 {offsets = [0, 0], sizes = [4, 32], strides = [1, 1]} : vector<4x128xf32> to vector<4x32xf32>
    %1268 = arith.negf %1267 : vector<4x32xf32>
    %1269 = math.exp %1268 : vector<4x32xf32>
    %cst_335 = arith.constant 1.000000e+00 : f32
    %1270 = vector.broadcast %cst_335 : f32 to vector<4x32xf32>
    %1271 = arith.addf %1270, %1269 : vector<4x32xf32>
    %1272 = arith.divf %1270, %1271 : vector<4x32xf32>
    %1273 = vector.extract_strided_slice %1266 {offsets = [0, 32], sizes = [4, 32], strides = [1, 1]} : vector<4x128xf32> to vector<4x32xf32>
    %1274 = arith.negf %1273 : vector<4x32xf32>
    %1275 = math.exp %1274 : vector<4x32xf32>
    %cst_336 = arith.constant 1.000000e+00 : f32
    %1276 = vector.broadcast %cst_336 : f32 to vector<4x32xf32>
    %1277 = arith.addf %1276, %1275 : vector<4x32xf32>
    %1278 = arith.divf %1276, %1277 : vector<4x32xf32>
    %1279 = vector.extract_strided_slice %1266 {offsets = [0, 64], sizes = [4, 32], strides = [1, 1]} : vector<4x128xf32> to vector<4x32xf32>
    %1280 = math.tanh %1279 : vector<4x32xf32>
    %1281 = vector.extract_strided_slice %1266 {offsets = [0, 96], sizes = [4, 32], strides = [1, 1]} : vector<4x128xf32> to vector<4x32xf32>
    %1282 = arith.negf %1281 : vector<4x32xf32>
    %1283 = math.exp %1282 : vector<4x32xf32>
    %cst_337 = arith.constant 1.000000e+00 : f32
    %1284 = vector.broadcast %cst_337 : f32 to vector<4x32xf32>
    %1285 = arith.addf %1284, %1283 : vector<4x32xf32>
    %1286 = arith.divf %1284, %1285 : vector<4x32xf32>
    %1287 = arith.mulf %1278, %1252 : vector<4x32xf32>
    %1288 = arith.mulf %1272, %1280 : vector<4x32xf32>
    %1289 = arith.addf %1287, %1288 : vector<4x32xf32>
    %1290 = math.tanh %1289 : vector<4x32xf32>
    %1291 = arith.mulf %1286, %1290 : vector<4x32xf32>
    %1292 = tpu.concatenate %1291, %1291 in 1 : vector<4x32xf32>, vector<4x32xf32> -> vector<4x64xf32>
    %cst_338 = arith.constant 0.000000e+00 : f32
    %1293 = vector.broadcast %cst_338 : f32 to vector<4x64xf32>
    %1294 = arith.select %1185, %1292, %1293 : vector<4x64xi1>, vector<4x64xf32>
    %1295 = vector.extract_strided_slice %1291 {offsets = [0, 0], sizes = [2, 32], strides = [1, 1]} : vector<4x32xf32> to vector<2x32xf32>
    %c4_339 = arith.constant 4 : index
    %c0_340 = arith.constant 0 : index
    %1296 = vector.load %arg20[%c4_339, %c0_340] : memref<16x64xf32, #tpu.memory_space<vmem>>, vector<2x32xf32>
    tpu.vector_store %arg20[%c4_339, %c0_340], %1295 {strides = array<i32>} : memref<16x64xf32, #tpu.memory_space<vmem>>, vector<2x32xf32>,
    %1297 = vector.extract_strided_slice %1291 {offsets = [2, 0], sizes = [2, 32], strides = [1, 1]} : vector<4x32xf32> to vector<2x32xf32>
    %c10_341 = arith.constant 10 : index
    %c32_342 = arith.constant 32 : index
    %1298 = vector.load %arg20[%c10_341, %c32_342] : memref<16x64xf32, #tpu.memory_space<vmem>>, vector<2x32xf32>
    tpu.vector_store %arg20[%c10_341, %c32_342], %1297 {strides = array<i32>} : memref<16x64xf32, #tpu.memory_space<vmem>>, vector<2x32xf32>,
    %1299 = vector.extract_strided_slice %1177 {offsets = [6, 0], sizes = [2, 128], strides = [1, 1]} : vector<16x256xf32> to vector<2x128xf32>
    %1300 = vector.extract_strided_slice %1177 {offsets = [8, 128], sizes = [2, 128], strides = [1, 1]} : vector<16x256xf32> to vector<2x128xf32>
    %1301 = tpu.concatenate %1299, %1300 in 0 : vector<2x128xf32>, vector<2x128xf32> -> vector<4x128xf32>
    %cst_343 = arith.constant dense<0.000000e+00> : vector<4x128xf32>
    %1302 = tpu.matmul %1294, %1174, %cst_343 {dimension_numbers = #tpu.dot_dimension_numbers<[1], [0], [0], [1], [0, 0, 1, 1], [], []>} : vector<4x64xf32>, vector<64x128xf32>, vector<4x128xf32> -> vector<4x128xf32>
    %1303 = arith.addf %1301, %1302 : vector<4x128xf32>
    %1304 = vector.extract_strided_slice %1303 {offsets = [0, 0], sizes = [4, 32], strides = [1, 1]} : vector<4x128xf32> to vector<4x32xf32>
    %1305 = arith.negf %1304 : vector<4x32xf32>
    %1306 = math.exp %1305 : vector<4x32xf32>
    %cst_344 = arith.constant 1.000000e+00 : f32
    %1307 = vector.broadcast %cst_344 : f32 to vector<4x32xf32>
    %1308 = arith.addf %1307, %1306 : vector<4x32xf32>
    %1309 = arith.divf %1307, %1308 : vector<4x32xf32>
    %1310 = vector.extract_strided_slice %1303 {offsets = [0, 32], sizes = [4, 32], strides = [1, 1]} : vector<4x128xf32> to vector<4x32xf32>
    %1311 = arith.negf %1310 : vector<4x32xf32>
    %1312 = math.exp %1311 : vector<4x32xf32>
    %cst_345 = arith.constant 1.000000e+00 : f32
    %1313 = vector.broadcast %cst_345 : f32 to vector<4x32xf32>
    %1314 = arith.addf %1313, %1312 : vector<4x32xf32>
    %1315 = arith.divf %1313, %1314 : vector<4x32xf32>
    %1316 = vector.extract_strided_slice %1303 {offsets = [0, 64], sizes = [4, 32], strides = [1, 1]} : vector<4x128xf32> to vector<4x32xf32>
    %1317 = math.tanh %1316 : vector<4x32xf32>
    %1318 = vector.extract_strided_slice %1303 {offsets = [0, 96], sizes = [4, 32], strides = [1, 1]} : vector<4x128xf32> to vector<4x32xf32>
    %1319 = arith.negf %1318 : vector<4x32xf32>
    %1320 = math.exp %1319 : vector<4x32xf32>
    %cst_346 = arith.constant 1.000000e+00 : f32
    %1321 = vector.broadcast %cst_346 : f32 to vector<4x32xf32>
    %1322 = arith.addf %1321, %1320 : vector<4x32xf32>
    %1323 = arith.divf %1321, %1322 : vector<4x32xf32>
    %1324 = arith.mulf %1315, %1289 : vector<4x32xf32>
    %1325 = arith.mulf %1309, %1317 : vector<4x32xf32>
    %1326 = arith.addf %1324, %1325 : vector<4x32xf32>
    %1327 = math.tanh %1326 : vector<4x32xf32>
    %1328 = arith.mulf %1323, %1327 : vector<4x32xf32>
    %1329 = tpu.concatenate %1328, %1328 in 1 : vector<4x32xf32>, vector<4x32xf32> -> vector<4x64xf32>
    %cst_347 = arith.constant 0.000000e+00 : f32
    %1330 = vector.broadcast %cst_347 : f32 to vector<4x64xf32>
    %1331 = arith.select %1185, %1329, %1330 : vector<4x64xi1>, vector<4x64xf32>
    %1332 = vector.extract_strided_slice %1328 {offsets = [0, 0], sizes = [2, 32], strides = [1, 1]} : vector<4x32xf32> to vector<2x32xf32>
    %c6_348 = arith.constant 6 : index
    %c0_349 = arith.constant 0 : index
    %1333 = vector.load %arg20[%c6_348, %c0_349] : memref<16x64xf32, #tpu.memory_space<vmem>>, vector<2x32xf32>
    tpu.vector_store %arg20[%c6_348, %c0_349], %1332 {strides = array<i32>} : memref<16x64xf32, #tpu.memory_space<vmem>>, vector<2x32xf32>,
    %1334 = vector.extract_strided_slice %1328 {offsets = [2, 0], sizes = [2, 32], strides = [1, 1]} : vector<4x32xf32> to vector<2x32xf32>
    %c8_350 = arith.constant 8 : index
    %c32_351 = arith.constant 32 : index
    %1335 = vector.load %arg20[%c8_350, %c32_351] : memref<16x64xf32, #tpu.memory_space<vmem>>, vector<2x32xf32>
    tpu.vector_store %arg20[%c8_350, %c32_351], %1334 {strides = array<i32>} : memref<16x64xf32, #tpu.memory_space<vmem>>, vector<2x32xf32>,
    %1336 = vector.extract_strided_slice %1177 {offsets = [8, 0], sizes = [2, 128], strides = [1, 1]} : vector<16x256xf32> to vector<2x128xf32>
    %1337 = vector.extract_strided_slice %1177 {offsets = [6, 128], sizes = [2, 128], strides = [1, 1]} : vector<16x256xf32> to vector<2x128xf32>
    %1338 = tpu.concatenate %1336, %1337 in 0 : vector<2x128xf32>, vector<2x128xf32> -> vector<4x128xf32>
    %cst_352 = arith.constant dense<0.000000e+00> : vector<4x128xf32>
    %1339 = tpu.matmul %1331, %1174, %cst_352 {dimension_numbers = #tpu.dot_dimension_numbers<[1], [0], [0], [1], [0, 0, 1, 1], [], []>} : vector<4x64xf32>, vector<64x128xf32>, vector<4x128xf32> -> vector<4x128xf32>
    %1340 = arith.addf %1338, %1339 : vector<4x128xf32>
    %1341 = vector.extract_strided_slice %1340 {offsets = [0, 0], sizes = [4, 32], strides = [1, 1]} : vector<4x128xf32> to vector<4x32xf32>
    %1342 = arith.negf %1341 : vector<4x32xf32>
    %1343 = math.exp %1342 : vector<4x32xf32>
    %cst_353 = arith.constant 1.000000e+00 : f32
    %1344 = vector.broadcast %cst_353 : f32 to vector<4x32xf32>
    %1345 = arith.addf %1344, %1343 : vector<4x32xf32>
    %1346 = arith.divf %1344, %1345 : vector<4x32xf32>
    %1347 = vector.extract_strided_slice %1340 {offsets = [0, 32], sizes = [4, 32], strides = [1, 1]} : vector<4x128xf32> to vector<4x32xf32>
    %1348 = arith.negf %1347 : vector<4x32xf32>
    %1349 = math.exp %1348 : vector<4x32xf32>
    %cst_354 = arith.constant 1.000000e+00 : f32
    %1350 = vector.broadcast %cst_354 : f32 to vector<4x32xf32>
    %1351 = arith.addf %1350, %1349 : vector<4x32xf32>
    %1352 = arith.divf %1350, %1351 : vector<4x32xf32>
    %1353 = vector.extract_strided_slice %1340 {offsets = [0, 64], sizes = [4, 32], strides = [1, 1]} : vector<4x128xf32> to vector<4x32xf32>
    %1354 = math.tanh %1353 : vector<4x32xf32>
    %1355 = vector.extract_strided_slice %1340 {offsets = [0, 96], sizes = [4, 32], strides = [1, 1]} : vector<4x128xf32> to vector<4x32xf32>
    %1356 = arith.negf %1355 : vector<4x32xf32>
    %1357 = math.exp %1356 : vector<4x32xf32>
    %cst_355 = arith.constant 1.000000e+00 : f32
    %1358 = vector.broadcast %cst_355 : f32 to vector<4x32xf32>
    %1359 = arith.addf %1358, %1357 : vector<4x32xf32>
    %1360 = arith.divf %1358, %1359 : vector<4x32xf32>
    %1361 = arith.mulf %1352, %1326 : vector<4x32xf32>
    %1362 = arith.mulf %1346, %1354 : vector<4x32xf32>
    %1363 = arith.addf %1361, %1362 : vector<4x32xf32>
    %1364 = math.tanh %1363 : vector<4x32xf32>
    %1365 = arith.mulf %1360, %1364 : vector<4x32xf32>
    %1366 = tpu.concatenate %1365, %1365 in 1 : vector<4x32xf32>, vector<4x32xf32> -> vector<4x64xf32>
    %cst_356 = arith.constant 0.000000e+00 : f32
    %1367 = vector.broadcast %cst_356 : f32 to vector<4x64xf32>
    %1368 = arith.select %1185, %1366, %1367 : vector<4x64xi1>, vector<4x64xf32>
    %1369 = vector.extract_strided_slice %1365 {offsets = [0, 0], sizes = [2, 32], strides = [1, 1]} : vector<4x32xf32> to vector<2x32xf32>
    %c8_357 = arith.constant 8 : index
    %c0_358 = arith.constant 0 : index
    %1370 = vector.load %arg20[%c8_357, %c0_358] : memref<16x64xf32, #tpu.memory_space<vmem>>, vector<2x32xf32>
    tpu.vector_store %arg20[%c8_357, %c0_358], %1369 {strides = array<i32>} : memref<16x64xf32, #tpu.memory_space<vmem>>, vector<2x32xf32>,
    %1371 = vector.extract_strided_slice %1365 {offsets = [2, 0], sizes = [2, 32], strides = [1, 1]} : vector<4x32xf32> to vector<2x32xf32>
    %c6_359 = arith.constant 6 : index
    %c32_360 = arith.constant 32 : index
    %1372 = vector.load %arg20[%c6_359, %c32_360] : memref<16x64xf32, #tpu.memory_space<vmem>>, vector<2x32xf32>
    tpu.vector_store %arg20[%c6_359, %c32_360], %1371 {strides = array<i32>} : memref<16x64xf32, #tpu.memory_space<vmem>>, vector<2x32xf32>,
    %1373 = vector.extract_strided_slice %1177 {offsets = [10, 0], sizes = [2, 128], strides = [1, 1]} : vector<16x256xf32> to vector<2x128xf32>
    %1374 = vector.extract_strided_slice %1177 {offsets = [4, 128], sizes = [2, 128], strides = [1, 1]} : vector<16x256xf32> to vector<2x128xf32>
    %1375 = tpu.concatenate %1373, %1374 in 0 : vector<2x128xf32>, vector<2x128xf32> -> vector<4x128xf32>
    %cst_361 = arith.constant dense<0.000000e+00> : vector<4x128xf32>
    %1376 = tpu.matmul %1368, %1174, %cst_361 {dimension_numbers = #tpu.dot_dimension_numbers<[1], [0], [0], [1], [0, 0, 1, 1], [], []>} : vector<4x64xf32>, vector<64x128xf32>, vector<4x128xf32> -> vector<4x128xf32>
    %1377 = arith.addf %1375, %1376 : vector<4x128xf32>
    %1378 = vector.extract_strided_slice %1377 {offsets = [0, 0], sizes = [4, 32], strides = [1, 1]} : vector<4x128xf32> to vector<4x32xf32>
    %1379 = arith.negf %1378 : vector<4x32xf32>
    %1380 = math.exp %1379 : vector<4x32xf32>
    %cst_362 = arith.constant 1.000000e+00 : f32
    %1381 = vector.broadcast %cst_362 : f32 to vector<4x32xf32>
    %1382 = arith.addf %1381, %1380 : vector<4x32xf32>
    %1383 = arith.divf %1381, %1382 : vector<4x32xf32>
    %1384 = vector.extract_strided_slice %1377 {offsets = [0, 32], sizes = [4, 32], strides = [1, 1]} : vector<4x128xf32> to vector<4x32xf32>
    %1385 = arith.negf %1384 : vector<4x32xf32>
    %1386 = math.exp %1385 : vector<4x32xf32>
    %cst_363 = arith.constant 1.000000e+00 : f32
    %1387 = vector.broadcast %cst_363 : f32 to vector<4x32xf32>
    %1388 = arith.addf %1387, %1386 : vector<4x32xf32>
    %1389 = arith.divf %1387, %1388 : vector<4x32xf32>
    %1390 = vector.extract_strided_slice %1377 {offsets = [0, 64], sizes = [4, 32], strides = [1, 1]} : vector<4x128xf32> to vector<4x32xf32>
    %1391 = math.tanh %1390 : vector<4x32xf32>
    %1392 = vector.extract_strided_slice %1377 {offsets = [0, 96], sizes = [4, 32], strides = [1, 1]} : vector<4x128xf32> to vector<4x32xf32>
    %1393 = arith.negf %1392 : vector<4x32xf32>
    %1394 = math.exp %1393 : vector<4x32xf32>
    %cst_364 = arith.constant 1.000000e+00 : f32
    %1395 = vector.broadcast %cst_364 : f32 to vector<4x32xf32>
    %1396 = arith.addf %1395, %1394 : vector<4x32xf32>
    %1397 = arith.divf %1395, %1396 : vector<4x32xf32>
    %1398 = arith.mulf %1389, %1363 : vector<4x32xf32>
    %1399 = arith.mulf %1383, %1391 : vector<4x32xf32>
    %1400 = arith.addf %1398, %1399 : vector<4x32xf32>
    %1401 = math.tanh %1400 : vector<4x32xf32>
    %1402 = arith.mulf %1397, %1401 : vector<4x32xf32>
    %1403 = tpu.concatenate %1402, %1402 in 1 : vector<4x32xf32>, vector<4x32xf32> -> vector<4x64xf32>
    %cst_365 = arith.constant 0.000000e+00 : f32
    %1404 = vector.broadcast %cst_365 : f32 to vector<4x64xf32>
    %1405 = arith.select %1185, %1403, %1404 : vector<4x64xi1>, vector<4x64xf32>
    %1406 = vector.extract_strided_slice %1402 {offsets = [0, 0], sizes = [2, 32], strides = [1, 1]} : vector<4x32xf32> to vector<2x32xf32>
    %c10_366 = arith.constant 10 : index
    %c0_367 = arith.constant 0 : index
    %1407 = vector.load %arg20[%c10_366, %c0_367] : memref<16x64xf32, #tpu.memory_space<vmem>>, vector<2x32xf32>
    tpu.vector_store %arg20[%c10_366, %c0_367], %1406 {strides = array<i32>} : memref<16x64xf32, #tpu.memory_space<vmem>>, vector<2x32xf32>,
    %1408 = vector.extract_strided_slice %1402 {offsets = [2, 0], sizes = [2, 32], strides = [1, 1]} : vector<4x32xf32> to vector<2x32xf32>
    %c4_368 = arith.constant 4 : index
    %c32_369 = arith.constant 32 : index
    %1409 = vector.load %arg20[%c4_368, %c32_369] : memref<16x64xf32, #tpu.memory_space<vmem>>, vector<2x32xf32>
    tpu.vector_store %arg20[%c4_368, %c32_369], %1408 {strides = array<i32>} : memref<16x64xf32, #tpu.memory_space<vmem>>, vector<2x32xf32>,
    %1410 = vector.extract_strided_slice %1177 {offsets = [12, 0], sizes = [2, 128], strides = [1, 1]} : vector<16x256xf32> to vector<2x128xf32>
    %1411 = vector.extract_strided_slice %1177 {offsets = [2, 128], sizes = [2, 128], strides = [1, 1]} : vector<16x256xf32> to vector<2x128xf32>
    %1412 = tpu.concatenate %1410, %1411 in 0 : vector<2x128xf32>, vector<2x128xf32> -> vector<4x128xf32>
    %cst_370 = arith.constant dense<0.000000e+00> : vector<4x128xf32>
    %1413 = tpu.matmul %1405, %1174, %cst_370 {dimension_numbers = #tpu.dot_dimension_numbers<[1], [0], [0], [1], [0, 0, 1, 1], [], []>} : vector<4x64xf32>, vector<64x128xf32>, vector<4x128xf32> -> vector<4x128xf32>
    %1414 = arith.addf %1412, %1413 : vector<4x128xf32>
    %1415 = vector.extract_strided_slice %1414 {offsets = [0, 0], sizes = [4, 32], strides = [1, 1]} : vector<4x128xf32> to vector<4x32xf32>
    %1416 = arith.negf %1415 : vector<4x32xf32>
    %1417 = math.exp %1416 : vector<4x32xf32>
    %cst_371 = arith.constant 1.000000e+00 : f32
    %1418 = vector.broadcast %cst_371 : f32 to vector<4x32xf32>
    %1419 = arith.addf %1418, %1417 : vector<4x32xf32>
    %1420 = arith.divf %1418, %1419 : vector<4x32xf32>
    %1421 = vector.extract_strided_slice %1414 {offsets = [0, 32], sizes = [4, 32], strides = [1, 1]} : vector<4x128xf32> to vector<4x32xf32>
    %1422 = arith.negf %1421 : vector<4x32xf32>
    %1423 = math.exp %1422 : vector<4x32xf32>
    %cst_372 = arith.constant 1.000000e+00 : f32
    %1424 = vector.broadcast %cst_372 : f32 to vector<4x32xf32>
    %1425 = arith.addf %1424, %1423 : vector<4x32xf32>
    %1426 = arith.divf %1424, %1425 : vector<4x32xf32>
    %1427 = vector.extract_strided_slice %1414 {offsets = [0, 64], sizes = [4, 32], strides = [1, 1]} : vector<4x128xf32> to vector<4x32xf32>
    %1428 = math.tanh %1427 : vector<4x32xf32>
    %1429 = vector.extract_strided_slice %1414 {offsets = [0, 96], sizes = [4, 32], strides = [1, 1]} : vector<4x128xf32> to vector<4x32xf32>
    %1430 = arith.negf %1429 : vector<4x32xf32>
    %1431 = math.exp %1430 : vector<4x32xf32>
    %cst_373 = arith.constant 1.000000e+00 : f32
    %1432 = vector.broadcast %cst_373 : f32 to vector<4x32xf32>
    %1433 = arith.addf %1432, %1431 : vector<4x32xf32>
    %1434 = arith.divf %1432, %1433 : vector<4x32xf32>
    %1435 = arith.mulf %1426, %1400 : vector<4x32xf32>
    %1436 = arith.mulf %1420, %1428 : vector<4x32xf32>
    %1437 = arith.addf %1435, %1436 : vector<4x32xf32>
    %1438 = math.tanh %1437 : vector<4x32xf32>
    %1439 = arith.mulf %1434, %1438 : vector<4x32xf32>
    %1440 = tpu.concatenate %1439, %1439 in 1 : vector<4x32xf32>, vector<4x32xf32> -> vector<4x64xf32>
    %cst_374 = arith.constant 0.000000e+00 : f32
    %1441 = vector.broadcast %cst_374 : f32 to vector<4x64xf32>
    %1442 = arith.select %1185, %1440, %1441 : vector<4x64xi1>, vector<4x64xf32>
    %1443 = vector.extract_strided_slice %1439 {offsets = [0, 0], sizes = [2, 32], strides = [1, 1]} : vector<4x32xf32> to vector<2x32xf32>
    %c12_375 = arith.constant 12 : index
    %c0_376 = arith.constant 0 : index
    %1444 = vector.load %arg20[%c12_375, %c0_376] : memref<16x64xf32, #tpu.memory_space<vmem>>, vector<2x32xf32>
    tpu.vector_store %arg20[%c12_375, %c0_376], %1443 {strides = array<i32>} : memref<16x64xf32, #tpu.memory_space<vmem>>, vector<2x32xf32>,
    %1445 = vector.extract_strided_slice %1439 {offsets = [2, 0], sizes = [2, 32], strides = [1, 1]} : vector<4x32xf32> to vector<2x32xf32>
    %c2_377 = arith.constant 2 : index
    %c32_378 = arith.constant 32 : index
    %1446 = vector.load %arg20[%c2_377, %c32_378] : memref<16x64xf32, #tpu.memory_space<vmem>>, vector<2x32xf32>
    tpu.vector_store %arg20[%c2_377, %c32_378], %1445 {strides = array<i32>} : memref<16x64xf32, #tpu.memory_space<vmem>>, vector<2x32xf32>,
    %1447 = vector.extract_strided_slice %1177 {offsets = [14, 0], sizes = [2, 128], strides = [1, 1]} : vector<16x256xf32> to vector<2x128xf32>
    %1448 = vector.extract_strided_slice %1177 {offsets = [0, 128], sizes = [2, 128], strides = [1, 1]} : vector<16x256xf32> to vector<2x128xf32>
    %1449 = tpu.concatenate %1447, %1448 in 0 : vector<2x128xf32>, vector<2x128xf32> -> vector<4x128xf32>
    %cst_379 = arith.constant dense<0.000000e+00> : vector<4x128xf32>
    %1450 = tpu.matmul %1442, %1174, %cst_379 {dimension_numbers = #tpu.dot_dimension_numbers<[1], [0], [0], [1], [0, 0, 1, 1], [], []>} : vector<4x64xf32>, vector<64x128xf32>, vector<4x128xf32> -> vector<4x128xf32>
    %1451 = arith.addf %1449, %1450 : vector<4x128xf32>
    %1452 = vector.extract_strided_slice %1451 {offsets = [0, 0], sizes = [4, 32], strides = [1, 1]} : vector<4x128xf32> to vector<4x32xf32>
    %1453 = arith.negf %1452 : vector<4x32xf32>
    %1454 = math.exp %1453 : vector<4x32xf32>
    %cst_380 = arith.constant 1.000000e+00 : f32
    %1455 = vector.broadcast %cst_380 : f32 to vector<4x32xf32>
    %1456 = arith.addf %1455, %1454 : vector<4x32xf32>
    %1457 = arith.divf %1455, %1456 : vector<4x32xf32>
    %1458 = vector.extract_strided_slice %1451 {offsets = [0, 32], sizes = [4, 32], strides = [1, 1]} : vector<4x128xf32> to vector<4x32xf32>
    %1459 = arith.negf %1458 : vector<4x32xf32>
    %1460 = math.exp %1459 : vector<4x32xf32>
    %cst_381 = arith.constant 1.000000e+00 : f32
    %1461 = vector.broadcast %cst_381 : f32 to vector<4x32xf32>
    %1462 = arith.addf %1461, %1460 : vector<4x32xf32>
    %1463 = arith.divf %1461, %1462 : vector<4x32xf32>
    %1464 = vector.extract_strided_slice %1451 {offsets = [0, 64], sizes = [4, 32], strides = [1, 1]} : vector<4x128xf32> to vector<4x32xf32>
    %1465 = math.tanh %1464 : vector<4x32xf32>
    %1466 = vector.extract_strided_slice %1451 {offsets = [0, 96], sizes = [4, 32], strides = [1, 1]} : vector<4x128xf32> to vector<4x32xf32>
    %1467 = arith.negf %1466 : vector<4x32xf32>
    %1468 = math.exp %1467 : vector<4x32xf32>
    %cst_382 = arith.constant 1.000000e+00 : f32
    %1469 = vector.broadcast %cst_382 : f32 to vector<4x32xf32>
    %1470 = arith.addf %1469, %1468 : vector<4x32xf32>
    %1471 = arith.divf %1469, %1470 : vector<4x32xf32>
    %1472 = arith.mulf %1463, %1437 : vector<4x32xf32>
    %1473 = arith.mulf %1457, %1465 : vector<4x32xf32>
    %1474 = arith.addf %1472, %1473 : vector<4x32xf32>
    %1475 = math.tanh %1474 : vector<4x32xf32>
    %1476 = arith.mulf %1471, %1475 : vector<4x32xf32>
    %1477 = vector.extract_strided_slice %1476 {offsets = [0, 0], sizes = [2, 32], strides = [1, 1]} : vector<4x32xf32> to vector<2x32xf32>
    %c14_383 = arith.constant 14 : index
    %c0_384 = arith.constant 0 : index
    %1478 = vector.load %arg20[%c14_383, %c0_384] : memref<16x64xf32, #tpu.memory_space<vmem>>, vector<2x32xf32>
    tpu.vector_store %arg20[%c14_383, %c0_384], %1477 {strides = array<i32>} : memref<16x64xf32, #tpu.memory_space<vmem>>, vector<2x32xf32>,
    %1479 = vector.extract_strided_slice %1476 {offsets = [2, 0], sizes = [2, 32], strides = [1, 1]} : vector<4x32xf32> to vector<2x32xf32>
    %c0_385 = arith.constant 0 : index
    %c32_386 = arith.constant 32 : index
    %1480 = vector.load %arg20[%c0_385, %c32_386] : memref<16x64xf32, #tpu.memory_space<vmem>>, vector<2x32xf32>
    tpu.vector_store %arg20[%c0_385, %c32_386], %1479 {strides = array<i32>} : memref<16x64xf32, #tpu.memory_space<vmem>>, vector<2x32xf32>,
    %c0_387 = arith.constant 0 : index
    %c0_388 = arith.constant 0 : index
    %1481 = vector.load %arg20[%c0_387, %c0_388] : memref<16x64xf32, #tpu.memory_space<vmem>>, vector<16x64xf32>
    %c0_389 = arith.constant 0 : index
    %c0_390 = arith.constant 0 : index
    %1482 = vector.load %arg16[%c0_389, %c0_390] : memref<64x14xf32, #tpu.memory_space<vmem>>, vector<64x14xf32>
    %cst_391 = arith.constant dense<0.000000e+00> : vector<16x14xf32>
    %1483 = tpu.matmul %1481, %1482, %cst_391 {dimension_numbers = #tpu.dot_dimension_numbers<[1], [0], [0], [1], [0, 0, 1, 1], [], []>} : vector<16x64xf32>, vector<64x14xf32>, vector<16x14xf32> -> vector<16x14xf32>
    %c0_392 = arith.constant 0 : index
    %c0_393 = arith.constant 0 : index
    %1484 = vector.load %arg17[%c0_392, %c0_393] : memref<1x14xf32, #tpu.memory_space<vmem>>, vector<1x14xf32>
    %1485 = vector.broadcast %1484 : vector<1x14xf32> to vector<16x14xf32>
    %1486 = arith.addf %1483, %1485 : vector<16x14xf32>
    %c0_394 = arith.constant 0 : index
    %c0_395 = arith.constant 0 : index
    %1487 = vector.load %arg18[%c0_394, %c0_395] : memref<16x14xf32, #tpu.memory_space<vmem>>, vector<16x14xf32>
    tpu.vector_store %arg18[%c0_394, %c0_395], %1486 {strides = array<i32>} : memref<16x14xf32, #tpu.memory_space<vmem>>, vector<16x14xf32>,
    return
  }
}

</mosaic_0001>

<bundles_post_ra>
// kernel: ae_forward.1
= control target key start
LH: loop header
LB: loop body
LE: loop exit
PB: predicated region body
PF: predicated region fallthrough
CT: control target
= control target key end

     0   :  { %s8836_s0 = inlined_call_operand.vmem [shape: f32[16,14], index: 0, kind: input, shape index: {}]   ;;  %s8837_s1 = inlined_call_operand.hbm [shape: f32[14,256], index: 1, kind: input, shape index: {}]   ;;  %s8838_s2 = inlined_call_operand.vmem [shape: f32[1,256], index: 2, kind: input, shape index: {}]   ;;  %s8839_s3 = inlined_call_operand.hbm [shape: f32[64,128], index: 3, kind: input, shape index: {}]   ;;  %s8840_s4 = inlined_call_operand.vmem [shape: f32[64,256], index: 4, kind: input, shape index: {}]   ;;  %s8841_s5 = inlined_call_operand.hbm [shape: f32[1,256], index: 5, kind: input, shape index: {}]   ;;  %s8842_s6 = inlined_call_operand.hbm [shape: f32[64,128], index: 6, kind: input, shape index: {}]   ;;  %s8843_s7 = inlined_call_operand.hbm [shape: f32[64,128], index: 7, kind: input, shape index: {}]   ;;  %s8844_s8 = inlined_call_operand.hbm [shape: f32[1,128], index: 8, kind: input, shape index: {}]   ;;  %s8845_s9 = inlined_call_operand.hbm [shape: f32[32,128], index: 9, kind: input, shape index: {}]   ;;  %s8846_s10 = inlined_call_operand.hbm [shape: f32[32,256], index: 10, kind: input, shape index: {}]   ;;  %s8847_s11 = inlined_call_operand.hbm [shape: f32[1,256], index: 11, kind: input, shape index: {}]   ;;  %s8848_s12 = inlined_call_operand.hbm [shape: f32[64,128], index: 12, kind: input, shape index: {}]   ;;  %s8849_s13 = inlined_call_operand.hbm [shape: f32[64,256], index: 13, kind: input, shape index: {}]   ;;  %s8850_s14 = inlined_call_operand.hbm [shape: f32[1,256], index: 14, kind: input, shape index: {}]   ;;  %s8851_s15 = inlined_call_operand.hbm [shape: f32[64,128], index: 15, kind: input, shape index: {}]   ;;  %s8852_s16 = inlined_call_operand.vmem [shape: f32[64,14], index: 16, kind: input, shape index: {}]   ;;  %s8853_s17 = inlined_call_operand.hbm [shape: f32[1,14], index: 17, kind: input, shape index: {}]   ;;  %s8854_s18 = inlined_call_operand.vmem [shape: f32[16,14], index: 18, kind: output, shape index: {}]  }
   0x1   :  { %8856 = sst [smem:[#allocation35_spill]] %s8836_s0 }
   0x2   :  { %8857 = sst [smem:[#allocation36_spill]] %s8837_s1 }
   0x3   :  { %8858 = sst [smem:[#allocation37_spill]] %s8838_s2 }
   0x4   :  { %23 = vsyncpa [#allocation6], 0 }
   0x5   :  { %24 = vsyncpa [#allocation8], 0 }
   0x6   :  { %25 = vsyncpa [#allocation11], 0 }
   0x7   :  { %26 = vsyncpa [#allocation14], 0 }
   0x8   :  { %27 = vsyncpa [#allocation17], 0 }
   0x9   :  { %28 = vsyncpa [#allocation20], 0 }
   0xa   :  { %29 = vsyncpa [#allocation23], 0 }
   0xb   :  { %30 = vsyncpa [#allocation26], 0  ;;  %s7238_s27 = smov [#allocation7]  }
   0xc   :  { %s52_s28 = sshll.u32 %s7238_s27, 4  ;;  %s53_s28 = int_to_ptr.vmem [resolvable:$true] %s52_s28 }
   0xd   :  { %s6950_s29 = scalar_lea.vmem %s53_s28, 1024  ;;  %p6955_p1 = scmp.lt.s32.totalorder %s53_s28, %s53_s28 }
   0xe   :  { %p6951_p0 = scmp.ne.s32.totalorder %s53_s28, %s6950_s29  ;;  %p6956_p2 = scmp.lt.s32.totalorder %s6950_s29, %s6950_s29 }
  0x10   :  { %p6957_p3 = por %p6956_p2, %p6955_p1 }
  0x12   :  { %p6958_p4 = pnand %p6957_p3, %p6951_p0 }
  0x14   :  { %6961 = shalt.err (!%p6958_p4)
}
  0x15   :  { %s7239_s30 = smov 128   ;;  %s7240_s0 = smov 8  }
  0x16   :  { %58 = dma.hbm_to_vmem [thread:$0]  %s8839_s3, 1024, %s53_s28, [#allocation8], %s7239_s30, %s7239_s30, %s7240_s0  }
  0x17   :  { %s7241_s20 = smov [#allocation10]   ;;  %s7242_s22 = smov [#allocation13]  }
  0x18   :  { %s76_s21 = sshll.u32 %s7241_s20, 4  ;;  %s101_s2 = sshll.u32 %s7242_s22, 4  ;;  %s77_s21 = int_to_ptr.vmem [resolvable:$true] %s76_s21  ;;  %s102_s2 = int_to_ptr.vmem [resolvable:$true] %s101_s2 }
  0x19   :  { %s6970_s23 = scalar_lea.vmem %s77_s21, 1024  ;;  %p6975_p6 = scmp.lt.s32.totalorder %s77_s21, %s77_s21 }
  0x1a   :  { %p6971_p5 = scmp.ne.s32.totalorder %s77_s21, %s6970_s23  ;;  %p6976_p7 = scmp.lt.s32.totalorder %s6970_s23, %s6970_s23 }
  0x1c   :  { %p6977_p8 = por %p6976_p7, %p6975_p6 }
  0x1e   :  { %p6978_p9 = pnand %p6977_p8, %p6971_p5 }
  0x20   :  { %6981 = shalt.err (!%p6978_p9)
}
  0x21   :  { %82 = dma.hbm_to_vmem [thread:$0]  %s8842_s6, 1024, %s77_s21, [#allocation11], %s7239_s30, %s7239_s30, %s7240_s0  }
  0x22   :  { %s6990_s3 = scalar_lea.vmem %s102_s2, 16  ;;  %s6994_s26 = scalar_lea.vmem %s102_s2, 32 }
  0x23   :  { %p6991_p10 = scmp.ne.s32.totalorder %s102_s2, %s6990_s3  ;;  %p6995_p11 = scmp.lt.s32.totalorder %s102_s2, %s102_s2 }
  0x24   :  { %p6996_p12 = scmp.lt.s32.totalorder %s6994_s26, %s6990_s3 }
  0x26   :  { %p6997_p13 = por %p6996_p12, %p6995_p11 }
  0x28   :  { %p6998_p0 = pnand %p6997_p13, %p6991_p10 }
  0x2a   :  { %7001 = shalt.err (!%p6998_p0)
}
  0x2b   :  { %104 = dma.hbm_to_vmem [thread:$0]  %s8844_s8, 16, %s102_s2, [#allocation14]  }
  0x2c   :  { %s7243_s29 = smov [#allocation16]   ;;  %s7244_s1 = smov [#allocation19]  }
  0x2d   :  { %s122_s19 = sshll.u32 %s7243_s29, 4  ;;  %s144_s20 = sshll.u32 %s7244_s1, 4  ;;  %s123_s19 = int_to_ptr.vmem [resolvable:$true] %s122_s19  ;;  %s145_s20 = int_to_ptr.vmem [resolvable:$true] %s144_s20 }
  0x2e   :  { %s7010_s22 = scalar_lea.vmem %s123_s19, 1024  ;;  %p7015_p2 = scmp.lt.s32.totalorder %s123_s19, %s123_s19 }
  0x2f   :  { %p7011_p1 = scmp.ne.s32.totalorder %s123_s19, %s7010_s22  ;;  %p7016_p3 = scmp.lt.s32.totalorder %s7010_s22, %s7010_s22 }
  0x31   :  { %p7017_p4 = por %p7016_p3, %p7015_p2 }
  0x33   :  { %p7018_p5 = pnand %p7017_p4, %p7011_p1 }
  0x35   :  { %7021 = shalt.err (!%p7018_p5)
}
  0x36   :  { %s7245_s6 = smov 256   ;;  %s7246_s21 = smov 16  }
  0x37   :  { %128 = dma.hbm_to_vmem [thread:$0]  %s8846_s10, 1024, %s123_s19, [#allocation17], %s7245_s6, %s7245_s6, %s7246_s21  }
  0x38   :  { %s7030_s8 = scalar_lea.vmem %s145_s20, 1024  ;;  %p7035_p7 = scmp.lt.s32.totalorder %s145_s20, %s145_s20 }
  0x39   :  { %p7031_p6 = scmp.ne.s32.totalorder %s145_s20, %s7030_s8  ;;  %p7036_p8 = scmp.lt.s32.totalorder %s7030_s8, %s7030_s8 }
  0x3b   :  { %p7037_p9 = por %p7036_p8, %p7035_p7 }
  0x3d   :  { %p7038_p10 = pnand %p7037_p9, %p7031_p6 }
  0x3f   :  { %7041 = shalt.err (!%p7038_p10)
}
  0x40   :  { %150 = dma.hbm_to_vmem [thread:$0]  %s8848_s12, 1024, %s145_s20, [#allocation20], %s7239_s30, %s7239_s30, %s7240_s0  }
  0x41   :  { %s7247_s3 = smov [#allocation22]   ;;  %s7248_s27 = smov [#allocation5]  }
  0x42   :  { %s169_s26 = sshll.u32 %s7247_s3, 4  ;;  %s38_s10 = sshll.u32 %s7248_s27, 4  ;;  %s170_s26 = int_to_ptr.vmem [resolvable:$true] %s169_s26  ;;  %s39_s10 = int_to_ptr.vmem [resolvable:$true] %s38_s10 }
  0x43   :  { %s7050_s28 = scalar_lea.vmem %s170_s26, 32  ;;  %p7055_p12 = scmp.lt.s32.totalorder %s170_s26, %s170_s26 }
  0x44   :  { %p7051_p11 = scmp.ne.s32.totalorder %s170_s26, %s7050_s28  ;;  %p7056_p13 = scmp.lt.s32.totalorder %s7050_s28, %s7050_s28 }
  0x46   :  { %p7057_p0 = por %p7056_p13, %p7055_p12 }
  0x48   :  { %p7058_p1 = pnand %p7057_p0, %p7051_p11 }
  0x4a   :  { %7061 = shalt.err (!%p7058_p1)
}
  0x4b   :  { %172 = dma.hbm_to_vmem [thread:$0]  %s8850_s14, 32, %s170_s26, [#allocation23]  }
  0x4c   :  { %s7070_s1 = scalar_lea.vmem %s39_s10, 512  ;;  %p7075_p3 = scmp.lt.s32.totalorder %s39_s10, %s39_s10 }
  0x4d   :  { %p7071_p2 = scmp.ne.s32.totalorder %s39_s10, %s7070_s1  ;;  %p7076_p4 = scmp.lt.s32.totalorder %s7070_s1, %s7070_s1 }
  0x4f   :  { %p7077_p5 = por %p7076_p4, %p7075_p3 }
  0x51   :  { %p7078_p6 = pnand %p7077_p5, %p7071_p2 }
  0x53   :  { %7081 = shalt.err (!%p7078_p6)
}
  0x54   :  { %s8859_s22 = sld [smem:[#allocation36_spill]]  ;;  %s7249_s23 = smov [#allocation9]  }
  0x55   :  { %s67_s24 = sshll.u32 %s7249_s23, 4  ;;  %s7250_s8 = smov [#allocation12]   ;;  %s68_s24 = int_to_ptr.vmem [resolvable:$true] %s67_s24 }
  0x56   :  { %s88_s14 = sshll.u32 %s7250_s8, 4  ;;  %s7090_s2 = scalar_lea.vmem %s68_s24, 32  ;;  %s89_s14 = int_to_ptr.vmem [resolvable:$true] %s88_s14 }
  0x57   :  { %p7091_p7 = scmp.ne.s32.totalorder %s68_s24, %s7090_s2  ;;  %p7095_p8 = scmp.lt.s32.totalorder %s68_s24, %s68_s24 }
  0x58   :  { %p7096_p9 = scmp.lt.s32.totalorder %s7090_s2, %s7090_s2 }
  0x5a   :  { %44 = dma.hbm_to_vmem [thread:$0]  %s8859_s22, 512, %s39_s10, [#allocation6], %s7245_s6, %s7245_s6, %s7246_s21  }
  0x5b   :  { %p7097_p10 = por %p7096_p9, %p7095_p8 }
  0x5d   :  { %p7098_p11 = pnand %p7097_p10, %p7091_p7 }
  0x5f   :  { %7101 = shalt.err (!%p7098_p11)
}
  0x60   :  { %70 = dma.hbm_to_vmem [thread:$0]  %s8841_s5, 32, %s68_s24, [#allocation8]  }
  0x61   :  { %s7110_s26 = scalar_lea.vmem %s89_s14, 1024  ;;  %p7115_p13 = scmp.lt.s32.totalorder %s89_s14, %s89_s14 }
  0x62   :  { %p7111_p12 = scmp.ne.s32.totalorder %s89_s14, %s7110_s26  ;;  %p7116_p0 = scmp.lt.s32.totalorder %s7110_s26, %s7110_s26 }
  0x64   :  { %p7117_p1 = por %p7116_p0, %p7115_p13 }
  0x66   :  { %p7118_p2 = pnand %p7117_p1, %p7111_p12 }
  0x68   :  { %7121 = shalt.err (!%p7118_p2)
}
  0x69   :  { %94 = dma.hbm_to_vmem [thread:$0]  %s8843_s7, 1024, %s89_s14, [#allocation11], %s7239_s30, %s7239_s30, %s7240_s0  }
  0x6a   :  { %s7251_s28 = smov [#allocation15]   ;;  %s7252_s19 = smov [#allocation18]  }
  0x6b   :  { %s110_s29 = sshll.u32 %s7251_s28, 4  ;;  %s135_s5 = sshll.u32 %s7252_s19, 4  ;;  %s111_s29 = int_to_ptr.vmem [resolvable:$true] %s110_s29  ;;  %s136_s5 = int_to_ptr.vmem [resolvable:$true] %s135_s5 }
  0x6c   :  { %s7130_s1 = scalar_lea.vmem %s111_s29, 512  ;;  %p7135_p4 = scmp.lt.s32.totalorder %s111_s29, %s111_s29 }
  0x6d   :  { %p7131_p3 = scmp.ne.s32.totalorder %s111_s29, %s7130_s1  ;;  %p7136_p5 = scmp.lt.s32.totalorder %s7130_s1, %s7130_s1 }
  0x6f   :  { %p7137_p6 = por %p7136_p5, %p7135_p4 }
  0x71   :  { %p7138_p7 = pnand %p7137_p6, %p7131_p3 }
  0x73   :  { %7141 = shalt.err (!%p7138_p7)
}
  0x74   :  { %116 = dma.hbm_to_vmem [thread:$0]  %s8845_s9, 512, %s111_s29, [#allocation14], %s7239_s30, %s7239_s30, %s7240_s0  }
  0x75   :  { %s7150_s7 = scalar_lea.vmem %s136_s5, 32  ;;  %p7155_p9 = scmp.lt.s32.totalorder %s136_s5, %s136_s5 }
  0x76   :  { %p7151_p8 = scmp.ne.s32.totalorder %s136_s5, %s7150_s7  ;;  %p7156_p10 = scmp.lt.s32.totalorder %s7150_s7, %s7150_s7 }
  0x78   :  { %p7157_p11 = por %p7156_p10, %p7155_p9 }
  0x7a   :  { %p7158_p12 = pnand %p7157_p11, %p7151_p8 }
  0x7c   :  { %7161 = shalt.err (!%p7158_p12)
}
  0x7d   :  { %138 = dma.hbm_to_vmem [thread:$0]  %s8847_s11, 32, %s136_s5, [#allocation17]  }
  0x7e   :  { %s7253_s24 = smov [#allocation21]   ;;  %s7254_s14 = smov [#allocation24]  }
  0x7f   :  { %s156_s8 = sshll.u32 %s7253_s24, 4  ;;  %s178_s2 = sshll.u32 %s7254_s14, 4  ;;  %s157_s8 = int_to_ptr.vmem [resolvable:$true] %s156_s8  ;;  %s179_s2 = int_to_ptr.vmem [resolvable:$true] %s178_s2 }
  0x80   :  { %s7170_s25 = scalar_lea.vmem %s157_s8, 2048  ;;  %p7175_p0 = scmp.lt.s32.totalorder %s157_s8, %s157_s8 }
  0x81   :  { %p7171_p13 = scmp.ne.s32.totalorder %s157_s8, %s7170_s25  ;;  %p7176_p1 = scmp.lt.s32.totalorder %s7170_s25, %s7170_s25 }
  0x83   :  { %p7177_p2 = por %p7176_p1, %p7175_p0 }
  0x85   :  { %p7178_p3 = pnand %p7177_p2, %p7171_p13 }
  0x87   :  { %7181 = shalt.err (!%p7178_p3)
}
  0x88   :  { %162 = dma.hbm_to_vmem [thread:$0]  %s8849_s13, 2048, %s157_s8, [#allocation20], %s7245_s6, %s7245_s6, %s7246_s21  }
  0x89   :  { %s7190_s11 = scalar_lea.vmem %s179_s2, 1024  ;;  %p7195_p5 = scmp.lt.s32.totalorder %s179_s2, %s179_s2 }
  0x8a   :  { %p7191_p4 = scmp.ne.s32.totalorder %s179_s2, %s7190_s11  ;;  %p7196_p6 = scmp.lt.s32.totalorder %s7190_s11, %s7190_s11 }
  0x8c   :  { %p7197_p7 = por %p7196_p6, %p7195_p5 }
  0x8e   :  { %p7198_p8 = pnand %p7197_p7, %p7191_p4 }
  0x90   :  { %7201 = shalt.err (!%p7198_p8)
}
  0x91   :  { %184 = dma.hbm_to_vmem [thread:$0]  %s8851_s15, 1024, %s179_s2, [#allocation23], %s7239_s30, %s7239_s30, %s7240_s0  }
  0x92   :  { %s7255_s10 = smov [#allocation25]  }
  0x93   :  { %s193_s28 = sshll.u32 %s7255_s10, 4  ;;  %s194_s28 = int_to_ptr.vmem [resolvable:$true] %s193_s28 }
  0x94   :  { %s7210_s29 = scalar_lea.vmem %s194_s28, 16  ;;  %s7214_s13 = scalar_lea.vmem %s194_s28, 32 }
  0x95   :  { %p7211_p9 = scmp.ne.s32.totalorder %s194_s28, %s7210_s29  ;;  %p7215_p10 = scmp.lt.s32.totalorder %s194_s28, %s194_s28 }
  0x96   :  { %p7216_p11 = scmp.lt.s32.totalorder %s7214_s13, %s7210_s29 }
  0x98   :  { %p7217_p12 = por %p7216_p11, %p7215_p10 }
  0x9a   :  { %p7218_p13 = pnand %p7217_p12, %p7211_p9 }
  0x9c   :  { %7221 = shalt.err (!%p7218_p13)
}
  0x9d   :  { %196 = dma.hbm_to_vmem [thread:$0]  %s8853_s17, 16, %s194_s28, [#allocation26]  }
  0x9e   :  { %7222 = dma.done.wait [#allocation6], 512  }
  0x9f   :  { %7223 = vsyncadd [#allocation6], 4294966784 }
  0xa0   :  { %7224 = dma.done.wait [#allocation8], 1056  }
  0xa1   :  { %7225 = vsyncadd [#allocation8], 4294966240 }
  0xa2   :  { %7226 = dma.done.wait [#allocation11], 2048  }
  0xa3   :  { %7227 = vsyncadd [#allocation11], 4294965248 }
  0xa4   :  { %7228 = dma.done.wait [#allocation14], 528  }
  0xa5   :  { %7229 = vsyncadd [#allocation14], 4294966768 }
  0xa6   :  { %7230 = dma.done.wait [#allocation17], 1056  }
  0xa7   :  { %7231 = vsyncadd [#allocation17], 4294966240 }
  0xa8   :  { %7232 = dma.done.wait [#allocation20], 3072  }
  0xa9   :  { %7233 = vsyncadd [#allocation20], 4294964224 }
  0xaa   :  { %7234 = dma.done.wait [#allocation23], 1056  }
  0xab   :  { %7235 = vsyncadd [#allocation23], 4294966240 }
  0xac   :  { %7236 = dma.done.wait [#allocation26], 16  }
  0xad   :  { %7237 = vsyncadd [#allocation26], 4294967280  ;;  %v7256_v0 = vmov 0.0   ;;  %vm7257_vm0 = vmmov 0   ;;  %vm272_vm1 = vcmask 1045504   ;;  %v7429_v2 = vld [vmem:[#allocation7 + $0x38] sm:$0xff]  ;;  %v255_v15 = vlaneseq }
  0xae   :  { %5865 = vmatprep.subr.mxu1 %v7256_v0  ;;  %343 = vmatprep.mubr.f32.mxu0 %v7256_v0  ;;  %v244_v1 = vld [vmem:[#allocation5 + $0x18] sm:$0x3f]  ;;  %v243_v3 = vld [vmem:[#allocation5 + $0x10] sm:$0x3f]  ;;  %v242_v4 = vld [vmem:[#allocation5 + $0x8] sm:$0xff]  ;;  %s8860_s30 = sld [smem:[#allocation35_spill]] }
  0xaf   :  { %5881 = vmatprep.mubr.msk.f32.mxu1 %vm7257_vm0, %v7256_v0  ;;  %5426 = vmatprep.subr.msk.mxu0 %vm272_vm1, %v244_v1  ;;  %v7432_v5 = vld [vmem:[#allocation7 + $0x30] sm:$0xff]  ;;  %v241_v6 = vld [vmem:[#allocation5] sm:$0xff]  ;;  %vm265_vm2 = vcmask 113664   ;;  %v7438_v8 = vld [vmem:[#allocation7 + $0x28] sm:$0xff]  ;;  %v7508_v16 = vshrl.u32 %v255_v15, 7  ;;  %s8861_s12 = sld [smem:[#allocation37_spill]] }
  0xb0   :  { %5866 = vmatpush3.msra.mxu1 %v7429_v2  ;;  %5427 = vmatpush1.msk.msra.mxu0 %vm272_vm1, %v243_v3  ;;  %v7442_v9 = vld [vmem:[#allocation7 + $0x20] sm:$0xff]  ;;  %v7451_v11 = vld [vmem:[#allocation7 + $0x18] sm:$0xff]  ;;  %v7456_v12 = vld [vmem:[#allocation7 + $0x10] sm:$0xff]  ;;  %vm367_vm3 = vcmask 1041408   ;;  %s7258_s20 = smov 64   ;;  %s7259_s7 = smov 32  }
  0xb1   :  { %5867 = vmatprep.subr.mxu1 %v7256_v0  ;;  %309 = vmatprep.subr.mxu0 %v242_v4  ;;  %v7462_v13 = vld [vmem:[#allocation7 + $0x8] sm:$0xff]  ;;  %v7468_v14 = vld [vmem:[#allocation7] sm:$0xff]  ;;  %v7511_v17 = vsub.s32 0, %v7508_v16  ;;  %v7517_v19 = vsub.s32 1, %v7508_v16  ;;  %v359_v4 = vand.u32 127, %v255_v15  ;;  %vm360_vm4 = vcmp.lt.s32.totalorder %v7508_v16, 2 }
  0xb2   :  { %5868 = vmatpush3.msra.mxu1 %v7432_v5  ;;  %310 = vmatpush1.msra.mxu0 %v241_v6  ;;  %vm480_vm7 = vcmask 519426   ;;  %vm475_vm8 = vcmask 261120   ;;  %vm478_vm9 = vcmask 254976   ;;  %vm7260_vm10 = vmmov 1  }
  0xb3   :  { %5869 = vmatprep.subr.mxu1 %v7256_v0  ;;  %5884 = vmatprep.subr.mxu0 %v7256_v0  ;;  %vm361_vm5 = vcmp.lt.s32.totalorder %v359_v4, 32  ;;  %vm369_vm12 = vcmask 523264   ;;  %vm2610_vm13 = vcmask 257026   ;;  %vm2834_vm14 = vcmask 261126  }
  0xb4   :  { %v239_v7 = vld [vmem:[%s8860_s30] sm:$0xff]  ;;  %5870 = vmatpush3.msra.mxu1 %v7438_v8  ;;  %v240_v10 = vld [vmem:[%s8860_s30 + $0x8] sm:$0xff]  ;;  %vm362_vm6 = vmxor %vm360_vm4, %vm361_vm5  ;;  %vm2722_vm15 = vcmask 259076  }
  0xb5   :  { %5428 = vmatmul.mubr.msk.f32.vlgmr.msra.gmra.mxu0 %vm265_vm2, %v239_v7  ;;  %5871 = vmatprep.subr.mxu1 %v7256_v0  ;;  %v245_v18 = vld [vmem:[%s8861_s12] sm:$0x3]  ;;  %vm7549_vm11 = vmxor %vm362_vm6, %vm7260_vm10 }
  0xb6   :  { %349 = vmatprep.mubr.f32.mxu0 %v7256_v0  ;;  %5872 = vmatpush3.msra.mxu1 %v7442_v9  ;;  %v258_v20 = vrot.slane %v245_v18, %v7511_v17  ;;  %v262_v21 = vrot.slane %v245_v18, %v7517_v19 }
  0xb7   :  { %5873 = vmatprep.subr.mxu1 %v7256_v0  ;;  %5885 = vmatpush3.msra.mxu0 %v7429_v2 }
  0xb8   :  { %5874 = vmatpush3.msra.mxu1 %v7451_v11  ;;  %5886 = vmatprep.subr.mxu0 %v7256_v0 }
  0xb9   :  { %5429 = vmatmul.mubr.msk.f32.gmra.mxu0 %vm265_vm2, %v240_v10  ;;  %5875 = vmatprep.subr.mxu1 %v7256_v0 }
  0xba   :  { %5876 = vmatpush3.msra.mxu1 %v7456_v12  ;;  %5887 = vmatpush3.msra.mxu0 %v7432_v5 }
  0xbb   :  { %5877 = vmatprep.subr.mxu1 %v7256_v0  ;;  %5888 = vmatprep.subr.mxu0 %v7256_v0 }
  0xbc   :  { %5878 = vmatpush3.msra.mxu1 %v7462_v13  ;;  %5889 = vmatpush3.msra.mxu0 %v7438_v8 }
  0xbd   :  { %5879 = vmatprep.subr.mxu1 %v7256_v0  ;;  %5890 = vmatprep.subr.mxu0 %v7256_v0 }
  0xbe   :  { %5880 = vmatpush3.msra.mxu1 %v7468_v14  ;;  %5891 = vmatpush3.msra.mxu0 %v7442_v9 }
  0xbf   :  { %5882 = vmatmul.mubr.f32.vlgmr.msra.gmra.mxu1 %v7256_v0  ;;  %5892 = vmatprep.subr.mxu0 %v7256_v0 }
  0xc0   :  { %5893 = vmatpush3.msra.mxu0 %v7451_v11  ;;  %5900 = vmatprep.mubr.msk.f32.mxu0 %vm7257_vm0, %v7256_v0 }
  0xc1   :  { %5894 = vmatprep.subr.mxu0 %v7256_v0  ;;  %5903 = vmatprep.subr.mxu1 %v7256_v0 }
  0xc2   :  { %5895 = vmatpush3.msra.mxu0 %v7456_v12  ;;  %5904 = vmatpush3.msra.mxu1 %v7429_v2 }
  0xc3   :  { %5896 = vmatprep.subr.mxu0 %v7256_v0  ;;  %5905 = vmatprep.subr.mxu1 %v7256_v0 }
  0xc4   :  { %5897 = vmatpush3.msra.mxu0 %v7462_v13  ;;  %5906 = vmatpush3.msra.mxu1 %v7432_v5 }
  0xc5   :  { %5898 = vmatprep.subr.mxu0 %v7256_v0  ;;  %5907 = vmatprep.subr.mxu1 %v7256_v0 }
  0xc6   :  { %5899 = vmatpush3.msra.mxu0 %v7468_v14  ;;  %5908 = vmatpush3.msra.mxu1 %v7438_v8 }
  0xc7   :  { %5909 = vmatprep.subr.mxu1 %v7256_v0  ;;  %5919 = vmatprep.mubr.msk.f32.mxu1 %vm7257_vm0, %v7256_v0 }
  0xc8   :  { %5910 = vmatpush3.msra.mxu1 %v7442_v9  ;;  %5922 = vmatprep.subr.mxu0 %v7256_v0 }
  0xc9   :  { %5911 = vmatprep.subr.mxu1 %v7256_v0 }
  0xca   :  { %5912 = vmatpush3.msra.mxu1 %v7451_v11 }
  0xcb   :  { %5913 = vmatprep.subr.mxu1 %v7256_v0 }
  0xcc   :  { %5914 = vmatpush3.msra.mxu1 %v7456_v12 }
  0xcd   :  { %5915 = vmatprep.subr.mxu1 %v7256_v0 }
  0xce   :  { %5916 = vmatpush3.msra.mxu1 %v7462_v13 }
  0xcf   :  { %5917 = vmatprep.subr.mxu1 %v7256_v0 }
  0xd0   :  { %5918 = vmatpush3.msra.mxu1 %v7468_v14 }
  0xd1   :  { %5941 = vmatprep.subr.mxu1 %v7256_v0 }
 0x175   :  { %v345_v22 = vpop.f32.mrf.mxu0 }
 0x176   :  { %v346_v23 = vadd.f32 %v345_v22, %v258_v20 }
 0x177   :  { %v347_v24 = vpop.f32.mrf.mxu0 }
 0x178   :  { %v348_v25 = vadd.f32 %v347_v24, %v262_v21  ;;  %v483_v30 = vrot.slane %v346_v23, 2  ;;  %v597_v31 = vrot.slane %v346_v23, 4  ;;  %v709_v36 = vrot.slane %v346_v23, 6 }
 0x179   :  { %v351_v26 = vpop.f32.mrf.mxu0 }
 0x17a   :  { %v352_v27 = vadd.f32 %v351_v26, %v258_v20  ;;  %v824_v28 = vrot.slane %v348_v25, 4  ;;  %v939_v37 = vrot.slane %v348_v25, 2  ;;  %v1165_v39 = vrot.slane %v348_v25, 6 }
 0x17b   :  { %v353_v29 = vpop.f32.mrf.mxu0 }
 0x17c   :  { %v354_v32 = vadd.f32 %v353_v29, %v262_v21  ;;  %v7522_v33 = vsel %vm367_vm3, %v352_v27, %v824_v28  ;;  %v937_v34 = vrot.slane %v352_v27, 2  ;;  %v1051_v35 = vrot.slane %v352_v27, 4 }
 0x17d   :  { %v1163_v38 = vrot.slane %v352_v27, 6 }
 0x17e   :  { %v365_v40 = vrot.slane %v354_v32, 4  ;;  %v485_v41 = vrot.slane %v354_v32, 2  ;;  %v7525_v42 = vsel %vm367_vm3, %v597_v31, %v354_v32  ;;  %v711_v43 = vrot.slane %v354_v32, 6 }
 0x17f   :  { %v7528_v44 = vsel %vm367_vm3, %v937_v34, %v939_v37  ;;  %v7531_v45 = vsel %vm367_vm3, %v1051_v35, %v348_v25  ;;  %v7534_v46 = vsel %vm367_vm3, %v1163_v38, %v1165_v39  ;;  %v439_v48 = vpop.f32.mrf.mxu1 }
 0x180   :  { %v368_v47 = vsel %vm367_vm3, %v346_v23, %v365_v40  ;;  %v7538_v49 = vsel %vm367_vm3, %v483_v30, %v485_v41  ;;  %v7541_v50 = vsel %vm367_vm3, %v709_v36, %v711_v43 }
 0x181   :  { %v443_v51 = vadd.f32 %v439_v48, %v368_v47  ;;  %v5883_v52 = vpop.f32.mrf.mxu1 }
 0x183   :  { %6622 = vtanh.f32 %v443_v51  ;;  %v5430_v54 = vmul.f32 -1.442695, %v443_v51 }
 0x185   :  { %6624 = vpow2.f32 %v5430_v54 }
 0x190   :  { %v6623_v53 = vpop.eup %6622 }
 0x191   :  { %453 = vrot.lane.b32.xlu0 %v6623_v53, %s7258_s20 }
 0x192   :  { %v6625_v55 = vpop.eup %6624 }
 0x193   :  { %v447_v56 = vadd.f32 1.0, %v6625_v55 }
 0x195   :  { %6626 = vrcp.f32 %v447_v56 }
 0x1a2   :  { %v6627_v57 = vpop.eup %6626 }
 0x1a3   :  { %v451_v60 = vmul.f32 0.0, %v6627_v57 }
 0x203   :  { %v454_v58 = vpop.permute.xlu0 %453 }
 0x204   :  { %v456_v59 = vmul.f32 %v6627_v57, %v454_v58 }
 0x206   :  { %458 = vrot.lane.b32.xlu0 %v456_v59, %s7259_s7 }
 0x278   :  { %v459_v61 = vpop.permute.xlu0 %458 }
 0x279   :  { %v461_v62 = vadd.f32 %v459_v61, %v451_v60 }
 0x27b   :  { %6628 = vtanh.f32 %v461_v62 }
 0x288   :  { %v6629_v63 = vpop.eup %6628 }
 0x289   :  { %464 = vrot.lane.b32.xlu1 %v6629_v63, %s7258_s20 }
 0x2fb   :  { %v465_v1 = vpop.permute.xlu1 %464 }
 0x2fc   :  { %v467_v3 = vmul.f32 %v6627_v57, %v465_v1 }
 0x2fe   :  { %472 = vrot.lane.b32.xlu0 %v467_v3, %s7258_s20  ;;  %469 = vrot.lane.b32.xlu1 %v467_v3, %s7259_s7 }
 0x370   :  { %v473_v7 = vpop.permute.xlu0 %472  ;;  %v470_v10 = vpop.permute.xlu1 %469 }
 0x371   :  { %481 = vst.msk [vmem:[#allocation2 + $0xc] sm:$0xc] %vm480_vm7, %v473_v7  ;;  %v476_v18 = vsel %vm475_vm8, %v470_v10, %v473_v7 }
 0x372   :  { %479 = vst.msk [vmem:[#allocation2] sm:$0x3] %vm478_vm9, %v470_v10  ;;  %v477_v15 = vsel %vm7549_vm11, %v476_v18, 0.0 }
 0x373   :  { %5901 = vmatmul.mubr.msk.f32.vlgmr.msra.gmra.mxu0 %vm369_vm12, %v477_v15 }
 0x374   :  { %5923 = vmatpush3.msra.mxu0 %v7429_v2  ;;  %5938 = vmatprep.mubr.msk.f32.mxu0 %vm7257_vm0, %v7256_v0 }
 0x375   :  { %5924 = vmatprep.subr.mxu0 %v7256_v0 }
 0x376   :  { %5925 = vmatpush3.msra.mxu0 %v7432_v5 }
 0x377   :  { %5926 = vmatprep.subr.mxu0 %v7256_v0 }
 0x378   :  { %5927 = vmatpush3.msra.mxu0 %v7438_v8 }
 0x379   :  { %5928 = vmatprep.subr.mxu0 %v7256_v0 }
 0x37a   :  { %5929 = vmatpush3.msra.mxu0 %v7442_v9 }
 0x37b   :  { %5930 = vmatprep.subr.mxu0 %v7256_v0 }
 0x37c   :  { %5931 = vmatpush3.msra.mxu0 %v7451_v11 }
 0x37d   :  { %5932 = vmatprep.subr.mxu0 %v7256_v0 }
 0x37e   :  { %5933 = vmatpush3.msra.mxu0 %v7456_v12 }
 0x37f   :  { %5934 = vmatprep.subr.mxu0 %v7256_v0 }
 0x380   :  { %5935 = vmatpush3.msra.mxu0 %v7462_v13 }
 0x381   :  { %5936 = vmatprep.subr.mxu0 %v7256_v0 }
 0x382   :  { %5937 = vmatpush3.msra.mxu0 %v7468_v14 }
 0x383   :  { %5960 = vmatprep.subr.mxu0 %v7256_v0 }
 0x433   :  { %v557_v16 = vpop.f32.mrf.mxu0 }
 0x434   :  { %v561_v20 = vadd.f32 %v557_v16, %v7538_v49 }
 0x435   :  { %v5902_v21 = vpop.f32.mrf.mxu0 }
 0x436   :  { %6630 = vtanh.f32 %v561_v20  ;;  %v5432_v23 = vmul.f32 -1.442695, %v561_v20 }
 0x438   :  { %6632 = vpow2.f32 %v5432_v23 }
 0x443   :  { %v6631_v22 = vpop.eup %6630 }
 0x444   :  { %571 = vrot.lane.b32.xlu1 %v6631_v22, %s7258_s20 }
 0x445   :  { %v6633_v24 = vpop.eup %6632 }
 0x446   :  { %v565_v25 = vadd.f32 1.0, %v6633_v24 }
 0x448   :  { %6634 = vrcp.f32 %v565_v25 }
 0x455   :  { %v6635_v26 = vpop.eup %6634 }
 0x456   :  { %v569_v29 = vmul.f32 %v6635_v26, %v461_v62 }
 0x4b6   :  { %v572_v27 = vpop.permute.xlu1 %571 }
 0x4b7   :  { %v574_v28 = vmul.f32 %v6635_v26, %v572_v27 }
 0x4b9   :  { %576 = vrot.lane.b32.xlu0 %v574_v28, %s7259_s7 }
 0x52b   :  { %v577_v30 = vpop.permute.xlu0 %576 }
 0x52c   :  { %v579_v31 = vadd.f32 %v577_v30, %v569_v29 }
 0x52e   :  { %6636 = vtanh.f32 %v579_v31 }
 0x53b   :  { %v6637_v32 = vpop.eup %6636 }
 0x53c   :  { %582 = vrot.lane.b32.xlu1 %v6637_v32, %s7258_s20 }
 0x5ae   :  { %v583_v34 = vpop.permute.xlu1 %582 }
 0x5af   :  { %v585_v35 = vmul.f32 %v6635_v26, %v583_v34 }
 0x5b1   :  { %590 = vrot.lane.b32.xlu1 %v585_v35, %s7258_s20  ;;  %587 = vrot.lane.b32.xlu0 %v585_v35, %s7259_s7 }
 0x623   :  { %v591_v36 = vpop.permute.xlu1 %590  ;;  %v588_v37 = vpop.permute.xlu0 %587 }
 0x624   :  { %596 = vst.msk [vmem:[#allocation2 + $0xa] sm:$0xc] %vm480_vm7, %v591_v36  ;;  %v593_v38 = vsel %vm475_vm8, %v588_v37, %v591_v36 }
 0x625   :  { %595 = vst.msk [vmem:[#allocation2 + $0x2] sm:$0x3] %vm478_vm9, %v588_v37  ;;  %v594_v39 = vsel %vm7549_vm11, %v593_v38, 0.0 }
 0x626   :  { %5920 = vmatmul.mubr.msk.f32.vlgmr.msra.gmra.mxu1 %vm369_vm12, %v594_v39 }
 0x627   :  { %5942 = vmatpush3.msra.mxu1 %v7429_v2  ;;  %5957 = vmatprep.mubr.msk.f32.mxu1 %vm7257_vm0, %v7256_v0 }
 0x628   :  { %5943 = vmatprep.subr.mxu1 %v7256_v0 }
 0x629   :  { %5944 = vmatpush3.msra.mxu1 %v7432_v5 }
 0x62a   :  { %5945 = vmatprep.subr.mxu1 %v7256_v0 }
 0x62b   :  { %5946 = vmatpush3.msra.mxu1 %v7438_v8 }
 0x62c   :  { %5947 = vmatprep.subr.mxu1 %v7256_v0 }
 0x62d   :  { %5948 = vmatpush3.msra.mxu1 %v7442_v9 }
 0x62e   :  { %5949 = vmatprep.subr.mxu1 %v7256_v0 }
 0x62f   :  { %5950 = vmatpush3.msra.mxu1 %v7451_v11 }
 0x630   :  { %5951 = vmatprep.subr.mxu1 %v7256_v0 }
 0x631   :  { %5952 = vmatpush3.msra.mxu1 %v7456_v12 }
 0x632   :  { %5953 = vmatprep.subr.mxu1 %v7256_v0 }
 0x633   :  { %5954 = vmatpush3.msra.mxu1 %v7462_v13 }
 0x634   :  { %5955 = vmatprep.subr.mxu1 %v7256_v0 }
 0x635   :  { %5956 = vmatpush3.msra.mxu1 %v7468_v14 }
 0x636   :  { %5979 = vmatprep.subr.mxu1 %v7256_v0 }
 0x6e6   :  { %v669_v40 = vpop.f32.mrf.mxu1 }
 0x6e7   :  { %v673_v41 = vadd.f32 %v669_v40, %v7525_v42 }
 0x6e8   :  { %v5921_v43 = vpop.f32.mrf.mxu1 }
 0x6e9   :  { %6638 = vtanh.f32 %v673_v41  ;;  %v5434_v48 = vmul.f32 -1.442695, %v673_v41 }
 0x6eb   :  { %6640 = vpow2.f32 %v5434_v48 }
 0x6f6   :  { %v6639_v47 = vpop.eup %6638 }
 0x6f7   :  { %683 = vrot.lane.b32.xlu0 %v6639_v47, %s7258_s20 }
 0x6f8   :  { %v6641_v49 = vpop.eup %6640 }
 0x6f9   :  { %v677_v51 = vadd.f32 1.0, %v6641_v49 }
 0x6fb   :  { %6642 = vrcp.f32 %v677_v51 }
 0x708   :  { %v6643_v52 = vpop.eup %6642 }
 0x709   :  { %v681_v55 = vmul.f32 %v6643_v52, %v579_v31 }
 0x769   :  { %v684_v53 = vpop.permute.xlu0 %683 }
 0x76a   :  { %v686_v54 = vmul.f32 %v6643_v52, %v684_v53 }
 0x76c   :  { %688 = vrot.lane.b32.xlu1 %v686_v54, %s7259_s7 }
 0x7de   :  { %v689_v56 = vpop.permute.xlu1 %688 }
 0x7df   :  { %v691_v57 = vadd.f32 %v689_v56, %v681_v55 }
 0x7e1   :  { %6644 = vtanh.f32 %v691_v57 }
 0x7ee   :  { %v6645_v42 = vpop.eup %6644 }
 0x7ef   :  { %694 = vrot.lane.b32.xlu0 %v6645_v42, %s7258_s20 }
 0x861   :  { %v695_v58 = vpop.permute.xlu0 %694 }
 0x862   :  { %v697_v59 = vmul.f32 %v6643_v52, %v695_v58 }
 0x864   :  { %702 = vrot.lane.b32.xlu0 %v697_v59, %s7258_s20  ;;  %699 = vrot.lane.b32.xlu1 %v697_v59, %s7259_s7 }
 0x8d6   :  { %v703_v60 = vpop.permute.xlu0 %702  ;;  %v700_v61 = vpop.permute.xlu1 %699 }
 0x8d7   :  { %708 = vst.msk [vmem:[#allocation2 + $0x8] sm:$0xc] %vm480_vm7, %v703_v60  ;;  %v705_v62 = vsel %vm475_vm8, %v700_v61, %v703_v60 }
 0x8d8   :  { %707 = vst.msk [vmem:[#allocation2 + $0x4] sm:$0x3] %vm478_vm9, %v700_v61  ;;  %v706_v63 = vsel %vm7549_vm11, %v705_v62, 0.0 }
 0x8d9   :  { %5939 = vmatmul.mubr.msk.f32.vlgmr.msra.gmra.mxu0 %vm369_vm12, %v706_v63 }
 0x8da   :  { %5961 = vmatpush3.msra.mxu0 %v7429_v2  ;;  %5976 = vmatprep.mubr.msk.f32.mxu0 %vm7257_vm0, %v7256_v0 }
 0x8db   :  { %5962 = vmatprep.subr.mxu0 %v7256_v0 }
 0x8dc   :  { %5963 = vmatpush3.msra.mxu0 %v7432_v5 }
 0x8dd   :  { %5964 = vmatprep.subr.mxu0 %v7256_v0 }
 0x8de   :  { %5965 = vmatpush3.msra.mxu0 %v7438_v8 }
 0x8df   :  { %5966 = vmatprep.subr.mxu0 %v7256_v0 }
 0x8e0   :  { %5967 = vmatpush3.msra.mxu0 %v7442_v9 }
 0x8e1   :  { %5968 = vmatprep.subr.mxu0 %v7256_v0 }
 0x8e2   :  { %5969 = vmatpush3.msra.mxu0 %v7451_v11 }
 0x8e3   :  { %5970 = vmatprep.subr.mxu0 %v7256_v0 }
 0x8e4   :  { %5971 = vmatpush3.msra.mxu0 %v7456_v12 }
 0x8e5   :  { %5972 = vmatprep.subr.mxu0 %v7256_v0 }
 0x8e6   :  { %5973 = vmatpush3.msra.mxu0 %v7462_v13 }
 0x8e7   :  { %5974 = vmatprep.subr.mxu0 %v7256_v0 }
 0x8e8   :  { %5975 = vmatpush3.msra.mxu0 %v7468_v14 }
 0x8e9   :  { %5998 = vmatprep.subr.mxu0 %v7256_v0 }
 0x999   :  { %v783_v1 = vpop.f32.mrf.mxu0 }
 0x99a   :  { %v787_v3 = vadd.f32 %v783_v1, %v7541_v50 }
 0x99b   :  { %v5940_v4 = vpop.f32.mrf.mxu0 }
 0x99c   :  { %6646 = vtanh.f32 %v787_v3  ;;  %v5436_v10 = vmul.f32 -1.442695, %v787_v3 }
 0x99e   :  { %6648 = vpow2.f32 %v5436_v10 }
 0x9a9   :  { %v6647_v7 = vpop.eup %6646 }
 0x9aa   :  { %797 = vrot.lane.b32.xlu1 %v6647_v7, %s7258_s20 }
 0x9ab   :  { %v6649_v18 = vpop.eup %6648 }
 0x9ac   :  { %v791_v15 = vadd.f32 1.0, %v6649_v18 }
 0x9ae   :  { %6650 = vrcp.f32 %v791_v15 }
 0x9bb   :  { %v6651_v16 = vpop.eup %6650 }
 0x9bc   :  { %v795_v22 = vmul.f32 %v6651_v16, %v691_v57 }
 0xa1c   :  { %v798_v20 = vpop.permute.xlu1 %797 }
 0xa1d   :  { %v800_v21 = vmul.f32 %v6651_v16, %v798_v20 }
 0xa1f   :  { %802 = vrot.lane.b32.xlu0 %v800_v21, %s7259_s7 }
 0xa91   :  { %v803_v23 = vpop.permute.xlu0 %802 }
 0xa92   :  { %v805_v24 = vadd.f32 %v803_v23, %v795_v22 }
 0xa94   :  { %6652 = vtanh.f32 %v805_v24 }
 0xaa1   :  { %v6653_v50 = vpop.eup %6652 }
 0xaa2   :  { %808 = vrot.lane.b32.xlu1 %v6653_v50, %s7258_s20 }
 0xb14   :  { %v809_v25 = vpop.permute.xlu1 %808 }
 0xb15   :  { %v811_v26 = vmul.f32 %v6651_v16, %v809_v25 }
 0xb17   :  { %816 = vrot.lane.b32.xlu1 %v811_v26, %s7258_s20  ;;  %813 = vrot.lane.b32.xlu0 %v811_v26, %s7259_s7 }
 0xb89   :  { %v817_v27 = vpop.permute.xlu1 %816  ;;  %v814_v28 = vpop.permute.xlu0 %813 }
 0xb8a   :  { %822 = vst.msk [vmem:[#allocation2 + $0x6] sm:$0xc] %vm480_vm7, %v817_v27  ;;  %v819_v29 = vsel %vm475_vm8, %v814_v28, %v817_v27 }
 0xb8b   :  { %821 = vst.msk [vmem:[#allocation2 + $0x6] sm:$0x3] %vm478_vm9, %v814_v28  ;;  %v820_v30 = vsel %vm7549_vm11, %v819_v29, 0.0 }
 0xb8c   :  { %5958 = vmatmul.mubr.msk.f32.vlgmr.msra.gmra.mxu1 %vm369_vm12, %v820_v30 }
 0xb8d   :  { %5980 = vmatpush3.msra.mxu1 %v7429_v2  ;;  %5995 = vmatprep.mubr.msk.f32.mxu1 %vm7257_vm0, %v7256_v0 }
 0xb8e   :  { %5981 = vmatprep.subr.mxu1 %v7256_v0 }
 0xb8f   :  { %5982 = vmatpush3.msra.mxu1 %v7432_v5 }
 0xb90   :  { %5983 = vmatprep.subr.mxu1 %v7256_v0 }
 0xb91   :  { %5984 = vmatpush3.msra.mxu1 %v7438_v8 }
 0xb92   :  { %5985 = vmatprep.subr.mxu1 %v7256_v0 }
 0xb93   :  { %5986 = vmatpush3.msra.mxu1 %v7442_v9 }
 0xb94   :  { %5987 = vmatprep.subr.mxu1 %v7256_v0 }
 0xb95   :  { %5988 = vmatpush3.msra.mxu1 %v7451_v11 }
 0xb96   :  { %5989 = vmatprep.subr.mxu1 %v7256_v0 }
 0xb97   :  { %5990 = vmatpush3.msra.mxu1 %v7456_v12 }
 0xb98   :  { %5991 = vmatprep.subr.mxu1 %v7256_v0 }
 0xb99   :  { %5992 = vmatpush3.msra.mxu1 %v7462_v13 }
 0xb9a   :  { %5993 = vmatprep.subr.mxu1 %v7256_v0 }
 0xb9b   :  { %5994 = vmatpush3.msra.mxu1 %v7468_v14 }
 0xc4c   :  { %v896_v31 = vpop.f32.mrf.mxu1 }
 0xc4d   :  { %v900_v32 = vadd.f32 %v896_v31, %v7522_v33 }
 0xc4e   :  { %v5959_v34 = vpop.f32.mrf.mxu1 }
 0xc4f   :  { %6654 = vtanh.f32 %v900_v32  ;;  %v5438_v36 = vmul.f32 -1.442695, %v900_v32 }
 0xc51   :  { %6656 = vpow2.f32 %v5438_v36 }
 0xc5c   :  { %v6655_v35 = vpop.eup %6654 }
 0xc5d   :  { %910 = vrot.lane.b32.xlu0 %v6655_v35, %s7258_s20 }
 0xc5e   :  { %v6657_v37 = vpop.eup %6656 }
 0xc5f   :  { %v904_v38 = vadd.f32 1.0, %v6657_v37 }
 0xc61   :  { %6658 = vrcp.f32 %v904_v38 }
 0xc6e   :  { %v6659_v39 = vpop.eup %6658 }
 0xc6f   :  { %v908_v43 = vmul.f32 %v6659_v39, %v805_v24 }
 0xccf   :  { %v911_v40 = vpop.permute.xlu0 %910 }
 0xcd0   :  { %v913_v41 = vmul.f32 %v6659_v39, %v911_v40 }
 0xcd2   :  { %915 = vrot.lane.b32.xlu1 %v913_v41, %s7259_s7 }
 0xd44   :  { %v916_v47 = vpop.permute.xlu1 %915 }
 0xd45   :  { %v918_v48 = vadd.f32 %v916_v47, %v908_v43 }
 0xd47   :  { %6660 = vtanh.f32 %v918_v48 }
 0xd54   :  { %v6661_v33 = vpop.eup %6660 }
 0xd55   :  { %921 = vrot.lane.b32.xlu0 %v6661_v33, %s7258_s20 }
 0xdc7   :  { %v922_v49 = vpop.permute.xlu0 %921 }
 0xdc8   :  { %v924_v51 = vmul.f32 %v6659_v39, %v922_v49  ;;  %v1291_v49 = vld [vmem:[%s8840_s4 + $0x70] sm:$0xff] }
 0xdca   :  { %929 = vrot.lane.b32.xlu0 %v924_v51, %s7258_s20  ;;  %926 = vrot.lane.b32.xlu1 %v924_v51, %s7259_s7  ;;  %v1290_v51 = vld [vmem:[%s8840_s4 + $0x68] sm:$0xff] }
 0xe3c   :  { %v930_v52 = vpop.permute.xlu0 %929  ;;  %v927_v53 = vpop.permute.xlu1 %926 }
 0xe3d   :  { %935 = vst.msk [vmem:[#allocation2 + $0x4] sm:$0xc] %vm480_vm7, %v930_v52  ;;  %v932_v54 = vsel %vm475_vm8, %v927_v53, %v930_v52  ;;  %v1289_v52 = vld [vmem:[%s8840_s4 + $0x60] sm:$0xff] }
 0xe3e   :  { %934 = vst.msk [vmem:[#allocation2 + $0x8] sm:$0x3] %vm478_vm9, %v927_v53  ;;  %v933_v55 = vsel %vm7549_vm11, %v932_v54, 0.0  ;;  %v1288_v53 = vld [vmem:[%s8840_s4 + $0x58] sm:$0xff]  ;;  %v1287_v54 = vld [vmem:[%s8840_s4 + $0x50] sm:$0xff] }
 0xe3f   :  { %5977 = vmatmul.mubr.msk.f32.vlgmr.msra.gmra.mxu0 %vm369_vm12, %v933_v55  ;;  %v1286_v55 = vld [vmem:[%s8840_s4 + $0x48] sm:$0xff] }
 0xe40   :  { %5999 = vmatpush3.msra.mxu0 %v7429_v2  ;;  %6014 = vmatprep.mubr.msk.f32.mxu0 %vm7257_vm0, %v7256_v0 }
 0xe41   :  { %6000 = vmatprep.subr.mxu0 %v7256_v0 }
 0xe42   :  { %6001 = vmatpush3.msra.mxu0 %v7432_v5 }
 0xe43   :  { %6002 = vmatprep.subr.mxu0 %v7256_v0 }
 0xe44   :  { %6003 = vmatpush3.msra.mxu0 %v7438_v8 }
 0xe45   :  { %6004 = vmatprep.subr.mxu0 %v7256_v0 }
 0xe46   :  { %6005 = vmatpush3.msra.mxu0 %v7442_v9 }
 0xe47   :  { %6006 = vmatprep.subr.mxu0 %v7256_v0 }
 0xe48   :  { %6007 = vmatpush3.msra.mxu0 %v7451_v11 }
 0xe49   :  { %6008 = vmatprep.subr.mxu0 %v7256_v0 }
 0xe4a   :  { %6009 = vmatpush3.msra.mxu0 %v7456_v12 }
 0xe4b   :  { %6010 = vmatprep.subr.mxu0 %v7256_v0 }
 0xe4c   :  { %6011 = vmatpush3.msra.mxu0 %v7462_v13 }
 0xe4d   :  { %6012 = vmatprep.subr.mxu0 %v7256_v0 }
 0xe4e   :  { %6013 = vmatpush3.msra.mxu0 %v7468_v14 }
 0xe4f   :  { %6017 = vmatprep.subr.mxu0 %v7256_v0 }
 0xeff   :  { %v1011_v2 = vpop.f32.mrf.mxu0 }
 0xf00   :  { %v1015_v5 = vadd.f32 %v1011_v2, %v7528_v44  ;;  %v1285_v2 = vld [vmem:[%s8840_s4 + $0x40] sm:$0xff] }
 0xf01   :  { %v5978_v8 = vpop.f32.mrf.mxu0 }
 0xf02   :  { %6662 = vtanh.f32 %v1015_v5  ;;  %v5440_v11 = vmul.f32 -1.442695, %v1015_v5  ;;  %v1284_v8 = vld [vmem:[%s8840_s4 + $0x38] sm:$0xff] }
 0xf04   :  { %6664 = vpow2.f32 %v5440_v11  ;;  %v1282_v11 = vld [vmem:[%s8840_s4 + $0x28] sm:$0xff] }
 0xf0f   :  { %v6663_v9 = vpop.eup %6662 }
 0xf10   :  { %1025 = vrot.lane.b32.xlu1 %v6663_v9, %s7258_s20  ;;  %v1283_v9 = vld [vmem:[%s8840_s4 + $0x30] sm:$0xff] }
 0xf11   :  { %v6665_v12 = vpop.eup %6664 }
 0xf12   :  { %v1019_v56 = vadd.f32 1.0, %v6665_v12  ;;  %v7760_v12 = vld [vmem:[#allocation10 + $0x38] sm:$0xff] }
 0xf14   :  { %6666 = vrcp.f32 %v1019_v56  ;;  %v1281_v56 = vld [vmem:[%s8840_s4 + $0x20] sm:$0xff] }
 0xf21   :  { %v6667_v13 = vpop.eup %6666 }
 0xf22   :  { %v1023_v14 = vmul.f32 %v6667_v13, %v918_v48 }
 0xf82   :  { %v1026_v57 = vpop.permute.xlu1 %1025 }
 0xf83   :  { %v1028_v42 = vmul.f32 %v6667_v13, %v1026_v57  ;;  %v7769_v57 = vld [vmem:[#allocation10 + $0x30] sm:$0xff] }
 0xf85   :  { %1030 = vrot.lane.b32.xlu0 %v1028_v42, %s7259_s7  ;;  %v1279_v42 = vld [vmem:[%s8840_s4 + $0x10] sm:$0xff] }
 0xff7   :  { %v1031_v58 = vpop.permute.xlu0 %1030 }
 0xff8   :  { %v1033_v59 = vadd.f32 %v1031_v58, %v1023_v14  ;;  %v7775_v14 = vld [vmem:[#allocation10 + $0x28] sm:$0xff]  ;;  %v1278_v58 = vld [vmem:[%s8840_s4 + $0x8] sm:$0xff] }
 0xffa   :  { %6668 = vtanh.f32 %v1033_v59 }
0x1007   :  { %v6669_v44 = vpop.eup %6668 }
0x1008   :  { %1036 = vrot.lane.b32.xlu1 %v6669_v44, %s7258_s20  ;;  %v7787_v44 = vld [vmem:[#allocation10 + $0x20] sm:$0xff] }
0x107a   :  { %v1037_v60 = vpop.permute.xlu1 %1036 }
0x107b   :  { %v1039_v61 = vmul.f32 %v6667_v13, %v1037_v60  ;;  %v1280_v13 = vld [vmem:[%s8840_s4 + $0x18] sm:$0xff]  ;;  %v7789_v60 = vld [vmem:[#allocation10 + $0x18] sm:$0xff] }
0x107d   :  { %1044 = vrot.lane.b32.xlu1 %v1039_v61, %s7258_s20  ;;  %1041 = vrot.lane.b32.xlu0 %v1039_v61, %s7259_s7 }
0x10ef   :  { %v1045_v62 = vpop.permute.xlu1 %1044  ;;  %v1042_v63 = vpop.permute.xlu0 %1041 }
0x10f0   :  { %1050 = vst.msk [vmem:[#allocation2 + $0x2] sm:$0xc] %vm480_vm7, %v1045_v62  ;;  %v1047_v1 = vsel %vm475_vm8, %v1042_v63, %v1045_v62 }
0x10f1   :  { %1049 = vst.msk [vmem:[#allocation2 + $0xa] sm:$0x3] %vm478_vm9, %v1042_v63  ;;  %v1048_v3 = vsel %vm7549_vm11, %v1047_v1, 0.0  ;;  %v7796_v63 = vld [vmem:[#allocation10 + $0x10] sm:$0xff]  ;;  %v7800_v1 = vld [vmem:[#allocation10 + $0x8] sm:$0xff] }
0x10f2   :  { %5996 = vmatmul.mubr.msk.f32.vlgmr.msra.gmra.mxu1 %vm369_vm12, %v1048_v3  ;;  %v7804_v3 = vld [vmem:[#allocation10] sm:$0xff] }
0x10f3   :  { %1383 = vmatprep.mubr.f32.mxu1 %v7256_v0 }
0x11b2   :  { %v1123_v4 = vpop.f32.mrf.mxu1 }
0x11b3   :  { %v1127_v7 = vadd.f32 %v1123_v4, %v7531_v45 }
0x11b4   :  { %v5997_v10 = vpop.f32.mrf.mxu1 }
0x11b5   :  { %6670 = vtanh.f32 %v1127_v7  ;;  %v5442_v15 = vmul.f32 -1.442695, %v1127_v7 }
0x11b7   :  { %6672 = vpow2.f32 %v5442_v15 }
0x11c2   :  { %v6671_v18 = vpop.eup %6670 }
0x11c3   :  { %1137 = vrot.lane.b32.xlu0 %v6671_v18, %s7258_s20 }
0x11c4   :  { %v6673_v16 = vpop.eup %6672 }
0x11c5   :  { %v1131_v20 = vadd.f32 1.0, %v6673_v16 }
0x11c7   :  { %6674 = vrcp.f32 %v1131_v20  ;;  %v1293_v20 = vld [vmem:[#allocation9] sm:$0x3] }
0x11d4   :  { %v6675_v21 = vpop.eup %6674 }
0x11d5   :  { %v1135_v24 = vmul.f32 %v6675_v21, %v1033_v59  ;;  %v1277_v59 = vld [vmem:[%s8840_s4] sm:$0xff] }
0x1235   :  { %v1138_v22 = vpop.permute.xlu0 %1137 }
0x1236   :  { %v1140_v23 = vmul.f32 %v6675_v21, %v1138_v22  ;;  %v1310_v22 = vrot.slane %v1293_v20, %v7517_v19 }
0x1238   :  { %1142 = vrot.lane.b32.xlu1 %v1140_v23, %s7259_s7 }
0x12aa   :  { %v1143_v50 = vpop.permute.xlu1 %1142 }
0x12ab   :  { %v1145_v25 = vadd.f32 %v1143_v50, %v1135_v24 }
0x12ad   :  { %6676 = vtanh.f32 %v1145_v25 }
0x12ba   :  { %v6677_v45 = vpop.eup %6676 }
0x12bb   :  { %1148 = vrot.lane.b32.xlu0 %v6677_v45, %s7258_s20 }
0x132d   :  { %v1149_v26 = vpop.permute.xlu0 %1148 }
0x132e   :  { %v1151_v27 = vmul.f32 %v6675_v21, %v1149_v26  ;;  %v1306_v21 = vrot.slane %v1293_v20, %v7511_v17 }
0x1330   :  { %1156 = vrot.lane.b32.xlu0 %v1151_v27, %s7258_s20  ;;  %1153 = vrot.lane.b32.xlu1 %v1151_v27, %s7259_s7 }
0x13a2   :  { %v1157_v28 = vpop.permute.xlu0 %1156  ;;  %v1154_v29 = vpop.permute.xlu1 %1153 }
0x13a3   :  { %1162 = vst.msk [vmem:[#allocation2] sm:$0xc] %vm480_vm7, %v1157_v28  ;;  %v1159_v30 = vsel %vm475_vm8, %v1154_v29, %v1157_v28 }
0x13a4   :  { %1161 = vst.msk [vmem:[#allocation2 + $0xc] sm:$0x3] %vm478_vm9, %v1154_v29  ;;  %v1160_v31 = vsel %vm7549_vm11, %v1159_v30, 0.0 }
0x13a5   :  { %6015 = vmatmul.mubr.msk.f32.vlgmr.msra.gmra.mxu0 %vm369_vm12, %v1160_v31 }
0x13a6   :  { %6033 = vmatprep.mubr.msk.f32.mxu0 %vm7257_vm0, %v7256_v0  ;;  %6018 = vmatpush3.msra.mxu0 %v7760_v12 }
0x13a7   :  { %6019 = vmatprep.subr.mxu0 %v7256_v0 }
0x13a8   :  { %6020 = vmatpush3.msra.mxu0 %v7769_v57 }
0x13a9   :  { %6021 = vmatprep.subr.mxu0 %v7256_v0 }
0x13aa   :  { %6022 = vmatpush3.msra.mxu0 %v7775_v14 }
0x13ab   :  { %6023 = vmatprep.subr.mxu0 %v7256_v0 }
0x13ac   :  { %6024 = vmatpush3.msra.mxu0 %v7787_v44 }
0x13ad   :  { %6025 = vmatprep.subr.mxu0 %v7256_v0 }
0x13ae   :  { %6026 = vmatpush3.msra.mxu0 %v7789_v60 }
0x13af   :  { %6027 = vmatprep.subr.mxu0 %v7256_v0 }
0x13b0   :  { %6028 = vmatpush3.msra.mxu0 %v7796_v63 }
0x13b1   :  { %6029 = vmatprep.subr.mxu0 %v7256_v0 }
0x13b2   :  { %6030 = vmatpush3.msra.mxu0 %v7800_v1 }
0x13b3   :  { %6031 = vmatprep.subr.mxu0 %v7256_v0 }
0x13b4   :  { %6032 = vmatpush3.msra.mxu0 %v7804_v3 }
0x13b5   :  { %6034 = vmatmul.mubr.f32.vlgmr.msra.gmra.mxu0 %v7256_v0  ;;  %6055 = vmatprep.subr.mxu0 %v7256_v0 }
0x13b6   :  { %6056 = vmatpush3.msra.mxu0 %v7760_v12  ;;  %6071 = vmatprep.mubr.msk.f32.mxu0 %vm7257_vm0, %v7256_v0 }
0x13b7   :  { %6057 = vmatprep.subr.mxu0 %v7256_v0 }
0x13b8   :  { %6058 = vmatpush3.msra.mxu0 %v7769_v57 }
0x13b9   :  { %6059 = vmatprep.subr.mxu0 %v7256_v0 }
0x13ba   :  { %6060 = vmatpush3.msra.mxu0 %v7775_v14 }
0x13bb   :  { %6061 = vmatprep.subr.mxu0 %v7256_v0 }
0x13bc   :  { %6062 = vmatpush3.msra.mxu0 %v7787_v44 }
0x13bd   :  { %6063 = vmatprep.subr.mxu0 %v7256_v0 }
0x13be   :  { %6064 = vmatpush3.msra.mxu0 %v7789_v60 }
0x13bf   :  { %6065 = vmatprep.subr.mxu0 %v7256_v0 }
0x13c0   :  { %6066 = vmatpush3.msra.mxu0 %v7796_v63 }
0x13c1   :  { %6067 = vmatprep.subr.mxu0 %v7256_v0 }
0x13c2   :  { %6068 = vmatpush3.msra.mxu0 %v7800_v1 }
0x13c3   :  { %6069 = vmatprep.subr.mxu0 %v7256_v0 }
0x13c4   :  { %6070 = vmatpush3.msra.mxu0 %v7804_v3 }
0x13c5   :  { %6093 = vmatprep.subr.mxu0 %v7256_v0 }
0x1465   :  { %v1237_v32 = vpop.f32.mrf.mxu0 }
0x1466   :  { %v1241_v34 = vadd.f32 %v1237_v32, %v7534_v46  ;;  %v1292_v46 = vld [vmem:[%s8840_s4 + $0x78] sm:$0xff] }
0x1467   :  { %v6016_v35 = vpop.f32.mrf.mxu0  ;;  %1335 = vmatprep.subr.mxu1 %v1292_v46 }
0x1468   :  { %6678 = vtanh.f32 %v1241_v34  ;;  %v5444_v37 = vmul.f32 -1.442695, %v1241_v34  ;;  %1336 = vmatpush1.msra.mxu1 %v1291_v49 }
0x1469   :  { %1337 = vmatprep.subr.mxu1 %v1290_v51 }
0x146a   :  { %6680 = vpow2.f32 %v5444_v37  ;;  %1338 = vmatpush1.msra.mxu1 %v1289_v52 }
0x146b   :  { %1339 = vmatprep.subr.mxu1 %v1288_v53 }
0x146c   :  { %1340 = vmatpush1.msra.mxu1 %v1287_v54 }
0x146d   :  { %1341 = vmatprep.subr.mxu1 %v1286_v55 }
0x146e   :  { %1342 = vmatpush1.msra.mxu1 %v1285_v2 }
0x146f   :  { %1343 = vmatprep.subr.mxu1 %v1284_v8 }
0x1470   :  { %1344 = vmatpush1.msra.mxu1 %v1283_v9 }
0x1471   :  { %1345 = vmatprep.subr.mxu1 %v1282_v11 }
0x1472   :  { %1346 = vmatpush1.msra.mxu1 %v1281_v56 }
0x1473   :  { %1347 = vmatprep.subr.mxu1 %v1280_v13 }
0x1474   :  { %1348 = vmatpush1.msra.mxu1 %v1279_v42 }
0x1475   :  { %v6679_v36 = vpop.eup %6678  ;;  %1349 = vmatprep.subr.mxu1 %v1278_v58  ;;  %v1466_v15 = vpop.f32.mrf.mxu0 }
0x1476   :  { %1251 = vrot.lane.b32.xlu1 %v6679_v36, %s7258_s20  ;;  %1350 = vmatpush1.msra.mxu1 %v1277_v59 }
0x1477   :  { %v6681_v38 = vpop.eup %6680  ;;  %6036 = vmatprep.subr.mxu1 %v7256_v0  ;;  %v6035_v16 = vpop.f32.mrf.mxu0 }
0x1478   :  { %v1245_v39 = vadd.f32 1.0, %v6681_v38 }
0x147a   :  { %6682 = vrcp.f32 %v1245_v39 }
0x1487   :  { %v6683_v40 = vpop.eup %6682 }
0x1488   :  { %v1249_v47 = vmul.f32 %v6683_v40, %v1145_v25 }
0x14e8   :  { %v1252_v41 = vpop.permute.xlu1 %1251 }
0x14e9   :  { %v1254_v43 = vmul.f32 %v6683_v40, %v1252_v41 }
0x14eb   :  { %1256 = vrot.lane.b32.xlu0 %v1254_v43, %s7259_s7 }
0x155d   :  { %v1257_v48 = vpop.permute.xlu0 %1256 }
0x155e   :  { %v1259_v33 = vadd.f32 %v1257_v48, %v1249_v47 }
0x1560   :  { %6684 = vtanh.f32 %v1259_v33 }
0x156d   :  { %v6685_v5 = vpop.eup %6684 }
0x156e   :  { %1262 = vrot.lane.b32.xlu1 %v6685_v5, %s7258_s20 }
0x15e0   :  { %v1263_v61 = vpop.permute.xlu1 %1262 }
0x15e1   :  { %v1265_v62 = vmul.f32 %v6683_v40, %v1263_v61 }
0x15e3   :  { %1267 = vrot.lane.b32.xlu1 %v1265_v62, %s7259_s7  ;;  %1271 = vrot.lane.b32.xlu0 %v1265_v62, %s7258_s20 }
0x1655   :  { %v1268_v4 = vpop.permute.xlu1 %1267  ;;  %v1272_v7 = vpop.permute.xlu0 %1271 }
0x1656   :  { %1270 = vst.msk [vmem:[#allocation2 + $0xe] sm:$0x3] %vm478_vm9, %v1268_v4 }
0x1657   :  { %1274 = vst.msk [vmem:[#allocation2 - $0x2] sm:$0xc] %vm480_vm7, %v1272_v7 }
0x165d   :  { %v1276_v18 = vld [vmem:[#allocation2 + $0x8] sm:$0xff] }
0x165e   :  { %v1275_v10 = vld [vmem:[#allocation2] sm:$0xff] }
0x165f   :  { %5445 = vmatmul.mubr.msk.f32.vlgmr.msra.gmra.mxu1 %vm369_vm12, %v1275_v10 }
0x1660   :  { %1389 = vmatprep.mubr.f32.mxu1 %v7256_v0  ;;  %6037 = vmatpush3.msra.mxu1 %v7760_v12 }
0x1661   :  { %6038 = vmatprep.subr.mxu1 %v7256_v0 }
0x1662   :  { %6039 = vmatpush3.msra.mxu1 %v7769_v57 }
0x1663   :  { %5446 = vmatmul.mubr.msk.f32.gmra.mxu1 %vm369_vm12, %v1276_v18  ;;  %6040 = vmatprep.subr.mxu1 %v7256_v0 }
0x1664   :  { %6041 = vmatpush3.msra.mxu1 %v7775_v14  ;;  %6052 = vmatprep.mubr.msk.f32.mxu1 %vm7257_vm0, %v7256_v0 }
0x1665   :  { %6042 = vmatprep.subr.mxu1 %v7256_v0 }
0x1666   :  { %6043 = vmatpush3.msra.mxu1 %v7787_v44 }
0x1667   :  { %6044 = vmatprep.subr.mxu1 %v7256_v0 }
0x1668   :  { %6045 = vmatpush3.msra.mxu1 %v7789_v60 }
0x1669   :  { %6046 = vmatprep.subr.mxu1 %v7256_v0 }
0x166a   :  { %6047 = vmatpush3.msra.mxu1 %v7796_v63 }
0x166b   :  { %6048 = vmatprep.subr.mxu1 %v7256_v0 }
0x166c   :  { %6049 = vmatpush3.msra.mxu1 %v7800_v1 }
0x166d   :  { %6050 = vmatprep.subr.mxu1 %v7256_v0 }
0x166e   :  { %6051 = vmatpush3.msra.mxu1 %v7804_v3 }
0x166f   :  { %6074 = vmatprep.subr.mxu1 %v7256_v0 }
0x171f   :  { %v1385_v23 = vpop.f32.mrf.mxu1 }
0x1720   :  { %v1386_v24 = vadd.f32 %v1385_v23, %v1306_v21 }
0x1721   :  { %v1387_v50 = vpop.f32.mrf.mxu1 }
0x1722   :  { %v1388_v25 = vadd.f32 %v1387_v50, %v1310_v22  ;;  %v1507_v29 = vrot.slane %v1386_v24, 2  ;;  %v1621_v30 = vrot.slane %v1386_v24, 4  ;;  %v1733_v36 = vrot.slane %v1386_v24, 6 }
0x1723   :  { %v1391_v45 = vpop.f32.mrf.mxu1 }
0x1724   :  { %v1392_v26 = vadd.f32 %v1391_v45, %v1306_v21  ;;  %v1848_v27 = vrot.slane %v1388_v25, 4  ;;  %v1963_v37 = vrot.slane %v1388_v25, 2  ;;  %v2189_v39 = vrot.slane %v1388_v25, 6 }
0x1725   :  { %v1393_v28 = vpop.f32.mrf.mxu1 }
0x1726   :  { %v1394_v31 = vadd.f32 %v1393_v28, %v1310_v22  ;;  %v7855_v32 = vsel %vm367_vm3, %v1392_v26, %v1848_v27  ;;  %v1961_v34 = vrot.slane %v1392_v26, 2  ;;  %v2075_v35 = vrot.slane %v1392_v26, 4 }
0x1727   :  { %v2187_v38 = vrot.slane %v1392_v26, 6 }
0x1728   :  { %v1397_v40 = vrot.slane %v1394_v31, 4  ;;  %v1509_v41 = vrot.slane %v1394_v31, 2  ;;  %v7858_v43 = vsel %vm367_vm3, %v1621_v30, %v1394_v31  ;;  %v1735_v47 = vrot.slane %v1394_v31, 6 }
0x1729   :  { %v7861_v48 = vsel %vm367_vm3, %v1961_v34, %v1963_v37  ;;  %v7864_v33 = vsel %vm367_vm3, %v2075_v35, %v1388_v25  ;;  %v7867_v46 = vsel %vm367_vm3, %v2187_v38, %v2189_v39 }
0x172a   :  { %v1399_v49 = vsel %vm367_vm3, %v1386_v24, %v1397_v40  ;;  %v1511_v51 = vsel %vm367_vm3, %v1507_v29, %v1509_v41  ;;  %v7872_v52 = vsel %vm367_vm3, %v1733_v36, %v1735_v47 }
0x172b   :  { %v1470_v53 = vadd.f32 %v1466_v15, %v1399_v49 }
0x172d   :  { %6686 = vtanh.f32 %v1470_v53  ;;  %v5447_v55 = vmul.f32 -1.442695, %v1470_v53 }
0x172f   :  { %6688 = vpow2.f32 %v5447_v55 }
0x173a   :  { %v6687_v54 = vpop.eup %6686 }
0x173b   :  { %1480 = vrot.lane.b32.xlu0 %v6687_v54, %s7258_s20 }
0x173c   :  { %v6689_v2 = vpop.eup %6688 }
0x173d   :  { %v1474_v5 = vadd.f32 1.0, %v6689_v2 }
0x173f   :  { %6690 = vrcp.f32 %v1474_v5 }
0x174c   :  { %v6691_v8 = vpop.eup %6690 }
0x174d   :  { %v1478_v56 = vmul.f32 0.0, %v6691_v8 }
0x17ad   :  { %v1481_v9 = vpop.permute.xlu0 %1480 }
0x17ae   :  { %v1483_v11 = vmul.f32 %v6691_v8, %v1481_v9 }
0x17b0   :  { %1485 = vrot.lane.b32.xlu1 %v1483_v11, %s7259_s7 }
0x1822   :  { %v1486_v13 = vpop.permute.xlu1 %1485 }
0x1823   :  { %v1488_v42 = vadd.f32 %v1486_v13, %v1478_v56 }
0x1825   :  { %6692 = vtanh.f32 %v1488_v42 }
0x1832   :  { %v6693_v58 = vpop.eup %6692 }
0x1833   :  { %1491 = vrot.lane.b32.xlu0 %v6693_v58, %s7258_s20 }
0x18a5   :  { %v1492_v59 = vpop.permute.xlu0 %1491 }
0x18a6   :  { %v1494_v61 = vmul.f32 %v6691_v8, %v1492_v59 }
0x18a8   :  { %1499 = vrot.lane.b32.xlu0 %v1494_v61, %s7258_s20  ;;  %1496 = vrot.lane.b32.xlu1 %v1494_v61, %s7259_s7 }
0x191a   :  { %v1500_v62 = vpop.permute.xlu0 %1499  ;;  %v1497_v4 = vpop.permute.xlu1 %1496 }
0x191b   :  { %1505 = vst.msk [vmem:[#allocation3 + $0xc] sm:$0xc] %vm480_vm7, %v1500_v62  ;;  %v1502_v7 = vsel %vm475_vm8, %v1497_v4, %v1500_v62 }
0x191c   :  { %1504 = vst.msk [vmem:[#allocation3] sm:$0x3] %vm478_vm9, %v1497_v4  ;;  %v1503_v10 = vsel %vm7549_vm11, %v1502_v7, 0.0 }
0x191d   :  { %6053 = vmatmul.mubr.msk.f32.vlgmr.msra.gmra.mxu1 %vm369_vm12, %v1503_v10 }
0x191e   :  { %6075 = vmatpush3.msra.mxu1 %v7760_v12  ;;  %6090 = vmatprep.mubr.msk.f32.mxu1 %vm7257_vm0, %v7256_v0 }
0x191f   :  { %6076 = vmatprep.subr.mxu1 %v7256_v0 }
0x1920   :  { %6077 = vmatpush3.msra.mxu1 %v7769_v57 }
0x1921   :  { %6078 = vmatprep.subr.mxu1 %v7256_v0 }
0x1922   :  { %6079 = vmatpush3.msra.mxu1 %v7775_v14 }
0x1923   :  { %6080 = vmatprep.subr.mxu1 %v7256_v0 }
0x1924   :  { %6081 = vmatpush3.msra.mxu1 %v7787_v44 }
0x1925   :  { %6082 = vmatprep.subr.mxu1 %v7256_v0 }
0x1926   :  { %6083 = vmatpush3.msra.mxu1 %v7789_v60 }
0x1927   :  { %6084 = vmatprep.subr.mxu1 %v7256_v0 }
0x1928   :  { %6085 = vmatpush3.msra.mxu1 %v7796_v63 }
0x1929   :  { %6086 = vmatprep.subr.mxu1 %v7256_v0 }
0x192a   :  { %6087 = vmatpush3.msra.mxu1 %v7800_v1 }
0x192b   :  { %6088 = vmatprep.subr.mxu1 %v7256_v0 }
0x192c   :  { %6089 = vmatpush3.msra.mxu1 %v7804_v3 }
0x192d   :  { %6112 = vmatprep.subr.mxu1 %v7256_v0 }
0x19dd   :  { %v1581_v18 = vpop.f32.mrf.mxu1 }
0x19de   :  { %v1585_v15 = vadd.f32 %v1581_v18, %v1511_v51 }
0x19df   :  { %v6054_v16 = vpop.f32.mrf.mxu1 }
0x19e0   :  { %6694 = vtanh.f32 %v1585_v15  ;;  %v5449_v21 = vmul.f32 -1.442695, %v1585_v15 }
0x19e2   :  { %6696 = vpow2.f32 %v5449_v21 }
0x19ed   :  { %v6695_v20 = vpop.eup %6694 }
0x19ee   :  { %1595 = vrot.lane.b32.xlu1 %v6695_v20, %s7258_s20 }
0x19ef   :  { %v6697_v22 = vpop.eup %6696 }
0x19f0   :  { %v1589_v23 = vadd.f32 1.0, %v6697_v22 }
0x19f2   :  { %6698 = vrcp.f32 %v1589_v23 }
0x19ff   :  { %v6699_v24 = vpop.eup %6698 }
0x1a00   :  { %v1593_v45 = vmul.f32 %v6699_v24, %v1488_v42 }
0x1a60   :  { %v1596_v50 = vpop.permute.xlu1 %1595 }
0x1a61   :  { %v1598_v25 = vmul.f32 %v6699_v24, %v1596_v50 }
0x1a63   :  { %1600 = vrot.lane.b32.xlu0 %v1598_v25, %s7259_s7 }
0x1ad5   :  { %v1601_v26 = vpop.permute.xlu0 %1600 }
0x1ad6   :  { %v1603_v27 = vadd.f32 %v1601_v26, %v1593_v45 }
0x1ad8   :  { %6700 = vtanh.f32 %v1603_v27 }
0x1ae5   :  { %v6701_v28 = vpop.eup %6700 }
0x1ae6   :  { %1606 = vrot.lane.b32.xlu1 %v6701_v28, %s7258_s20 }
0x1b58   :  { %v1607_v29 = vpop.permute.xlu1 %1606 }
0x1b59   :  { %v1609_v30 = vmul.f32 %v6699_v24, %v1607_v29 }
0x1b5b   :  { %1614 = vrot.lane.b32.xlu1 %v1609_v30, %s7258_s20  ;;  %1611 = vrot.lane.b32.xlu0 %v1609_v30, %s7259_s7 }
0x1bcd   :  { %v1615_v31 = vpop.permute.xlu1 %1614  ;;  %v1612_v34 = vpop.permute.xlu0 %1611 }
0x1bce   :  { %1620 = vst.msk [vmem:[#allocation3 + $0xa] sm:$0xc] %vm480_vm7, %v1615_v31  ;;  %v1617_v35 = vsel %vm475_vm8, %v1612_v34, %v1615_v31 }
0x1bcf   :  { %1619 = vst.msk [vmem:[#allocation3 + $0x2] sm:$0x3] %vm478_vm9, %v1612_v34  ;;  %v1618_v36 = vsel %vm7549_vm11, %v1617_v35, 0.0 }
0x1bd0   :  { %6072 = vmatmul.mubr.msk.f32.vlgmr.msra.gmra.mxu0 %vm369_vm12, %v1618_v36 }
0x1bd1   :  { %6094 = vmatpush3.msra.mxu0 %v7760_v12  ;;  %6109 = vmatprep.mubr.msk.f32.mxu0 %vm7257_vm0, %v7256_v0 }
0x1bd2   :  { %6095 = vmatprep.subr.mxu0 %v7256_v0 }
0x1bd3   :  { %6096 = vmatpush3.msra.mxu0 %v7769_v57 }
0x1bd4   :  { %6097 = vmatprep.subr.mxu0 %v7256_v0 }
0x1bd5   :  { %6098 = vmatpush3.msra.mxu0 %v7775_v14 }
0x1bd6   :  { %6099 = vmatprep.subr.mxu0 %v7256_v0 }
0x1bd7   :  { %6100 = vmatpush3.msra.mxu0 %v7787_v44 }
0x1bd8   :  { %6101 = vmatprep.subr.mxu0 %v7256_v0 }
0x1bd9   :  { %6102 = vmatpush3.msra.mxu0 %v7789_v60 }
0x1bda   :  { %6103 = vmatprep.subr.mxu0 %v7256_v0 }
0x1bdb   :  { %6104 = vmatpush3.msra.mxu0 %v7796_v63 }
0x1bdc   :  { %6105 = vmatprep.subr.mxu0 %v7256_v0 }
0x1bdd   :  { %6106 = vmatpush3.msra.mxu0 %v7800_v1 }
0x1bde   :  { %6107 = vmatprep.subr.mxu0 %v7256_v0 }
0x1bdf   :  { %6108 = vmatpush3.msra.mxu0 %v7804_v3 }
0x1be0   :  { %6131 = vmatprep.subr.mxu0 %v7256_v0 }
0x1c90   :  { %v1693_v37 = vpop.f32.mrf.mxu0 }
0x1c91   :  { %v1697_v38 = vadd.f32 %v1693_v37, %v7858_v43 }
0x1c92   :  { %v6073_v39 = vpop.f32.mrf.mxu0 }
0x1c93   :  { %6702 = vtanh.f32 %v1697_v38  ;;  %v5451_v41 = vmul.f32 -1.442695, %v1697_v38 }
0x1c95   :  { %6704 = vpow2.f32 %v5451_v41 }
0x1ca0   :  { %v6703_v40 = vpop.eup %6702 }
0x1ca1   :  { %1707 = vrot.lane.b32.xlu0 %v6703_v40, %s7258_s20 }
0x1ca2   :  { %v6705_v47 = vpop.eup %6704 }
0x1ca3   :  { %v1701_v49 = vadd.f32 1.0, %v6705_v47 }
0x1ca5   :  { %6706 = vrcp.f32 %v1701_v49 }
0x1cb2   :  { %v6707_v51 = vpop.eup %6706 }
0x1cb3   :  { %v1705_v55 = vmul.f32 %v6707_v51, %v1603_v27 }
0x1d13   :  { %v1708_v53 = vpop.permute.xlu0 %1707 }
0x1d14   :  { %v1710_v54 = vmul.f32 %v6707_v51, %v1708_v53 }
0x1d16   :  { %1712 = vrot.lane.b32.xlu1 %v1710_v54, %s7259_s7 }
0x1d88   :  { %v1713_v2 = vpop.permute.xlu1 %1712 }
0x1d89   :  { %v1715_v5 = vadd.f32 %v1713_v2, %v1705_v55 }
0x1d8b   :  { %6708 = vtanh.f32 %v1715_v5 }
0x1d98   :  { %v6709_v43 = vpop.eup %6708 }
0x1d99   :  { %1718 = vrot.lane.b32.xlu0 %v6709_v43, %s7258_s20 }
0x1e0b   :  { %v1719_v8 = vpop.permute.xlu0 %1718 }
0x1e0c   :  { %v1721_v9 = vmul.f32 %v6707_v51, %v1719_v8 }
0x1e0e   :  { %1726 = vrot.lane.b32.xlu0 %v1721_v9, %s7258_s20  ;;  %1723 = vrot.lane.b32.xlu1 %v1721_v9, %s7259_s7 }
0x1e80   :  { %v1727_v11 = vpop.permute.xlu0 %1726  ;;  %v1724_v56 = vpop.permute.xlu1 %1723 }
0x1e81   :  { %1732 = vst.msk [vmem:[#allocation3 + $0x8] sm:$0xc] %vm480_vm7, %v1727_v11  ;;  %v1729_v13 = vsel %vm475_vm8, %v1724_v56, %v1727_v11 }
0x1e82   :  { %1731 = vst.msk [vmem:[#allocation3 + $0x4] sm:$0x3] %vm478_vm9, %v1724_v56  ;;  %v1730_v42 = vsel %vm7549_vm11, %v1729_v13, 0.0 }
0x1e83   :  { %6091 = vmatmul.mubr.msk.f32.vlgmr.msra.gmra.mxu1 %vm369_vm12, %v1730_v42 }
0x1e84   :  { %6113 = vmatpush3.msra.mxu1 %v7760_v12  ;;  %6128 = vmatprep.mubr.msk.f32.mxu1 %vm7257_vm0, %v7256_v0 }
0x1e85   :  { %6114 = vmatprep.subr.mxu1 %v7256_v0 }
0x1e86   :  { %6115 = vmatpush3.msra.mxu1 %v7769_v57 }
0x1e87   :  { %6116 = vmatprep.subr.mxu1 %v7256_v0 }
0x1e88   :  { %6117 = vmatpush3.msra.mxu1 %v7775_v14 }
0x1e89   :  { %6118 = vmatprep.subr.mxu1 %v7256_v0 }
0x1e8a   :  { %6119 = vmatpush3.msra.mxu1 %v7787_v44 }
0x1e8b   :  { %6120 = vmatprep.subr.mxu1 %v7256_v0 }
0x1e8c   :  { %6121 = vmatpush3.msra.mxu1 %v7789_v60 }
0x1e8d   :  { %6122 = vmatprep.subr.mxu1 %v7256_v0 }
0x1e8e   :  { %6123 = vmatpush3.msra.mxu1 %v7796_v63 }
0x1e8f   :  { %6124 = vmatprep.subr.mxu1 %v7256_v0 }
0x1e90   :  { %6125 = vmatpush3.msra.mxu1 %v7800_v1 }
0x1e91   :  { %6126 = vmatprep.subr.mxu1 %v7256_v0 }
0x1e92   :  { %6127 = vmatpush3.msra.mxu1 %v7804_v3 }
0x1e93   :  { %6150 = vmatprep.subr.mxu1 %v7256_v0 }
0x1f43   :  { %v1807_v58 = vpop.f32.mrf.mxu1 }
0x1f44   :  { %v1811_v59 = vadd.f32 %v1807_v58, %v7872_v52 }
0x1f45   :  { %v6092_v61 = vpop.f32.mrf.mxu1 }
0x1f46   :  { %6710 = vtanh.f32 %v1811_v59  ;;  %v5453_v4 = vmul.f32 -1.442695, %v1811_v59 }
0x1f48   :  { %6712 = vpow2.f32 %v5453_v4 }
0x1f53   :  { %v6711_v62 = vpop.eup %6710 }
0x1f54   :  { %1821 = vrot.lane.b32.xlu1 %v6711_v62, %s7258_s20 }
0x1f55   :  { %v6713_v7 = vpop.eup %6712 }
0x1f56   :  { %v1815_v10 = vadd.f32 1.0, %v6713_v7 }
0x1f58   :  { %6714 = vrcp.f32 %v1815_v10 }
0x1f65   :  { %v6715_v18 = vpop.eup %6714 }
0x1f66   :  { %v1819_v20 = vmul.f32 %v6715_v18, %v1715_v5 }
0x1fc6   :  { %v1822_v15 = vpop.permute.xlu1 %1821 }
0x1fc7   :  { %v1824_v16 = vmul.f32 %v6715_v18, %v1822_v15 }
0x1fc9   :  { %1826 = vrot.lane.b32.xlu0 %v1824_v16, %s7259_s7 }
0x203b   :  { %v1827_v21 = vpop.permute.xlu0 %1826 }
0x203c   :  { %v1829_v22 = vadd.f32 %v1827_v21, %v1819_v20 }
0x203e   :  { %6716 = vtanh.f32 %v1829_v22 }
0x204b   :  { %v6717_v52 = vpop.eup %6716 }
0x204c   :  { %1832 = vrot.lane.b32.xlu1 %v6717_v52, %s7258_s20 }
0x20be   :  { %v1833_v23 = vpop.permute.xlu1 %1832 }
0x20bf   :  { %v1835_v24 = vmul.f32 %v6715_v18, %v1833_v23 }
0x20c1   :  { %1840 = vrot.lane.b32.xlu1 %v1835_v24, %s7258_s20  ;;  %1837 = vrot.lane.b32.xlu0 %v1835_v24, %s7259_s7 }
0x2133   :  { %v1841_v50 = vpop.permute.xlu1 %1840  ;;  %v1838_v25 = vpop.permute.xlu0 %1837 }
0x2134   :  { %1846 = vst.msk [vmem:[#allocation3 + $0x6] sm:$0xc] %vm480_vm7, %v1841_v50  ;;  %v1843_v45 = vsel %vm475_vm8, %v1838_v25, %v1841_v50 }
0x2135   :  { %1845 = vst.msk [vmem:[#allocation3 + $0x6] sm:$0x3] %vm478_vm9, %v1838_v25  ;;  %v1844_v26 = vsel %vm7549_vm11, %v1843_v45, 0.0 }
0x2136   :  { %6110 = vmatmul.mubr.msk.f32.vlgmr.msra.gmra.mxu0 %vm369_vm12, %v1844_v26 }
0x2137   :  { %6132 = vmatpush3.msra.mxu0 %v7760_v12  ;;  %6147 = vmatprep.mubr.msk.f32.mxu0 %vm7257_vm0, %v7256_v0 }
0x2138   :  { %6133 = vmatprep.subr.mxu0 %v7256_v0 }
0x2139   :  { %6134 = vmatpush3.msra.mxu0 %v7769_v57 }
0x213a   :  { %6135 = vmatprep.subr.mxu0 %v7256_v0 }
0x213b   :  { %6136 = vmatpush3.msra.mxu0 %v7775_v14 }
0x213c   :  { %6137 = vmatprep.subr.mxu0 %v7256_v0 }
0x213d   :  { %6138 = vmatpush3.msra.mxu0 %v7787_v44 }
0x213e   :  { %6139 = vmatprep.subr.mxu0 %v7256_v0 }
0x213f   :  { %6140 = vmatpush3.msra.mxu0 %v7789_v60 }
0x2140   :  { %6141 = vmatprep.subr.mxu0 %v7256_v0 }
0x2141   :  { %6142 = vmatpush3.msra.mxu0 %v7796_v63 }
0x2142   :  { %6143 = vmatprep.subr.mxu0 %v7256_v0 }
0x2143   :  { %6144 = vmatpush3.msra.mxu0 %v7800_v1 }
0x2144   :  { %6145 = vmatprep.subr.mxu0 %v7256_v0 }
0x2145   :  { %6146 = vmatpush3.msra.mxu0 %v7804_v3 }
0x21f6   :  { %v1920_v27 = vpop.f32.mrf.mxu0 }
0x21f7   :  { %v1924_v28 = vadd.f32 %v1920_v27, %v7855_v32 }
0x21f8   :  { %v6111_v29 = vpop.f32.mrf.mxu0 }
0x21f9   :  { %6718 = vtanh.f32 %v1924_v28  ;;  %v5455_v31 = vmul.f32 -1.442695, %v1924_v28 }
0x21fb   :  { %6720 = vpow2.f32 %v5455_v31 }
0x2206   :  { %v6719_v30 = vpop.eup %6718 }
0x2207   :  { %1934 = vrot.lane.b32.xlu0 %v6719_v30, %s7258_s20 }
0x2208   :  { %v6721_v34 = vpop.eup %6720 }
0x2209   :  { %v1928_v35 = vadd.f32 1.0, %v6721_v34 }
0x220b   :  { %6722 = vrcp.f32 %v1928_v35 }
0x2218   :  { %v6723_v36 = vpop.eup %6722 }
0x2219   :  { %v1932_v39 = vmul.f32 %v6723_v36, %v1829_v22 }
0x2279   :  { %v1935_v37 = vpop.permute.xlu0 %1934 }
0x227a   :  { %v1937_v38 = vmul.f32 %v6723_v36, %v1935_v37 }
0x227c   :  { %1939 = vrot.lane.b32.xlu1 %v1937_v38, %s7259_s7 }
0x22ee   :  { %v1940_v40 = vpop.permute.xlu1 %1939 }
0x22ef   :  { %v1942_v41 = vadd.f32 %v1940_v40, %v1932_v39 }
0x22f1   :  { %6724 = vtanh.f32 %v1942_v41 }
0x22fe   :  { %v6725_v32 = vpop.eup %6724 }
0x22ff   :  { %1945 = vrot.lane.b32.xlu0 %v6725_v32, %s7258_s20 }
0x2371   :  { %v1946_v47 = vpop.permute.xlu0 %1945 }
0x2372   :  { %v1948_v49 = vmul.f32 %v6723_v36, %v1946_v47  ;;  %v2307_v47 = vld [vmem:[#allocation12 + $0x30] sm:$0xff] }
0x2374   :  { %1953 = vrot.lane.b32.xlu0 %v1948_v49, %s7258_s20  ;;  %1950 = vrot.lane.b32.xlu1 %v1948_v49, %s7259_s7  ;;  %v2306_v49 = vld [vmem:[#allocation12 + $0x28] sm:$0xff] }
0x23e6   :  { %v1954_v51 = vpop.permute.xlu0 %1953  ;;  %v1951_v53 = vpop.permute.xlu1 %1950 }
0x23e7   :  { %1959 = vst.msk [vmem:[#allocation3 + $0x4] sm:$0xc] %vm480_vm7, %v1954_v51  ;;  %v1956_v54 = vsel %vm475_vm8, %v1951_v53, %v1954_v51  ;;  %v2305_v51 = vld [vmem:[#allocation12 + $0x20] sm:$0xff] }
0x23e8   :  { %1958 = vst.msk [vmem:[#allocation3 + $0x8] sm:$0x3] %vm478_vm9, %v1951_v53  ;;  %v1957_v55 = vsel %vm7549_vm11, %v1956_v54, 0.0  ;;  %v2304_v54 = vld [vmem:[#allocation12 + $0x18] sm:$0xff] }
0x23e9   :  { %6129 = vmatmul.mubr.msk.f32.vlgmr.msra.gmra.mxu1 %vm369_vm12, %v1957_v55  ;;  %v2303_v55 = vld [vmem:[#allocation12 + $0x10] sm:$0xff] }
0x23ea   :  { %6151 = vmatpush3.msra.mxu1 %v7760_v12  ;;  %6166 = vmatprep.mubr.msk.f32.mxu1 %vm7257_vm0, %v7256_v0 }
0x23eb   :  { %6152 = vmatprep.subr.mxu1 %v7256_v0 }
0x23ec   :  { %6153 = vmatpush3.msra.mxu1 %v7769_v57 }
0x23ed   :  { %6154 = vmatprep.subr.mxu1 %v7256_v0 }
0x23ee   :  { %6155 = vmatpush3.msra.mxu1 %v7775_v14 }
0x23ef   :  { %6156 = vmatprep.subr.mxu1 %v7256_v0 }
0x23f0   :  { %6157 = vmatpush3.msra.mxu1 %v7787_v44 }
0x23f1   :  { %6158 = vmatprep.subr.mxu1 %v7256_v0 }
0x23f2   :  { %6159 = vmatpush3.msra.mxu1 %v7789_v60 }
0x23f3   :  { %6160 = vmatprep.subr.mxu1 %v7256_v0 }
0x23f4   :  { %6161 = vmatpush3.msra.mxu1 %v7796_v63 }
0x23f5   :  { %6162 = vmatprep.subr.mxu1 %v7256_v0 }
0x23f6   :  { %6163 = vmatpush3.msra.mxu1 %v7800_v1 }
0x23f7   :  { %6164 = vmatprep.subr.mxu1 %v7256_v0 }
0x23f8   :  { %6165 = vmatpush3.msra.mxu1 %v7804_v3 }
0x23f9   :  { %6188 = vmatprep.subr.mxu1 %v7256_v0 }
0x24a9   :  { %v2035_v12 = vpop.f32.mrf.mxu1 }
0x24aa   :  { %v2039_v57 = vadd.f32 %v2035_v12, %v7861_v48  ;;  %v8051_v12 = vld [vmem:[#allocation15 + $0x18] sm:$0xff] }
0x24ab   :  { %v6130_v14 = vpop.f32.mrf.mxu1 }
0x24ac   :  { %6726 = vtanh.f32 %v2039_v57  ;;  %v5457_v60 = vmul.f32 -1.442695, %v2039_v57  ;;  %v8054_v57 = vld [vmem:[#allocation15 + $0x10] sm:$0xff]  ;;  %v2302_v14 = vld [vmem:[#allocation12 + $0x8] sm:$0xff] }
0x24ae   :  { %6728 = vpow2.f32 %v5457_v60  ;;  %v8059_v60 = vld [vmem:[#allocation15 + $0x8] sm:$0xff] }
0x24b9   :  { %v6727_v44 = vpop.eup %6726 }
0x24ba   :  { %2049 = vrot.lane.b32.xlu1 %v6727_v44, %s7258_s20  ;;  %v2301_v44 = vld [vmem:[#allocation12] sm:$0xff] }
0x24bb   :  { %v6729_v63 = vpop.eup %6728 }
0x24bc   :  { %v2043_v2 = vadd.f32 1.0, %v6729_v63  ;;  %v8062_v63 = vld [vmem:[#allocation15] sm:$0xff] }
0x24be   :  { %6730 = vrcp.f32 %v2043_v2 }
0x24cb   :  { %v6731_v1 = vpop.eup %6730 }
0x24cc   :  { %v2047_v3 = vmul.f32 %v6731_v1, %v1942_v41 }
0x252c   :  { %v2050_v5 = vpop.permute.xlu1 %2049 }
0x252d   :  { %v2052_v43 = vmul.f32 %v6731_v1, %v2050_v5 }
0x252f   :  { %2054 = vrot.lane.b32.xlu0 %v2052_v43, %s7259_s7 }
0x25a1   :  { %v2055_v8 = vpop.permute.xlu0 %2054 }
0x25a2   :  { %v2057_v9 = vadd.f32 %v2055_v8, %v2047_v3 }
0x25a4   :  { %6732 = vtanh.f32 %v2057_v9 }
0x25b1   :  { %v6733_v48 = vpop.eup %6732 }
0x25b2   :  { %2060 = vrot.lane.b32.xlu1 %v6733_v48, %s7258_s20 }
0x2624   :  { %v2061_v11 = vpop.permute.xlu1 %2060 }
0x2625   :  { %v2063_v56 = vmul.f32 %v6731_v1, %v2061_v11  ;;  %v5462_v11 = vld [vmem:[#allocation13] ss:$0 sm:$0xff] }
0x2627   :  { %2068 = vrot.lane.b32.xlu1 %v2063_v56, %s7258_s20  ;;  %2065 = vrot.lane.b32.xlu0 %v2063_v56, %s7259_s7 }
0x2699   :  { %v2069_v13 = vpop.permute.xlu1 %2068  ;;  %v2066_v42 = vpop.permute.xlu0 %2065 }
0x269a   :  { %2074 = vst.msk [vmem:[#allocation3 + $0x2] sm:$0xc] %vm480_vm7, %v2069_v13  ;;  %v2071_v58 = vsel %vm475_vm8, %v2066_v42, %v2069_v13 }
0x269b   :  { %2073 = vst.msk [vmem:[#allocation3 + $0xa] sm:$0x3] %vm478_vm9, %v2066_v42  ;;  %v2072_v59 = vsel %vm7549_vm11, %v2071_v58, 0.0 }
0x269c   :  { %6148 = vmatmul.mubr.msk.f32.vlgmr.msra.gmra.mxu0 %vm369_vm12, %v2072_v59 }
0x275c   :  { %v2147_v61 = vpop.f32.mrf.mxu0 }
0x275d   :  { %v2151_v62 = vadd.f32 %v2147_v61, %v7864_v33 }
0x275e   :  { %v6149_v4 = vpop.f32.mrf.mxu0 }
0x275f   :  { %6734 = vtanh.f32 %v2151_v62  ;;  %v5459_v10 = vmul.f32 -1.442695, %v2151_v62 }
0x2761   :  { %6736 = vpow2.f32 %v5459_v10 }
0x276c   :  { %v6735_v7 = vpop.eup %6734 }
0x276d   :  { %2161 = vrot.lane.b32.xlu0 %v6735_v7, %s7258_s20 }
0x276e   :  { %v6737_v18 = vpop.eup %6736 }
0x276f   :  { %v2155_v15 = vadd.f32 1.0, %v6737_v18 }
0x2771   :  { %6738 = vrcp.f32 %v2155_v15 }
0x277e   :  { %v6739_v16 = vpop.eup %6738 }
0x277f   :  { %v2159_v22 = vmul.f32 %v6739_v16, %v2057_v9 }
0x27df   :  { %v2162_v20 = vpop.permute.xlu0 %2161 }
0x27e0   :  { %v2164_v21 = vmul.f32 %v6739_v16, %v2162_v20 }
0x27e2   :  { %2166 = vrot.lane.b32.xlu1 %v2164_v21, %s7259_s7 }
0x2854   :  { %v2167_v52 = vpop.permute.xlu1 %2166 }
0x2855   :  { %v2169_v23 = vadd.f32 %v2167_v52, %v2159_v22 }
0x2857   :  { %6740 = vtanh.f32 %v2169_v23 }
0x2864   :  { %v6741_v33 = vpop.eup %6740 }
0x2865   :  { %2172 = vrot.lane.b32.xlu0 %v6741_v33, %s7258_s20 }
0x28d7   :  { %v2173_v24 = vpop.permute.xlu0 %2172 }
0x28d8   :  { %v2175_v50 = vmul.f32 %v6739_v16, %v2173_v24 }
0x28da   :  { %2180 = vrot.lane.b32.xlu0 %v2175_v50, %s7258_s20  ;;  %2177 = vrot.lane.b32.xlu1 %v2175_v50, %s7259_s7 }
0x294c   :  { %v2181_v25 = vpop.permute.xlu0 %2180  ;;  %v2178_v45 = vpop.permute.xlu1 %2177 }
0x294d   :  { %2186 = vst.msk [vmem:[#allocation3] sm:$0xc] %vm480_vm7, %v2181_v25  ;;  %v2183_v26 = vsel %vm475_vm8, %v2178_v45, %v2181_v25 }
0x294e   :  { %2185 = vst.msk [vmem:[#allocation3 + $0xc] sm:$0x3] %vm478_vm9, %v2178_v45  ;;  %v2184_v27 = vsel %vm7549_vm11, %v2183_v26, 0.0 }
0x294f   :  { %6167 = vmatmul.mubr.msk.f32.vlgmr.msra.gmra.mxu1 %vm369_vm12, %v2184_v27 }
0x2950   :  { %6196 = vmatprep.mubr.msk.f32.mxu1 %vm7257_vm0, %v7256_v0  ;;  %6189 = vmatpush3.msra.mxu1 %v8051_v12 }
0x2951   :  { %6190 = vmatprep.subr.mxu1 %v7256_v0 }
0x2952   :  { %6191 = vmatpush3.msra.mxu1 %v8054_v57 }
0x2953   :  { %6192 = vmatprep.subr.mxu1 %v7256_v0 }
0x2954   :  { %6193 = vmatpush3.msra.mxu1 %v8059_v60 }
0x2955   :  { %6194 = vmatprep.subr.mxu1 %v7256_v0 }
0x2956   :  { %6195 = vmatpush3.msra.mxu1 %v8062_v63 }
0x2957   :  { %6197 = vmatmul.mubr.f32.vlgmr.msra.gmra.mxu1 %v7256_v0  ;;  %6210 = vmatprep.subr.mxu1 %v7256_v0 }
0x2958   :  { %6211 = vmatpush3.msra.mxu1 %v8051_v12  ;;  %6218 = vmatprep.mubr.msk.f32.mxu1 %vm7257_vm0, %v7256_v0 }
0x2959   :  { %6212 = vmatprep.subr.mxu1 %v7256_v0 }
0x295a   :  { %6213 = vmatpush3.msra.mxu1 %v8054_v57 }
0x295b   :  { %6214 = vmatprep.subr.mxu1 %v7256_v0 }
0x295c   :  { %6215 = vmatpush3.msra.mxu1 %v8059_v60 }
0x295d   :  { %6216 = vmatprep.subr.mxu1 %v7256_v0 }
0x295e   :  { %6217 = vmatpush3.msra.mxu1 %v8062_v63 }
0x295f   :  { %6232 = vmatprep.subr.mxu1 %v7256_v0 }
0x2a0f   :  { %v2261_v28 = vpop.f32.mrf.mxu1 }
0x2a10   :  { %v2265_v29 = vadd.f32 %v2261_v28, %v7867_v46  ;;  %v2308_v46 = vld [vmem:[#allocation12 + $0x38] sm:$0xff] }
0x2a11   :  { %v6168_v30 = vpop.f32.mrf.mxu1  ;;  %6169 = vmatprep.subr.mxu0 %v2308_v46 }
0x2a12   :  { %6742 = vtanh.f32 %v2265_v29  ;;  %v5461_v34 = vmul.f32 -1.442695, %v2265_v29  ;;  %6170 = vmatpush3.msra.mxu0 %v2308_v46 }
0x2a13   :  { %6171 = vmatprep.subr.mxu0 %v2307_v47 }
0x2a14   :  { %6744 = vpow2.f32 %v5461_v34  ;;  %6172 = vmatpush3.msra.mxu0 %v2307_v47 }
0x2a15   :  { %6173 = vmatprep.subr.mxu0 %v2306_v49 }
0x2a16   :  { %6174 = vmatpush3.msra.mxu0 %v2306_v49 }
0x2a17   :  { %6175 = vmatprep.subr.mxu0 %v2305_v51  ;;  %v2469_v9 = vpop.f32.mrf.mxu1 }
0x2a18   :  { %6176 = vmatpush3.msra.mxu0 %v2305_v51 }
0x2a19   :  { %6177 = vmatprep.subr.mxu0 %v2304_v54  ;;  %v6198_v48 = vpop.f32.mrf.mxu1 }
0x2a1a   :  { %6178 = vmatpush3.msra.mxu0 %v2304_v54 }
0x2a1b   :  { %6179 = vmatprep.subr.mxu0 %v2303_v55 }
0x2a1c   :  { %6180 = vmatpush3.msra.mxu0 %v2303_v55 }
0x2a1d   :  { %6181 = vmatprep.subr.mxu0 %v2302_v14 }
0x2a1e   :  { %6182 = vmatpush3.msra.mxu0 %v2302_v14 }
0x2a1f   :  { %v6743_v31 = vpop.eup %6742  ;;  %6183 = vmatprep.subr.mxu0 %v2301_v44 }
0x2a20   :  { %2275 = vrot.lane.b32.xlu1 %v6743_v31, %s7258_s20  ;;  %6184 = vmatpush3.msra.mxu0 %v2301_v44 }
0x2a21   :  { %v6745_v35 = vpop.eup %6744  ;;  %6199 = vmatprep.subr.mxu0 %v7256_v0 }
0x2a22   :  { %v2269_v36 = vadd.f32 1.0, %v6745_v35 }
0x2a24   :  { %6746 = vrcp.f32 %v2269_v36 }
0x2a31   :  { %v6747_v37 = vpop.eup %6746 }
0x2a32   :  { %v2273_v40 = vmul.f32 %v6747_v37, %v2169_v23 }
0x2a92   :  { %v2276_v38 = vpop.permute.xlu1 %2275 }
0x2a93   :  { %v2278_v39 = vmul.f32 %v6747_v37, %v2276_v38 }
0x2a95   :  { %2280 = vrot.lane.b32.xlu0 %v2278_v39, %s7259_s7 }
0x2b07   :  { %v2281_v41 = vpop.permute.xlu0 %2280 }
0x2b08   :  { %v2283_v32 = vadd.f32 %v2281_v41, %v2273_v40 }
0x2b0a   :  { %6748 = vtanh.f32 %v2283_v32 }
0x2b17   :  { %v6749_v53 = vpop.eup %6748 }
0x2b18   :  { %2286 = vrot.lane.b32.xlu1 %v6749_v53, %s7258_s20 }
0x2b8a   :  { %v2287_v2 = vpop.permute.xlu1 %2286 }
0x2b8b   :  { %v2289_v1 = vmul.f32 %v6747_v37, %v2287_v2 }
0x2b8d   :  { %2291 = vrot.lane.b32.xlu1 %v2289_v1, %s7259_s7  ;;  %2295 = vrot.lane.b32.xlu0 %v2289_v1, %s7258_s20 }
0x2bff   :  { %v2292_v5 = vpop.permute.xlu1 %2291  ;;  %v2296_v43 = vpop.permute.xlu0 %2295 }
0x2c00   :  { %2294 = vst.msk [vmem:[#allocation3 + $0xe] sm:$0x3] %vm478_vm9, %v2292_v5 }
0x2c01   :  { %2298 = vst.msk [vmem:[#allocation3 - $0x2] sm:$0xc] %vm480_vm7, %v2296_v43 }
0x2c07   :  { %v2300_v8 = vld [vmem:[#allocation3 + $0x8] sm:$0xff] }
0x2c08   :  { %v2299_v3 = vld [vmem:[#allocation3] sm:$0xff] }
0x2c09   :  { %6185 = vmatprep.mubr.msk.f32.mxu0 %vm369_vm12, %v2299_v3 }
0x2c0a   :  { %6186 = vmatmul.mubr.msk.f32.vlgmr.msra.gmra.mxu0 %vm369_vm12, %v2300_v8 }
0x2c0b   :  { %6200 = vmatpush3.msra.mxu0 %v8051_v12  ;;  %6207 = vmatprep.mubr.msk.f32.mxu0 %vm7257_vm0, %v7256_v0 }
0x2c0c   :  { %6201 = vmatprep.subr.mxu0 %v7256_v0 }
0x2c0d   :  { %6202 = vmatpush3.msra.mxu0 %v8054_v57 }
0x2c0e   :  { %6203 = vmatprep.subr.mxu0 %v7256_v0 }
0x2c0f   :  { %6204 = vmatpush3.msra.mxu0 %v8059_v60 }
0x2c10   :  { %6205 = vmatprep.subr.mxu0 %v7256_v0 }
0x2c11   :  { %6206 = vmatpush3.msra.mxu0 %v8062_v63 }
0x2c12   :  { %6221 = vmatprep.subr.mxu0 %v7256_v0 }
0x2cca   :  { %v6187_v56 = vpop.f32.mrf.mxu0 }
0x2ccb   :  { %v8095_v13 = vadd.f32 %v6187_v56, %v5462_v11 }
0x2ccc   :  { %v2392_v42 = vpop.f32.mrf.mxu0 }
0x2ccd   :  { %v8097_v58 = vadd.f32 %v5462_v11, %v2392_v42 }
0x2ccf   :  { %v2473_v59 = vadd.f32 %v2469_v9, %v8097_v58 }
0x2cd1   :  { %6750 = vtanh.f32 %v2473_v59  ;;  %v5465_v62 = vmul.f32 -1.442695, %v2473_v59 }
0x2cd3   :  { %6752 = vpow2.f32 %v5465_v62 }
0x2cde   :  { %v6751_v61 = vpop.eup %6750 }
0x2cdf   :  { %2483 = vrot.lane.b32.xlu0 %v6751_v61, %s7258_s20 }
0x2ce0   :  { %v6753_v4 = vpop.eup %6752 }
0x2ce1   :  { %v2477_v7 = vadd.f32 1.0, %v6753_v4 }
0x2ce3   :  { %6754 = vrcp.f32 %v2477_v7 }
0x2cf0   :  { %v6755_v10 = vpop.eup %6754 }
0x2cf1   :  { %v2481_v16 = vmul.f32 0.0, %v6755_v10 }
0x2d51   :  { %v2484_v18 = vpop.permute.xlu0 %2483 }
0x2d52   :  { %v2486_v15 = vmul.f32 %v6755_v10, %v2484_v18 }
0x2d54   :  { %2488 = vrot.lane.b32.xlu1 %v2486_v15, %s7259_s7 }
0x2dc6   :  { %v2489_v20 = vpop.permute.xlu1 %2488 }
0x2dc7   :  { %v2491_v21 = vadd.f32 %v2489_v20, %v2481_v16 }
0x2dc9   :  { %6756 = vtanh.f32 %v2491_v21  ;;  %v2587_v35 = vrot.slane %v2491_v21, 6 }
0x2dd6   :  { %v6757_v22 = vpop.eup %6756 }
0x2dd7   :  { %2494 = vrot.lane.b32.xlu0 %v6757_v22, %s7258_s20 }
0x2e49   :  { %v2495_v52 = vpop.permute.xlu0 %2494 }
0x2e4a   :  { %v2497_v23 = vmul.f32 %v6755_v10, %v2495_v52 }
0x2e4c   :  { %2499 = vrot.lane.b32.xlu1 %v2497_v23, %s7259_s7 }
0x2ebe   :  { %v2500_v33 = vpop.permute.xlu1 %2499 }
0x2ebf   :  { %2502 = vst.msk [vmem:[#allocation4] sm:$0x3] %vm478_vm9, %v2500_v33  ;;  %6208 = vmatmul.mubr.msk.f32.vlgmr.msra.gmra.mxu0 %vm475_vm8, %v2500_v33 }
0x2ec0   :  { %6222 = vmatpush3.msra.mxu0 %v8051_v12  ;;  %6229 = vmatprep.mubr.msk.f32.mxu0 %vm7257_vm0, %v7256_v0 }
0x2ec1   :  { %6223 = vmatprep.subr.mxu0 %v7256_v0 }
0x2ec2   :  { %6224 = vmatpush3.msra.mxu0 %v8054_v57 }
0x2ec3   :  { %6225 = vmatprep.subr.mxu0 %v7256_v0 }
0x2ec4   :  { %6226 = vmatpush3.msra.mxu0 %v8059_v60 }
0x2ec5   :  { %6227 = vmatprep.subr.mxu0 %v7256_v0 }
0x2ec6   :  { %6228 = vmatpush3.msra.mxu0 %v8062_v63 }
0x2ec7   :  { %6243 = vmatprep.subr.mxu0 %v7256_v0 }
0x2f7f   :  { %v2571_v24 = vpop.f32.mrf.mxu0 }
0x2f80   :  { %v2576_v50 = vrot.slane %v2571_v24, 6 }
0x2f81   :  { %v6209_v25 = vpop.f32.mrf.mxu0 }
0x2f82   :  { %v2578_v45 = vadd.f32 %v2576_v50, %v8097_v58 }
0x2f84   :  { %6758 = vtanh.f32 %v2578_v45  ;;  %v5467_v27 = vmul.f32 -1.442695, %v2578_v45 }
0x2f86   :  { %6760 = vpow2.f32 %v5467_v27 }
0x2f91   :  { %v6759_v26 = vpop.eup %6758 }
0x2f92   :  { %2591 = vrot.lane.b32.xlu0 %v6759_v26, %s7258_s20 }
0x2f93   :  { %v6761_v28 = vpop.eup %6760 }
0x2f94   :  { %v2582_v29 = vadd.f32 1.0, %v6761_v28 }
0x2f96   :  { %6762 = vrcp.f32 %v2582_v29 }
0x2fa3   :  { %v6763_v30 = vpop.eup %6762 }
0x2fa4   :  { %v2589_v36 = vmul.f32 %v6763_v30, %v2587_v35 }
0x3004   :  { %v2592_v31 = vpop.permute.xlu0 %2591 }
0x3005   :  { %v2594_v34 = vmul.f32 %v6763_v30, %v2592_v31 }
0x3007   :  { %2596 = vrot.lane.b32.xlu1 %v2594_v34, %s7259_s7 }
0x3079   :  { %v2597_v37 = vpop.permute.xlu1 %2596 }
0x307a   :  { %v2599_v38 = vadd.f32 %v2597_v37, %v2589_v36 }
0x307c   :  { %6764 = vtanh.f32 %v2599_v38  ;;  %v2699_v43 = vrot.slane %v2599_v38, 6 }
0x3089   :  { %v6765_v39 = vpop.eup %6764 }
0x308a   :  { %2602 = vrot.lane.b32.xlu0 %v6765_v39, %s7258_s20 }
0x30fc   :  { %v2603_v40 = vpop.permute.xlu0 %2602 }
0x30fd   :  { %v8120_v41 = vmul.f32 %v6763_v30, %v2603_v40 }
0x30ff   :  { %v2612_v32 = vrot.slane %v8120_v41, 2 }
0x3101   :  { %2613 = vrot.lane.b32.xlu1 %v2612_v32, %s7259_s7 }
0x3173   :  { %v2614_v46 = vpop.permute.xlu1 %2613 }
0x3174   :  { %6219 = vmatmul.mubr.msk.f32.vlgmr.msra.gmra.mxu1 %vm475_vm8, %v2614_v46 }
0x3175   :  { %6233 = vmatpush3.msra.mxu1 %v8051_v12  ;;  %6240 = vmatprep.mubr.msk.f32.mxu1 %vm7257_vm0, %v7256_v0 }
0x3176   :  { %6234 = vmatprep.subr.mxu1 %v7256_v0 }
0x3177   :  { %6235 = vmatpush3.msra.mxu1 %v8054_v57 }
0x3178   :  { %6236 = vmatprep.subr.mxu1 %v7256_v0 }
0x3179   :  { %6237 = vmatpush3.msra.mxu1 %v8059_v60 }
0x317a   :  { %6238 = vmatprep.subr.mxu1 %v7256_v0 }
0x317b   :  { %6239 = vmatpush3.msra.mxu1 %v8062_v63 }
0x317c   :  { %6254 = vmatprep.subr.mxu1 %v7256_v0 }
0x3234   :  { %v2683_v47 = vpop.f32.mrf.mxu1 }
0x3235   :  { %v2688_v49 = vrot.slane %v2683_v47, 4 }
0x3236   :  { %v6220_v51 = vpop.f32.mrf.mxu1 }
0x3237   :  { %v2690_v53 = vadd.f32 %v2688_v49, %v8097_v58 }
0x3239   :  { %6766 = vtanh.f32 %v2690_v53  ;;  %v5469_v55 = vmul.f32 -1.442695, %v2690_v53 }
0x323b   :  { %6768 = vpow2.f32 %v5469_v55 }
0x3246   :  { %v6767_v54 = vpop.eup %6766 }
0x3247   :  { %2703 = vrot.lane.b32.xlu0 %v6767_v54, %s7258_s20 }
0x3248   :  { %v6769_v14 = vpop.eup %6768 }
0x3249   :  { %v2694_v44 = vadd.f32 1.0, %v6769_v14 }
0x324b   :  { %6770 = vrcp.f32 %v2694_v44 }
0x3258   :  { %v6771_v2 = vpop.eup %6770 }
0x3259   :  { %v2701_v3 = vmul.f32 %v6771_v2, %v2699_v43 }
0x32b9   :  { %v2704_v1 = vpop.permute.xlu0 %2703 }
0x32ba   :  { %v2706_v5 = vmul.f32 %v6771_v2, %v2704_v1 }
0x32bc   :  { %2708 = vrot.lane.b32.xlu1 %v2706_v5, %s7259_s7 }
0x332e   :  { %v2709_v8 = vpop.permute.xlu1 %2708 }
0x332f   :  { %v2711_v9 = vadd.f32 %v2709_v8, %v2701_v3 }
0x3331   :  { %6772 = vtanh.f32 %v2711_v9  ;;  %v2811_v52 = vrot.slane %v2711_v9, 6 }
0x333e   :  { %v6773_v48 = vpop.eup %6772 }
0x333f   :  { %2714 = vrot.lane.b32.xlu0 %v6773_v48, %s7258_s20 }
0x33b1   :  { %v2715_v11 = vpop.permute.xlu0 %2714 }
0x33b2   :  { %v8139_v56 = vmul.f32 %v6771_v2, %v2715_v11 }
0x33b4   :  { %v2724_v42 = vrot.slane %v8139_v56, 4 }
0x33b6   :  { %2725 = vrot.lane.b32.xlu1 %v2724_v42, %s7259_s7 }
0x3428   :  { %v2726_v59 = vpop.permute.xlu1 %2725 }
0x3429   :  { %6230 = vmatmul.mubr.msk.f32.vlgmr.msra.gmra.mxu0 %vm475_vm8, %v2726_v59 }
0x342a   :  { %6244 = vmatpush3.msra.mxu0 %v8051_v12  ;;  %6251 = vmatprep.mubr.msk.f32.mxu0 %vm7257_vm0, %v7256_v0 }
0x342b   :  { %6245 = vmatprep.subr.mxu0 %v7256_v0 }
0x342c   :  { %6246 = vmatpush3.msra.mxu0 %v8054_v57 }
0x342d   :  { %6247 = vmatprep.subr.mxu0 %v7256_v0 }
0x342e   :  { %6248 = vmatpush3.msra.mxu0 %v8059_v60 }
0x342f   :  { %6249 = vmatprep.subr.mxu0 %v7256_v0 }
0x3430   :  { %6250 = vmatpush3.msra.mxu0 %v8062_v63 }
0x3431   :  { %6265 = vmatprep.subr.mxu0 %v7256_v0 }
0x34e9   :  { %v2795_v61 = vpop.f32.mrf.mxu0 }
0x34ea   :  { %v2800_v62 = vrot.slane %v2795_v61, 2 }
0x34eb   :  { %v6231_v4 = vpop.f32.mrf.mxu0 }
0x34ec   :  { %v2802_v7 = vadd.f32 %v2800_v62, %v8097_v58 }
0x34ee   :  { %6774 = vtanh.f32 %v2802_v7  ;;  %v5471_v18 = vmul.f32 -1.442695, %v2802_v7 }
0x34f0   :  { %6776 = vpow2.f32 %v5471_v18 }
0x34fb   :  { %v6775_v10 = vpop.eup %6774 }
0x34fc   :  { %2815 = vrot.lane.b32.xlu0 %v6775_v10, %s7258_s20 }
0x34fd   :  { %v6777_v15 = vpop.eup %6776 }
0x34fe   :  { %v2806_v16 = vadd.f32 1.0, %v6777_v15 }
0x3500   :  { %6778 = vrcp.f32 %v2806_v16 }
0x350d   :  { %v6779_v20 = vpop.eup %6778 }
0x350e   :  { %v2813_v23 = vmul.f32 %v6779_v20, %v2811_v52 }
0x356e   :  { %v2816_v21 = vpop.permute.xlu0 %2815 }
0x356f   :  { %v2818_v22 = vmul.f32 %v6779_v20, %v2816_v21 }
0x3571   :  { %2820 = vrot.lane.b32.xlu1 %v2818_v22, %s7259_s7 }
0x35e3   :  { %v2821_v33 = vpop.permute.xlu1 %2820 }
0x35e4   :  { %v2823_v24 = vadd.f32 %v2821_v33, %v2813_v23 }
0x35e6   :  { %6780 = vtanh.f32 %v2823_v24  ;;  %v2920_v39 = vrot.slane %v2823_v24, 6 }
0x35f3   :  { %v6781_v58 = vpop.eup %6780 }
0x35f4   :  { %2826 = vrot.lane.b32.xlu0 %v6781_v58, %s7258_s20 }
0x3666   :  { %v2827_v50 = vpop.permute.xlu0 %2826 }
0x3667   :  { %v8158_v25 = vmul.f32 %v6779_v20, %v2827_v50 }
0x3669   :  { %v2836_v45 = vrot.slane %v8158_v25, 6 }
0x366b   :  { %2837 = vrot.lane.b32.xlu1 %v2836_v45, %s7259_s7 }
0x36dd   :  { %v2838_v26 = vpop.permute.xlu1 %2837 }
0x36de   :  { %6241 = vmatmul.mubr.msk.f32.vlgmr.msra.gmra.mxu1 %vm475_vm8, %v2838_v26 }
0x36df   :  { %6255 = vmatpush3.msra.mxu1 %v8051_v12  ;;  %6262 = vmatprep.mubr.msk.f32.mxu1 %vm7257_vm0, %v7256_v0 }
0x36e0   :  { %6256 = vmatprep.subr.mxu1 %v7256_v0 }
0x36e1   :  { %6257 = vmatpush3.msra.mxu1 %v8054_v57 }
0x36e2   :  { %6258 = vmatprep.subr.mxu1 %v7256_v0 }
0x36e3   :  { %6259 = vmatpush3.msra.mxu1 %v8059_v60 }
0x36e4   :  { %6260 = vmatprep.subr.mxu1 %v7256_v0 }
0x36e5   :  { %6261 = vmatpush3.msra.mxu1 %v8062_v63 }
0x379e   :  { %v2907_v27 = vpop.f32.mrf.mxu1 }
0x379f   :  { %v2911_v28 = vadd.f32 %v2907_v27, %v8095_v13 }
0x37a0   :  { %v6242_v29 = vpop.f32.mrf.mxu1 }
0x37a1   :  { %6782 = vtanh.f32 %v2911_v28  ;;  %v5473_v31 = vmul.f32 -1.442695, %v2911_v28 }
0x37a3   :  { %6784 = vpow2.f32 %v5473_v31 }
0x37ae   :  { %v6783_v30 = vpop.eup %6782 }
0x37af   :  { %2924 = vrot.lane.b32.xlu0 %v6783_v30, %s7258_s20 }
0x37b0   :  { %v6785_v34 = vpop.eup %6784 }
0x37b1   :  { %v2915_v35 = vadd.f32 1.0, %v6785_v34 }
0x37b3   :  { %6786 = vrcp.f32 %v2915_v35 }
0x37c0   :  { %v6787_v36 = vpop.eup %6786 }
0x37c1   :  { %v2922_v40 = vmul.f32 %v6787_v36, %v2920_v39 }
0x3821   :  { %v2925_v37 = vpop.permute.xlu0 %2924 }
0x3822   :  { %v2927_v38 = vmul.f32 %v6787_v36, %v2925_v37 }
0x3824   :  { %2929 = vrot.lane.b32.xlu1 %v2927_v38, %s7259_s7 }
0x3896   :  { %v2930_v32 = vpop.permute.xlu1 %2929 }
0x3897   :  { %v2932_v46 = vadd.f32 %v2930_v32, %v2922_v40 }
0x3899   :  { %6788 = vtanh.f32 %v2932_v46 }
0x38a6   :  { %v6789_v47 = vpop.eup %6788 }
0x38a7   :  { %2935 = vrot.lane.b32.xlu0 %v6789_v47, %s7258_s20 }
0x3919   :  { %v2936_v49 = vpop.permute.xlu0 %2935 }
0x391a   :  { %v2938_v51 = vmul.f32 %v6787_v36, %v2936_v49 }
0x391c   :  { %2940 = vrot.lane.b32.xlu1 %v2938_v51, %s7259_s7 }
0x398e   :  { %v2941_v53 = vpop.permute.xlu1 %2940 }
0x398f   :  { %2943 = vst.msk [vmem:[#allocation4 + $0x8] sm:$0x3] %vm478_vm9, %v2941_v53  ;;  %6252 = vmatmul.mubr.msk.f32.vlgmr.msra.gmra.mxu0 %vm475_vm8, %v2941_v53 }
0x3990   :  { %6266 = vmatpush3.msra.mxu0 %v8051_v12  ;;  %6273 = vmatprep.mubr.msk.f32.mxu0 %vm7257_vm0, %v7256_v0 }
0x3991   :  { %6267 = vmatprep.subr.mxu0 %v7256_v0 }
0x3992   :  { %6268 = vmatpush3.msra.mxu0 %v8054_v57 }
0x3993   :  { %6269 = vmatprep.subr.mxu0 %v7256_v0 }
0x3994   :  { %6270 = vmatpush3.msra.mxu0 %v8059_v60 }
0x3995   :  { %6271 = vmatprep.subr.mxu0 %v7256_v0 }
0x3996   :  { %6272 = vmatpush3.msra.mxu0 %v8062_v63  ;;  %v3028_v63 = vrot.slane %v2932_v46, 6 }
0x3997   :  { %6276 = vmatprep.subr.mxu0 %v7256_v0 }
0x3a4f   :  { %v3012_v54 = vpop.f32.mrf.mxu0 }
0x3a50   :  { %v3017_v55 = vrot.slane %v3012_v54, 6  ;;  %v3283_v54 = vld [vmem:[#allocation16 + $0x38] sm:$0xff] }
0x3a51   :  { %v6253_v12 = vpop.f32.mrf.mxu0  ;;  %3334 = vmatprep.subr.mxu1 %v3283_v54 }
0x3a52   :  { %v3019_v14 = vadd.f32 %v3017_v55, %v8095_v13  ;;  %v3282_v55 = vld [vmem:[#allocation16 + $0x30] sm:$0xff] }
0x3a54   :  { %6790 = vtanh.f32 %v3019_v14  ;;  %v5475_v57 = vmul.f32 -1.442695, %v3019_v14  ;;  %v3279_v14 = vld [vmem:[#allocation16 + $0x18] sm:$0xff] }
0x3a56   :  { %6792 = vpow2.f32 %v5475_v57  ;;  %v3277_v57 = vld [vmem:[#allocation16 + $0x8] sm:$0xff] }
0x3a61   :  { %v6791_v44 = vpop.eup %6790 }
0x3a62   :  { %3032 = vrot.lane.b32.xlu0 %v6791_v44, %s7258_s20  ;;  %v3278_v44 = vld [vmem:[#allocation16 + $0x10] sm:$0xff] }
0x3a63   :  { %v6793_v2 = vpop.eup %6792 }
0x3a64   :  { %v3023_v1 = vadd.f32 1.0, %v6793_v2  ;;  %v3276_v2 = vld [vmem:[#allocation16] sm:$0xff] }
0x3a66   :  { %6794 = vrcp.f32 %v3023_v1 }
0x3a73   :  { %v6795_v60 = vpop.eup %6794 }
0x3a74   :  { %v3030_v3 = vmul.f32 %v6795_v60, %v3028_v63  ;;  %v8238_v63 = vld [vmem:[#allocation19 + $0x20] sm:$0xff] }
0x3ad4   :  { %v3033_v5 = vpop.permute.xlu0 %3032 }
0x3ad5   :  { %v3035_v43 = vmul.f32 %v6795_v60, %v3033_v5  ;;  %v8232_v5 = vld [vmem:[#allocation19 + $0x30] sm:$0xff] }
0x3ad7   :  { %3037 = vrot.lane.b32.xlu1 %v3035_v43, %s7259_s7  ;;  %v8234_v43 = vld [vmem:[#allocation19 + $0x28] sm:$0xff] }
0x3b49   :  { %v3038_v8 = vpop.permute.xlu1 %3037 }
0x3b4a   :  { %v3040_v9 = vadd.f32 %v3038_v8, %v3030_v3  ;;  %v8242_v3 = vld [vmem:[#allocation19 + $0x18] sm:$0xff]  ;;  %v8250_v8 = vld [vmem:[#allocation19 + $0x8] sm:$0xff] }
0x3b4c   :  { %6796 = vtanh.f32 %v3040_v9  ;;  %v3139_v23 = vrot.slane %v3040_v9, 6 }
0x3b59   :  { %v6797_v48 = vpop.eup %6796 }
0x3b5a   :  { %3043 = vrot.lane.b32.xlu0 %v6797_v48, %s7258_s20  ;;  %v8254_v48 = vld [vmem:[#allocation19] sm:$0xff] }
0x3bcc   :  { %v3044_v11 = vpop.permute.xlu0 %3043 }
0x3bcd   :  { %v8193_v42 = vmul.f32 %v6795_v60, %v3044_v11  ;;  %v8222_v60 = vld [vmem:[#allocation19 + $0x38] sm:$0xff] }
0x3bcf   :  { %v3052_v59 = vrot.slane %v8193_v42, 2 }
0x3bd1   :  { %3053 = vrot.lane.b32.xlu1 %v3052_v59, %s7259_s7 }
0x3c43   :  { %v3054_v61 = vpop.permute.xlu1 %3053 }
0x3c44   :  { %6263 = vmatmul.mubr.msk.f32.vlgmr.msra.gmra.mxu1 %vm475_vm8, %v3054_v61 }
0x3c45   :  { %3374 = vmatprep.mubr.f32.mxu1 %v7256_v0  ;;  %3335 = vmatpush1.msra.mxu1 %v3282_v55 }
0x3d04   :  { %v3123_v62 = vpop.f32.mrf.mxu1 }
0x3d05   :  { %v3128_v4 = vrot.slane %v3123_v62, 4 }
0x3d06   :  { %v6264_v7 = vpop.f32.mrf.mxu1 }
0x3d07   :  { %v3130_v10 = vadd.f32 %v3128_v4, %v8095_v13 }
0x3d09   :  { %6798 = vtanh.f32 %v3130_v10  ;;  %v5477_v15 = vmul.f32 -1.442695, %v3130_v10 }
0x3d0b   :  { %6800 = vpow2.f32 %v5477_v15  ;;  %v3284_v15 = vld [vmem:[#allocation18] sm:$0x3] }
0x3d16   :  { %v6799_v18 = vpop.eup %6798 }
0x3d17   :  { %3143 = vrot.lane.b32.xlu0 %v6799_v18, %s7258_s20 }
0x3d18   :  { %v6801_v16 = vpop.eup %6800 }
0x3d19   :  { %v3134_v20 = vadd.f32 1.0, %v6801_v16 }
0x3d1b   :  { %6802 = vrcp.f32 %v3134_v20 }
0x3d28   :  { %v6803_v21 = vpop.eup %6802 }
0x3d29   :  { %v3141_v33 = vmul.f32 %v6803_v21, %v3139_v23 }
0x3d89   :  { %v3144_v22 = vpop.permute.xlu0 %3143 }
0x3d8a   :  { %v3146_v52 = vmul.f32 %v6803_v21, %v3144_v22  ;;  %v8313_v22 = vrot.slane %v3284_v15, %v7517_v19 }
0x3d8c   :  { %3148 = vrot.lane.b32.xlu1 %v3146_v52, %s7259_s7 }
0x3dfe   :  { %v3149_v24 = vpop.permute.xlu1 %3148 }
0x3dff   :  { %v3151_v58 = vadd.f32 %v3149_v24, %v3141_v33 }
0x3e01   :  { %6804 = vtanh.f32 %v3151_v58 }
0x3e0e   :  { %v6805_v50 = vpop.eup %6804 }
0x3e0f   :  { %3154 = vrot.lane.b32.xlu0 %v6805_v50, %s7258_s20 }
0x3e81   :  { %v3155_v45 = vpop.permute.xlu0 %3154 }
0x3e82   :  { %v3157_v26 = vmul.f32 %v6803_v21, %v3155_v45  ;;  %v8310_v21 = vrot.slane %v3284_v15, %v7511_v17 }
0x3e84   :  { %v3163_v27 = vrot.slane %v3157_v26, 4 }
0x3e86   :  { %3164 = vrot.lane.b32.xlu1 %v3163_v27, %s7259_s7 }
0x3ef8   :  { %v3165_v28 = vpop.permute.xlu1 %3164 }
0x3ef9   :  { %6274 = vmatmul.mubr.msk.f32.vlgmr.msra.gmra.mxu0 %vm475_vm8, %v3165_v28 }
0x3efa   :  { %6292 = vmatprep.mubr.msk.f32.mxu0 %vm7257_vm0, %v7256_v0  ;;  %6277 = vmatpush3.msra.mxu0 %v8222_v60 }
0x3efb   :  { %6278 = vmatprep.subr.mxu0 %v7256_v0 }
0x3efc   :  { %6279 = vmatpush3.msra.mxu0 %v8232_v5 }
0x3efd   :  { %6280 = vmatprep.subr.mxu0 %v7256_v0 }
0x3efe   :  { %6281 = vmatpush3.msra.mxu0 %v8234_v43 }
0x3eff   :  { %6282 = vmatprep.subr.mxu0 %v7256_v0 }
0x3f00   :  { %6283 = vmatpush3.msra.mxu0 %v8238_v63 }
0x3f01   :  { %6284 = vmatprep.subr.mxu0 %v7256_v0 }
0x3f02   :  { %6285 = vmatpush3.msra.mxu0 %v8242_v3 }
0x3f03   :  { %6286 = vmatprep.subr.mxu0 %v7256_v0 }
0x3fb9   :  { %v3234_v29 = vpop.f32.mrf.mxu0 }
0x3fba   :  { %v3239_v30 = vrot.slane %v3234_v29, 2 }
0x3fbb   :  { %v6275_v31 = vpop.f32.mrf.mxu0 }
0x3fbc   :  { %v3241_v34 = vadd.f32 %v3239_v30, %v8095_v13  ;;  %v3250_v13 = vrot.slane %v3151_v58, 6 }
0x3fbe   :  { %6806 = vtanh.f32 %v3241_v34  ;;  %v5479_v36 = vmul.f32 -1.442695, %v3241_v34 }
0x3fc0   :  { %6808 = vpow2.f32 %v5479_v36 }
0x3fcb   :  { %v6807_v35 = vpop.eup %6806 }
0x3fcc   :  { %3254 = vrot.lane.b32.xlu0 %v6807_v35, %s7258_s20 }
0x3fcd   :  { %v6809_v37 = vpop.eup %6808 }
0x3fce   :  { %v3245_v38 = vadd.f32 1.0, %v6809_v37 }
0x3fd0   :  { %6810 = vrcp.f32 %v3245_v38 }
0x3fdd   :  { %v8209_v39 = vpop.eup %6810 }
0x3fde   :  { %v3252_v46 = vmul.f32 %v8209_v39, %v3250_v13 }
0x403e   :  { %v3255_v40 = vpop.permute.xlu0 %3254 }
0x403f   :  { %v3257_v32 = vmul.f32 %v8209_v39, %v3255_v40 }
0x4041   :  { %3259 = vrot.lane.b32.xlu1 %v3257_v32, %s7259_s7 }
0x4045   :  { %2607 = vrot.lane.b32.xlu1 %v8120_v41, %s7259_s7  ;;  %v3281_v41 = vld [vmem:[#allocation16 + $0x28] sm:$0xff] }
0x4046   :  { %3336 = vmatprep.subr.mxu1 %v3281_v41 }
0x4049   :  { %2831 = vrot.lane.b32.xlu1 %v8158_v25, %s7259_s7  ;;  %v3280_v25 = vld [vmem:[#allocation16 + $0x20] sm:$0xff] }
0x404a   :  { %3337 = vmatpush1.msra.mxu1 %v3280_v25 }
0x404b   :  { %3338 = vmatprep.subr.mxu1 %v3279_v14 }
0x404c   :  { %3339 = vmatpush1.msra.mxu1 %v3278_v44 }
0x404d   :  { %3159 = vrot.lane.b32.xlu1 %v3157_v26, %s7259_s7  ;;  %3340 = vmatprep.subr.mxu1 %v3277_v57 }
0x404e   :  { %3341 = vmatpush1.msra.mxu1 %v3276_v2 }
0x404f   :  { %6295 = vmatprep.subr.mxu1 %v7256_v0 }
0x40b3   :  { %v3260_v47 = vpop.permute.xlu1 %3259 }
0x40b4   :  { %v3262_v49 = vadd.f32 %v3260_v47, %v3252_v46 }
0x40b6   :  { %6812 = vtanh.f32 %v3262_v49 }
0x40b7   :  { %v2608_v51 = vpop.permute.xlu1 %2607 }
0x40b8   :  { %2611 = vst.msk [vmem:[#allocation4] sm:$0xc] %vm2610_vm13, %v2608_v51 }
0x40bb   :  { %v2832_v53 = vpop.permute.xlu1 %2831 }
0x40bc   :  { %2835 = vst.msk [vmem:[#allocation4] sm:$0xc0] %vm2834_vm14, %v2832_v53 }
0x40bf   :  { %v3160_v12 = vpop.permute.xlu1 %3159 }
0x40c0   :  { %3162 = vst.msk [vmem:[#allocation4 + $0x8] sm:$0x30] %vm2722_vm15, %v3160_v12 }
0x40c3   :  { %v6813_v1 = vpop.eup %6812 }
0x40c4   :  { %3265 = vrot.lane.b32.xlu0 %v6813_v1, %s7258_s20 }
0x40c8   :  { %2719 = vrot.lane.b32.xlu0 %v8139_v56, %s7259_s7  ;;  %v8248_v56 = vld [vmem:[#allocation19 + $0x10] sm:$0xff] }
0x40c9   :  { %6287 = vmatpush3.msra.mxu0 %v8248_v56 }
0x40ca   :  { %6288 = vmatprep.subr.mxu0 %v7256_v0 }
0x40cb   :  { %6289 = vmatpush3.msra.mxu0 %v8250_v8 }
0x40cc   :  { %3048 = vrot.lane.b32.xlu0 %v8193_v42, %s7259_s7  ;;  %6290 = vmatprep.subr.mxu0 %v7256_v0 }
0x40cd   :  { %6291 = vmatpush3.msra.mxu0 %v8254_v48 }
0x40ce   :  { %6293 = vmatmul.mubr.f32.vlgmr.msra.gmra.mxu0 %v7256_v0  ;;  %6314 = vmatprep.subr.mxu0 %v7256_v0 }
0x40cf   :  { %6315 = vmatpush3.msra.mxu0 %v8222_v60  ;;  %6330 = vmatprep.mubr.msk.f32.mxu0 %vm7257_vm0, %v7256_v0 }
0x40d0   :  { %6316 = vmatprep.subr.mxu0 %v7256_v0 }
0x40d1   :  { %6317 = vmatpush3.msra.mxu0 %v8232_v5 }
0x40d2   :  { %6318 = vmatprep.subr.mxu0 %v7256_v0 }
0x40d3   :  { %6319 = vmatpush3.msra.mxu0 %v8234_v43 }
0x40d4   :  { %6320 = vmatprep.subr.mxu0 %v7256_v0 }
0x40d5   :  { %6321 = vmatpush3.msra.mxu0 %v8238_v63 }
0x40d6   :  { %6322 = vmatprep.subr.mxu0 %v7256_v0 }
0x40d7   :  { %6323 = vmatpush3.msra.mxu0 %v8242_v3 }
0x40d8   :  { %6324 = vmatprep.subr.mxu0 %v7256_v0 }
0x40d9   :  { %6325 = vmatpush3.msra.mxu0 %v8248_v56 }
0x40da   :  { %6326 = vmatprep.subr.mxu0 %v7256_v0 }
0x40db   :  { %6327 = vmatpush3.msra.mxu0 %v8250_v8 }
0x40dc   :  { %6328 = vmatprep.subr.mxu0 %v7256_v0 }
0x40dd   :  { %6329 = vmatpush3.msra.mxu0 %v8254_v48 }
0x40de   :  { %6352 = vmatprep.subr.mxu0 %v7256_v0 }
0x4136   :  { %v3266_v9 = vpop.permute.xlu0 %3265 }
0x4137   :  { %v3268_v11 = vmul.f32 %v8209_v39, %v3266_v9 }
0x4139   :  { %3270 = vrot.lane.b32.xlu0 %v3268_v11, %s7259_s7 }
0x413a   :  { %v2720_v42 = vpop.permute.xlu0 %2719 }
0x413b   :  { %2723 = vst.msk [vmem:[#allocation4] sm:$0x30] %vm2722_vm15, %v2720_v42 }
0x413e   :  { %v3049_v59 = vpop.permute.xlu0 %3048 }
0x413f   :  { %3051 = vst.msk [vmem:[#allocation4 + $0x8] sm:$0xc] %vm2610_vm13, %v3049_v59 }
0x4142   :  { %v3274_v61 = vld [vmem:[#allocation4] sm:$0xff] }
0x4143   :  { %5480 = vmatmul.mubr.msk.f32.vlgmr.msra.gmra.mxu1 %vm475_vm8, %v3274_v61 }
0x4144   :  { %3380 = vmatprep.mubr.f32.mxu1 %v7256_v0  ;;  %6296 = vmatpush3.msra.mxu1 %v8222_v60 }
0x4145   :  { %6297 = vmatprep.subr.mxu1 %v7256_v0 }
0x4146   :  { %6298 = vmatpush3.msra.mxu1 %v8232_v5 }
0x4147   :  { %6299 = vmatprep.subr.mxu1 %v7256_v0 }
0x4148   :  { %6300 = vmatpush3.msra.mxu1 %v8234_v43 }
0x4149   :  { %6301 = vmatprep.subr.mxu1 %v7256_v0 }
0x414a   :  { %6302 = vmatpush3.msra.mxu1 %v8238_v63 }
0x414b   :  { %6303 = vmatprep.subr.mxu1 %v7256_v0 }
0x414c   :  { %6304 = vmatpush3.msra.mxu1 %v8242_v3 }
0x414d   :  { %6305 = vmatprep.subr.mxu1 %v7256_v0 }
0x414e   :  { %6306 = vmatpush3.msra.mxu1 %v8248_v56 }
0x414f   :  { %6307 = vmatprep.subr.mxu1 %v7256_v0 }
0x4150   :  { %6308 = vmatpush3.msra.mxu1 %v8250_v8 }
0x4151   :  { %6309 = vmatprep.subr.mxu1 %v7256_v0 }
0x4152   :  { %6310 = vmatpush3.msra.mxu1 %v8254_v48 }
0x4153   :  { %6333 = vmatprep.subr.mxu1 %v7256_v0 }
0x418e   :  { %v3457_v7 = vpop.f32.mrf.mxu0 }
0x4190   :  { %v6294_v10 = vpop.f32.mrf.mxu0 }
0x41ab   :  { %v3271_v62 = vpop.permute.xlu0 %3270 }
0x41ac   :  { %3273 = vst.msk [vmem:[#allocation4 + $0x8] sm:$0xc0] %vm2834_vm14, %v3271_v62 }
0x41b3   :  { %v3275_v4 = vld [vmem:[#allocation4 + $0x8] sm:$0xff] }
0x41b4   :  { %5481 = vmatmul.mubr.msk.f32.gmra.mxu1 %vm475_vm8, %v3275_v4 }
0x41b5   :  { %6311 = vmatprep.mubr.msk.f32.mxu1 %vm7257_vm0, %v7256_v0 }
0x4203   :  { %v3376_v18 = vpop.f32.mrf.mxu1 }
0x4204   :  { %v8319_v33 = vadd.f32 %v3376_v18, %v8310_v21 }
0x4205   :  { %v8305_v16 = vpop.f32.mrf.mxu1 }
0x4206   :  { %v3498_v49 = vrot.slane %v8319_v33, 2  ;;  %v3612_v18 = vrot.slane %v8319_v33, 4 }
0x4274   :  { %v8307_v20 = vpop.f32.mrf.mxu1 }
0x4276   :  { %v3384_v52 = vpop.f32.mrf.mxu1 }
0x4277   :  { %v8316_v23 = vadd.f32 %v3384_v52, %v8313_v22 }
0x4279   :  { %v3388_v24 = vrot.slane %v8316_v23, 4  ;;  %v3500_v47 = vrot.slane %v8316_v23, 2  ;;  %v3614_v15 = vsel %vm367_vm3, %v3612_v18, %v8316_v23 }
0x427b   :  { %v3390_v58 = vsel %vm367_vm3, %v8319_v33, %v3388_v24  ;;  %v3502_v51 = vsel %vm367_vm3, %v3498_v49, %v3500_v47  ;;  %v3724_v47 = vrot.slane %v8319_v33, 6 }
0x427c   :  { %v3461_v50 = vadd.f32 %v3457_v7, %v3390_v58 }
0x427e   :  { %6814 = vtanh.f32 %v3461_v50  ;;  %v5482_v26 = vmul.f32 -1.442695, %v3461_v50 }
0x4280   :  { %6816 = vpow2.f32 %v5482_v26 }
0x428b   :  { %v6815_v45 = vpop.eup %6814 }
0x428c   :  { %3471 = vrot.lane.b32.xlu1 %v6815_v45, %s7258_s20 }
0x428d   :  { %v6817_v27 = vpop.eup %6816 }
0x428e   :  { %v3465_v28 = vadd.f32 1.0, %v6817_v27 }
0x4290   :  { %6818 = vrcp.f32 %v3465_v28 }
0x429d   :  { %v6819_v29 = vpop.eup %6818 }
0x429e   :  { %v3469_v34 = vmul.f32 0.0, %v6819_v29 }
0x42fe   :  { %v3472_v30 = vpop.permute.xlu1 %3471 }
0x42ff   :  { %v3474_v31 = vmul.f32 %v6819_v29, %v3472_v30 }
0x4301   :  { %3476 = vrot.lane.b32.xlu0 %v3474_v31, %s7259_s7 }
0x4373   :  { %v3477_v35 = vpop.permute.xlu0 %3476 }
0x4374   :  { %v3479_v36 = vadd.f32 %v3477_v35, %v3469_v34 }
0x4376   :  { %6820 = vtanh.f32 %v3479_v36 }
0x4383   :  { %v6821_v37 = vpop.eup %6820 }
0x4384   :  { %3482 = vrot.lane.b32.xlu1 %v6821_v37, %s7258_s20 }
0x43f6   :  { %v3483_v38 = vpop.permute.xlu1 %3482 }
0x43f7   :  { %v3485_v39 = vmul.f32 %v6819_v29, %v3483_v38 }
0x43f9   :  { %3490 = vrot.lane.b32.xlu1 %v3485_v39, %s7258_s20  ;;  %3487 = vrot.lane.b32.xlu0 %v3485_v39, %s7259_s7 }
0x446b   :  { %v3491_v40 = vpop.permute.xlu1 %3490  ;;  %v3488_v32 = vpop.permute.xlu0 %3487 }
0x446c   :  { %3496 = vst.msk [vmem:[#allocation2 + $0xc] sm:$0xc] %vm480_vm7, %v3491_v40  ;;  %v3493_v13 = vsel %vm475_vm8, %v3488_v32, %v3491_v40 }
0x446d   :  { %3495 = vst.msk [vmem:[#allocation2] sm:$0x3] %vm478_vm9, %v3488_v32  ;;  %v3494_v46 = vsel %vm7549_vm11, %v3493_v13, 0.0 }
0x446e   :  { %6312 = vmatmul.mubr.msk.f32.vlgmr.msra.gmra.mxu1 %vm369_vm12, %v3494_v46  ;;  %v3726_v46 = vrot.slane %v8316_v23, 6 }
0x446f   :  { %6334 = vmatpush3.msra.mxu1 %v8222_v60  ;;  %6349 = vmatprep.mubr.msk.f32.mxu1 %vm7257_vm0, %v7256_v0 }
0x4470   :  { %6335 = vmatprep.subr.mxu1 %v7256_v0  ;;  %v3728_v49 = vsel %vm367_vm3, %v3724_v47, %v3726_v46 }
0x4471   :  { %6336 = vmatpush3.msra.mxu1 %v8232_v5 }
0x4472   :  { %6337 = vmatprep.subr.mxu1 %v7256_v0 }
0x4473   :  { %6338 = vmatpush3.msra.mxu1 %v8234_v43 }
0x4474   :  { %6339 = vmatprep.subr.mxu1 %v7256_v0 }
0x4475   :  { %6340 = vmatpush3.msra.mxu1 %v8238_v63 }
0x4476   :  { %6341 = vmatprep.subr.mxu1 %v7256_v0 }
0x4477   :  { %6342 = vmatpush3.msra.mxu1 %v8242_v3 }
0x4478   :  { %6343 = vmatprep.subr.mxu1 %v7256_v0 }
0x4479   :  { %6344 = vmatpush3.msra.mxu1 %v8248_v56 }
0x447a   :  { %6345 = vmatprep.subr.mxu1 %v7256_v0 }
0x447b   :  { %6346 = vmatpush3.msra.mxu1 %v8250_v8 }
0x447c   :  { %6347 = vmatprep.subr.mxu1 %v7256_v0 }
0x447d   :  { %6348 = vmatpush3.msra.mxu1 %v8254_v48 }
0x447e   :  { %6371 = vmatprep.subr.mxu1 %v7256_v0 }
0x452e   :  { %v3572_v53 = vpop.f32.mrf.mxu1 }
0x452f   :  { %v3576_v54 = vadd.f32 %v3572_v53, %v3502_v51 }
0x4530   :  { %v6313_v55 = vpop.f32.mrf.mxu1 }
0x4531   :  { %6822 = vtanh.f32 %v3576_v54  ;;  %v5484_v25 = vmul.f32 -1.442695, %v3576_v54 }
0x4533   :  { %6824 = vpow2.f32 %v5484_v25 }
0x453e   :  { %v6823_v41 = vpop.eup %6822 }
0x453f   :  { %3586 = vrot.lane.b32.xlu0 %v6823_v41, %s7258_s20 }
0x4540   :  { %v6825_v12 = vpop.eup %6824 }
0x4541   :  { %v3580_v14 = vadd.f32 1.0, %v6825_v12 }
0x4543   :  { %6826 = vrcp.f32 %v3580_v14 }
0x4550   :  { %v6827_v44 = vpop.eup %6826 }
0x4551   :  { %v3584_v1 = vmul.f32 %v6827_v44, %v3479_v36 }
0x45b1   :  { %v3587_v57 = vpop.permute.xlu0 %3586 }
0x45b2   :  { %v3589_v2 = vmul.f32 %v6827_v44, %v3587_v57 }
0x45b4   :  { %3591 = vrot.lane.b32.xlu1 %v3589_v2, %s7259_s7 }
0x4626   :  { %v3592_v9 = vpop.permute.xlu1 %3591 }
0x4627   :  { %v3594_v11 = vadd.f32 %v3592_v9, %v3584_v1 }
0x4629   :  { %6828 = vtanh.f32 %v3594_v11 }
0x4636   :  { %v6829_v42 = vpop.eup %6828 }
0x4637   :  { %3597 = vrot.lane.b32.xlu0 %v6829_v42, %s7258_s20 }
0x46a9   :  { %v3598_v59 = vpop.permute.xlu0 %3597 }
0x46aa   :  { %v3600_v61 = vmul.f32 %v6827_v44, %v3598_v59 }
0x46ac   :  { %3605 = vrot.lane.b32.xlu0 %v3600_v61, %s7258_s20  ;;  %3602 = vrot.lane.b32.xlu1 %v3600_v61, %s7259_s7 }
0x471e   :  { %v3606_v62 = vpop.permute.xlu0 %3605  ;;  %v3603_v4 = vpop.permute.xlu1 %3602 }
0x471f   :  { %3611 = vst.msk [vmem:[#allocation2 + $0xa] sm:$0xc] %vm480_vm7, %v3606_v62  ;;  %v3608_v7 = vsel %vm475_vm8, %v3603_v4, %v3606_v62 }
0x4720   :  { %3610 = vst.msk [vmem:[#allocation2 + $0x2] sm:$0x3] %vm478_vm9, %v3603_v4  ;;  %v3609_v10 = vsel %vm7549_vm11, %v3608_v7, 0.0  ;;  %v8450_v4 = vadd.f32 %v8305_v16, %v8313_v22  ;;  %v8454_v7 = vadd.f32 %v8307_v20, %v8310_v21 }
0x4721   :  { %6331 = vmatmul.mubr.msk.f32.vlgmr.msra.gmra.mxu0 %vm369_vm12, %v3609_v10 }
0x4722   :  { %6353 = vmatpush3.msra.mxu0 %v8222_v60  ;;  %6368 = vmatprep.mubr.msk.f32.mxu0 %vm7257_vm0, %v7256_v0  ;;  %v3839_v10 = vrot.slane %v8450_v4, 4 }
0x4723   :  { %6354 = vmatprep.subr.mxu0 %v7256_v0 }
0x4724   :  { %6355 = vmatpush3.msra.mxu0 %v8232_v5  ;;  %v3841_v18 = vsel %vm367_vm3, %v8454_v7, %v3839_v10 }
0x4725   :  { %6356 = vmatprep.subr.mxu0 %v7256_v0 }
0x4726   :  { %6357 = vmatpush3.msra.mxu0 %v8234_v43 }
0x4727   :  { %6358 = vmatprep.subr.mxu0 %v7256_v0 }
0x4728   :  { %6359 = vmatpush3.msra.mxu0 %v8238_v63 }
0x4729   :  { %6360 = vmatprep.subr.mxu0 %v7256_v0 }
0x472a   :  { %6361 = vmatpush3.msra.mxu0 %v8242_v3 }
0x472b   :  { %6362 = vmatprep.subr.mxu0 %v7256_v0 }
0x472c   :  { %6363 = vmatpush3.msra.mxu0 %v8248_v56 }
0x472d   :  { %6364 = vmatprep.subr.mxu0 %v7256_v0 }
0x472e   :  { %6365 = vmatpush3.msra.mxu0 %v8250_v8 }
0x472f   :  { %6366 = vmatprep.subr.mxu0 %v7256_v0 }
0x4730   :  { %6367 = vmatpush3.msra.mxu0 %v8254_v48 }
0x4731   :  { %6390 = vmatprep.subr.mxu0 %v7256_v0 }
0x47e1   :  { %v3684_v52 = vpop.f32.mrf.mxu0 }
0x47e2   :  { %v3688_v24 = vadd.f32 %v3684_v52, %v3614_v15 }
0x47e3   :  { %v6332_v58 = vpop.f32.mrf.mxu0 }
0x47e4   :  { %6830 = vtanh.f32 %v3688_v24  ;;  %v5486_v45 = vmul.f32 -1.442695, %v3688_v24 }
0x47e6   :  { %6832 = vpow2.f32 %v5486_v45 }
0x47f1   :  { %v6831_v50 = vpop.eup %6830 }
0x47f2   :  { %3698 = vrot.lane.b32.xlu1 %v6831_v50, %s7258_s20 }
0x47f3   :  { %v6833_v26 = vpop.eup %6832 }
0x47f4   :  { %v3692_v27 = vadd.f32 1.0, %v6833_v26 }
0x47f6   :  { %6834 = vrcp.f32 %v3692_v27 }
0x4803   :  { %v6835_v28 = vpop.eup %6834 }
0x4804   :  { %v3696_v31 = vmul.f32 %v6835_v28, %v3594_v11 }
0x4864   :  { %v3699_v29 = vpop.permute.xlu1 %3698 }
0x4865   :  { %v3701_v30 = vmul.f32 %v6835_v28, %v3699_v29 }
0x4867   :  { %3703 = vrot.lane.b32.xlu0 %v3701_v30, %s7259_s7 }
0x48d9   :  { %v3704_v34 = vpop.permute.xlu0 %3703 }
0x48da   :  { %v3706_v35 = vadd.f32 %v3704_v34, %v3696_v31 }
0x48dc   :  { %6836 = vtanh.f32 %v3706_v35 }
0x48e9   :  { %v6837_v36 = vpop.eup %6836 }
0x48ea   :  { %3709 = vrot.lane.b32.xlu1 %v6837_v36, %s7258_s20 }
0x495c   :  { %v3710_v37 = vpop.permute.xlu1 %3709 }
0x495d   :  { %v3712_v38 = vmul.f32 %v6835_v28, %v3710_v37 }
0x495f   :  { %3717 = vrot.lane.b32.xlu1 %v3712_v38, %s7258_s20  ;;  %3714 = vrot.lane.b32.xlu0 %v3712_v38, %s7259_s7 }
0x49d1   :  { %v3718_v39 = vpop.permute.xlu1 %3717  ;;  %v3715_v40 = vpop.permute.xlu0 %3714 }
0x49d2   :  { %3723 = vst.msk [vmem:[#allocation2 + $0x8] sm:$0xc] %vm480_vm7, %v3718_v39  ;;  %v3720_v32 = vsel %vm475_vm8, %v3715_v40, %v3718_v39 }
0x49d3   :  { %3722 = vst.msk [vmem:[#allocation2 + $0x4] sm:$0x3] %vm478_vm9, %v3715_v40  ;;  %v3721_v13 = vsel %vm7549_vm11, %v3720_v32, 0.0 }
0x49d4   :  { %6350 = vmatmul.mubr.msk.f32.vlgmr.msra.gmra.mxu1 %vm369_vm12, %v3721_v13 }
0x49d5   :  { %6372 = vmatpush3.msra.mxu1 %v8222_v60  ;;  %6387 = vmatprep.mubr.msk.f32.mxu1 %vm7257_vm0, %v7256_v0 }
0x49d6   :  { %6373 = vmatprep.subr.mxu1 %v7256_v0 }
0x49d7   :  { %6374 = vmatpush3.msra.mxu1 %v8232_v5 }
0x49d8   :  { %6375 = vmatprep.subr.mxu1 %v7256_v0 }
0x49d9   :  { %6376 = vmatpush3.msra.mxu1 %v8234_v43 }
0x49da   :  { %6377 = vmatprep.subr.mxu1 %v7256_v0 }
0x49db   :  { %6378 = vmatpush3.msra.mxu1 %v8238_v63 }
0x49dc   :  { %6379 = vmatprep.subr.mxu1 %v7256_v0 }
0x49dd   :  { %6380 = vmatpush3.msra.mxu1 %v8242_v3 }
0x49de   :  { %6381 = vmatprep.subr.mxu1 %v7256_v0 }
0x49df   :  { %6382 = vmatpush3.msra.mxu1 %v8248_v56 }
0x49e0   :  { %6383 = vmatprep.subr.mxu1 %v7256_v0 }
0x49e1   :  { %6384 = vmatpush3.msra.mxu1 %v8250_v8 }
0x49e2   :  { %6385 = vmatprep.subr.mxu1 %v7256_v0 }
0x49e3   :  { %6386 = vmatpush3.msra.mxu1 %v8254_v48 }
0x49e4   :  { %6409 = vmatprep.subr.mxu1 %v7256_v0 }
0x4a94   :  { %v3798_v51 = vpop.f32.mrf.mxu1 }
0x4a95   :  { %v3802_v53 = vadd.f32 %v3798_v51, %v3728_v49 }
0x4a96   :  { %v6351_v54 = vpop.f32.mrf.mxu1 }
0x4a97   :  { %6838 = vtanh.f32 %v3802_v53  ;;  %v5488_v41 = vmul.f32 -1.442695, %v3802_v53 }
0x4a99   :  { %6840 = vpow2.f32 %v5488_v41 }
0x4aa4   :  { %v6839_v55 = vpop.eup %6838 }
0x4aa5   :  { %3812 = vrot.lane.b32.xlu0 %v6839_v55, %s7258_s20 }
0x4aa6   :  { %v6841_v25 = vpop.eup %6840 }
0x4aa7   :  { %v3806_v12 = vadd.f32 1.0, %v6841_v25 }
0x4aa9   :  { %6842 = vrcp.f32 %v3806_v12 }
0x4ab6   :  { %v6843_v14 = vpop.eup %6842 }
0x4ab7   :  { %v3810_v23 = vmul.f32 %v6843_v14, %v3706_v35 }
0x4b17   :  { %v3813_v44 = vpop.permute.xlu0 %3812 }
0x4b18   :  { %v3815_v57 = vmul.f32 %v6843_v14, %v3813_v44 }
0x4b1a   :  { %3817 = vrot.lane.b32.xlu1 %v3815_v57, %s7259_s7 }
0x4b8c   :  { %v3818_v33 = vpop.permute.xlu1 %3817 }
0x4b8d   :  { %v3820_v2 = vadd.f32 %v3818_v33, %v3810_v23 }
0x4b8f   :  { %6844 = vtanh.f32 %v3820_v2 }
0x4b9c   :  { %v6845_v1 = vpop.eup %6844 }
0x4b9d   :  { %3823 = vrot.lane.b32.xlu0 %v6845_v1, %s7258_s20 }
0x4c0f   :  { %v3824_v9 = vpop.permute.xlu0 %3823 }
0x4c10   :  { %v3826_v11 = vmul.f32 %v6843_v14, %v3824_v9  ;;  %v4066_v14 = vrot.slane %v8454_v7, 4 }
0x4c12   :  { %3831 = vrot.lane.b32.xlu0 %v3826_v11, %s7258_s20  ;;  %3828 = vrot.lane.b32.xlu1 %v3826_v11, %s7259_s7  ;;  %v4068_v44 = vsel %vm367_vm3, %v4066_v14, %v8450_v4 }
0x4c84   :  { %v3832_v42 = vpop.permute.xlu0 %3831  ;;  %v3829_v59 = vpop.permute.xlu1 %3828 }
0x4c85   :  { %3837 = vst.msk [vmem:[#allocation2 + $0x6] sm:$0xc] %vm480_vm7, %v3832_v42  ;;  %v3834_v61 = vsel %vm475_vm8, %v3829_v59, %v3832_v42 }
0x4c86   :  { %3836 = vst.msk [vmem:[#allocation2 + $0x6] sm:$0x3] %vm478_vm9, %v3829_v59  ;;  %v3835_v62 = vsel %vm7549_vm11, %v3834_v61, 0.0 }
0x4c87   :  { %6369 = vmatmul.mubr.msk.f32.vlgmr.msra.gmra.mxu0 %vm369_vm12, %v3835_v62 }
0x4c88   :  { %6391 = vmatpush3.msra.mxu0 %v8222_v60  ;;  %6406 = vmatprep.mubr.msk.f32.mxu0 %vm7257_vm0, %v7256_v0 }
0x4c89   :  { %6392 = vmatprep.subr.mxu0 %v7256_v0 }
0x4c8a   :  { %6393 = vmatpush3.msra.mxu0 %v8232_v5 }
0x4c8b   :  { %6394 = vmatprep.subr.mxu0 %v7256_v0 }
0x4c8c   :  { %6395 = vmatpush3.msra.mxu0 %v8234_v43 }
0x4c8d   :  { %6396 = vmatprep.subr.mxu0 %v7256_v0 }
0x4c8e   :  { %6397 = vmatpush3.msra.mxu0 %v8238_v63 }
0x4c8f   :  { %6398 = vmatprep.subr.mxu0 %v7256_v0 }
0x4c90   :  { %6399 = vmatpush3.msra.mxu0 %v8242_v3 }
0x4c91   :  { %6400 = vmatprep.subr.mxu0 %v7256_v0 }
0x4c92   :  { %6401 = vmatpush3.msra.mxu0 %v8248_v56 }
0x4c93   :  { %6402 = vmatprep.subr.mxu0 %v7256_v0 }
0x4c94   :  { %6403 = vmatpush3.msra.mxu0 %v8250_v8 }
0x4c95   :  { %6404 = vmatprep.subr.mxu0 %v7256_v0 }
0x4c96   :  { %6405 = vmatpush3.msra.mxu0 %v8254_v48 }
0x4d47   :  { %v3911_v15 = vpop.f32.mrf.mxu0 }
0x4d48   :  { %v3915_v52 = vadd.f32 %v3911_v15, %v3841_v18 }
0x4d49   :  { %v6370_v24 = vpop.f32.mrf.mxu0 }
0x4d4a   :  { %6846 = vtanh.f32 %v3915_v52  ;;  %v5490_v50 = vmul.f32 -1.442695, %v3915_v52 }
0x4d4c   :  { %6848 = vpow2.f32 %v5490_v50 }
0x4d57   :  { %v6847_v58 = vpop.eup %6846 }
0x4d58   :  { %3925 = vrot.lane.b32.xlu1 %v6847_v58, %s7258_s20 }
0x4d59   :  { %v6849_v16 = vpop.eup %6848 }
0x4d5a   :  { %v3919_v22 = vadd.f32 1.0, %v6849_v16 }
0x4d5c   :  { %6850 = vrcp.f32 %v3919_v22 }
0x4d69   :  { %v6851_v45 = vpop.eup %6850 }
0x4d6a   :  { %v3923_v26 = vmul.f32 %v6851_v45, %v3820_v2 }
0x4dca   :  { %v3926_v20 = vpop.permute.xlu1 %3925 }
0x4dcb   :  { %v3928_v21 = vmul.f32 %v6851_v45, %v3926_v20  ;;  %v4180_v20 = vrot.slane %v8450_v4, 6 }
0x4dcd   :  { %3930 = vrot.lane.b32.xlu0 %v3928_v21, %s7259_s7 }
0x4e3f   :  { %v3931_v27 = vpop.permute.xlu0 %3930 }
0x4e40   :  { %v3933_v28 = vadd.f32 %v3931_v27, %v3923_v26 }
0x4e42   :  { %6852 = vtanh.f32 %v3933_v28 }
0x4e4f   :  { %v6853_v29 = vpop.eup %6852 }
0x4e50   :  { %3936 = vrot.lane.b32.xlu1 %v6853_v29, %s7258_s20 }
0x4ec2   :  { %v3937_v30 = vpop.permute.xlu1 %3936 }
0x4ec3   :  { %v3939_v31 = vmul.f32 %v6851_v45, %v3937_v30  ;;  %v4178_v45 = vrot.slane %v8454_v7, 6 }
0x4ec5   :  { %3944 = vrot.lane.b32.xlu1 %v3939_v31, %s7258_s20  ;;  %3941 = vrot.lane.b32.xlu0 %v3939_v31, %s7259_s7  ;;  %v4182_v21 = vsel %vm367_vm3, %v4178_v45, %v4180_v20 }
0x4f37   :  { %v3945_v34 = vpop.permute.xlu1 %3944  ;;  %v3942_v35 = vpop.permute.xlu0 %3941 }
0x4f38   :  { %3950 = vst.msk [vmem:[#allocation2 + $0x4] sm:$0xc] %vm480_vm7, %v3945_v34  ;;  %v3947_v36 = vsel %vm475_vm8, %v3942_v35, %v3945_v34 }
0x4f39   :  { %3949 = vst.msk [vmem:[#allocation2 + $0x8] sm:$0x3] %vm478_vm9, %v3942_v35  ;;  %v3948_v37 = vsel %vm7549_vm11, %v3947_v36, 0.0 }
0x4f3a   :  { %6388 = vmatmul.mubr.msk.f32.vlgmr.msra.gmra.mxu1 %vm369_vm12, %v3948_v37 }
0x4f3b   :  { %6410 = vmatpush3.msra.mxu1 %v8222_v60  ;;  %6425 = vmatprep.mubr.msk.f32.mxu1 %vm7257_vm0, %v7256_v0  ;;  %v3952_v60 = vrot.slane %v8454_v7, 2 }
0x4f3c   :  { %6411 = vmatprep.subr.mxu1 %v7256_v0 }
0x4f3d   :  { %6412 = vmatpush3.msra.mxu1 %v8232_v5  ;;  %v3954_v5 = vrot.slane %v8450_v4, 2 }
0x4f3e   :  { %6413 = vmatprep.subr.mxu1 %v7256_v0 }
0x4f3f   :  { %6414 = vmatpush3.msra.mxu1 %v8234_v43  ;;  %v3956_v43 = vsel %vm367_vm3, %v3952_v60, %v3954_v5  ;;  %v4307_v5 = vld [vmem:[#allocation21 + $0x78] sm:$0xff] }
0x4f40   :  { %6415 = vmatprep.subr.mxu1 %v7256_v0  ;;  %4350 = vmatprep.subr.mxu0 %v4307_v5 }
0x4f41   :  { %6416 = vmatpush3.msra.mxu1 %v8238_v63 }
0x4f42   :  { %6417 = vmatprep.subr.mxu1 %v7256_v0 }
0x4f43   :  { %6418 = vmatpush3.msra.mxu1 %v8242_v3 }
0x4f44   :  { %6419 = vmatprep.subr.mxu1 %v7256_v0 }
0x4f45   :  { %6420 = vmatpush3.msra.mxu1 %v8248_v56 }
0x4f46   :  { %6421 = vmatprep.subr.mxu1 %v7256_v0 }
0x4f47   :  { %6422 = vmatpush3.msra.mxu1 %v8250_v8 }
0x4f48   :  { %6423 = vmatprep.subr.mxu1 %v7256_v0 }
0x4f49   :  { %6424 = vmatpush3.msra.mxu1 %v8254_v48 }
0x4f4a   :  { %6428 = vmatprep.subr.mxu1 %v7256_v0 }
0x4ffa   :  { %v4026_v63 = vpop.f32.mrf.mxu1 }
0x4ffb   :  { %v4030_v3 = vadd.f32 %v4026_v63, %v3956_v43  ;;  %v4306_v43 = vld [vmem:[#allocation21 + $0x70] sm:$0xff]  ;;  %v4305_v63 = vld [vmem:[#allocation21 + $0x68] sm:$0xff] }
0x4ffc   :  { %v6389_v38 = vpop.f32.mrf.mxu1 }
0x4ffd   :  { %6854 = vtanh.f32 %v4030_v3  ;;  %v5492_v8 = vmul.f32 -1.442695, %v4030_v3  ;;  %v4304_v3 = vld [vmem:[#allocation21 + $0x60] sm:$0xff]  ;;  %v4303_v38 = vld [vmem:[#allocation21 + $0x58] sm:$0xff] }
0x4fff   :  { %6856 = vpow2.f32 %v5492_v8  ;;  %v4301_v8 = vld [vmem:[#allocation21 + $0x48] sm:$0xff] }
0x500a   :  { %v6855_v56 = vpop.eup %6854 }
0x500b   :  { %4040 = vrot.lane.b32.xlu0 %v6855_v56, %s7258_s20  ;;  %v4302_v56 = vld [vmem:[#allocation21 + $0x50] sm:$0xff] }
0x500c   :  { %v6857_v39 = vpop.eup %6856 }
0x500d   :  { %v4034_v40 = vadd.f32 1.0, %v6857_v39  ;;  %v4300_v39 = vld [vmem:[#allocation21 + $0x40] sm:$0xff] }
0x500f   :  { %6858 = vrcp.f32 %v4034_v40 }
0x501c   :  { %v6859_v48 = vpop.eup %6858 }
0x501d   :  { %v4038_v46 = vmul.f32 %v6859_v48, %v3933_v28 }
0x507d   :  { %v4041_v32 = vpop.permute.xlu0 %4040 }
0x507e   :  { %v4043_v13 = vmul.f32 %v6859_v48, %v4041_v32  ;;  %v4298_v32 = vld [vmem:[#allocation21 + $0x30] sm:$0xff] }
0x5080   :  { %4045 = vrot.lane.b32.xlu1 %v4043_v13, %s7259_s7  ;;  %v4297_v13 = vld [vmem:[#allocation21 + $0x28] sm:$0xff] }
0x50f2   :  { %v4046_v47 = vpop.permute.xlu1 %4045 }
0x50f3   :  { %v4048_v49 = vadd.f32 %v4046_v47, %v4038_v46  ;;  %v8525_v46 = vld [vmem:[#allocation24 + $0x38] sm:$0xff] }
0x50f4   :  { %v4296_v47 = vld [vmem:[#allocation21 + $0x20] sm:$0xff] }
0x50f5   :  { %6860 = vtanh.f32 %v4048_v49 }
0x5102   :  { %v6861_v51 = vpop.eup %6860 }
0x5103   :  { %4051 = vrot.lane.b32.xlu0 %v6861_v51, %s7258_s20  ;;  %v8528_v51 = vld [vmem:[#allocation24 + $0x30] sm:$0xff] }
0x5175   :  { %v4052_v53 = vpop.permute.xlu0 %4051 }
0x5176   :  { %v4054_v54 = vmul.f32 %v6859_v48, %v4052_v53  ;;  %v4299_v48 = vld [vmem:[#allocation21 + $0x38] sm:$0xff]  ;;  %v4294_v53 = vld [vmem:[#allocation21 + $0x10] sm:$0xff] }
0x5178   :  { %4059 = vrot.lane.b32.xlu0 %v4054_v54, %s7258_s20  ;;  %4056 = vrot.lane.b32.xlu1 %v4054_v54, %s7259_s7  ;;  %v8531_v54 = vld [vmem:[#allocation24 + $0x28] sm:$0xff] }
0x51ea   :  { %v4060_v55 = vpop.permute.xlu0 %4059  ;;  %v4057_v41 = vpop.permute.xlu1 %4056 }
0x51eb   :  { %4065 = vst.msk [vmem:[#allocation2 + $0x2] sm:$0xc] %vm480_vm7, %v4060_v55  ;;  %v4062_v25 = vsel %vm475_vm8, %v4057_v41, %v4060_v55  ;;  %v4293_v55 = vld [vmem:[#allocation21 + $0x8] sm:$0xff] }
0x51ec   :  { %4064 = vst.msk [vmem:[#allocation2 + $0xa] sm:$0x3] %vm478_vm9, %v4057_v41  ;;  %v4063_v12 = vsel %vm7549_vm11, %v4062_v25, 0.0  ;;  %v4292_v41 = vld [vmem:[#allocation21] sm:$0xff] }
0x51ed   :  { %6407 = vmatmul.mubr.msk.f32.vlgmr.msra.gmra.mxu0 %vm369_vm12, %v4063_v12  ;;  %v8537_v25 = vld [vmem:[#allocation24 + $0x20] sm:$0xff]  ;;  %v8539_v12 = vld [vmem:[#allocation24 + $0x18] sm:$0xff] }
0x51ee   :  { %4398 = vmatprep.mubr.f32.mxu0 %v7256_v0  ;;  %4351 = vmatpush1.msra.mxu0 %v4306_v43 }
0x51ef   :  { %4352 = vmatprep.subr.mxu0 %v4305_v63 }
0x51f0   :  { %4353 = vmatpush1.msra.mxu0 %v4304_v3 }
0x51f1   :  { %4354 = vmatprep.subr.mxu0 %v4303_v38 }
0x51f2   :  { %4355 = vmatpush1.msra.mxu0 %v4302_v56 }
0x51f3   :  { %4356 = vmatprep.subr.mxu0 %v4301_v8 }
0x51f4   :  { %4357 = vmatpush1.msra.mxu0 %v4300_v39 }
0x51f5   :  { %4358 = vmatprep.subr.mxu0 %v4299_v48 }
0x51f6   :  { %4359 = vmatpush1.msra.mxu0 %v4298_v32 }
0x51f7   :  { %4360 = vmatprep.subr.mxu0 %v4297_v13 }
0x51f8   :  { %4361 = vmatpush1.msra.mxu0 %v4296_v47 }
0x52ad   :  { %v4138_v57 = vpop.f32.mrf.mxu0 }
0x52ae   :  { %v4142_v23 = vadd.f32 %v4138_v57, %v4068_v44  ;;  %v8546_v57 = vld [vmem:[#allocation24 + $0x10] sm:$0xff] }
0x52af   :  { %v6408_v33 = vpop.f32.mrf.mxu0 }
0x52b0   :  { %6862 = vtanh.f32 %v4142_v23  ;;  %v5494_v1 = vmul.f32 -1.442695, %v4142_v23  ;;  %v8550_v23 = vld [vmem:[#allocation24 + $0x8] sm:$0xff]  ;;  %v8554_v33 = vld [vmem:[#allocation24] sm:$0xff] }
0x52b2   :  { %6864 = vpow2.f32 %v5494_v1 }
0x52bd   :  { %v6863_v2 = vpop.eup %6862 }
0x52be   :  { %4152 = vrot.lane.b32.xlu1 %v6863_v2, %s7258_s20 }
0x52bf   :  { %v6865_v9 = vpop.eup %6864 }
0x52c0   :  { %v4146_v11 = vadd.f32 1.0, %v6865_v9 }
0x52c2   :  { %6866 = vrcp.f32 %v4146_v11 }
0x52cf   :  { %v6867_v42 = vpop.eup %6866 }
0x52d0   :  { %v4150_v62 = vmul.f32 %v6867_v42, %v4048_v49  ;;  %v4295_v49 = vld [vmem:[#allocation21 + $0x18] sm:$0xff] }
0x52d1   :  { %4362 = vmatprep.subr.mxu0 %v4295_v49 }
0x52d2   :  { %4363 = vmatpush1.msra.mxu0 %v4294_v53 }
0x52d3   :  { %4364 = vmatprep.subr.mxu0 %v4293_v55 }
0x52d4   :  { %4365 = vmatpush1.msra.mxu0 %v4292_v41 }
0x52d5   :  { %6447 = vmatprep.subr.mxu0 %v7256_v0 }
0x5330   :  { %v4153_v59 = vpop.permute.xlu1 %4152 }
0x5331   :  { %v4155_v61 = vmul.f32 %v6867_v42, %v4153_v59 }
0x5333   :  { %4157 = vrot.lane.b32.xlu0 %v4155_v61, %s7259_s7  ;;  %v4308_v61 = vld [vmem:[#allocation22] sm:$0x3] }
0x53a5   :  { %v4158_v10 = vpop.permute.xlu0 %4157 }
0x53a6   :  { %v4160_v18 = vadd.f32 %v4158_v10, %v4150_v62  ;;  %v4321_v62 = vrot.slane %v4308_v61, %v7511_v17  ;;  %v4325_v10 = vrot.slane %v4308_v61, %v7517_v19 }
0x53a8   :  { %6868 = vtanh.f32 %v4160_v18 }
0x53b5   :  { %v6869_v15 = vpop.eup %6868 }
0x53b6   :  { %4163 = vrot.lane.b32.xlu1 %v6869_v15, %s7258_s20 }
0x5428   :  { %v4164_v52 = vpop.permute.xlu1 %4163 }
0x5429   :  { %v4166_v24 = vmul.f32 %v6867_v42, %v4164_v52 }
0x542b   :  { %4171 = vrot.lane.b32.xlu1 %v4166_v24, %s7258_s20  ;;  %4168 = vrot.lane.b32.xlu0 %v4166_v24, %s7259_s7 }
0x549d   :  { %v4172_v58 = vpop.permute.xlu1 %4171  ;;  %v4169_v50 = vpop.permute.xlu0 %4168 }
0x549e   :  { %4177 = vst.msk [vmem:[#allocation2] sm:$0xc] %vm480_vm7, %v4172_v58  ;;  %v4174_v16 = vsel %vm475_vm8, %v4169_v50, %v4172_v58 }
0x549f   :  { %4176 = vst.msk [vmem:[#allocation2 + $0xc] sm:$0x3] %vm478_vm9, %v4169_v50  ;;  %v4175_v22 = vsel %vm7549_vm11, %v4174_v16, 0.0 }
0x54a0   :  { %6426 = vmatmul.mubr.msk.f32.vlgmr.msra.gmra.mxu1 %vm369_vm12, %v4175_v22 }
0x54a1   :  { %6444 = vmatprep.mubr.msk.f32.mxu1 %vm7257_vm0, %v7256_v0  ;;  %6429 = vmatpush3.msra.mxu1 %v8525_v46 }
0x54a2   :  { %6430 = vmatprep.subr.mxu1 %v7256_v0 }
0x54a3   :  { %6431 = vmatpush3.msra.mxu1 %v8528_v51 }
0x54a4   :  { %6432 = vmatprep.subr.mxu1 %v7256_v0 }
0x54a5   :  { %6433 = vmatpush3.msra.mxu1 %v8531_v54 }
0x54a6   :  { %6434 = vmatprep.subr.mxu1 %v7256_v0 }
0x54a7   :  { %6435 = vmatpush3.msra.mxu1 %v8537_v25 }
0x54a8   :  { %6436 = vmatprep.subr.mxu1 %v7256_v0 }
0x54a9   :  { %6437 = vmatpush3.msra.mxu1 %v8539_v12 }
0x54aa   :  { %6438 = vmatprep.subr.mxu1 %v7256_v0 }
0x54ab   :  { %6439 = vmatpush3.msra.mxu1 %v8546_v57 }
0x54ac   :  { %6440 = vmatprep.subr.mxu1 %v7256_v0 }
0x54ad   :  { %6441 = vmatpush3.msra.mxu1 %v8550_v23 }
0x54ae   :  { %6442 = vmatprep.subr.mxu1 %v7256_v0 }
0x54af   :  { %6443 = vmatpush3.msra.mxu1 %v8554_v33 }
0x54b0   :  { %6445 = vmatmul.mubr.f32.vlgmr.msra.gmra.mxu1 %v7256_v0  ;;  %6466 = vmatprep.subr.mxu1 %v7256_v0 }
0x54b1   :  { %6467 = vmatpush3.msra.mxu1 %v8525_v46  ;;  %6482 = vmatprep.mubr.msk.f32.mxu1 %vm7257_vm0, %v7256_v0 }
0x54b2   :  { %6468 = vmatprep.subr.mxu1 %v7256_v0 }
0x54b3   :  { %6469 = vmatpush3.msra.mxu1 %v8528_v51 }
0x54b4   :  { %6470 = vmatprep.subr.mxu1 %v7256_v0 }
0x54b5   :  { %6471 = vmatpush3.msra.mxu1 %v8531_v54 }
0x54b6   :  { %6472 = vmatprep.subr.mxu1 %v7256_v0 }
0x54b7   :  { %6473 = vmatpush3.msra.mxu1 %v8537_v25 }
0x54b8   :  { %6474 = vmatprep.subr.mxu1 %v7256_v0 }
0x54b9   :  { %6475 = vmatpush3.msra.mxu1 %v8539_v12 }
0x54ba   :  { %6476 = vmatprep.subr.mxu1 %v7256_v0 }
0x54bb   :  { %6477 = vmatpush3.msra.mxu1 %v8546_v57 }
0x54bc   :  { %6478 = vmatprep.subr.mxu1 %v7256_v0 }
0x54bd   :  { %6479 = vmatpush3.msra.mxu1 %v8550_v23 }
0x54be   :  { %6480 = vmatprep.subr.mxu1 %v7256_v0 }
0x54bf   :  { %6481 = vmatpush3.msra.mxu1 %v8554_v33 }
0x54c0   :  { %6504 = vmatprep.subr.mxu1 %v7256_v0 }
0x5560   :  { %v4252_v26 = vpop.f32.mrf.mxu1 }
0x5561   :  { %v4256_v27 = vadd.f32 %v4252_v26, %v4182_v21 }
0x5562   :  { %v6427_v28 = vpop.f32.mrf.mxu1 }
0x5563   :  { %6870 = vtanh.f32 %v4256_v27  ;;  %v5496_v30 = vmul.f32 -1.442695, %v4256_v27 }
0x5565   :  { %6872 = vpow2.f32 %v5496_v30 }
0x5570   :  { %v6871_v29 = vpop.eup %6870  ;;  %v4481_v42 = vpop.f32.mrf.mxu1 }
0x5571   :  { %4266 = vrot.lane.b32.xlu0 %v6871_v29, %s7258_s20 }
0x5572   :  { %v6873_v31 = vpop.eup %6872  ;;  %v6446_v59 = vpop.f32.mrf.mxu1 }
0x5573   :  { %v4260_v34 = vadd.f32 1.0, %v6873_v31 }
0x5575   :  { %6874 = vrcp.f32 %v4260_v34 }
0x5582   :  { %v6875_v35 = vpop.eup %6874 }
0x5583   :  { %v4264_v4 = vmul.f32 %v6875_v35, %v4160_v18 }
0x55e3   :  { %v4267_v36 = vpop.permute.xlu0 %4266 }
0x55e4   :  { %v4269_v37 = vmul.f32 %v6875_v35, %v4267_v36 }
0x55e6   :  { %4271 = vrot.lane.b32.xlu1 %v4269_v37, %s7259_s7 }
0x5658   :  { %v4272_v7 = vpop.permute.xlu1 %4271 }
0x5659   :  { %v4274_v60 = vadd.f32 %v4272_v7, %v4264_v4 }
0x565b   :  { %6876 = vtanh.f32 %v4274_v60 }
0x5668   :  { %v6877_v40 = vpop.eup %6876 }
0x5669   :  { %4277 = vrot.lane.b32.xlu0 %v6877_v40, %s7258_s20 }
0x56db   :  { %v4278_v14 = vpop.permute.xlu0 %4277 }
0x56dc   :  { %v4280_v44 = vmul.f32 %v6875_v35, %v4278_v14 }
0x56de   :  { %4282 = vrot.lane.b32.xlu0 %v4280_v44, %s7259_s7  ;;  %4286 = vrot.lane.b32.xlu1 %v4280_v44, %s7258_s20 }
0x5750   :  { %v4283_v2 = vpop.permute.xlu0 %4282  ;;  %v4287_v1 = vpop.permute.xlu1 %4286 }
0x5751   :  { %4285 = vst.msk [vmem:[#allocation2 + $0xe] sm:$0x3] %vm478_vm9, %v4283_v2 }
0x5752   :  { %4289 = vst.msk [vmem:[#allocation2 - $0x2] sm:$0xc] %vm480_vm7, %v4287_v1 }
0x5758   :  { %v4291_v11 = vld [vmem:[#allocation2 + $0x8] sm:$0xff] }
0x5759   :  { %v4290_v9 = vld [vmem:[#allocation2] sm:$0xff] }
0x575a   :  { %5497 = vmatmul.mubr.msk.f32.vlgmr.msra.gmra.mxu0 %vm369_vm12, %v4290_v9 }
0x575b   :  { %4404 = vmatprep.mubr.f32.mxu0 %v7256_v0  ;;  %6448 = vmatpush3.msra.mxu0 %v8525_v46 }
0x575c   :  { %6449 = vmatprep.subr.mxu0 %v7256_v0 }
0x575d   :  { %6450 = vmatpush3.msra.mxu0 %v8528_v51 }
0x575e   :  { %5498 = vmatmul.mubr.msk.f32.gmra.mxu0 %vm369_vm12, %v4291_v11  ;;  %6451 = vmatprep.subr.mxu0 %v7256_v0 }
0x575f   :  { %6452 = vmatpush3.msra.mxu0 %v8531_v54  ;;  %6463 = vmatprep.mubr.msk.f32.mxu0 %vm7257_vm0, %v7256_v0 }
0x5760   :  { %6453 = vmatprep.subr.mxu0 %v7256_v0 }
0x5761   :  { %6454 = vmatpush3.msra.mxu0 %v8537_v25 }
0x5762   :  { %6455 = vmatprep.subr.mxu0 %v7256_v0 }
0x5763   :  { %6456 = vmatpush3.msra.mxu0 %v8539_v12 }
0x5764   :  { %6457 = vmatprep.subr.mxu0 %v7256_v0 }
0x5765   :  { %6458 = vmatpush3.msra.mxu0 %v8546_v57 }
0x5766   :  { %6459 = vmatprep.subr.mxu0 %v7256_v0 }
0x5767   :  { %6460 = vmatpush3.msra.mxu0 %v8550_v23 }
0x5768   :  { %6461 = vmatprep.subr.mxu0 %v7256_v0 }
0x5769   :  { %6462 = vmatpush3.msra.mxu0 %v8554_v33 }
0x576a   :  { %6485 = vmatprep.subr.mxu0 %v7256_v0 }
0x581a   :  { %v4400_v18 = vpop.f32.mrf.mxu0 }
0x581b   :  { %v4401_v15 = vadd.f32 %v4400_v18, %v4321_v62 }
0x581c   :  { %v4402_v52 = vpop.f32.mrf.mxu0 }
0x581d   :  { %v4403_v24 = vadd.f32 %v4402_v52, %v4325_v10  ;;  %v4522_v45 = vrot.slane %v4401_v15, 2  ;;  %v4636_v20 = vrot.slane %v4401_v15, 4  ;;  %v4748_v29 = vrot.slane %v4401_v15, 6 }
0x581e   :  { %v4406_v58 = vpop.f32.mrf.mxu0 }
0x581f   :  { %v4407_v50 = vadd.f32 %v4406_v58, %v4321_v62  ;;  %v4863_v16 = vrot.slane %v4403_v24, 4  ;;  %v4978_v17 = vrot.slane %v4403_v24, 2  ;;  %v5204_v19 = vrot.slane %v4403_v24, 6 }
0x5820   :  { %v4408_v22 = vpop.f32.mrf.mxu0 }
0x5821   :  { %v4409_v21 = vadd.f32 %v4408_v22, %v4325_v10  ;;  %v8605_v26 = vsel %vm367_vm3, %v4407_v50, %v4863_v16  ;;  %v4976_v27 = vrot.slane %v4407_v50, 2  ;;  %v5090_v28 = vrot.slane %v4407_v50, 4 }
0x5822   :  { %v5202_v30 = vrot.slane %v4407_v50, 6 }
0x5823   :  { %v4412_v31 = vrot.slane %v4409_v21, 4  ;;  %v4524_v34 = vrot.slane %v4409_v21, 2  ;;  %v8608_v35 = vsel %vm367_vm3, %v4636_v20, %v4409_v21  ;;  %v4750_v36 = vrot.slane %v4409_v21, 6 }
0x5824   :  { %v8611_v37 = vsel %vm367_vm3, %v4976_v27, %v4978_v17  ;;  %v8614_v4 = vsel %vm367_vm3, %v5090_v28, %v4403_v24  ;;  %v8617_v7 = vsel %vm367_vm3, %v5202_v30, %v5204_v19 }
0x5825   :  { %v4414_v60 = vsel %vm367_vm3, %v4401_v15, %v4412_v31  ;;  %v4526_v5 = vsel %vm367_vm3, %v4522_v45, %v4524_v34  ;;  %v8622_v43 = vsel %vm367_vm3, %v4748_v29, %v4750_v36 }
0x5826   :  { %v4485_v63 = vadd.f32 %v4481_v42, %v4414_v60 }
0x5828   :  { %6878 = vtanh.f32 %v4485_v63  ;;  %v5499_v38 = vmul.f32 -1.442695, %v4485_v63 }
0x582a   :  { %6880 = vpow2.f32 %v5499_v38 }
0x5835   :  { %v6879_v3 = vpop.eup %6878 }
0x5836   :  { %4495 = vrot.lane.b32.xlu1 %v6879_v3, %s7258_s20 }
0x5837   :  { %v6881_v56 = vpop.eup %6880 }
0x5838   :  { %v4489_v8 = vadd.f32 1.0, %v6881_v56 }
0x583a   :  { %6882 = vrcp.f32 %v4489_v8 }
0x5847   :  { %v6883_v39 = vpop.eup %6882 }
0x5848   :  { %v4493_v32 = vmul.f32 0.0, %v6883_v39 }
0x58a8   :  { %v4496_v40 = vpop.permute.xlu1 %4495 }
0x58a9   :  { %v4498_v48 = vmul.f32 %v6883_v39, %v4496_v40 }
0x58ab   :  { %4500 = vrot.lane.b32.xlu0 %v4498_v48, %s7259_s7 }
0x591d   :  { %v4501_v13 = vpop.permute.xlu0 %4500 }
0x591e   :  { %v4503_v47 = vadd.f32 %v4501_v13, %v4493_v32 }
0x5920   :  { %6884 = vtanh.f32 %v4503_v47 }
0x592d   :  { %v6885_v49 = vpop.eup %6884 }
0x592e   :  { %4506 = vrot.lane.b32.xlu1 %v6885_v49, %s7258_s20 }
0x59a0   :  { %v4507_v53 = vpop.permute.xlu1 %4506 }
0x59a1   :  { %v4509_v55 = vmul.f32 %v6883_v39, %v4507_v53 }
0x59a3   :  { %4514 = vrot.lane.b32.xlu1 %v4509_v55, %s7258_s20  ;;  %4511 = vrot.lane.b32.xlu0 %v4509_v55, %s7259_s7 }
0x5a15   :  { %v4515_v41 = vpop.permute.xlu1 %4514  ;;  %v4512_v14 = vpop.permute.xlu0 %4511 }
0x5a16   :  { %4520 = vst.msk [vmem:[#allocation3 + $0xc] sm:$0xc] %vm480_vm7, %v4515_v41  ;;  %v4517_v44 = vsel %vm475_vm8, %v4512_v14, %v4515_v41 }
0x5a17   :  { %4519 = vst.msk [vmem:[#allocation3] sm:$0x3] %vm478_vm9, %v4512_v14  ;;  %v4518_v2 = vsel %vm7549_vm11, %v4517_v44, 0.0 }
0x5a18   :  { %6464 = vmatmul.mubr.msk.f32.vlgmr.msra.gmra.mxu0 %vm369_vm12, %v4518_v2 }
0x5a19   :  { %6486 = vmatpush3.msra.mxu0 %v8525_v46  ;;  %6501 = vmatprep.mubr.msk.f32.mxu0 %vm7257_vm0, %v7256_v0 }
0x5a1a   :  { %6487 = vmatprep.subr.mxu0 %v7256_v0 }
0x5a1b   :  { %6488 = vmatpush3.msra.mxu0 %v8528_v51 }
0x5a1c   :  { %6489 = vmatprep.subr.mxu0 %v7256_v0 }
0x5a1d   :  { %6490 = vmatpush3.msra.mxu0 %v8531_v54 }
0x5a1e   :  { %6491 = vmatprep.subr.mxu0 %v7256_v0 }
0x5a1f   :  { %6492 = vmatpush3.msra.mxu0 %v8537_v25 }
0x5a20   :  { %6493 = vmatprep.subr.mxu0 %v7256_v0 }
0x5a21   :  { %6494 = vmatpush3.msra.mxu0 %v8539_v12 }
0x5a22   :  { %6495 = vmatprep.subr.mxu0 %v7256_v0 }
0x5a23   :  { %6496 = vmatpush3.msra.mxu0 %v8546_v57 }
0x5a24   :  { %6497 = vmatprep.subr.mxu0 %v7256_v0 }
0x5a25   :  { %6498 = vmatpush3.msra.mxu0 %v8550_v23 }
0x5a26   :  { %6499 = vmatprep.subr.mxu0 %v7256_v0 }
0x5a27   :  { %6500 = vmatpush3.msra.mxu0 %v8554_v33 }
0x5a28   :  { %6523 = vmatprep.subr.mxu0 %v7256_v0 }
0x5ad8   :  { %v4596_v1 = vpop.f32.mrf.mxu0 }
0x5ad9   :  { %v4600_v9 = vadd.f32 %v4596_v1, %v4526_v5 }
0x5ada   :  { %v6465_v11 = vpop.f32.mrf.mxu0 }
0x5adb   :  { %6886 = vtanh.f32 %v4600_v9  ;;  %v5501_v59 = vmul.f32 -1.442695, %v4600_v9 }
0x5add   :  { %6888 = vpow2.f32 %v5501_v59 }
0x5ae8   :  { %v6887_v42 = vpop.eup %6886 }
0x5ae9   :  { %4610 = vrot.lane.b32.xlu0 %v6887_v42, %s7258_s20 }
0x5aea   :  { %v6889_v61 = vpop.eup %6888 }
0x5aeb   :  { %v4604_v62 = vadd.f32 1.0, %v6889_v61 }
0x5aed   :  { %6890 = vrcp.f32 %v4604_v62 }
0x5afa   :  { %v6891_v10 = vpop.eup %6890 }
0x5afb   :  { %v4608_v52 = vmul.f32 %v6891_v10, %v4503_v47 }
0x5b5b   :  { %v4611_v18 = vpop.permute.xlu0 %4610 }
0x5b5c   :  { %v4613_v15 = vmul.f32 %v6891_v10, %v4611_v18 }
0x5b5e   :  { %4615 = vrot.lane.b32.xlu1 %v4613_v15, %s7259_s7 }
0x5bd0   :  { %v4616_v24 = vpop.permute.xlu1 %4615 }
0x5bd1   :  { %v4618_v58 = vadd.f32 %v4616_v24, %v4608_v52 }
0x5bd3   :  { %6892 = vtanh.f32 %v4618_v58 }
0x5be0   :  { %v6893_v50 = vpop.eup %6892 }
0x5be1   :  { %4621 = vrot.lane.b32.xlu0 %v6893_v50, %s7258_s20 }
0x5c53   :  { %v4622_v16 = vpop.permute.xlu0 %4621 }
0x5c54   :  { %v4624_v22 = vmul.f32 %v6891_v10, %v4622_v16 }
0x5c56   :  { %4629 = vrot.lane.b32.xlu0 %v4624_v22, %s7258_s20  ;;  %4626 = vrot.lane.b32.xlu1 %v4624_v22, %s7259_s7 }
0x5cc8   :  { %v4630_v45 = vpop.permute.xlu0 %4629  ;;  %v4627_v20 = vpop.permute.xlu1 %4626 }
0x5cc9   :  { %4635 = vst.msk [vmem:[#allocation3 + $0xa] sm:$0xc] %vm480_vm7, %v4630_v45  ;;  %v4632_v21 = vsel %vm475_vm8, %v4627_v20, %v4630_v45 }
0x5cca   :  { %4634 = vst.msk [vmem:[#allocation3 + $0x2] sm:$0x3] %vm478_vm9, %v4627_v20  ;;  %v4633_v27 = vsel %vm7549_vm11, %v4632_v21, 0.0 }
0x5ccb   :  { %6483 = vmatmul.mubr.msk.f32.vlgmr.msra.gmra.mxu1 %vm369_vm12, %v4633_v27 }
0x5ccc   :  { %6505 = vmatpush3.msra.mxu1 %v8525_v46  ;;  %6520 = vmatprep.mubr.msk.f32.mxu1 %vm7257_vm0, %v7256_v0 }
0x5ccd   :  { %6506 = vmatprep.subr.mxu1 %v7256_v0 }
0x5cce   :  { %6507 = vmatpush3.msra.mxu1 %v8528_v51 }
0x5ccf   :  { %6508 = vmatprep.subr.mxu1 %v7256_v0 }
0x5cd0   :  { %6509 = vmatpush3.msra.mxu1 %v8531_v54 }
0x5cd1   :  { %6510 = vmatprep.subr.mxu1 %v7256_v0 }
0x5cd2   :  { %6511 = vmatpush3.msra.mxu1 %v8537_v25 }
0x5cd3   :  { %6512 = vmatprep.subr.mxu1 %v7256_v0 }
0x5cd4   :  { %6513 = vmatpush3.msra.mxu1 %v8539_v12 }
0x5cd5   :  { %6514 = vmatprep.subr.mxu1 %v7256_v0 }
0x5cd6   :  { %6515 = vmatpush3.msra.mxu1 %v8546_v57 }
0x5cd7   :  { %6516 = vmatprep.subr.mxu1 %v7256_v0 }
0x5cd8   :  { %6517 = vmatpush3.msra.mxu1 %v8550_v23 }
0x5cd9   :  { %6518 = vmatprep.subr.mxu1 %v7256_v0 }
0x5cda   :  { %6519 = vmatpush3.msra.mxu1 %v8554_v33 }
0x5cdb   :  { %6542 = vmatprep.subr.mxu1 %v7256_v0 }
0x5d8b   :  { %v4708_v28 = vpop.f32.mrf.mxu1 }
0x5d8c   :  { %v4712_v29 = vadd.f32 %v4708_v28, %v8608_v35 }
0x5d8d   :  { %v6484_v17 = vpop.f32.mrf.mxu1 }
0x5d8e   :  { %6894 = vtanh.f32 %v4712_v29  ;;  %v5503_v19 = vmul.f32 -1.442695, %v4712_v29 }
0x5d90   :  { %6896 = vpow2.f32 %v5503_v19 }
0x5d9b   :  { %v6895_v30 = vpop.eup %6894 }
0x5d9c   :  { %4722 = vrot.lane.b32.xlu1 %v6895_v30, %s7258_s20 }
0x5d9d   :  { %v6897_v31 = vpop.eup %6896 }
0x5d9e   :  { %v4716_v34 = vadd.f32 1.0, %v6897_v31 }
0x5da0   :  { %6898 = vrcp.f32 %v4716_v34 }
0x5dad   :  { %v6899_v36 = vpop.eup %6898 }
0x5dae   :  { %v4720_v63 = vmul.f32 %v6899_v36, %v4618_v58 }
0x5e0e   :  { %v4723_v60 = vpop.permute.xlu1 %4722 }
0x5e0f   :  { %v4725_v5 = vmul.f32 %v6899_v36, %v4723_v60 }
0x5e11   :  { %4727 = vrot.lane.b32.xlu0 %v4725_v5, %s7259_s7 }
0x5e83   :  { %v4728_v3 = vpop.permute.xlu0 %4727 }
0x5e84   :  { %v4730_v38 = vadd.f32 %v4728_v3, %v4720_v63 }
0x5e86   :  { %6900 = vtanh.f32 %v4730_v38 }
0x5e93   :  { %v6901_v35 = vpop.eup %6900 }
0x5e94   :  { %4733 = vrot.lane.b32.xlu1 %v6901_v35, %s7258_s20 }
0x5f06   :  { %v4734_v56 = vpop.permute.xlu1 %4733 }
0x5f07   :  { %v4736_v8 = vmul.f32 %v6899_v36, %v4734_v56 }
0x5f09   :  { %4741 = vrot.lane.b32.xlu1 %v4736_v8, %s7258_s20  ;;  %4738 = vrot.lane.b32.xlu0 %v4736_v8, %s7259_s7 }
0x5f7b   :  { %v4742_v39 = vpop.permute.xlu1 %4741  ;;  %v4739_v40 = vpop.permute.xlu0 %4738 }
0x5f7c   :  { %4747 = vst.msk [vmem:[#allocation3 + $0x8] sm:$0xc] %vm480_vm7, %v4742_v39  ;;  %v4744_v48 = vsel %vm475_vm8, %v4739_v40, %v4742_v39 }
0x5f7d   :  { %4746 = vst.msk [vmem:[#allocation3 + $0x4] sm:$0x3] %vm478_vm9, %v4739_v40  ;;  %v4745_v32 = vsel %vm7549_vm11, %v4744_v48, 0.0 }
0x5f7e   :  { %6502 = vmatmul.mubr.msk.f32.vlgmr.msra.gmra.mxu0 %vm369_vm12, %v4745_v32 }
0x5f7f   :  { %6524 = vmatpush3.msra.mxu0 %v8525_v46  ;;  %6539 = vmatprep.mubr.msk.f32.mxu0 %vm7257_vm0, %v7256_v0 }
0x5f80   :  { %6525 = vmatprep.subr.mxu0 %v7256_v0 }
0x5f81   :  { %6526 = vmatpush3.msra.mxu0 %v8528_v51 }
0x5f82   :  { %6527 = vmatprep.subr.mxu0 %v7256_v0 }
0x5f83   :  { %6528 = vmatpush3.msra.mxu0 %v8531_v54 }
0x5f84   :  { %6529 = vmatprep.subr.mxu0 %v7256_v0 }
0x5f85   :  { %6530 = vmatpush3.msra.mxu0 %v8537_v25 }
0x5f86   :  { %6531 = vmatprep.subr.mxu0 %v7256_v0 }
0x5f87   :  { %6532 = vmatpush3.msra.mxu0 %v8539_v12 }
0x5f88   :  { %6533 = vmatprep.subr.mxu0 %v7256_v0 }
0x5f89   :  { %6534 = vmatpush3.msra.mxu0 %v8546_v57 }
0x5f8a   :  { %6535 = vmatprep.subr.mxu0 %v7256_v0 }
0x5f8b   :  { %6536 = vmatpush3.msra.mxu0 %v8550_v23 }
0x5f8c   :  { %6537 = vmatprep.subr.mxu0 %v7256_v0 }
0x5f8d   :  { %6538 = vmatpush3.msra.mxu0 %v8554_v33 }
0x5f8e   :  { %6561 = vmatprep.subr.mxu0 %v7256_v0 }
0x603e   :  { %v4822_v13 = vpop.f32.mrf.mxu0 }
0x603f   :  { %v4826_v47 = vadd.f32 %v4822_v13, %v8622_v43 }
0x6040   :  { %v6503_v49 = vpop.f32.mrf.mxu0 }
0x6041   :  { %6902 = vtanh.f32 %v4826_v47  ;;  %v5505_v55 = vmul.f32 -1.442695, %v4826_v47 }
0x6043   :  { %6904 = vpow2.f32 %v5505_v55 }
0x604e   :  { %v6903_v53 = vpop.eup %6902 }
0x604f   :  { %4836 = vrot.lane.b32.xlu0 %v6903_v53, %s7258_s20 }
0x6050   :  { %v6905_v41 = vpop.eup %6904 }
0x6051   :  { %v4830_v14 = vadd.f32 1.0, %v6905_v41 }
0x6053   :  { %6906 = vrcp.f32 %v4830_v14 }
0x6060   :  { %v6907_v44 = vpop.eup %6906 }
0x6061   :  { %v4834_v9 = vmul.f32 %v6907_v44, %v4730_v38 }
0x60c1   :  { %v4837_v2 = vpop.permute.xlu0 %4836 }
0x60c2   :  { %v4839_v1 = vmul.f32 %v6907_v44, %v4837_v2 }
0x60c4   :  { %4841 = vrot.lane.b32.xlu1 %v4839_v1, %s7259_s7 }
0x6136   :  { %v4842_v11 = vpop.permute.xlu1 %4841 }
0x6137   :  { %v4844_v42 = vadd.f32 %v4842_v11, %v4834_v9 }
0x6139   :  { %6908 = vtanh.f32 %v4844_v42 }
0x6146   :  { %v6909_v43 = vpop.eup %6908 }
0x6147   :  { %4847 = vrot.lane.b32.xlu0 %v6909_v43, %s7258_s20 }
0x61b9   :  { %v4848_v59 = vpop.permute.xlu0 %4847 }
0x61ba   :  { %v4850_v61 = vmul.f32 %v6907_v44, %v4848_v59 }
0x61bc   :  { %4855 = vrot.lane.b32.xlu0 %v4850_v61, %s7258_s20  ;;  %4852 = vrot.lane.b32.xlu1 %v4850_v61, %s7259_s7 }
0x622e   :  { %v4856_v62 = vpop.permute.xlu0 %4855  ;;  %v4853_v10 = vpop.permute.xlu1 %4852 }
0x622f   :  { %4861 = vst.msk [vmem:[#allocation3 + $0x6] sm:$0xc] %vm480_vm7, %v4856_v62  ;;  %v4858_v18 = vsel %vm475_vm8, %v4853_v10, %v4856_v62 }
0x6230   :  { %4860 = vst.msk [vmem:[#allocation3 + $0x6] sm:$0x3] %vm478_vm9, %v4853_v10  ;;  %v4859_v15 = vsel %vm7549_vm11, %v4858_v18, 0.0 }
0x6231   :  { %6521 = vmatmul.mubr.msk.f32.vlgmr.msra.gmra.mxu1 %vm369_vm12, %v4859_v15 }
0x6232   :  { %6543 = vmatpush3.msra.mxu1 %v8525_v46  ;;  %6558 = vmatprep.mubr.msk.f32.mxu1 %vm7257_vm0, %v7256_v0 }
0x6233   :  { %6544 = vmatprep.subr.mxu1 %v7256_v0 }
0x6234   :  { %6545 = vmatpush3.msra.mxu1 %v8528_v51 }
0x6235   :  { %6546 = vmatprep.subr.mxu1 %v7256_v0 }
0x6236   :  { %6547 = vmatpush3.msra.mxu1 %v8531_v54 }
0x6237   :  { %6548 = vmatprep.subr.mxu1 %v7256_v0 }
0x6238   :  { %6549 = vmatpush3.msra.mxu1 %v8537_v25 }
0x6239   :  { %6550 = vmatprep.subr.mxu1 %v7256_v0 }
0x623a   :  { %6551 = vmatpush3.msra.mxu1 %v8539_v12 }
0x623b   :  { %6552 = vmatprep.subr.mxu1 %v7256_v0 }
0x623c   :  { %6553 = vmatpush3.msra.mxu1 %v8546_v57 }
0x623d   :  { %6554 = vmatprep.subr.mxu1 %v7256_v0 }
0x623e   :  { %6555 = vmatpush3.msra.mxu1 %v8550_v23 }
0x623f   :  { %6556 = vmatprep.subr.mxu1 %v7256_v0 }
0x6240   :  { %6557 = vmatpush3.msra.mxu1 %v8554_v33 }
0x62f1   :  { %v4935_v52 = vpop.f32.mrf.mxu1 }
0x62f2   :  { %v4939_v24 = vadd.f32 %v4935_v52, %v8605_v26 }
0x62f3   :  { %v6522_v58 = vpop.f32.mrf.mxu1 }
0x62f4   :  { %6910 = vtanh.f32 %v4939_v24  ;;  %v5507_v16 = vmul.f32 -1.442695, %v4939_v24 }
0x62f6   :  { %6912 = vpow2.f32 %v5507_v16 }
0x6301   :  { %v6911_v50 = vpop.eup %6910 }
0x6302   :  { %4949 = vrot.lane.b32.xlu1 %v6911_v50, %s7258_s20 }
0x6303   :  { %v6913_v22 = vpop.eup %6912 }
0x6304   :  { %v4943_v45 = vadd.f32 1.0, %v6913_v22 }
0x6306   :  { %6914 = vrcp.f32 %v4943_v45 }
0x6313   :  { %v6915_v20 = vpop.eup %6914 }
0x6314   :  { %v4947_v28 = vmul.f32 %v6915_v20, %v4844_v42 }
0x6374   :  { %v4950_v21 = vpop.permute.xlu1 %4949 }
0x6375   :  { %v4952_v27 = vmul.f32 %v6915_v20, %v4950_v21 }
0x6377   :  { %4954 = vrot.lane.b32.xlu0 %v4952_v27, %s7259_s7 }
0x63e9   :  { %v4955_v29 = vpop.permute.xlu0 %4954 }
0x63ea   :  { %v4957_v17 = vadd.f32 %v4955_v29, %v4947_v28  ;;  %v5322_v28 = vld [vmem:[%s8852_s16 + $0x30] sm:$0xff]  ;;  %v5321_v29 = vld [vmem:[%s8852_s16 + $0x28] sm:$0xff] }
0x63ec   :  { %6916 = vtanh.f32 %v4957_v17 }
0x63f9   :  { %v6917_v26 = vpop.eup %6916 }
0x63fa   :  { %4960 = vrot.lane.b32.xlu1 %v6917_v26, %s7258_s20 }
0x646c   :  { %v4961_v30 = vpop.permute.xlu1 %4960 }
0x646d   :  { %v4963_v19 = vmul.f32 %v6915_v20, %v4961_v30  ;;  %v5319_v30 = vld [vmem:[%s8852_s16 + $0x18] sm:$0xff] }
0x646f   :  { %4968 = vrot.lane.b32.xlu1 %v4963_v19, %s7258_s20  ;;  %4965 = vrot.lane.b32.xlu0 %v4963_v19, %s7259_s7  ;;  %v5318_v19 = vld [vmem:[%s8852_s16 + $0x10] sm:$0xff] }
0x64e1   :  { %v4969_v31 = vpop.permute.xlu1 %4968  ;;  %v4966_v34 = vpop.permute.xlu0 %4965 }
0x64e2   :  { %4974 = vst.msk [vmem:[#allocation3 + $0x4] sm:$0xc] %vm480_vm7, %v4969_v31  ;;  %v4971_v36 = vsel %vm475_vm8, %v4966_v34, %v4969_v31  ;;  %v5317_v31 = vld [vmem:[%s8852_s16 + $0x8] sm:$0xff] }
0x64e3   :  { %4973 = vst.msk [vmem:[#allocation3 + $0x8] sm:$0x3] %vm478_vm9, %v4966_v34  ;;  %v4972_v60 = vsel %vm7549_vm11, %v4971_v36, 0.0  ;;  %v5316_v34 = vld [vmem:[%s8852_s16] sm:$0xff] }
0x64e4   :  { %6540 = vmatmul.mubr.msk.f32.vlgmr.msra.gmra.mxu0 %vm369_vm12, %v4972_v60 }
0x64e5   :  { %6562 = vmatpush3.msra.mxu0 %v8525_v46  ;;  %6577 = vmatprep.mubr.msk.f32.mxu0 %vm7257_vm0, %v7256_v0 }
0x64e6   :  { %6563 = vmatprep.subr.mxu0 %v7256_v0 }
0x64e7   :  { %6564 = vmatpush3.msra.mxu0 %v8528_v51 }
0x64e8   :  { %6565 = vmatprep.subr.mxu0 %v7256_v0 }
0x64e9   :  { %6566 = vmatpush3.msra.mxu0 %v8531_v54 }
0x64ea   :  { %6567 = vmatprep.subr.mxu0 %v7256_v0 }
0x64eb   :  { %6568 = vmatpush3.msra.mxu0 %v8537_v25 }
0x64ec   :  { %6569 = vmatprep.subr.mxu0 %v7256_v0 }
0x64ed   :  { %6570 = vmatpush3.msra.mxu0 %v8539_v12 }
0x64ee   :  { %6571 = vmatprep.subr.mxu0 %v7256_v0 }
0x64ef   :  { %6572 = vmatpush3.msra.mxu0 %v8546_v57 }
0x64f0   :  { %6573 = vmatprep.subr.mxu0 %v7256_v0 }
0x64f1   :  { %6574 = vmatpush3.msra.mxu0 %v8550_v23 }
0x64f2   :  { %6575 = vmatprep.subr.mxu0 %v7256_v0 }
0x64f3   :  { %6576 = vmatpush3.msra.mxu0 %v8554_v33 }
0x65a4   :  { %v5050_v46 = vpop.f32.mrf.mxu0 }
0x65a5   :  { %v5054_v51 = vadd.f32 %v5050_v46, %v8611_v37 }
0x65a6   :  { %v6541_v54 = vpop.f32.mrf.mxu0 }
0x65a7   :  { %6918 = vtanh.f32 %v5054_v51  ;;  %v5509_v12 = vmul.f32 -1.442695, %v5054_v51 }
0x65a9   :  { %6920 = vpow2.f32 %v5509_v12  ;;  %v5514_v12 = vld [vmem:[#allocation25] ss:$0 sm:$0xff] }
0x65b4   :  { %v6919_v25 = vpop.eup %6918 }
0x65b5   :  { %5064 = vrot.lane.b32.xlu0 %v6919_v25, %s7258_s20 }
0x65b6   :  { %v6921_v5 = vpop.eup %6920 }
0x65b7   :  { %v5058_v57 = vadd.f32 1.0, %v6921_v5 }
0x65b9   :  { %6922 = vrcp.f32 %v5058_v57 }
0x65c6   :  { %v6923_v63 = vpop.eup %6922 }
0x65c7   :  { %v5062_v0 = vmul.f32 %v6923_v63, %v4957_v17  ;;  %v5320_v17 = vld [vmem:[%s8852_s16 + $0x20] sm:$0xff] }
0x6627   :  { %v5065_v3 = vpop.permute.xlu0 %5064 }
0x6628   :  { %v5067_v23 = vmul.f32 %v6923_v63, %v5065_v3 }
0x662a   :  { %5069 = vrot.lane.b32.xlu1 %v5067_v23, %s7259_s7 }
0x669c   :  { %v5070_v33 = vpop.permute.xlu1 %5069 }
0x669d   :  { %v5072_v38 = vadd.f32 %v5070_v33, %v5062_v0 }
0x669f   :  { %6924 = vtanh.f32 %v5072_v38 }
0x66ac   :  { %v6925_v37 = vpop.eup %6924 }
0x66ad   :  { %5075 = vrot.lane.b32.xlu0 %v6925_v37, %s7258_s20 }
0x671f   :  { %v5076_v35 = vpop.permute.xlu0 %5075 }
0x6720   :  { %v5078_v56 = vmul.f32 %v6923_v63, %v5076_v35 }
0x6722   :  { %5083 = vrot.lane.b32.xlu0 %v5078_v56, %s7258_s20  ;;  %5080 = vrot.lane.b32.xlu1 %v5078_v56, %s7259_s7 }
0x6794   :  { %v5084_v8 = vpop.permute.xlu0 %5083  ;;  %v5081_v39 = vpop.permute.xlu1 %5080 }
0x6795   :  { %5089 = vst.msk [vmem:[#allocation3 + $0x2] sm:$0xc] %vm480_vm7, %v5084_v8  ;;  %v5086_v40 = vsel %vm475_vm8, %v5081_v39, %v5084_v8 }
0x6796   :  { %5088 = vst.msk [vmem:[#allocation3 + $0xa] sm:$0x3] %vm478_vm9, %v5081_v39  ;;  %v5087_v48 = vsel %vm7549_vm11, %v5086_v40, 0.0 }
0x6797   :  { %6559 = vmatmul.mubr.msk.f32.vlgmr.msra.gmra.mxu1 %vm369_vm12, %v5087_v48 }
0x6857   :  { %v5162_v32 = vpop.f32.mrf.mxu1 }
0x6858   :  { %v5166_v13 = vadd.f32 %v5162_v32, %v8614_v4 }
0x6859   :  { %v6560_v47 = vpop.f32.mrf.mxu1 }
0x685a   :  { %6926 = vtanh.f32 %v5166_v13  ;;  %v5511_v53 = vmul.f32 -1.442695, %v5166_v13 }
0x685c   :  { %6928 = vpow2.f32 %v5511_v53 }
0x6867   :  { %v6927_v49 = vpop.eup %6926 }
0x6868   :  { %5176 = vrot.lane.b32.xlu1 %v6927_v49, %s7258_s20 }
0x6869   :  { %v6929_v55 = vpop.eup %6928 }
0x686a   :  { %v5170_v41 = vadd.f32 1.0, %v6929_v55 }
0x686c   :  { %6930 = vrcp.f32 %v5170_v41 }
0x6879   :  { %v6931_v14 = vpop.eup %6930 }
0x687a   :  { %v5174_v1 = vmul.f32 %v6931_v14, %v5072_v38 }
0x68da   :  { %v5177_v44 = vpop.permute.xlu1 %5176 }
0x68db   :  { %v5179_v2 = vmul.f32 %v6931_v14, %v5177_v44 }
0x68dd   :  { %5181 = vrot.lane.b32.xlu0 %v5179_v2, %s7259_s7 }
0x694f   :  { %v5182_v9 = vpop.permute.xlu0 %5181 }
0x6950   :  { %v5184_v11 = vadd.f32 %v5182_v9, %v5174_v1 }
0x6952   :  { %6932 = vtanh.f32 %v5184_v11 }
0x695f   :  { %v6933_v4 = vpop.eup %6932 }
0x6960   :  { %5187 = vrot.lane.b32.xlu1 %v6933_v4, %s7258_s20 }
0x69d2   :  { %v5188_v42 = vpop.permute.xlu1 %5187 }
0x69d3   :  { %v5190_v43 = vmul.f32 %v6931_v14, %v5188_v42 }
0x69d5   :  { %5195 = vrot.lane.b32.xlu1 %v5190_v43, %s7258_s20  ;;  %5192 = vrot.lane.b32.xlu0 %v5190_v43, %s7259_s7 }
0x6a47   :  { %v5196_v59 = vpop.permute.xlu1 %5195  ;;  %v5193_v61 = vpop.permute.xlu0 %5192 }
0x6a48   :  { %5201 = vst.msk [vmem:[#allocation3] sm:$0xc] %vm480_vm7, %v5196_v59  ;;  %v5198_v62 = vsel %vm475_vm8, %v5193_v61, %v5196_v59 }
0x6a49   :  { %5200 = vst.msk [vmem:[#allocation3 + $0xc] sm:$0x3] %vm478_vm9, %v5193_v61  ;;  %v5199_v10 = vsel %vm7549_vm11, %v5198_v62, 0.0 }
0x6a4a   :  { %6578 = vmatmul.mubr.msk.f32.vlgmr.msra.gmra.mxu0 %vm369_vm12, %v5199_v10 }
0x6b0a   :  { %v5276_v18 = vpop.f32.mrf.mxu0 }
0x6b0b   :  { %v5280_v15 = vadd.f32 %v5276_v18, %v8617_v7  ;;  %v5323_v7 = vld [vmem:[%s8852_s16 + $0x38] sm:$0xff] }
0x6b0c   :  { %v6579_v52 = vpop.f32.mrf.mxu0  ;;  %6580 = vmatprep.subr.mxu1 %v5323_v7 }
0x6b0d   :  { %6934 = vtanh.f32 %v5280_v15  ;;  %v5513_v58 = vmul.f32 -1.442695, %v5280_v15  ;;  %6581 = vmatpush3.msra.mxu1 %v5323_v7 }
0x6b0e   :  { %6582 = vmatprep.subr.mxu1 %v5322_v28 }
0x6b0f   :  { %6936 = vpow2.f32 %v5513_v58  ;;  %6583 = vmatpush3.msra.mxu1 %v5322_v28 }
0x6b10   :  { %6584 = vmatprep.subr.mxu1 %v5321_v29 }
0x6b11   :  { %6585 = vmatpush3.msra.mxu1 %v5321_v29 }
0x6b12   :  { %6586 = vmatprep.subr.mxu1 %v5320_v17 }
0x6b13   :  { %6587 = vmatpush3.msra.mxu1 %v5320_v17 }
0x6b14   :  { %6588 = vmatprep.subr.mxu1 %v5319_v30 }
0x6b15   :  { %6589 = vmatpush3.msra.mxu1 %v5319_v30 }
0x6b16   :  { %6590 = vmatprep.subr.mxu1 %v5318_v19 }
0x6b17   :  { %6591 = vmatpush3.msra.mxu1 %v5318_v19 }
0x6b18   :  { %6592 = vmatprep.subr.mxu1 %v5317_v31 }
0x6b19   :  { %6593 = vmatpush3.msra.mxu1 %v5317_v31 }
0x6b1a   :  { %v6935_v24 = vpop.eup %6934  ;;  %6594 = vmatprep.subr.mxu1 %v5316_v34 }
0x6b1b   :  { %5290 = vrot.lane.b32.xlu0 %v6935_v24, %s7258_s20  ;;  %6595 = vmatpush3.msra.mxu1 %v5316_v34 }
0x6b1c   :  { %v6937_v50 = vpop.eup %6936 }
0x6b1d   :  { %v5284_v16 = vadd.f32 1.0, %v6937_v50 }
0x6b1f   :  { %6938 = vrcp.f32 %v5284_v16 }
0x6b2c   :  { %v6939_v22 = vpop.eup %6938 }
0x6b2d   :  { %v5288_v6 = vmul.f32 %v6939_v22, %v5184_v11 }
0x6b8d   :  { %v5291_v45 = vpop.permute.xlu0 %5290 }
0x6b8e   :  { %v5293_v20 = vmul.f32 %v6939_v22, %v5291_v45 }
0x6b90   :  { %5295 = vrot.lane.b32.xlu1 %v5293_v20, %s7259_s7 }
0x6c02   :  { %v5296_v21 = vpop.permute.xlu1 %5295 }
0x6c03   :  { %v5298_v27 = vadd.f32 %v5296_v21, %v5288_v6 }
0x6c05   :  { %6940 = vtanh.f32 %v5298_v27 }
0x6c12   :  { %v6941_v26 = vpop.eup %6940 }
0x6c13   :  { %5301 = vrot.lane.b32.xlu0 %v6941_v26, %s7258_s20 }
0x6c85   :  { %v5302_v36 = vpop.permute.xlu0 %5301 }
0x6c86   :  { %v5304_v60 = vmul.f32 %v6939_v22, %v5302_v36 }
0x6c88   :  { %5306 = vrot.lane.b32.xlu0 %v5304_v60, %s7259_s7  ;;  %5310 = vrot.lane.b32.xlu1 %v5304_v60, %s7258_s20 }
0x6cfa   :  { %v5307_v46 = vpop.permute.xlu0 %5306  ;;  %v5311_v51 = vpop.permute.xlu1 %5310 }
0x6cfb   :  { %5309 = vst.msk [vmem:[#allocation3 + $0xe] sm:$0x3] %vm478_vm9, %v5307_v46 }
0x6cfc   :  { %5313 = vst.msk [vmem:[#allocation3 - $0x2] sm:$0xc] %vm480_vm7, %v5311_v51 }
0x6d02   :  { %v5315_v25 = vld [vmem:[#allocation3 + $0x8] sm:$0xff] }
0x6d03   :  { %v5314_v54 = vld [vmem:[#allocation3] sm:$0xff] }
0x6d04   :  { %6596 = vmatprep.mubr.msk.f32.mxu1 %vm369_vm12, %v5314_v54 }
0x6d05   :  { %6597 = vmatmul.mubr.msk.f32.vlgmr.msra.gmra.mxu1 %vm369_vm12, %v5315_v25 }
0x6dc5   :  { %v6598_v5 = vpop.f32.mrf.mxu1 }
0x6dc6   :  { %v5409_v57 = vadd.f32 %v6598_v5, %v5514_v12 }
0x6dc7   :  { %v5403_v63 = vpop.f32.mrf.mxu1 }
0x6dc8   :  { %5413 = vst.msk [vmem:[%s8854_s18 + $0x8] sm:$0xff] %vm265_vm2, %v5409_v57  ;;  %v5404_v3 = vadd.f32 %v5514_v12, %v5403_v63 }
0x6dca   :  { %5412 = vst.msk [vmem:[%s8854_s18] sm:$0xff] %vm265_vm2, %v5404_v3 }
0x6dcb   :  { %5418 = vsyncpa [#allocation6], 1 }
0x6dcc   :  { %5419 = vsyncpa [#allocation8], 1 }
0x6dcd   :  { %5420 = vsyncpa [#allocation11], 1 }
0x6dce   :  { %5421 = vsyncpa [#allocation14], 1 }
0x6dcf   :  { %5422 = vsyncpa [#allocation17], 1 }
0x6dd0   :  { %5423 = vsyncpa [#allocation20], 1 }
0x6dd1   :  { %5424 = vsyncpa [#allocation23], 1 }
0x6dd2   :  { %5425 = vsyncpa [#allocation26], 1 }

</bundles_post_ra>
